<compile_context>
chip_gen: v5e
topology: v5e:2x2
jax: 0.10.0
libtpu: 0.0.40
codegen_flags: <defaults>
</compile_context>

<pallas_src>
import numpy as np
import jax
import jax.numpy as jnp
from jax.experimental import pallas as pl
from jax.experimental.pallas import tpu as pltpu

# ---------------- model sizes (small, consistent with the module) -----------
B, C_IN, T, H, W = 2, 3, 4, 16, 16
STEM_C = 32                         # MobileNetV2 stem conv output channels
FEAT = 1280                         # MobileNetV2 feature dim (input of self.proj)
EMB = 32                            # emb_dim (module default 256, kept small)
N_CLS = 8
K_PATCH = 3 * 3 * C_IN              # 27
K_PAD = 32                          # contraction dim zero-padded for clean packing


def _relu6(x):
    return jnp.clip(x, 0.0, 6.0)


def _im2col(x_nchw):
    """x: (N, C, H, W) -> im2col patches (N, HO*WO, K_PAD) for 3x3/s2/p1 conv.

    Shared by the kernel wrapper and the plain-JAX reference so the tap
    ordering / zero padding is consistent by construction.
    """
    n, c, h, w = x_nchw.shape
    ho = (h + 2 - 3) // 2 + 1
    wo = (w + 2 - 3) // 2 + 1
    x = jnp.transpose(x_nchw, (0, 2, 3, 1))                           # NHWC
    xp = jnp.pad(x, ((0, 0), (1, 1), (1, 1), (0, 0)))
    slices = [xp[:, ky:ky + 2 * ho:2, kx:kx + 2 * wo:2, :]
              for ky in range(3) for kx in range(3)]
    patches = jnp.stack(slices, axis=3)                               # (N,HO,WO,9,C)
    patches = patches.reshape(n, ho * wo, 9 * c)                      # (N, HW, 27)
    return jnp.pad(patches, ((0, 0), (0, 0), (0, K_PAD - 9 * c)))     # (N, HW, 32)


# ============================ fused Pallas kernel ============================
def fused_kernel(x_ref, sw_ref, sb_ref, hw_ref, hb_ref, pool_ref,
                 pw_ref, pb_ref, aw_ref, ab_ref, seg_ref, sel_ref,
                 fw_ref, fb_ref, o_ref):
    """Whole forward in one invocation: stem conv (im2col matmul) -> head 1x1
    conv -> per-frame avg-pool (constant matmul) -> proj(+folded BN)+ReLU ->
    per-batch softmax attention over T -> weighted sum -> fc.
    All intermediates stay in VMEM/vregs; everything is 2D (no reshapes)."""
    x = x_ref[...]                                                    # (B*T*HW, K_PAD)

    # stem conv 3x3/s2 (+ BN folded into weights) + ReLU6
    f1 = _relu6(jnp.dot(x, sw_ref[...],
                        preferred_element_type=jnp.float32) + sb_ref[...])   # (512, 32)

    # head 1x1 conv (+ folded BN) + ReLU6 -- dominant matmul, M=512 rows
    y = _relu6(jnp.dot(f1, hw_ref[...],
                       preferred_element_type=jnp.float32) + hb_ref[...])    # (512, 1280)

    # AdaptiveAvgPool2d(1) per frame as a constant block-diagonal averaging
    # matmul (rides the MXU, no XLU sublane reductions, no in-kernel iota).
    feats = jnp.dot(pool_ref[...], y, preferred_element_type=jnp.float32)    # (B*T, 1280)

    # proj (+ folded BatchNorm1d) + ReLU    (Dropout(0.5) == identity at eval)
    h = jnp.maximum(jnp.dot(feats, pw_ref[...],
                            preferred_element_type=jnp.float32) + pb_ref[...], 0.0)  # (B*T, EMB)

    # attention logits: VPU multiply + lane reduce (not an N=1 MXU matmul)
    s = jnp.sum(h * aw_ref[...], axis=-1, keepdims=True) + ab_ref[...]       # (B*T, 1)

    # per-batch softmax over T: a single global max shift is exact for softmax;
    # per-batch denominators come from the constant block matrix `seg`.
    e = jnp.exp(s - jnp.max(s, axis=0, keepdims=True))                       # (B*T, 1)
    denom = jnp.dot(seg_ref[...], e, preferred_element_type=jnp.float32)     # (B*T, 1)
    wgt = e / denom                                                          # (B*T, 1)

    # attention-weighted sum over T per batch via constant selection matmul
    emb = jnp.dot(sel_ref[...], wgt * h, preferred_element_type=jnp.float32)  # (B, EMB)

    o_ref[...] = (jnp.dot(emb, fw_ref[...],
                          preferred_element_type=jnp.float32) + fb_ref[...])  # (B, N_CLS)


# ============================ pallas_call wrapper ============================
def _const_spec(shape):
    nd = len(shape)
    return pl.BlockSpec(shape, lambda i, _n=nd: (0,) * _n)


def temporal_attn_forward(x, p):
    b, c, t, h, w = x.shape
    ho = (h + 2 - 3) // 2 + 1
    wo = (w + 2 - 3) // 2 + 1
    hw = ho * wo

    # layout glue (plain JAX, small): permute to frames, im2col (+K pad), flatten
    xr = jnp.transpose(x, (0, 2, 1, 3, 4)).reshape(b * t, c, h, w)    # (BT,C,H,W)
    patches = _im2col(xr).reshape(b * t * hw, K_PAD)                  # (B*T*HW, 32)

    # constant pooling / segment / selection matrices (hoisted out of kernel)
    pool = jnp.asarray(np.kron(np.eye(b * t, dtype=np.float32),
                               np.full((1, hw), 1.0 / hw, np.float32)))   # (BT, BT*HW)
    seg = jnp.asarray(np.kron(np.eye(b, dtype=np.float32),
                              np.ones((t, t), np.float32)))               # (BT, BT)
    sel = jnp.asarray(np.kron(np.eye(b, dtype=np.float32),
                              np.ones((1, t), np.float32)))               # (B, BT)

    args = (patches, p["stem_w"], p["stem_b"], p["head_w"], p["head_b"], pool,
            p["proj_w"], p["bn_b"], p["attn_w"], p["attn_b"], seg, sel,
            p["fc_w"], p["fc_b"])

    m = b * t * hw
    flops = 2 * (m * K_PAD * STEM_C + m * STEM_C * FEAT + b * t * m * FEAT
                 + b * t * FEAT * EMB + b * EMB * N_CLS)
    bytes_accessed = 4 * (sum(int(np.prod(a.shape)) for a in args) + b * N_CLS)

    return pl.pallas_call(
        fused_kernel,
        out_shape=jax.ShapeDtypeStruct((b, N_CLS), jnp.float32),
        grid=(1,),                                        # single fused step
        in_specs=[_const_spec(a.shape) for a in args],
        out_specs=_const_spec((b, N_CLS)),
        compiler_params=pltpu.CompilerParams(
            dimension_semantics=("arbitrary",)),
        cost_estimate=pl.CostEstimate(flops=flops, transcendentals=b * t,
                                      bytes_accessed=bytes_accessed),
    )(*args)


# ============================ parameters (synthetic) =========================
def _fold_bn(gamma, beta, mean, var, eps):
    scale = gamma / jnp.sqrt(var + eps)
    return scale[None, :], (beta - mean * scale)[None, :]


def init_params(key):
    ks = jax.random.split(key, 20)

    def nrm(i, shape, scl=0.1):
        return scl * jax.random.normal(ks[i], shape, jnp.float32)

    def bn(i0, n, eps):
        g = 1.0 + 0.1 * jax.random.normal(ks[i0], (n,), jnp.float32)
        be = 0.1 * jax.random.normal(ks[i0 + 1], (n,), jnp.float32)
        mu = 0.1 * jax.random.normal(ks[i0 + 2], (n,), jnp.float32)
        va = jax.random.uniform(ks[i0 + 3], (n,), jnp.float32, 0.5, 1.5)
        return _fold_bn(g, be, mu, va, eps)

    p = {}
    # backbone stem: Conv2d(3, 32, 3, s=2, p=1, bias=False) + BN(eps=1e-3) + ReLU6
    # BN scale folded into the weights; K padded 27 -> 32 once, here.
    stem_w = nrm(0, (K_PATCH, STEM_C))                     # (kH*kW*Cin, Cout)
    s_scale, s_bias = bn(1, STEM_C, 1e-3)
    p["stem_w"] = jnp.pad(stem_w, ((0, K_PAD - K_PATCH), (0, 0))) * s_scale
    p["stem_b"] = s_bias
    # backbone head: Conv2d(STEM_C, 1280, 1, bias=False) + BN(eps=1e-3) + ReLU6
    head_w = nrm(5, (STEM_C, FEAT))
    h_scale, h_bias = bn(6, FEAT, 1e-3)
    p["head_w"] = head_w * h_scale
    p["head_b"] = h_bias
    # proj: Linear(1280, EMB, bias=False) stored (in, out); BatchNorm1d folded in
    proj_w = nrm(10, (FEAT, EMB), 0.05)
    b_scale, b_bias = bn(11, EMB, 1e-5)
    p["proj_w"] = proj_w * b_scale
    p["bn_b"] = b_bias
    # attn: Linear(EMB, 1) — weight stored as a (1, EMB) row for the VPU path
    p["attn_w"] = nrm(15, (1, EMB))
    p["attn_b"] = nrm(16, (1, 1))
    # fc: Linear(EMB, N_CLS)
    p["fc_w"] = nrm(17, (EMB, N_CLS))
    p["fc_b"] = nrm(18, (1, N_CLS))
    return p


# ============================ plain-JAX reference ============================
def reference_forward(x, p):
    """Same math in plain JAX/XLA, used only for a numerical sanity check."""
    b, c, t, h, w = x.shape
    xr = jnp.transpose(x, (0, 2, 1, 3, 4)).reshape(b * t, c, h, w)
    patches = _im2col(xr)                                             # (BT,HW,K_PAD)
    f1 = _relu6(patches @ p["stem_w"] + p["stem_b"])
    y = _relu6(f1 @ p["head_w"] + p["head_b"])
    pooled = y.mean(axis=1)                                           # (BT, FEAT)
    f = pooled.reshape(b, t, FEAT)
    hh = jnp.maximum(f @ p["proj_w"] + p["bn_b"], 0.0)
    s = (hh * p["attn_w"]).sum(-1) + p["attn_b"][0, 0]                # (B, T)
    ww = jax.nn.softmax(s, axis=1)[..., None]
    emb = (ww * hh).sum(axis=1)
    return emb @ p["fc_w"] + p["fc_b"]


if __name__ == "__main__":
    key = jax.random.PRNGKey(0)
    kx, kp = jax.random.split(key)
    x = jax.random.normal(kx, (B, C_IN, T, H, W), jnp.float32)
    params = init_params(kp)

    fwd = jax.jit(temporal_attn_forward)
    out = jax.block_until_ready(fwd(x, params))
    ref = reference_forward(x, params)

    assert out.shape == (B, N_CLS), out.shape
    if not jnp.allclose(out, ref, rtol=1e-3, atol=1e-3):
        raise AssertionError("Pallas output mismatch vs plain-JAX reference")
    print("KERNEL_OK")
</pallas_src>

<mosaic_0001>
module attributes {stable_mosaic.version = 11 : i64} {
  func.func @fused_kernel(%arg0: i32, %arg1: memref<512x32xf32, #tpu.memory_space<vmem>>, %arg2: memref<32x32xf32, #tpu.memory_space<vmem>>, %arg3: memref<1x32xf32, #tpu.memory_space<vmem>>, %arg4: memref<32x1280xf32, #tpu.memory_space<vmem>>, %arg5: memref<1x1280xf32, #tpu.memory_space<vmem>>, %arg6: memref<8x512xf32, #tpu.memory_space<vmem>>, %arg7: memref<1280x32xf32, #tpu.memory_space<vmem>>, %arg8: memref<1x32xf32, #tpu.memory_space<vmem>>, %arg9: memref<1x32xf32, #tpu.memory_space<vmem>>, %arg10: memref<1x1xf32, #tpu.memory_space<vmem>>, %arg11: memref<8x8xf32, #tpu.memory_space<vmem>>, %arg12: memref<2x8xf32, #tpu.memory_space<vmem>>, %arg13: memref<32x8xf32, #tpu.memory_space<vmem>>, %arg14: memref<1x8xf32, #tpu.memory_space<vmem>>, %arg15: memref<2x8xf32, #tpu.memory_space<vmem>>) attributes {dimension_semantics = [#tpu.dimension_semantics<arbitrary>], iteration_bounds = array<i64: 1>, scalar_prefetch = 0 : i64, scratch_operands = 0 : i64, tpu.core_type = #tpu.core_type<tc>, window_params = [{pipeline_mode = #tpu.pipeline_mode<synchronous>, transform_indices = @transform_0, window_bounds = array<i64: 512, 32>}, {pipeline_mode = #tpu.pipeline_mode<synchronous>, transform_indices = @transform_1, window_bounds = array<i64: 32, 32>}, {pipeline_mode = #tpu.pipeline_mode<synchronous>, transform_indices = @transform_2, window_bounds = array<i64: 1, 32>}, {pipeline_mode = #tpu.pipeline_mode<synchronous>, transform_indices = @transform_3, window_bounds = array<i64: 32, 1280>}, {pipeline_mode = #tpu.pipeline_mode<synchronous>, transform_indices = @transform_4, window_bounds = array<i64: 1, 1280>}, {pipeline_mode = #tpu.pipeline_mode<synchronous>, transform_indices = @transform_5, window_bounds = array<i64: 8, 512>}, {pipeline_mode = #tpu.pipeline_mode<synchronous>, transform_indices = @transform_6, window_bounds = array<i64: 1280, 32>}, {pipeline_mode = #tpu.pipeline_mode<synchronous>, transform_indices = @transform_7, window_bounds = array<i64: 1, 32>}, {pipeline_mode = #tpu.pipeline_mode<synchronous>, transform_indices = @transform_8, window_bounds = array<i64: 1, 32>}, {pipeline_mode = #tpu.pipeline_mode<synchronous>, transform_indices = @transform_9, window_bounds = array<i64: 1, 1>}, {pipeline_mode = #tpu.pipeline_mode<synchronous>, transform_indices = @transform_10, window_bounds = array<i64: 8, 8>}, {pipeline_mode = #tpu.pipeline_mode<synchronous>, transform_indices = @transform_11, window_bounds = array<i64: 2, 8>}, {pipeline_mode = #tpu.pipeline_mode<synchronous>, transform_indices = @transform_12, window_bounds = array<i64: 32, 8>}, {pipeline_mode = #tpu.pipeline_mode<synchronous>, transform_indices = @transform_13, window_bounds = array<i64: 1, 8>}, {pipeline_mode = #tpu.pipeline_mode<synchronous>, transform_indices = @transform_14, window_bounds = array<i64: 2, 8>}]} {
    %c0 = arith.constant 0 : index
    %c0_0 = arith.constant 0 : index
    %0 = vector.load %arg1[%c0, %c0_0] : memref<512x32xf32, #tpu.memory_space<vmem>>, vector<512x32xf32>
    %c0_1 = arith.constant 0 : index
    %c0_2 = arith.constant 0 : index
    %1 = vector.load %arg2[%c0_1, %c0_2] : memref<32x32xf32, #tpu.memory_space<vmem>>, vector<32x32xf32>
    %cst = arith.constant dense<0.000000e+00> : vector<512x32xf32>
    %2 = tpu.matmul %0, %1, %cst {dimension_numbers = #tpu.dot_dimension_numbers<[1], [0], [0], [1], [0, 0, 1, 1], [], []>} : vector<512x32xf32>, vector<32x32xf32>, vector<512x32xf32> -> vector<512x32xf32>
    %c0_3 = arith.constant 0 : index
    %c0_4 = arith.constant 0 : index
    %3 = vector.load %arg3[%c0_3, %c0_4] : memref<1x32xf32, #tpu.memory_space<vmem>>, vector<1x32xf32>
    %4 = vector.broadcast %3 : vector<1x32xf32> to vector<512x32xf32>
    %5 = arith.addf %2, %4 : vector<512x32xf32>
    %cst_5 = arith.constant 0.000000e+00 : f32
    %cst_6 = arith.constant 6.000000e+00 : f32
    %6 = vector.broadcast %cst_5 : f32 to vector<512x32xf32>
    %7 = arith.maximumf %6, %5 : vector<512x32xf32>
    %8 = vector.broadcast %cst_6 : f32 to vector<512x32xf32>
    %9 = arith.minimumf %8, %7 : vector<512x32xf32>
    %c0_7 = arith.constant 0 : index
    %c0_8 = arith.constant 0 : index
    %10 = vector.load %arg4[%c0_7, %c0_8] : memref<32x1280xf32, #tpu.memory_space<vmem>>, vector<32x1280xf32>
    %cst_9 = arith.constant dense<0.000000e+00> : vector<512x1280xf32>
    %11 = tpu.matmul %9, %10, %cst_9 {dimension_numbers = #tpu.dot_dimension_numbers<[1], [0], [0], [1], [0, 0, 1, 1], [], []>} : vector<512x32xf32>, vector<32x1280xf32>, vector<512x1280xf32> -> vector<512x1280xf32>
    %c0_10 = arith.constant 0 : index
    %c0_11 = arith.constant 0 : index
    %12 = vector.load %arg5[%c0_10, %c0_11] : memref<1x1280xf32, #tpu.memory_space<vmem>>, vector<1x1280xf32>
    %13 = vector.broadcast %12 : vector<1x1280xf32> to vector<512x1280xf32>
    %14 = arith.addf %11, %13 : vector<512x1280xf32>
    %cst_12 = arith.constant 0.000000e+00 : f32
    %cst_13 = arith.constant 6.000000e+00 : f32
    %15 = vector.broadcast %cst_12 : f32 to vector<512x1280xf32>
    %16 = arith.maximumf %15, %14 : vector<512x1280xf32>
    %17 = vector.broadcast %cst_13 : f32 to vector<512x1280xf32>
    %18 = arith.minimumf %17, %16 : vector<512x1280xf32>
    %c0_14 = arith.constant 0 : index
    %c0_15 = arith.constant 0 : index
    %19 = vector.load %arg6[%c0_14, %c0_15] : memref<8x512xf32, #tpu.memory_space<vmem>>, vector<8x512xf32>
    %cst_16 = arith.constant dense<0.000000e+00> : vector<8x1280xf32>
    %20 = tpu.matmul %19, %18, %cst_16 {dimension_numbers = #tpu.dot_dimension_numbers<[1], [0], [0], [1], [0, 0, 1, 1], [], []>} : vector<8x512xf32>, vector<512x1280xf32>, vector<8x1280xf32> -> vector<8x1280xf32>
    %c0_17 = arith.constant 0 : index
    %c0_18 = arith.constant 0 : index
    %21 = vector.load %arg7[%c0_17, %c0_18] : memref<1280x32xf32, #tpu.memory_space<vmem>>, vector<1280x32xf32>
    %cst_19 = arith.constant dense<0.000000e+00> : vector<8x32xf32>
    %22 = tpu.matmul %20, %21, %cst_19 {dimension_numbers = #tpu.dot_dimension_numbers<[1], [0], [0], [1], [0, 0, 1, 1], [], []>} : vector<8x1280xf32>, vector<1280x32xf32>, vector<8x32xf32> -> vector<8x32xf32>
    %c0_20 = arith.constant 0 : index
    %c0_21 = arith.constant 0 : index
    %23 = vector.load %arg8[%c0_20, %c0_21] : memref<1x32xf32, #tpu.memory_space<vmem>>, vector<1x32xf32>
    %24 = vector.broadcast %23 : vector<1x32xf32> to vector<8x32xf32>
    %25 = arith.addf %22, %24 : vector<8x32xf32>
    %cst_22 = arith.constant 0.000000e+00 : f32
    %26 = vector.broadcast %cst_22 : f32 to vector<8x32xf32>
    %27 = arith.maximumf %25, %26 : vector<8x32xf32>
    %c0_23 = arith.constant 0 : index
    %c0_24 = arith.constant 0 : index
    %28 = vector.load %arg9[%c0_23, %c0_24] : memref<1x32xf32, #tpu.memory_space<vmem>>, vector<1x32xf32>
    %29 = vector.broadcast %28 : vector<1x32xf32> to vector<8x32xf32>
    %30 = arith.mulf %27, %29 : vector<8x32xf32>
    %cst_25 = arith.constant dense<0.000000e+00> : vector<8xf32>
    %31 = vector.multi_reduction <add>, %30, %cst_25 [1] : vector<8x32xf32> to vector<8xf32>
    %32 = vector.shape_cast %31 : vector<8xf32> to vector<8x1xf32>
    %c0_26 = arith.constant 0 : index
    %c0_27 = arith.constant 0 : index
    %33 = vector.load %arg10[%c0_26, %c0_27] : memref<1x1xf32, #tpu.memory_space<vmem>>, vector<1x1xf32>
    %34 = vector.broadcast %33 : vector<1x1xf32> to vector<8x1xf32>
    %35 = arith.addf %32, %34 : vector<8x1xf32>
    %cst_28 = arith.constant dense<0xFF800000> : vector<1xf32>
    %36 = vector.multi_reduction <maximumf>, %35, %cst_28 [0] : vector<8x1xf32> to vector<1xf32>
    %37 = vector.shape_cast %36 : vector<1xf32> to vector<1x1xf32>
    %38 = vector.broadcast %37 : vector<1x1xf32> to vector<8x1xf32>
    %39 = arith.subf %35, %38 : vector<8x1xf32>
    %40 = math.exp %39 : vector<8x1xf32>
    %c0_29 = arith.constant 0 : index
    %c0_30 = arith.constant 0 : index
    %41 = vector.load %arg11[%c0_29, %c0_30] : memref<8x8xf32, #tpu.memory_space<vmem>>, vector<8x8xf32>
    %cst_31 = arith.constant dense<0.000000e+00> : vector<8x1xf32>
    %42 = tpu.matmul %41, %40, %cst_31 {dimension_numbers = #tpu.dot_dimension_numbers<[1], [0], [0], [1], [0, 0, 1, 1], [], []>} : vector<8x8xf32>, vector<8x1xf32>, vector<8x1xf32> -> vector<8x1xf32>
    %43 = arith.divf %40, %42 : vector<8x1xf32>
    %c0_32 = arith.constant 0 : index
    %c0_33 = arith.constant 0 : index
    %44 = vector.load %arg12[%c0_32, %c0_33] : memref<2x8xf32, #tpu.memory_space<vmem>>, vector<2x8xf32>
    %45 = vector.broadcast %43 : vector<8x1xf32> to vector<8x32xf32>
    %46 = arith.mulf %45, %27 : vector<8x32xf32>
    %cst_34 = arith.constant dense<0.000000e+00> : vector<2x32xf32>
    %47 = tpu.matmul %44, %46, %cst_34 {dimension_numbers = #tpu.dot_dimension_numbers<[1], [0], [0], [1], [0, 0, 1, 1], [], []>} : vector<2x8xf32>, vector<8x32xf32>, vector<2x32xf32> -> vector<2x32xf32>
    %c0_35 = arith.constant 0 : index
    %c0_36 = arith.constant 0 : index
    %48 = vector.load %arg13[%c0_35, %c0_36] : memref<32x8xf32, #tpu.memory_space<vmem>>, vector<32x8xf32>
    %cst_37 = arith.constant dense<0.000000e+00> : vector<2x8xf32>
    %49 = tpu.matmul %47, %48, %cst_37 {dimension_numbers = #tpu.dot_dimension_numbers<[1], [0], [0], [1], [0, 0, 1, 1], [], []>} : vector<2x32xf32>, vector<32x8xf32>, vector<2x8xf32> -> vector<2x8xf32>
    %c0_38 = arith.constant 0 : index
    %c0_39 = arith.constant 0 : index
    %50 = vector.load %arg14[%c0_38, %c0_39] : memref<1x8xf32, #tpu.memory_space<vmem>>, vector<1x8xf32>
    %51 = vector.broadcast %50 : vector<1x8xf32> to vector<2x8xf32>
    %52 = arith.addf %49, %51 : vector<2x8xf32>
    %c0_40 = arith.constant 0 : index
    %c0_41 = arith.constant 0 : index
    %53 = vector.load %arg15[%c0_40, %c0_41] : memref<2x8xf32, #tpu.memory_space<vmem>>, vector<2x8xf32>
    tpu.vector_store %arg15[%c0_40, %c0_41], %52 {strides = array<i32>} : memref<2x8xf32, #tpu.memory_space<vmem>>, vector<2x8xf32>,
    return
  }
  func.func @transform_0(%arg0: i32) -> (i32, i32) {
    %c0_i32 = arith.constant 0 : i32
    %c0_i32_0 = arith.constant 0 : i32
    %c0_i32_1 = arith.constant 0 : i32
    return %c0_i32, %c0_i32_0 : i32, i32
  }
  func.func @transform_1(%arg0: i32) -> (i32, i32) {
    %c0_i32 = arith.constant 0 : i32
    %c0_i32_0 = arith.constant 0 : i32
    %c0_i32_1 = arith.constant 0 : i32
    return %c0_i32, %c0_i32_0 : i32, i32
  }
  func.func @transform_2(%arg0: i32) -> (i32, i32) {
    %c0_i32 = arith.constant 0 : i32
    %c0_i32_0 = arith.constant 0 : i32
    %c0_i32_1 = arith.constant 0 : i32
    return %c0_i32, %c0_i32_0 : i32, i32
  }
  func.func @transform_3(%arg0: i32) -> (i32, i32) {
    %c0_i32 = arith.constant 0 : i32
    %c0_i32_0 = arith.constant 0 : i32
    %c0_i32_1 = arith.constant 0 : i32
    return %c0_i32, %c0_i32_0 : i32, i32
  }
  func.func @transform_4(%arg0: i32) -> (i32, i32) {
    %c0_i32 = arith.constant 0 : i32
    %c0_i32_0 = arith.constant 0 : i32
    %c0_i32_1 = arith.constant 0 : i32
    return %c0_i32, %c0_i32_0 : i32, i32
  }
  func.func @transform_5(%arg0: i32) -> (i32, i32) {
    %c0_i32 = arith.constant 0 : i32
    %c0_i32_0 = arith.constant 0 : i32
    %c0_i32_1 = arith.constant 0 : i32
    return %c0_i32, %c0_i32_0 : i32, i32
  }
  func.func @transform_6(%arg0: i32) -> (i32, i32) {
    %c0_i32 = arith.constant 0 : i32
    %c0_i32_0 = arith.constant 0 : i32
    %c0_i32_1 = arith.constant 0 : i32
    return %c0_i32, %c0_i32_0 : i32, i32
  }
  func.func @transform_7(%arg0: i32) -> (i32, i32) {
    %c0_i32 = arith.constant 0 : i32
    %c0_i32_0 = arith.constant 0 : i32
    %c0_i32_1 = arith.constant 0 : i32
    return %c0_i32, %c0_i32_0 : i32, i32
  }
  func.func @transform_8(%arg0: i32) -> (i32, i32) {
    %c0_i32 = arith.constant 0 : i32
    %c0_i32_0 = arith.constant 0 : i32
    %c0_i32_1 = arith.constant 0 : i32
    return %c0_i32, %c0_i32_0 : i32, i32
  }
  func.func @transform_9(%arg0: i32) -> (i32, i32) {
    %c0_i32 = arith.constant 0 : i32
    %c0_i32_0 = arith.constant 0 : i32
    %c0_i32_1 = arith.constant 0 : i32
    return %c0_i32, %c0_i32_0 : i32, i32
  }
  func.func @transform_10(%arg0: i32) -> (i32, i32) {
    %c0_i32 = arith.constant 0 : i32
    %c0_i32_0 = arith.constant 0 : i32
    %c0_i32_1 = arith.constant 0 : i32
    return %c0_i32, %c0_i32_0 : i32, i32
  }
  func.func @transform_11(%arg0: i32) -> (i32, i32) {
    %c0_i32 = arith.constant 0 : i32
    %c0_i32_0 = arith.constant 0 : i32
    %c0_i32_1 = arith.constant 0 : i32
    return %c0_i32, %c0_i32_0 : i32, i32
  }
  func.func @transform_12(%arg0: i32) -> (i32, i32) {
    %c0_i32 = arith.constant 0 : i32
    %c0_i32_0 = arith.constant 0 : i32
    %c0_i32_1 = arith.constant 0 : i32
    return %c0_i32, %c0_i32_0 : i32, i32
  }
  func.func @transform_13(%arg0: i32) -> (i32, i32) {
    %c0_i32 = arith.constant 0 : i32
    %c0_i32_0 = arith.constant 0 : i32
    %c0_i32_1 = arith.constant 0 : i32
    return %c0_i32, %c0_i32_0 : i32, i32
  }
  func.func @transform_14(%arg0: i32) -> (i32, i32) {
    %c0_i32 = arith.constant 0 : i32
    %c0_i32_0 = arith.constant 0 : i32
    %c0_i32_1 = arith.constant 0 : i32
    return %c0_i32, %c0_i32_0 : i32, i32
  }
}

</mosaic_0001>

<bundles_post_ra>
// kernel: temporal_attn_forward.1
= control target key start
LH: loop header
LB: loop body
LE: loop exit
PB: predicated region body
PF: predicated region fallthrough
CT: control target
= control target key end

     0   :  { %s11584_s0 = inlined_call_operand.vmem [shape: f32[512,32], index: 0, kind: input, shape index: {}]   ;;  %s11585_s1 = inlined_call_operand.vmem [shape: f32[32,32], index: 1, kind: input, shape index: {}]   ;;  %s11586_s2 = inlined_call_operand.vmem [shape: f32[1,32], index: 2, kind: input, shape index: {}]   ;;  %s11587_s3 = inlined_call_operand.vmem [shape: f32[32,1280], index: 3, kind: input, shape index: {}]   ;;  %s11588_s4 = inlined_call_operand.vmem [shape: f32[1,1280], index: 4, kind: input, shape index: {}]   ;;  %s11589_s5 = inlined_call_operand.vmem [shape: f32[8,512], index: 5, kind: input, shape index: {}]   ;;  %s11590_s6 = inlined_call_operand.vmem [shape: f32[1280,32], index: 6, kind: input, shape index: {}]   ;;  %s11591_s7 = inlined_call_operand.vmem [shape: f32[1,32], index: 7, kind: input, shape index: {}]   ;;  %s11592_s8 = inlined_call_operand.vmem [shape: f32[1,32], index: 8, kind: input, shape index: {}]   ;;  %s11593_s9 = inlined_call_operand.<no memory space> [shape: f32[1,1], index: 9, kind: input, shape index: {}]   ;;  %s11594_s10 = inlined_call_operand.vmem [shape: f32[8,8], index: 10, kind: input, shape index: {}]   ;;  %s11595_s11 = inlined_call_operand.vmem [shape: f32[2,8], index: 11, kind: input, shape index: {}]   ;;  %s11596_s12 = inlined_call_operand.vmem [shape: f32[32,8], index: 12, kind: input, shape index: {}]   ;;  %s11597_s13 = inlined_call_operand.vmem [shape: f32[1,8], index: 13, kind: input, shape index: {}]   ;;  %s11598_s14 = inlined_call_operand.hbm [shape: f32[2,8], index: 14, kind: output, shape index: {}]  }
   0x1   :  { %v19_v0 = vstv %s11593_s9 }
   0x2   :  { %20 = vst [vmem:[#allocation2] sm:$0x1] %v19_v0 }
   0x3   :  { %v117_v1 = vld [vmem:[%s11585_s1 + $0x18] sm:$0xff]  ;;  %v116_v2 = vld [vmem:[%s11585_s1 + $0x10] sm:$0xff]  ;;  %v115_v3 = vld [vmem:[%s11585_s1 + $0x8] sm:$0xff]  ;;  %vm122_vm0 = vcmask 261120  }
   0x4   :  { %327 = vmatpush.msra.mxu0 %v117_v1  ;;  %6297 = vmatpush.msra.mxu3 %v117_v1  ;;  %v114_v4 = vld [vmem:[%s11585_s1] sm:$0xff]  ;;  %v113_v6 = vld [vmem:[%s11584_s0 + $0x1f8] sm:$0xff] }
   0x5   :  { %v50_v5 = vld [vmem:[%s11584_s0] sm:$0xff] }
   0x6   :  { %328 = vmatpush.msra.mxu0 %v116_v2  ;;  %6298 = vmatpush.msra.mxu3 %v116_v2 }
   0x8   :  { %329 = vmatpush.msra.mxu0 %v115_v3  ;;  %6299 = vmatpush.msra.mxu3 %v115_v3 }
   0x9   :  { %21 = vsyncpa [#allocation4], 0  ;;  %v51_v7 = vld [vmem:[%s11584_s0 + $0x8] sm:$0xff]  ;;  %v52_v8 = vld [vmem:[%s11584_s0 + $0x10] sm:$0xff]  ;;  %vm5460_vm1 = vcmask 7168   ;;  %vm5472_vm2 = vcmask 64512  }
   0xa   :  { %330 = vmatpush.msra.mxu0 %v114_v4  ;;  %6300 = vmatpush.msra.mxu3 %v114_v4  ;;  %v53_v9 = vld [vmem:[%s11584_s0 + $0x18] sm:$0xff]  ;;  %v54_v10 = vld [vmem:[%s11584_s0 + $0x20] sm:$0xff]  ;;  %v55_v11 = vld [vmem:[%s11584_s0 + $0x28] sm:$0xff]  ;;  %s6360_s1 = smov [#allocation3]   ;;  %vm5572_vm7 = vcmask 58368  }
   0xb   :  { %5590 = vmatmul.msk.f32.vlgmr.msra.gmra.mxu0 %vm122_vm0, %v50_v5  ;;  %5653 = vmatmul.msk.f32.vlgmr.msra.gmra.mxu3 %vm122_vm0, %v113_v6  ;;  %v56_v12 = vld [vmem:[%s11584_s0 + $0x30] sm:$0xff]  ;;  %v57_v13 = vld [vmem:[%s11584_s0 + $0x38] sm:$0xff]  ;;  %v58_v14 = vld [vmem:[%s11584_s0 + $0x40] sm:$0xff] }
   0xc   :  { %v59_v15 = vld [vmem:[%s11584_s0 + $0x48] sm:$0xff]  ;;  %v60_v16 = vld [vmem:[%s11584_s0 + $0x50] sm:$0xff]  ;;  %v61_v17 = vld [vmem:[%s11584_s0 + $0x58] sm:$0xff] }
   0xd   :  { %v682_v18 = vld [vmem:[%s11587_s3 + $0xf0] sm:$0xff]  ;;  %v684_v19 = vld [vmem:[%s11587_s3 + $0x100] sm:$0xff]  ;;  %v63_v27 = vld [vmem:[%s11584_s0 + $0x68] sm:$0xff] }
   0xe   :  { %v62_v20 = vld [vmem:[%s11584_s0 + $0x60] sm:$0xff]  ;;  %920 = vmatpush.msra.mxu1 %v682_v18  ;;  %1338 = vmatpush.msrb.mxu3 %v684_v19  ;;  %v674_v22 = vld [vmem:[%s11587_s3 + $0xb0] sm:$0xff]  ;;  %v685_v28 = vld [vmem:[%s11587_s3 + $0x108] sm:$0xff] }
   0xf   :  { %v672_v21 = vld [vmem:[%s11587_s3 + $0xa0] sm:$0xff]  ;;  %6301 = vmatpush.msra.mxu2 %v682_v18  ;;  %v662_v23 = vld [vmem:[%s11587_s3 + $0x50] sm:$0xff]  ;;  %v683_v29 = vld [vmem:[%s11587_s3 + $0xf8] sm:$0xff]  ;;  %1547 = vmatpush.msrb.mxu0 %v685_v28 }
  0x10   :  { %921 = vmatpush.msra.mxu1 %v672_v21  ;;  %1339 = vmatpush.msrb.mxu3 %v674_v22  ;;  %v664_v24 = vld [vmem:[%s11587_s3 + $0x60] sm:$0xff]  ;;  %v654_v26 = vld [vmem:[%s11587_s3 + $0x10] sm:$0xff]  ;;  %v673_v30 = vld [vmem:[%s11587_s3 + $0xa8] sm:$0xff] }
  0x11   :  { %6302 = vmatpush.msra.mxu2 %v672_v21  ;;  %v652_v25 = vld [vmem:[%s11587_s3] sm:$0xff]  ;;  %v64_v31 = vld [vmem:[%s11584_s0 + $0x70] sm:$0xff]  ;;  %v663_v32 = vld [vmem:[%s11587_s3 + $0x58] sm:$0xff] }
  0x12   :  { %922 = vmatpush.msra.mxu1 %v662_v23  ;;  %1340 = vmatpush.msrb.mxu3 %v664_v24  ;;  %v653_v33 = vld [vmem:[%s11587_s3 + $0x8] sm:$0xff]  ;;  %v65_v34 = vld [vmem:[%s11584_s0 + $0x78] sm:$0xff]  ;;  %v6561_v35 = vld [vmem:[%s11586_s2] ss:$0 sm:$0xff] }
  0x13   :  { %5591 = vmatmul.msk.f32.gmra.mxu0 %vm122_vm0, %v51_v7  ;;  %6303 = vmatpush.msra.mxu2 %v662_v23  ;;  %v66_v37 = vld [vmem:[%s11584_s0 + $0x80] sm:$0xff]  ;;  %v686_v41 = vld [vmem:[%s11587_s3 + $0x110] sm:$0xff]  ;;  %v67_v45 = vld [vmem:[%s11584_s0 + $0x88] sm:$0xff] }
  0x14   :  { %923 = vmatpush.msra.mxu1 %v652_v25  ;;  %1341 = vmatpush.msrb.mxu3 %v654_v26  ;;  %v687_v50 = vld [vmem:[%s11587_s3 + $0x118] sm:$0xff]  ;;  %v68_v53 = vld [vmem:[%s11584_s0 + $0x90] sm:$0xff]  ;;  %v70_v63 = vld [vmem:[%s11584_s0 + $0xa0] sm:$0xff] }
  0x15   :  { %6304 = vmatpush.msra.mxu2 %v652_v25  ;;  %v69_v58 = vld [vmem:[%s11584_s0 + $0x98] sm:$0xff]  ;;  %v71_v4 = vld [vmem:[%s11584_s0 + $0xa8] sm:$0xff]  ;;  %v74_v19 = vld [vmem:[%s11584_s0 + $0xc0] sm:$0xff] }
  0x16   :  { %1756 = vmatpush.msrb.mxu1 %v686_v41  ;;  %v75_v24 = vld [vmem:[%s11584_s0 + $0xc8] sm:$0xff]  ;;  %v78_v41 = vld [vmem:[%s11584_s0 + $0xe0] sm:$0xff] }
  0x17   :  { %1129 = vmatpush.msrb.mxu2 %v683_v29  ;;  %v76_v29 = vld [vmem:[%s11584_s0 + $0xd0] sm:$0xff] }
  0x19   :  { %1130 = vmatpush.msrb.mxu2 %v673_v30 }
  0x1b   :  { %5592 = vmatmul.msk.f32.gmra.mxu0 %vm122_vm0, %v52_v8  ;;  %1131 = vmatpush.msrb.mxu2 %v663_v32 }
  0x1d   :  { %1132 = vmatpush.msrb.mxu2 %v653_v33 }
  0x23   :  { %5593 = vmatmul.msk.f32.gmra.mxu0 %vm122_vm0, %v53_v9  ;;  %v72_v9 = vld [vmem:[%s11584_s0 + $0xb0] sm:$0xff] }
  0x2b   :  { %5594 = vmatmul.msk.f32.gmra.mxu0 %vm122_vm0, %v54_v10 }
  0x33   :  { %5595 = vmatmul.msk.f32.gmra.mxu0 %vm122_vm0, %v55_v11 }
  0x3b   :  { %5596 = vmatmul.msk.f32.gmra.mxu0 %vm122_vm0, %v56_v12 }
  0x43   :  { %5597 = vmatmul.msk.f32.gmra.mxu0 %vm122_vm0, %v57_v13 }
  0x4b   :  { %5598 = vmatmul.msk.f32.gmra.mxu0 %vm122_vm0, %v58_v14  ;;  %v73_v14 = vld [vmem:[%s11584_s0 + $0xb8] sm:$0xff] }
  0x53   :  { %5599 = vmatmul.msk.f32.gmra.mxu0 %vm122_vm0, %v59_v15 }
  0x5b   :  { %5600 = vmatmul.msk.f32.gmra.mxu0 %vm122_vm0, %v60_v16 }
  0x63   :  { %5601 = vmatmul.msk.f32.gmra.mxu0 %vm122_vm0, %v61_v17 }
  0x6b   :  { %5602 = vmatmul.msk.f32.gmra.mxu0 %vm122_vm0, %v62_v20 }
  0x73   :  { %5603 = vmatmul.msk.f32.gmra.mxu0 %vm122_vm0, %v63_v27 }
  0x7b   :  { %5604 = vmatmul.msk.f32.gmra.mxu0 %vm122_vm0, %v64_v31 }
  0x83   :  { %5605 = vmatmul.msk.f32.gmra.mxu0 %vm122_vm0, %v65_v34  ;;  %v77_v34 = vld [vmem:[%s11584_s0 + $0xd8] sm:$0xff] }
  0x88   :  { %v332_v36 = vpop.f32.mrf.mxu0 }
  0x89   :  { %v333_v38 = vadd.f32 %v6561_v35, %v332_v36 }
  0x8b   :  { %v524_v39 = vmax.f32 %v333_v38, 0.0  ;;  %5606 = vmatmul.msk.f32.gmra.mxu0 %vm122_vm0, %v66_v37 }
  0x8d   :  { %v6568_v40 = vmin.f32 %v524_v39, 6.0 }
  0x8e   :  { %v521_v42 = vpop.f32.mrf.mxu3 }
  0x8f   :  { %v522_v43 = vadd.f32 %v6561_v35, %v521_v42  ;;  %5654 = vmatmul.msk.f32.vlgmr.msra.gmra.mxu1 %vm122_vm0, %v6568_v40  ;;  %5782 = vmatmul.msk.f32.vlgmr.msrb.gmra.mxu3 %vm122_vm0, %v6568_v40 }
  0x90   :  { %v335_v44 = vpop.f32.mrf.mxu0 }
  0x91   :  { %v587_v46 = vmax.f32 %v522_v43, 0.0  ;;  %v336_v47 = vadd.f32 %v6561_v35, %v335_v44 }
  0x93   :  { %v6582_v48 = vmin.f32 %v587_v46, 6.0  ;;  %v525_v49 = vmax.f32 %v336_v47, 0.0  ;;  %5607 = vmatmul.msk.f32.gmra.mxu0 %vm122_vm0, %v67_v45  ;;  %v79_v46 = vld [vmem:[%s11584_s0 + $0xe8] sm:$0xff] }
  0x95   :  { %11754 = vst [vmem:[#allocation6_spill] sm:$0xff] %v6582_v48  ;;  %v6588_v51 = vmin.f32 %v525_v49, 6.0  ;;  %5717 = vmatmul.msk.f32.vlgmr.msra.gmra.mxu2 %vm122_vm0, %v6582_v48 }
  0x96   :  { %1965 = vmatpush.msra.mxu2 %v687_v50 }
  0x97   :  { %5655 = vmatmul.msk.f32.gmra.mxu1 %vm122_vm0, %v6588_v51  ;;  %5783 = vmatmul.msk.f32.gmra.mxu3 %vm122_vm0, %v6588_v51 }
  0x98   :  { %v338_v52 = vpop.f32.mrf.mxu0 }
  0x99   :  { %v339_v54 = vadd.f32 %v6561_v35, %v338_v52  ;;  %v675_v52 = vld [vmem:[%s11587_s3 + $0xb8] sm:$0xff] }
  0x9a   :  { %1548 = vmatpush.msrb.mxu0 %v675_v52 }
  0x9b   :  { %v526_v55 = vmax.f32 %v339_v54, 0.0  ;;  %5608 = vmatmul.msk.f32.gmra.mxu0 %vm122_vm0, %v68_v53  ;;  %v80_v54 = vld [vmem:[%s11584_s0 + $0xf0] sm:$0xff] }
  0x9d   :  { %v6601_v56 = vmin.f32 %v526_v55, 6.0  ;;  %5718 = vmatmul.msk.f32.vlgmr.msrb.gmra.mxu2 %vm122_vm0, %v6568_v40 }
  0x9f   :  { %11755 = vst [vmem:[#allocation7_spill] sm:$0xff] %v6601_v56  ;;  %5656 = vmatmul.msk.f32.gmra.mxu1 %vm122_vm0, %v6601_v56  ;;  %5784 = vmatmul.msk.f32.gmra.mxu3 %vm122_vm0, %v6601_v56 }
  0xa0   :  { %v341_v57 = vpop.f32.mrf.mxu0 }
  0xa1   :  { %v342_v59 = vadd.f32 %v6561_v35, %v341_v57 }
  0xa3   :  { %v527_v60 = vmax.f32 %v342_v59, 0.0  ;;  %5609 = vmatmul.msk.f32.gmra.mxu0 %vm122_vm0, %v69_v58 }
  0xa5   :  { %v6614_v61 = vmin.f32 %v527_v60, 6.0  ;;  %5719 = vmatmul.msk.f32.gmra.mxu2 %vm122_vm0, %v6588_v51  ;;  %v81_v60 = vld [vmem:[%s11584_s0 + $0xf8] sm:$0xff] }
  0xa7   :  { %11756 = vst [vmem:[#allocation8_spill] sm:$0xff] %v6614_v61  ;;  %5657 = vmatmul.msk.f32.gmra.mxu1 %vm122_vm0, %v6614_v61  ;;  %5785 = vmatmul.msk.f32.gmra.mxu3 %vm122_vm0, %v6614_v61 }
  0xa8   :  { %v344_v62 = vpop.f32.mrf.mxu0 }
  0xa9   :  { %v345_v0 = vadd.f32 %v6561_v35, %v344_v62 }
  0xab   :  { %v528_v1 = vmax.f32 %v345_v0, 0.0  ;;  %5610 = vmatmul.msk.f32.gmra.mxu0 %vm122_vm0, %v70_v63 }
  0xad   :  { %v6627_v2 = vmin.f32 %v528_v1, 6.0  ;;  %5720 = vmatmul.msk.f32.gmra.mxu2 %vm122_vm0, %v6601_v56 }
  0xaf   :  { %11757 = vst [vmem:[#allocation9_spill] sm:$0xff] %v6627_v2  ;;  %5658 = vmatmul.msk.f32.gmra.mxu1 %vm122_vm0, %v6627_v2  ;;  %5786 = vmatmul.msk.f32.gmra.mxu3 %vm122_vm0, %v6627_v2 }
  0xb0   :  { %v347_v3 = vpop.f32.mrf.mxu0 }
  0xb1   :  { %v348_v5 = vadd.f32 %v6561_v35, %v347_v3  ;;  %v82_v3 = vld [vmem:[%s11584_s0 + $0x100] sm:$0xff] }
  0xb3   :  { %v529_v6 = vmax.f32 %v348_v5, 0.0  ;;  %5611 = vmatmul.msk.f32.gmra.mxu0 %vm122_vm0, %v71_v4  ;;  %v677_v5 = vld [vmem:[%s11587_s3 + $0xc8] sm:$0xff] }
  0xb4   :  { %1966 = vmatpush.msra.mxu2 %v677_v5  ;;  %v88_v5 = vld [vmem:[%s11584_s0 + $0x130] sm:$0xff] }
  0xb5   :  { %v6640_v7 = vmin.f32 %v529_v6, 6.0  ;;  %5721 = vmatmul.msk.f32.gmra.mxu2 %vm122_vm0, %v6614_v61 }
  0xb7   :  { %11758 = vst [vmem:[#allocation10_spill] sm:$0xff] %v6640_v7  ;;  %5659 = vmatmul.msk.f32.gmra.mxu1 %vm122_vm0, %v6640_v7  ;;  %5787 = vmatmul.msk.f32.gmra.mxu3 %vm122_vm0, %v6640_v7 }
  0xb8   :  { %v350_v8 = vpop.f32.mrf.mxu0 }
  0xb9   :  { %v351_v10 = vadd.f32 %v6561_v35, %v350_v8 }
  0xbb   :  { %v530_v11 = vmax.f32 %v351_v10, 0.0  ;;  %5612 = vmatmul.msk.f32.gmra.mxu0 %vm122_vm0, %v72_v9  ;;  %v676_v10 = vld [vmem:[%s11587_s3 + $0xc0] sm:$0xff] }
  0xbc   :  { %1757 = vmatpush.msrb.mxu1 %v676_v10 }
  0xbd   :  { %v6653_v12 = vmin.f32 %v530_v11, 6.0  ;;  %5722 = vmatmul.msk.f32.gmra.mxu2 %vm122_vm0, %v6627_v2 }
  0xbf   :  { %11759 = vst [vmem:[#allocation11_spill] sm:$0xff] %v6653_v12  ;;  %5660 = vmatmul.msk.f32.gmra.mxu1 %vm122_vm0, %v6653_v12  ;;  %5788 = vmatmul.msk.f32.gmra.mxu3 %vm122_vm0, %v6653_v12 }
  0xc0   :  { %v353_v13 = vpop.f32.mrf.mxu0 }
  0xc1   :  { %v354_v15 = vadd.f32 %v6561_v35, %v353_v13  ;;  %v83_v13 = vld [vmem:[%s11584_s0 + $0x108] sm:$0xff] }
  0xc3   :  { %v531_v16 = vmax.f32 %v354_v15, 0.0  ;;  %5613 = vmatmul.msk.f32.gmra.mxu0 %vm122_vm0, %v73_v14 }
  0xc5   :  { %v6666_v17 = vmin.f32 %v531_v16, 6.0  ;;  %5723 = vmatmul.msk.f32.gmra.mxu2 %vm122_vm0, %v6640_v7 }
  0xc7   :  { %11760 = vst [vmem:[#allocation12_spill] sm:$0xff] %v6666_v17  ;;  %5661 = vmatmul.msk.f32.gmra.mxu1 %vm122_vm0, %v6666_v17  ;;  %5789 = vmatmul.msk.f32.gmra.mxu3 %vm122_vm0, %v6666_v17 }
  0xc8   :  { %v356_v18 = vpop.f32.mrf.mxu0 }
  0xc9   :  { %v357_v20 = vadd.f32 %v6561_v35, %v356_v18 }
  0xcb   :  { %v532_v21 = vmax.f32 %v357_v20, 0.0  ;;  %5614 = vmatmul.msk.f32.gmra.mxu0 %vm122_vm0, %v74_v19 }
  0xcd   :  { %v6679_v22 = vmin.f32 %v532_v21, 6.0  ;;  %5724 = vmatmul.msk.f32.gmra.mxu2 %vm122_vm0, %v6653_v12 }
  0xcf   :  { %11761 = vst [vmem:[#allocation13_spill] sm:$0xff] %v6679_v22  ;;  %5662 = vmatmul.msk.f32.gmra.mxu1 %vm122_vm0, %v6679_v22  ;;  %5790 = vmatmul.msk.f32.gmra.mxu3 %vm122_vm0, %v6679_v22 }
  0xd0   :  { %v359_v23 = vpop.f32.mrf.mxu0 }
  0xd1   :  { %v360_v25 = vadd.f32 %v6561_v35, %v359_v23  ;;  %v84_v23 = vld [vmem:[%s11584_s0 + $0x110] sm:$0xff] }
  0xd3   :  { %v533_v26 = vmax.f32 %v360_v25, 0.0  ;;  %5615 = vmatmul.msk.f32.gmra.mxu0 %vm122_vm0, %v75_v24 }
  0xd5   :  { %v6692_v27 = vmin.f32 %v533_v26, 6.0  ;;  %5725 = vmatmul.msk.f32.gmra.mxu2 %vm122_vm0, %v6666_v17 }
  0xd7   :  { %11762 = vst [vmem:[#allocation14_spill] sm:$0xff] %v6692_v27  ;;  %5663 = vmatmul.msk.f32.gmra.mxu1 %vm122_vm0, %v6692_v27  ;;  %5791 = vmatmul.msk.f32.gmra.mxu3 %vm122_vm0, %v6692_v27 }
  0xd8   :  { %v362_v28 = vpop.f32.mrf.mxu0 }
  0xd9   :  { %v363_v30 = vadd.f32 %v6561_v35, %v362_v28 }
  0xdb   :  { %v534_v31 = vmax.f32 %v363_v30, 0.0  ;;  %5616 = vmatmul.msk.f32.gmra.mxu0 %vm122_vm0, %v76_v29 }
  0xdd   :  { %v6705_v32 = vmin.f32 %v534_v31, 6.0  ;;  %5726 = vmatmul.msk.f32.gmra.mxu2 %vm122_vm0, %v6679_v22 }
  0xdf   :  { %11763 = vst [vmem:[#allocation15_spill] sm:$0xff] %v6705_v32  ;;  %5664 = vmatmul.msk.f32.gmra.mxu1 %vm122_vm0, %v6705_v32  ;;  %5792 = vmatmul.msk.f32.gmra.mxu3 %vm122_vm0, %v6705_v32 }
  0xe0   :  { %v365_v33 = vpop.f32.mrf.mxu0 }
  0xe1   :  { %v366_v36 = vadd.f32 %v6561_v35, %v365_v33  ;;  %v85_v33 = vld [vmem:[%s11584_s0 + $0x118] sm:$0xff] }
  0xe3   :  { %v535_v37 = vmax.f32 %v366_v36, 0.0  ;;  %5617 = vmatmul.msk.f32.gmra.mxu0 %vm122_vm0, %v77_v34 }
  0xe5   :  { %v6718_v38 = vmin.f32 %v535_v37, 6.0  ;;  %5727 = vmatmul.msk.f32.gmra.mxu2 %vm122_vm0, %v6692_v27 }
  0xe7   :  { %11764 = vst [vmem:[#allocation16_spill] sm:$0xff] %v6718_v38  ;;  %5665 = vmatmul.msk.f32.gmra.mxu1 %vm122_vm0, %v6718_v38  ;;  %5793 = vmatmul.msk.f32.gmra.mxu3 %vm122_vm0, %v6718_v38 }
  0xe8   :  { %v368_v39 = vpop.f32.mrf.mxu0 }
  0xe9   :  { %v369_v42 = vadd.f32 %v6561_v35, %v368_v39 }
  0xeb   :  { %v536_v43 = vmax.f32 %v369_v42, 0.0  ;;  %5618 = vmatmul.msk.f32.gmra.mxu0 %vm122_vm0, %v78_v41 }
  0xed   :  { %v6731_v44 = vmin.f32 %v536_v43, 6.0  ;;  %5728 = vmatmul.msk.f32.gmra.mxu2 %vm122_vm0, %v6705_v32 }
  0xef   :  { %11765 = vst [vmem:[#allocation17_spill] sm:$0xff] %v6731_v44  ;;  %5666 = vmatmul.msk.f32.gmra.mxu1 %vm122_vm0, %v6731_v44  ;;  %5794 = vmatmul.msk.f32.gmra.mxu3 %vm122_vm0, %v6731_v44 }
  0xf0   :  { %v371_v45 = vpop.f32.mrf.mxu0 }
  0xf1   :  { %v372_v47 = vadd.f32 %v6561_v35, %v371_v45  ;;  %v86_v45 = vld [vmem:[%s11584_s0 + $0x120] sm:$0xff] }
  0xf3   :  { %v537_v49 = vmax.f32 %v372_v47, 0.0  ;;  %5619 = vmatmul.msk.f32.gmra.mxu0 %vm122_vm0, %v79_v46 }
  0xf5   :  { %v6744_v50 = vmin.f32 %v537_v49, 6.0  ;;  %5729 = vmatmul.msk.f32.gmra.mxu2 %vm122_vm0, %v6718_v38 }
  0xf7   :  { %11766 = vst [vmem:[#allocation18_spill] sm:$0xff] %v6744_v50  ;;  %5667 = vmatmul.msk.f32.gmra.mxu1 %vm122_vm0, %v6744_v50  ;;  %5795 = vmatmul.msk.f32.gmra.mxu3 %vm122_vm0, %v6744_v50 }
  0xf8   :  { %v374_v53 = vpop.f32.mrf.mxu0 }
  0xf9   :  { %v375_v55 = vadd.f32 %v6561_v35, %v374_v53 }
  0xfb   :  { %v538_v57 = vmax.f32 %v375_v55, 0.0  ;;  %5620 = vmatmul.msk.f32.gmra.mxu0 %vm122_vm0, %v80_v54 }
  0xfd   :  { %v6760_v58 = vmin.f32 %v538_v57, 6.0  ;;  %5730 = vmatmul.msk.f32.gmra.mxu2 %vm122_vm0, %v6731_v44  ;;  %v87_v57 = vld [vmem:[%s11584_s0 + $0x128] sm:$0xff] }
  0xff   :  { %11767 = vst [vmem:[#allocation19_spill] sm:$0xff] %v6760_v58  ;;  %5668 = vmatmul.msk.f32.gmra.mxu1 %vm122_vm0, %v6760_v58  ;;  %5796 = vmatmul.msk.f32.gmra.mxu3 %vm122_vm0, %v6760_v58 }
 0x100   :  { %v377_v59 = vpop.f32.mrf.mxu0 }
 0x101   :  { %v378_v62 = vadd.f32 %v6561_v35, %v377_v59 }
 0x103   :  { %v539_v63 = vmax.f32 %v378_v62, 0.0  ;;  %5621 = vmatmul.msk.f32.gmra.mxu0 %vm122_vm0, %v81_v60 }
 0x105   :  { %v6773_v0 = vmin.f32 %v539_v63, 6.0  ;;  %5731 = vmatmul.msk.f32.gmra.mxu2 %vm122_vm0, %v6744_v50 }
 0x107   :  { %11768 = vst [vmem:[#allocation20_spill] sm:$0xff] %v6773_v0  ;;  %5669 = vmatmul.msk.f32.gmra.mxu1 %vm122_vm0, %v6773_v0  ;;  %5797 = vmatmul.msk.f32.gmra.mxu3 %vm122_vm0, %v6773_v0 }
 0x108   :  { %v380_v1 = vpop.f32.mrf.mxu0 }
 0x109   :  { %v381_v4 = vadd.f32 %v6561_v35, %v380_v1 }
 0x10b   :  { %v540_v6 = vmax.f32 %v381_v4, 0.0  ;;  %5622 = vmatmul.msk.f32.gmra.mxu0 %vm122_vm0, %v82_v3 }
 0x10c   :  { %v6789_v8 = vpop.f32.mrf.mxu1 }
 0x10d   :  { %v6791_v9 = vmin.f32 %v540_v6, 6.0  ;;  %5732 = vmatmul.msk.f32.gmra.mxu2 %vm122_vm0, %v6760_v58 }
 0x10f   :  { %11769 = vst [vmem:[#allocation21_spill] sm:$0xff] %v6791_v9  ;;  %5670 = vmatmul.msk.f32.gmra.mxu1 %vm122_vm0, %v6791_v9  ;;  %5798 = vmatmul.msk.f32.gmra.mxu3 %vm122_vm0, %v6791_v9 }
 0x110   :  { %v383_v11 = vpop.f32.mrf.mxu0 }
 0x111   :  { %v384_v14 = vadd.f32 %v6561_v35, %v383_v11 }
 0x112   :  { %v6806_v15 = vpop.f32.mrf.mxu3 }
 0x113   :  { %11770 = vst [vmem:[#allocation22_spill] sm:$0xff] %v6806_v15  ;;  %v541_v16 = vmax.f32 %v384_v14, 0.0  ;;  %5623 = vmatmul.msk.f32.gmra.mxu0 %vm122_vm0, %v83_v13 }
 0x114   :  { %v6809_v18 = vpop.f32.mrf.mxu1 }
 0x115   :  { %v6811_v19 = vmin.f32 %v541_v16, 6.0  ;;  %5733 = vmatmul.msk.f32.gmra.mxu2 %vm122_vm0, %v6773_v0 }
 0x117   :  { %11771 = vst [vmem:[#allocation23_spill] sm:$0xff] %v6811_v19  ;;  %5671 = vmatmul.msk.f32.gmra.mxu1 %vm122_vm0, %v6811_v19  ;;  %5799 = vmatmul.msk.f32.gmra.mxu3 %vm122_vm0, %v6811_v19 }
 0x118   :  { %v386_v20 = vpop.f32.mrf.mxu0  ;;  %v6819_v21 = vpop.f32.mrf.mxu2 }
 0x119   :  { %11772 = vst [vmem:[#allocation24_spill] sm:$0xff] %v6819_v21  ;;  %v387_v24 = vadd.f32 %v6561_v35, %v386_v20 }
 0x11a   :  { %v6825_v25 = vpop.f32.mrf.mxu3 }
 0x11b   :  { %11773 = vst [vmem:[#allocation25_spill] sm:$0xff] %v6825_v25  ;;  %v542_v26 = vmax.f32 %v387_v24, 0.0  ;;  %5624 = vmatmul.msk.f32.gmra.mxu0 %vm122_vm0, %v84_v23  ;;  %v89_v23 = vld [vmem:[%s11584_s0 + $0x138] sm:$0xff]  ;;  %v688_v25 = vld [vmem:[%s11587_s3 + $0x120] sm:$0xff] }
 0x11c   :  { %v6828_v28 = vpop.f32.mrf.mxu1  ;;  %2174 = vmatpush.msra.mxu3 %v688_v25  ;;  %v668_v25 = vld [vmem:[%s11587_s3 + $0x80] sm:$0xff] }
 0x11d   :  { %v6830_v29 = vmin.f32 %v542_v26, 6.0  ;;  %5734 = vmatmul.msk.f32.gmra.mxu2 %vm122_vm0, %v6791_v9 }
 0x11f   :  { %11774 = vst [vmem:[#allocation26_spill] sm:$0xff] %v6830_v29  ;;  %5672 = vmatmul.msk.f32.gmra.mxu1 %vm122_vm0, %v6830_v29  ;;  %5800 = vmatmul.msk.f32.gmra.mxu3 %vm122_vm0, %v6830_v29 }
 0x120   :  { %v389_v30 = vpop.f32.mrf.mxu0  ;;  %v6838_v31 = vpop.f32.mrf.mxu2 }
 0x121   :  { %11775 = vst [vmem:[#allocation27_spill] sm:$0xff] %v6838_v31  ;;  %v390_v34 = vadd.f32 %v6561_v35, %v389_v30 }
 0x122   :  { %v6844_v36 = vpop.f32.mrf.mxu3 }
 0x123   :  { %11776 = vst [vmem:[#allocation28_spill] sm:$0xff] %v6844_v36  ;;  %v543_v37 = vmax.f32 %v390_v34, 0.0  ;;  %5625 = vmatmul.msk.f32.gmra.mxu0 %vm122_vm0, %v85_v33 }
 0x124   :  { %v6847_v39 = vpop.f32.mrf.mxu1 }
 0x125   :  { %v6849_v41 = vmin.f32 %v543_v37, 6.0  ;;  %5735 = vmatmul.msk.f32.gmra.mxu2 %vm122_vm0, %v6811_v19 }
 0x127   :  { %11777 = vst [vmem:[#allocation29_spill] sm:$0xff] %v6849_v41  ;;  %5673 = vmatmul.msk.f32.gmra.mxu1 %vm122_vm0, %v6849_v41  ;;  %5801 = vmatmul.msk.f32.gmra.mxu3 %vm122_vm0, %v6849_v41 }
 0x128   :  { %v392_v42 = vpop.f32.mrf.mxu0  ;;  %v6857_v43 = vpop.f32.mrf.mxu2 }
 0x129   :  { %11778 = vst [vmem:[#allocation30_spill] sm:$0xff] %v6857_v43  ;;  %v393_v46 = vadd.f32 %v6561_v35, %v392_v42 }
 0x12a   :  { %v6863_v47 = vpop.f32.mrf.mxu3 }
 0x12b   :  { %11779 = vst [vmem:[#allocation31_spill] sm:$0xff] %v6863_v47  ;;  %v544_v49 = vmax.f32 %v393_v46, 0.0  ;;  %5626 = vmatmul.msk.f32.gmra.mxu0 %vm122_vm0, %v86_v45  ;;  %v90_v45 = vld [vmem:[%s11584_s0 + $0x140] sm:$0xff] }
 0x12c   :  { %v6866_v52 = vpop.f32.mrf.mxu1 }
 0x12d   :  { %v6868_v53 = vmin.f32 %v544_v49, 6.0  ;;  %5736 = vmatmul.msk.f32.gmra.mxu2 %vm122_vm0, %v6830_v29 }
 0x12f   :  { %11780 = vst [vmem:[#allocation32_spill] sm:$0xff] %v6868_v53  ;;  %5674 = vmatmul.msk.f32.gmra.mxu1 %vm122_vm0, %v6868_v53  ;;  %5802 = vmatmul.msk.f32.gmra.mxu3 %vm122_vm0, %v6868_v53 }
 0x130   :  { %v395_v54 = vpop.f32.mrf.mxu0  ;;  %v6876_v55 = vpop.f32.mrf.mxu2 }
 0x131   :  { %11781 = vst [vmem:[#allocation33_spill] sm:$0xff] %v6876_v55  ;;  %v396_v59 = vadd.f32 %v6561_v35, %v395_v54  ;;  %v692_v55 = vld [vmem:[%s11588_s4] sm:$0xff] }
 0x132   :  { %v6882_v60 = vpop.f32.mrf.mxu3 }
 0x133   :  { %11782 = vst [vmem:[#allocation34_spill] sm:$0xff] %v6882_v60  ;;  %v545_v62 = vmax.f32 %v396_v59, 0.0  ;;  %5627 = vmatmul.msk.f32.gmra.mxu0 %vm122_vm0, %v87_v57  ;;  %v658_v60 = vld [vmem:[%s11587_s3 + $0x30] sm:$0xff] }
 0x134   :  { %v6885_v63 = vpop.f32.mrf.mxu1 }
 0x135   :  { %v6887_v1 = vmin.f32 %v545_v62, 6.0  ;;  %5737 = vmatmul.msk.f32.gmra.mxu2 %vm122_vm0, %v6849_v41 }
 0x137   :  { %11783 = vst [vmem:[#allocation35_spill] sm:$0xff] %v6887_v1  ;;  %5675 = vmatmul.msk.f32.gmra.mxu1 %vm122_vm0, %v6887_v1  ;;  %5803 = vmatmul.msk.f32.gmra.mxu3 %vm122_vm0, %v6887_v1 }
 0x138   :  { %v398_v3 = vpop.f32.mrf.mxu0  ;;  %v6895_v4 = vpop.f32.mrf.mxu2 }
 0x139   :  { %11784 = vst [vmem:[#allocation36_spill] sm:$0xff] %v6895_v4  ;;  %v399_v6 = vadd.f32 %v6561_v35, %v398_v3 }
 0x13a   :  { %v6901_v10 = vpop.f32.mrf.mxu3 }
 0x13b   :  { %11785 = vst [vmem:[#allocation37_spill] sm:$0xff] %v6901_v10  ;;  %v546_v11 = vmax.f32 %v399_v6, 0.0  ;;  %5628 = vmatmul.msk.f32.gmra.mxu0 %vm122_vm0, %v88_v5  ;;  %v91_v5 = vld [vmem:[%s11584_s0 + $0x148] sm:$0xff] }
 0x13c   :  { %v6904_v13 = vpop.f32.mrf.mxu1 }
 0x13d   :  { %v6906_v14 = vmin.f32 %v546_v11, 6.0  ;;  %5738 = vmatmul.msk.f32.gmra.mxu2 %vm122_vm0, %v6868_v53 }
 0x13f   :  { %11786 = vst [vmem:[#allocation38_spill] sm:$0xff] %v6906_v14  ;;  %5676 = vmatmul.msk.f32.gmra.mxu1 %vm122_vm0, %v6906_v14  ;;  %5804 = vmatmul.msk.f32.gmra.mxu3 %vm122_vm0, %v6906_v14 }
 0x140   :  { %v401_v16 = vpop.f32.mrf.mxu0  ;;  %v6914_v20 = vpop.f32.mrf.mxu2 }
 0x141   :  { %11787 = vst [vmem:[#allocation39_spill] sm:$0xff] %v6914_v20  ;;  %v402_v24 = vadd.f32 %v6561_v35, %v401_v16 }
 0x142   :  { %v6920_v26 = vpop.f32.mrf.mxu3 }
 0x143   :  { %11788 = vst [vmem:[#allocation40_spill] sm:$0xff] %v6920_v26  ;;  %v547_v30 = vmax.f32 %v402_v24, 0.0  ;;  %5629 = vmatmul.msk.f32.gmra.mxu0 %vm122_vm0, %v89_v23 }
 0x144   :  { %v6923_v33 = vpop.f32.mrf.mxu1 }
 0x145   :  { %v6925_v34 = vmin.f32 %v547_v30, 6.0  ;;  %5739 = vmatmul.msk.f32.gmra.mxu2 %vm122_vm0, %v6887_v1 }
 0x147   :  { %11789 = vst [vmem:[#allocation41_spill] sm:$0xff] %v6925_v34  ;;  %5677 = vmatmul.msk.f32.gmra.mxu1 %vm122_vm0, %v6925_v34  ;;  %5805 = vmatmul.msk.f32.gmra.mxu3 %vm122_vm0, %v6925_v34 }
 0x148   :  { %v404_v37 = vpop.f32.mrf.mxu0  ;;  %v6933_v42 = vpop.f32.mrf.mxu2 }
 0x149   :  { %11790 = vst [vmem:[#allocation42_spill] sm:$0xff] %v6933_v42  ;;  %v405_v46 = vadd.f32 %v6561_v35, %v404_v37 }
 0x14a   :  { %v6939_v49 = vpop.f32.mrf.mxu3 }
 0x14b   :  { %11791 = vst [vmem:[#allocation43_spill] sm:$0xff] %v6939_v49  ;;  %v548_v54 = vmax.f32 %v405_v46, 0.0  ;;  %5630 = vmatmul.msk.f32.gmra.mxu0 %vm122_vm0, %v90_v45  ;;  %v92_v45 = vld [vmem:[%s11584_s0 + $0x150] sm:$0xff] }
 0x14c   :  { %v6942_v57 = vpop.f32.mrf.mxu1 }
 0x14d   :  { %v6944_v59 = vmin.f32 %v548_v54, 6.0  ;;  %5740 = vmatmul.msk.f32.gmra.mxu2 %vm122_vm0, %v6906_v14 }
 0x14f   :  { %11792 = vst [vmem:[#allocation44_spill] sm:$0xff] %v6944_v59  ;;  %5678 = vmatmul.msk.f32.gmra.mxu1 %vm122_vm0, %v6944_v59  ;;  %5806 = vmatmul.msk.f32.gmra.mxu3 %vm122_vm0, %v6944_v59 }
 0x150   :  { %v407_v62 = vpop.f32.mrf.mxu0  ;;  %v6952_v3 = vpop.f32.mrf.mxu2 }
 0x151   :  { %11793 = vst [vmem:[#allocation45_spill] sm:$0xff] %v6952_v3  ;;  %v408_v6 = vadd.f32 %v6561_v35, %v407_v62 }
 0x152   :  { %v6958_v11 = vpop.f32.mrf.mxu3 }
 0x153   :  { %11794 = vst [vmem:[#allocation46_spill] sm:$0xff] %v6958_v11  ;;  %v549_v16 = vmax.f32 %v408_v6, 0.0  ;;  %5631 = vmatmul.msk.f32.gmra.mxu0 %vm122_vm0, %v91_v5 }
 0x154   :  { %v6961_v23 = vpop.f32.mrf.mxu1 }
 0x155   :  { %v6963_v24 = vmin.f32 %v549_v16, 6.0  ;;  %5741 = vmatmul.msk.f32.gmra.mxu2 %vm122_vm0, %v6925_v34 }
 0x157   :  { %11795 = vst [vmem:[#allocation47_spill] sm:$0xff] %v6963_v24  ;;  %5679 = vmatmul.msk.f32.gmra.mxu1 %vm122_vm0, %v6963_v24  ;;  %5807 = vmatmul.msk.f32.gmra.mxu3 %vm122_vm0, %v6963_v24 }
 0x158   :  { %v410_v30 = vpop.f32.mrf.mxu0  ;;  %v6971_v37 = vpop.f32.mrf.mxu2 }
 0x159   :  { %11796 = vst [vmem:[#allocation48_spill] sm:$0xff] %v6971_v37  ;;  %v411_v46 = vadd.f32 %v6561_v35, %v410_v30 }
 0x15a   :  { %v6977_v54 = vpop.f32.mrf.mxu3 }
 0x15b   :  { %11797 = vst [vmem:[#allocation49_spill] sm:$0xff] %v6977_v54  ;;  %v550_v62 = vmax.f32 %v411_v46, 0.0  ;;  %5632 = vmatmul.msk.f32.gmra.mxu0 %vm122_vm0, %v92_v45  ;;  %v93_v45 = vld [vmem:[%s11584_s0 + $0x158] sm:$0xff] }
 0x15c   :  { %v6980_v5 = vpop.f32.mrf.mxu1 }
 0x15d   :  { %v6982_v6 = vmin.f32 %v550_v62, 6.0  ;;  %5742 = vmatmul.msk.f32.gmra.mxu2 %vm122_vm0, %v6944_v59 }
 0x15f   :  { %11798 = vst [vmem:[#allocation50_spill] sm:$0xff] %v6982_v6  ;;  %5680 = vmatmul.msk.f32.gmra.mxu1 %vm122_vm0, %v6982_v6  ;;  %5808 = vmatmul.msk.f32.gmra.mxu3 %vm122_vm0, %v6982_v6 }
 0x160   :  { %v413_v16 = vpop.f32.mrf.mxu0  ;;  %v6990_v30 = vpop.f32.mrf.mxu2 }
 0x161   :  { %11799 = vst [vmem:[#allocation51_spill] sm:$0xff] %v6990_v30  ;;  %v414_v46 = vadd.f32 %v6561_v35, %v413_v16  ;;  %v678_v16 = vld [vmem:[%s11587_s3 + $0xd0] sm:$0xff] }
 0x162   :  { %v6996_v62 = vpop.f32.mrf.mxu3  ;;  %2175 = vmatpush.msra.mxu3 %v678_v16 }
 0x163   :  { %11800 = vst [vmem:[#allocation52_spill] sm:$0xff] %v6996_v62  ;;  %v551_v15 = vmax.f32 %v414_v46, 0.0  ;;  %5633 = vmatmul.msk.f32.gmra.mxu0 %vm122_vm0, %v93_v45  ;;  %v94_v46 = vld [vmem:[%s11584_s0 + $0x160] sm:$0xff] }
 0x164   :  { %v7002_v36 = vpop.f32.mrf.mxu1  ;;  %2176 = vmatpush.msra.mxu3 %v668_v25 }
 0x165   :  { %v7004_v47 = vmin.f32 %v551_v15, 6.0  ;;  %5743 = vmatmul.msk.f32.gmra.mxu2 %vm122_vm0, %v6963_v24 }
 0x166   :  { %2177 = vmatpush.msra.mxu3 %v658_v60  ;;  %v95_v60 = vld [vmem:[%s11584_s0 + $0x168] sm:$0xff] }
 0x167   :  { %11801 = vst [vmem:[#allocation53_spill] sm:$0xff] %v7004_v47  ;;  %5681 = vmatmul.msk.f32.gmra.mxu1 %vm122_vm0, %v7004_v47  ;;  %5809 = vmatmul.msk.f32.gmra.mxu3 %vm122_vm0, %v7004_v47 }
 0x168   :  { %v416_v15 = vpop.f32.mrf.mxu0  ;;  %v7018_v45 = vpop.f32.mrf.mxu2 }
 0x169   :  { %11802 = vst [vmem:[#allocation54_spill] sm:$0xff] %v7018_v45  ;;  %v417_v16 = vadd.f32 %v6561_v35, %v416_v15 }
 0x16a   :  { %v7027_v10 = vpop.f32.mrf.mxu3 }
 0x16b   :  { %11803 = vst [vmem:[#allocation55_spill] sm:$0xff] %v7027_v10  ;;  %v552_v26 = vmax.f32 %v417_v16, 0.0  ;;  %5634 = vmatmul.msk.f32.gmra.mxu0 %vm122_vm0, %v94_v46  ;;  %v665_v10 = vld [vmem:[%s11587_s3 + $0x68] sm:$0xff] }
 0x16c   :  { %v961_v49 = vpop.f32.mrf.mxu1  ;;  %1549 = vmatpush.msrb.mxu0 %v665_v10 }
 0x16d   :  { %v7030_v11 = vmin.f32 %v552_v26, 6.0  ;;  %5744 = vmatmul.msk.f32.gmra.mxu2 %vm122_vm0, %v6982_v6 }
 0x16f   :  { %11804 = vst [vmem:[#allocation56_spill] sm:$0xff] %v7030_v11  ;;  %5682 = vmatmul.msk.f32.gmra.mxu1 %vm122_vm0, %v7030_v11  ;;  %5810 = vmatmul.msk.f32.gmra.mxu3 %vm122_vm0, %v7030_v11 }
 0x170   :  { %v419_v25 = vpop.f32.mrf.mxu0  ;;  %v7038_v15 = vpop.f32.mrf.mxu2 }
 0x171   :  { %11805 = vst [vmem:[#allocation57_spill] sm:$0xff] %v7038_v15  ;;  %v420_v46 = vadd.f32 %v6561_v35, %v419_v25 }
 0x172   :  { %v7044_v26 = vpop.f32.mrf.mxu3 }
 0x173   :  { %11806 = vst [vmem:[#allocation58_spill] sm:$0xff] %v7044_v26  ;;  %v553_v16 = vmax.f32 %v420_v46, 0.0  ;;  %5635 = vmatmul.msk.f32.gmra.mxu0 %vm122_vm0, %v95_v60  ;;  %v96_v60 = vld [vmem:[%s11584_s0 + $0x170] sm:$0xff] }
 0x174   :  { %v964_v54 = vpop.f32.mrf.mxu1 }
 0x175   :  { %v7047_v62 = vmin.f32 %v553_v16, 6.0  ;;  %5745 = vmatmul.msk.f32.gmra.mxu2 %vm122_vm0, %v7004_v47 }
 0x177   :  { %11807 = vst [vmem:[#allocation59_spill] sm:$0xff] %v7047_v62  ;;  %5683 = vmatmul.msk.f32.gmra.mxu1 %vm122_vm0, %v7047_v62  ;;  %5811 = vmatmul.msk.f32.gmra.mxu3 %vm122_vm0, %v7047_v62 }
 0x178   :  { %v422_v25 = vpop.f32.mrf.mxu0  ;;  %v7058_v46 = vpop.f32.mrf.mxu2 }
 0x179   :  { %11808 = vst [vmem:[#allocation60_spill] sm:$0xff] %v7058_v46  ;;  %v423_v16 = vadd.f32 %v6561_v35, %v422_v25 }
 0x17a   :  { %v7064_v26 = vpop.f32.mrf.mxu3 }
 0x17b   :  { %11809 = vst [vmem:[#allocation61_spill] sm:$0xff] %v7064_v26  ;;  %v554_v31 = vmax.f32 %v423_v16, 0.0  ;;  %5636 = vmatmul.msk.f32.gmra.mxu0 %vm122_vm0, %v96_v60  ;;  %v7083_v60 = vperm.slane %v692_v55, 0 }
 0x17c   :  { %v967_v10 = vpop.f32.mrf.mxu1 }
 0x17d   :  { %v7067_v43 = vmin.f32 %v554_v31, 6.0  ;;  %5746 = vmatmul.msk.f32.gmra.mxu2 %vm122_vm0, %v7030_v11  ;;  %v97_v31 = vld [vmem:[%s11584_s0 + $0x178] sm:$0xff]  ;;  %11812 = vst [vmem:[#allocation64_spill] sm:$0xff] %v7083_v60  ;;  %v968_v20 = vadd.f32 %v967_v10, %v7083_v60  ;;  %v965_v55 = vadd.f32 %v964_v54, %v7083_v60 }
 0x17f   :  { %11810 = vst [vmem:[#allocation62_spill] sm:$0xff] %v7067_v43  ;;  %5684 = vmatmul.msk.f32.gmra.mxu1 %vm122_vm0, %v7067_v43  ;;  %5812 = vmatmul.msk.f32.gmra.mxu3 %vm122_vm0, %v7067_v43  ;;  %v3138_v45 = vmax.f32 %v968_v20, 0.0  ;;  %v667_v20 = vld [vmem:[%s11587_s3 + $0x78] sm:$0xff] }
 0x180   :  { %v425_v25 = vpop.f32.mrf.mxu0  ;;  %v7078_v16 = vpop.f32.mrf.mxu2  ;;  %1967 = vmatpush.msra.mxu2 %v667_v20 }
 0x181   :  { %11811 = vst [vmem:[#allocation63_spill] sm:$0xff] %v7078_v16  ;;  %v426_v26 = vadd.f32 %v6561_v35, %v425_v25 }
 0x182   :  { %v7086_v4 = vpop.f32.mrf.mxu3 }
 0x183   :  { %11813 = vst [vmem:[#allocation65_spill] sm:$0xff] %v7086_v4  ;;  %v555_v42 = vmax.f32 %v426_v26, 0.0  ;;  %5637 = vmatmul.msk.f32.gmra.mxu0 %vm122_vm0, %v97_v31  ;;  %v962_v26 = vadd.f32 %v961_v49, %v7083_v60  ;;  %v3128_v31 = vmax.f32 %v965_v55, 0.0  ;;  %v3778_v49 = vmin.f32 %v3138_v45, 6.0 }
 0x184   :  { %v970_v3 = vpop.f32.mrf.mxu1  ;;  %v953_v45 = vadd.f32 %v6961_v23, %v7083_v60  ;;  %v99_v23 = vld [vmem:[%s11584_s0 + $0x188] sm:$0xff] }
 0x185   :  { %v7090_v37 = vmin.f32 %v555_v42, 6.0  ;;  %v971_v30 = vadd.f32 %v970_v3, %v7083_v60  ;;  %5747 = vmatmul.msk.f32.gmra.mxu2 %vm122_vm0, %v7047_v62  ;;  %v98_v3 = vld [vmem:[%s11584_s0 + $0x180] sm:$0xff] }
 0x187   :  { %11814 = vst [vmem:[#allocation66_spill] sm:$0xff] %v7090_v37  ;;  %v3148_v15 = vmax.f32 %v971_v30, 0.0  ;;  %5685 = vmatmul.msk.f32.gmra.mxu1 %vm122_vm0, %v7090_v37  ;;  %5813 = vmatmul.msk.f32.gmra.mxu3 %vm122_vm0, %v7090_v37  ;;  %v959_v30 = vadd.f32 %v7002_v36, %v7083_v60  ;;  %v666_v36 = vld [vmem:[%s11587_s3 + $0x70] sm:$0xff] }
 0x188   :  { %v428_v10 = vpop.f32.mrf.mxu0  ;;  %v7101_v42 = vpop.f32.mrf.mxu2  ;;  %1758 = vmatpush.msrb.mxu1 %v666_v36 }
 0x189   :  { %11815 = vst [vmem:[#allocation67_spill] sm:$0xff] %v7101_v42  ;;  %v3788_v25 = vmin.f32 %v3148_v15, 6.0  ;;  %v429_v54 = vadd.f32 %v6561_v35, %v428_v10  ;;  %v956_v15 = vadd.f32 %v6980_v5, %v7083_v60  ;;  %v3118_v10 = vmax.f32 %v962_v26, 0.0 }
 0x18a   :  { %v7112_v4 = vpop.f32.mrf.mxu3  ;;  %v3108_v55 = vmax.f32 %v959_v30, 0.0  ;;  %v950_v5 = vadd.f32 %v6942_v57, %v7083_v60  ;;  %v947_v30 = vadd.f32 %v6923_v33, %v7083_v60  ;;  %v941_v33 = vadd.f32 %v6885_v63, %v7083_v60  ;;  %v100_v63 = vld [vmem:[%s11584_s0 + $0x190] sm:$0xff] }
 0x18b   :  { %11816 = vst [vmem:[#allocation68_spill] sm:$0xff] %v7112_v4  ;;  %v556_v46 = vmax.f32 %v429_v54, 0.0  ;;  %5638 = vmatmul.msk.f32.gmra.mxu0 %vm122_vm0, %v98_v3  ;;  %4282 = vmatpush.msrb.mxu3 %v3788_v25  ;;  %v3768_v3 = vmin.f32 %v3128_v31, 6.0  ;;  %v3758_v26 = vmin.f32 %v3118_v10, 6.0  ;;  %v3088_v31 = vmax.f32 %v953_v45, 0.0 }
 0x18c   :  { %v7117_v16 = vpop.f32.mrf.mxu1  ;;  %v3078_v10 = vmax.f32 %v950_v5, 0.0  ;;  %v3068_v45 = vmax.f32 %v947_v30, 0.0  ;;  %v935_v30 = vadd.f32 %v6847_v39, %v7083_v60  ;;  %v929_v39 = vadd.f32 %v6809_v18, %v7083_v60  ;;  %v101_v18 = vld [vmem:[%s11584_s0 + $0x198] sm:$0xff] }
 0x18d   :  { %v7119_v42 = vmin.f32 %v556_v46, 6.0  ;;  %5748 = vmatmul.msk.f32.gmra.mxu2 %vm122_vm0, %v7067_v43  ;;  %4283 = vmatpush.msrb.mxu3 %v3778_v49  ;;  %v3098_v46 = vmax.f32 %v956_v15, 0.0  ;;  %v3748_v49 = vmin.f32 %v3108_v55, 6.0  ;;  %v944_v15 = vadd.f32 %v6904_v13, %v7083_v60 }
 0x18e   :  { %v3728_v55 = vmin.f32 %v3088_v31, 6.0  ;;  %v938_v13 = vadd.f32 %v6866_v52, %v7083_v60  ;;  %v3048_v31 = vmax.f32 %v941_v33, 0.0  ;;  %v3028_v33 = vmax.f32 %v935_v30, 0.0 }
 0x18f   :  { %11817 = vst [vmem:[#allocation69_spill] sm:$0xff] %v7119_v42  ;;  %5686 = vmatmul.msk.f32.gmra.mxu1 %vm122_vm0, %v7119_v42  ;;  %5814 = vmatmul.msk.f32.gmra.mxu3 %vm122_vm0, %v7119_v42  ;;  %v3058_v5 = vmax.f32 %v944_v15, 0.0  ;;  %v932_v15 = vadd.f32 %v6828_v28, %v7083_v60  ;;  %v926_v28 = vadd.f32 %v6789_v8, %v7083_v60  ;;  %v3008_v30 = vmax.f32 %v929_v39, 0.0 }
 0x190   :  { %4284 = vmatpush.msrb.mxu3 %v3768_v3  ;;  %v431_v25 = vpop.f32.mrf.mxu0  ;;  %v7134_v54 = vpop.f32.mrf.mxu2  ;;  %v3738_v3 = vmin.f32 %v3098_v46, 6.0  ;;  %v3718_v46 = vmin.f32 %v3078_v10, 6.0  ;;  %v3038_v10 = vmax.f32 %v938_v13, 0.0 }
 0x191   :  { %11818 = vst [vmem:[#allocation70_spill] sm:$0xff] %v7134_v54  ;;  %v432_v20 = vadd.f32 %v6561_v35, %v431_v25  ;;  %v3018_v13 = vmax.f32 %v932_v15, 0.0  ;;  %v2998_v8 = vmax.f32 %v926_v28, 0.0 }
 0x192   :  { %4285 = vmatpush.msrb.mxu3 %v3758_v26  ;;  %v7142_v36 = vpop.f32.mrf.mxu3 }
 0x193   :  { %11819 = vst [vmem:[#allocation71_spill] sm:$0xff] %v7142_v36  ;;  %v557_v57 = vmax.f32 %v432_v20, 0.0  ;;  %5639 = vmatmul.msk.f32.gmra.mxu0 %vm122_vm0, %v99_v23  ;;  %v3658_v15 = vmin.f32 %v3018_v13, 6.0  ;;  %v3638_v39 = vmin.f32 %v2998_v8, 6.0  ;;  %v102_v13 = vld [vmem:[%s11584_s0 + $0x1a0] sm:$0xff]  ;;  %v103_v8 = vld [vmem:[%s11584_s0 + $0x1a8] sm:$0xff] }
 0x194   :  { %4286 = vmatpush.msrb.mxu3 %v3748_v49  ;;  %v7147_v4 = vpop.f32.mrf.mxu1  ;;  %v3708_v49 = vmin.f32 %v3068_v45, 6.0  ;;  %v3688_v45 = vmin.f32 %v3048_v31, 6.0  ;;  %v3668_v31 = vmin.f32 %v3028_v33, 6.0 }
 0x195   :  { %v7149_v25 = vmin.f32 %v557_v57, 6.0  ;;  %5749 = vmatmul.msk.f32.gmra.mxu2 %vm122_vm0, %v7090_v37 }
 0x196   :  { %4287 = vmatpush.msrb.mxu3 %v3738_v3  ;;  %v3698_v3 = vmin.f32 %v3058_v5, 6.0  ;;  %v3678_v5 = vmin.f32 %v3038_v10, 6.0 }
 0x197   :  { %11820 = vst [vmem:[#allocation72_spill] sm:$0xff] %v7149_v25  ;;  %5687 = vmatmul.msk.f32.gmra.mxu1 %vm122_vm0, %v7149_v25  ;;  %5815 = vmatmul.msk.f32.gmra.mxu3 %vm122_vm0, %v7149_v25 }
 0x198   :  { %4288 = vmatpush.msrb.mxu3 %v3728_v55  ;;  %v434_v26 = vpop.f32.mrf.mxu0  ;;  %v7161_v23 = vpop.f32.mrf.mxu2 }
 0x199   :  { %11821 = vst [vmem:[#allocation73_spill] sm:$0xff] %v7161_v23  ;;  %v435_v20 = vadd.f32 %v6561_v35, %v434_v26 }
 0x19a   :  { %4289 = vmatpush.msrb.mxu3 %v3718_v46  ;;  %v7169_v57 = vpop.f32.mrf.mxu3 }
 0x19b   :  { %11822 = vst [vmem:[#allocation74_spill] sm:$0xff] %v7169_v57  ;;  %v558_v52 = vmax.f32 %v435_v20, 0.0  ;;  %5640 = vmatmul.msk.f32.gmra.mxu0 %vm122_vm0, %v100_v63 }
 0x19c   :  { %4290 = vmatpush.msrb.mxu3 %v3708_v49  ;;  %v7174_v55 = vpop.f32.mrf.mxu1 }
 0x19d   :  { %v7176_v26 = vmin.f32 %v558_v52, 6.0  ;;  %5750 = vmatmul.msk.f32.gmra.mxu2 %vm122_vm0, %v7119_v42 }
 0x19e   :  { %4291 = vmatpush.msrb.mxu3 %v3698_v3 }
 0x19f   :  { %11823 = vst [vmem:[#allocation75_spill] sm:$0xff] %v7176_v26  ;;  %5688 = vmatmul.msk.f32.gmra.mxu1 %vm122_vm0, %v7176_v26  ;;  %5816 = vmatmul.msk.f32.gmra.mxu3 %vm122_vm0, %v7176_v26 }
 0x1a0   :  { %4292 = vmatpush.msrb.mxu3 %v3688_v45  ;;  %v437_v46 = vpop.f32.mrf.mxu0  ;;  %v7188_v63 = vpop.f32.mrf.mxu2  ;;  %v3648_v45 = vmin.f32 %v3008_v30, 6.0 }
 0x1a1   :  { %11824 = vst [vmem:[#allocation76_spill] sm:$0xff] %v7188_v63  ;;  %v438_v20 = vadd.f32 %v6561_v35, %v437_v46 }
 0x1a2   :  { %4293 = vmatpush.msrb.mxu3 %v3678_v5  ;;  %v7194_v49 = vpop.f32.mrf.mxu3 }
 0x1a3   :  { %11825 = vst [vmem:[#allocation77_spill] sm:$0xff] %v7194_v49  ;;  %v559_v52 = vmax.f32 %v438_v20, 0.0  ;;  %5641 = vmatmul.msk.f32.gmra.mxu0 %vm122_vm0, %v101_v18 }
 0x1a4   :  { %4294 = vmatpush.msrb.mxu3 %v3668_v31  ;;  %v7197_v10 = vpop.f32.mrf.mxu1 }
 0x1a5   :  { %v7199_v3 = vmin.f32 %v559_v52, 6.0  ;;  %5751 = vmatmul.msk.f32.gmra.mxu2 %vm122_vm0, %v7149_v25 }
 0x1a6   :  { %4295 = vmatpush.msrb.mxu3 %v3658_v15 }
 0x1a7   :  { %11826 = vst [vmem:[#allocation78_spill] sm:$0xff] %v7199_v3  ;;  %5689 = vmatmul.msk.f32.gmra.mxu1 %vm122_vm0, %v7199_v3  ;;  %5817 = vmatmul.msk.f32.gmra.mxu3 %vm122_vm0, %v7199_v3 }
 0x1a8   :  { %4296 = vmatpush.msrb.mxu3 %v3648_v45  ;;  %v440_v33 = vpop.f32.mrf.mxu0  ;;  %v7207_v28 = vpop.f32.mrf.mxu2 }
 0x1a9   :  { %11827 = vst [vmem:[#allocation79_spill] sm:$0xff] %v7207_v28  ;;  %v441_v5 = vadd.f32 %v6561_v35, %v440_v33 }
 0x1aa   :  { %4297 = vmatpush.msrb.mxu3 %v3638_v39  ;;  %v7213_v46 = vpop.f32.mrf.mxu3 }
 0x1ab   :  { %11828 = vst [vmem:[#allocation80_spill] sm:$0xff] %v7213_v46  ;;  %v560_v18 = vmax.f32 %v441_v5, 0.0  ;;  %5642 = vmatmul.msk.f32.gmra.mxu0 %vm122_vm0, %v102_v13 }
 0x1ac   :  { %v7216_v20 = vpop.f32.mrf.mxu1 }
 0x1ad   :  { %v7218_v30 = vmin.f32 %v560_v18, 6.0  ;;  %5752 = vmatmul.msk.f32.gmra.mxu2 %vm122_vm0, %v7176_v26 }
 0x1af   :  { %11829 = vst [vmem:[#allocation81_spill] sm:$0xff] %v7218_v30  ;;  %5690 = vmatmul.msk.f32.gmra.mxu1 %vm122_vm0, %v7218_v30  ;;  %5818 = vmatmul.msk.f32.gmra.mxu3 %vm122_vm0, %v7218_v30 }
 0x1b0   :  { %v443_v31 = vpop.f32.mrf.mxu0  ;;  %v7226_v52 = vpop.f32.mrf.mxu2 }
 0x1b1   :  { %11830 = vst [vmem:[#allocation82_spill] sm:$0xff] %v7226_v52  ;;  %v444_v15 = vadd.f32 %v6561_v35, %v443_v31  ;;  %v104_v31 = vld [vmem:[%s11584_s0 + $0x1b0] sm:$0xff] }
 0x1b2   :  { %v7232_v45 = vpop.f32.mrf.mxu3 }
 0x1b3   :  { %11831 = vst [vmem:[#allocation83_spill] sm:$0xff] %v7232_v45  ;;  %v561_v39 = vmax.f32 %v444_v15, 0.0  ;;  %5643 = vmatmul.msk.f32.gmra.mxu0 %vm122_vm0, %v103_v8 }
 0x1b4   :  { %v7235_v33 = vpop.f32.mrf.mxu1 }
 0x1b5   :  { %v7237_v13 = vmin.f32 %v561_v39, 6.0  ;;  %5753 = vmatmul.msk.f32.gmra.mxu2 %vm122_vm0, %v7199_v3 }
 0x1b7   :  { %11832 = vst [vmem:[#allocation84_spill] sm:$0xff] %v7237_v13  ;;  %5691 = vmatmul.msk.f32.gmra.mxu1 %vm122_vm0, %v7237_v13  ;;  %5819 = vmatmul.msk.f32.gmra.mxu3 %vm122_vm0, %v7237_v13 }
 0x1b8   :  { %v446_v5 = vpop.f32.mrf.mxu0  ;;  %v7245_v18 = vpop.f32.mrf.mxu2 }
 0x1b9   :  { %11833 = vst [vmem:[#allocation85_spill] sm:$0xff] %v7245_v18  ;;  %v447_v8 = vadd.f32 %v6561_v35, %v446_v5  ;;  %v105_v5 = vld [vmem:[%s11584_s0 + $0x1b8] sm:$0xff] }
 0x1ba   :  { %v7251_v15 = vpop.f32.mrf.mxu3 }
 0x1bb   :  { %11834 = vst [vmem:[#allocation86_spill] sm:$0xff] %v7251_v15  ;;  %v562_v39 = vmax.f32 %v447_v8, 0.0  ;;  %5644 = vmatmul.msk.f32.gmra.mxu0 %vm122_vm0, %v104_v31  ;;  %v7272_v31 = vld [vmem:[%s11586_s2] ss:$0 sm:$0xff]  ;;  %s5581_s2 = sshll.u32 %s11598_s14, 4  ;;  %s5582_s2 = int_to_ptr.hbm [resolvable:$true] %s5581_s2 }
 0x1bc   :  { %v7254_v36 = vpop.f32.mrf.mxu1 }
 0x1bd   :  { %v7256_v57 = vmin.f32 %v562_v39, 6.0  ;;  %5754 = vmatmul.msk.f32.gmra.mxu2 %vm122_vm0, %v7218_v30 }
 0x1bf   :  { %11835 = vst [vmem:[#allocation87_spill] sm:$0xff] %v7256_v57  ;;  %5692 = vmatmul.msk.f32.gmra.mxu1 %vm122_vm0, %v7256_v57  ;;  %5820 = vmatmul.msk.f32.gmra.mxu3 %vm122_vm0, %v7256_v57 }
 0x1c0   :  { %v449_v49 = vpop.f32.mrf.mxu0  ;;  %v7264_v35 = vpop.f32.mrf.mxu2 }
 0x1c1   :  { %11836 = vst [vmem:[#allocation88_spill] sm:$0xff] %v7264_v35  ;;  %v450_v8 = vadd.f32 %v7272_v31, %v449_v49 }
 0x1c2   :  { %v7275_v39 = vpop.f32.mrf.mxu3 }
 0x1c3   :  { %11837 = vst [vmem:[#allocation89_spill] sm:$0xff] %v7275_v39  ;;  %v563_v46 = vmax.f32 %v450_v8, 0.0  ;;  %5645 = vmatmul.msk.f32.gmra.mxu0 %vm122_vm0, %v105_v5  ;;  %v106_v5 = vld [vmem:[%s11584_s0 + $0x1c0] sm:$0xff] }
 0x1c4   :  { %v7278_v45 = vpop.f32.mrf.mxu1 }
 0x1c5   :  { %v7280_v15 = vmin.f32 %v563_v46, 6.0  ;;  %5755 = vmatmul.msk.f32.gmra.mxu2 %vm122_vm0, %v7237_v13 }
 0x1c7   :  { %11838 = vst [vmem:[#allocation90_spill] sm:$0xff] %v7280_v15  ;;  %5693 = vmatmul.msk.f32.gmra.mxu1 %vm122_vm0, %v7280_v15  ;;  %5821 = vmatmul.msk.f32.gmra.mxu3 %vm122_vm0, %v7280_v15 }
 0x1c8   :  { %v452_v63 = vpop.f32.mrf.mxu0  ;;  %v7288_v49 = vpop.f32.mrf.mxu2 }
 0x1c9   :  { %11839 = vst [vmem:[#allocation91_spill] sm:$0xff] %v7288_v49  ;;  %v453_v8 = vadd.f32 %v7272_v31, %v452_v63 }
 0x1ca   :  { %v7294_v46 = vpop.f32.mrf.mxu3 }
 0x1cb   :  { %11840 = vst [vmem:[#allocation92_spill] sm:$0xff] %v7294_v46  ;;  %v564_v39 = vmax.f32 %v453_v8, 0.0  ;;  %5646 = vmatmul.msk.f32.gmra.mxu0 %vm122_vm0, %v106_v5  ;;  %v107_v5 = vld [vmem:[%s11584_s0 + $0x1c8] sm:$0xff] }
 0x1cc   :  { %v7297_v28 = vpop.f32.mrf.mxu1 }
 0x1cd   :  { %v7299_v52 = vmin.f32 %v564_v39, 6.0  ;;  %5756 = vmatmul.msk.f32.gmra.mxu2 %vm122_vm0, %v7256_v57 }
 0x1cf   :  { %11841 = vst [vmem:[#allocation93_spill] sm:$0xff] %v7299_v52  ;;  %5694 = vmatmul.msk.f32.gmra.mxu1 %vm122_vm0, %v7299_v52  ;;  %5822 = vmatmul.msk.f32.gmra.mxu3 %vm122_vm0, %v7299_v52 }
 0x1d0   :  { %v455_v18 = vpop.f32.mrf.mxu0  ;;  %v7307_v63 = vpop.f32.mrf.mxu2 }
 0x1d1   :  { %11842 = vst [vmem:[#allocation94_spill] sm:$0xff] %v7307_v63  ;;  %v456_v8 = vadd.f32 %v7272_v31, %v455_v18 }
 0x1d2   :  { %v7313_v39 = vpop.f32.mrf.mxu3 }
 0x1d3   :  { %11843 = vst [vmem:[#allocation95_spill] sm:$0xff] %v7313_v39  ;;  %v565_v46 = vmax.f32 %v456_v8, 0.0  ;;  %5647 = vmatmul.msk.f32.gmra.mxu0 %vm122_vm0, %v107_v5  ;;  %v108_v5 = vld [vmem:[%s11584_s0 + $0x1d0] sm:$0xff] }
 0x1d4   :  { %v7316_v35 = vpop.f32.mrf.mxu1 }
 0x1d5   :  { %v7318_v49 = vmin.f32 %v565_v46, 6.0  ;;  %5757 = vmatmul.msk.f32.gmra.mxu2 %vm122_vm0, %v7280_v15 }
 0x1d7   :  { %11844 = vst [vmem:[#allocation96_spill] sm:$0xff] %v7318_v49  ;;  %5695 = vmatmul.msk.f32.gmra.mxu1 %vm122_vm0, %v7318_v49  ;;  %5823 = vmatmul.msk.f32.gmra.mxu3 %vm122_vm0, %v7318_v49 }
 0x1d8   :  { %v458_v63 = vpop.f32.mrf.mxu0  ;;  %v7326_v18 = vpop.f32.mrf.mxu2 }
 0x1d9   :  { %11845 = vst [vmem:[#allocation97_spill] sm:$0xff] %v7326_v18  ;;  %v459_v8 = vadd.f32 %v7272_v31, %v458_v63 }
 0x1da   :  { %v7332_v46 = vpop.f32.mrf.mxu3 }
 0x1db   :  { %11846 = vst [vmem:[#allocation98_spill] sm:$0xff] %v7332_v46  ;;  %v566_v39 = vmax.f32 %v459_v8, 0.0  ;;  %5648 = vmatmul.msk.f32.gmra.mxu0 %vm122_vm0, %v108_v5  ;;  %v109_v5 = vld [vmem:[%s11584_s0 + $0x1d8] sm:$0xff] }
 0x1dc   :  { %v7335_v54 = vpop.f32.mrf.mxu1  ;;  %v655_v46 = vld [vmem:[%s11587_s3 + $0x18] sm:$0xff] }
 0x1dd   :  { %v7337_v23 = vmin.f32 %v566_v39, 6.0  ;;  %5758 = vmatmul.msk.f32.gmra.mxu2 %vm122_vm0, %v7299_v52  ;;  %1550 = vmatpush.msrb.mxu0 %v655_v46 }
 0x1df   :  { %11847 = vst [vmem:[#allocation99_spill] sm:$0xff] %v7337_v23  ;;  %5696 = vmatmul.msk.f32.gmra.mxu1 %vm122_vm0, %v7337_v23  ;;  %5824 = vmatmul.msk.f32.gmra.mxu3 %vm122_vm0, %v7337_v23 }
 0x1e0   :  { %v461_v18 = vpop.f32.mrf.mxu0  ;;  %v7345_v63 = vpop.f32.mrf.mxu2 }
 0x1e1   :  { %11848 = vst [vmem:[#allocation100_spill] sm:$0xff] %v7345_v63  ;;  %v462_v8 = vadd.f32 %v7272_v31, %v461_v18 }
 0x1e2   :  { %v7351_v39 = vpop.f32.mrf.mxu3 }
 0x1e3   :  { %11849 = vst [vmem:[#allocation101_spill] sm:$0xff] %v7351_v39  ;;  %v567_v21 = vmax.f32 %v462_v8, 0.0  ;;  %5649 = vmatmul.msk.f32.gmra.mxu0 %vm122_vm0, %v109_v5  ;;  %v110_v5 = vld [vmem:[%s11584_s0 + $0x1e0] sm:$0xff] }
 0x1e4   :  { %v7357_v52 = vpop.f32.mrf.mxu1 }
 0x1e5   :  { %v7359_v15 = vmin.f32 %v567_v21, 6.0  ;;  %5759 = vmatmul.msk.f32.gmra.mxu2 %vm122_vm0, %v7318_v49 }
 0x1e7   :  { %11850 = vst [vmem:[#allocation102_spill] sm:$0xff] %v7359_v15  ;;  %5697 = vmatmul.msk.f32.gmra.mxu1 %vm122_vm0, %v7359_v15  ;;  %5825 = vmatmul.msk.f32.gmra.mxu3 %vm122_vm0, %v7359_v15 }
 0x1e8   :  { %v464_v18 = vpop.f32.mrf.mxu0  ;;  %v7367_v39 = vpop.f32.mrf.mxu2 }
 0x1e9   :  { %11851 = vst [vmem:[#allocation103_spill] sm:$0xff] %v7367_v39  ;;  %v465_v46 = vadd.f32 %v7272_v31, %v464_v18 }
 0x1ea   :  { %v7373_v21 = vpop.f32.mrf.mxu3 }
 0x1eb   :  { %11852 = vst [vmem:[#allocation104_spill] sm:$0xff] %v7373_v21  ;;  %v568_v8 = vmax.f32 %v465_v46, 0.0  ;;  %5650 = vmatmul.msk.f32.gmra.mxu0 %vm122_vm0, %v110_v5  ;;  %v111_v5 = vld [vmem:[%s11584_s0 + $0x1e8] sm:$0xff] }
 0x1ec   :  { %v7376_v63 = vpop.f32.mrf.mxu1 }
 0x1ed   :  { %v7378_v49 = vmin.f32 %v568_v8, 6.0  ;;  %5760 = vmatmul.msk.f32.gmra.mxu2 %vm122_vm0, %v7337_v23 }
 0x1ef   :  { %11853 = vst [vmem:[#allocation105_spill] sm:$0xff] %v7378_v49  ;;  %5698 = vmatmul.msk.f32.gmra.mxu1 %vm122_vm0, %v7378_v49  ;;  %5826 = vmatmul.msk.f32.gmra.mxu3 %vm122_vm0, %v7378_v49 }
 0x1f0   :  { %v467_v39 = vpop.f32.mrf.mxu0  ;;  %v7386_v18 = vpop.f32.mrf.mxu2 }
 0x1f1   :  { %11854 = vst [vmem:[#allocation106_spill] sm:$0xff] %v7386_v18  ;;  %v468_v46 = vadd.f32 %v7272_v31, %v467_v39 }
 0x1f2   :  { %v7392_v8 = vpop.f32.mrf.mxu3 }
 0x1f3   :  { %11855 = vst [vmem:[#allocation107_spill] sm:$0xff] %v7392_v8  ;;  %v569_v21 = vmax.f32 %v468_v46, 0.0  ;;  %5651 = vmatmul.msk.f32.gmra.mxu0 %vm122_vm0, %v111_v5  ;;  %v112_v5 = vld [vmem:[%s11584_s0 + $0x1f0] sm:$0xff] }
 0x1f4   :  { %v7395_v23 = vpop.f32.mrf.mxu1 }
 0x1f5   :  { %v7397_v57 = vmin.f32 %v569_v21, 6.0  ;;  %5761 = vmatmul.msk.f32.gmra.mxu2 %vm122_vm0, %v7359_v15 }
 0x1f7   :  { %11856 = vst [vmem:[#allocation108_spill] sm:$0xff] %v7397_v57  ;;  %5699 = vmatmul.msk.f32.gmra.mxu1 %vm122_vm0, %v7397_v57  ;;  %5827 = vmatmul.msk.f32.gmra.mxu3 %vm122_vm0, %v7397_v57 }
 0x1f8   :  { %v470_v18 = vpop.f32.mrf.mxu0  ;;  %v7405_v39 = vpop.f32.mrf.mxu2 }
 0x1f9   :  { %11857 = vst [vmem:[#allocation109_spill] sm:$0xff] %v7405_v39  ;;  %v471_v46 = vadd.f32 %v7272_v31, %v470_v18 }
 0x1fa   :  { %v7411_v21 = vpop.f32.mrf.mxu3 }
 0x1fb   :  { %11858 = vst [vmem:[#allocation110_spill] sm:$0xff] %v7411_v21  ;;  %v570_v8 = vmax.f32 %v471_v46, 0.0  ;;  %5652 = vmatmul.msk.f32.gmra.mxu0 %vm122_vm0, %v112_v5 }
 0x1fc   :  { %v7414_v15 = vpop.f32.mrf.mxu1 }
 0x1fd   :  { %v7416_v13 = vmin.f32 %v570_v8, 6.0  ;;  %5762 = vmatmul.msk.f32.gmra.mxu2 %vm122_vm0, %v7378_v49 }
 0x1ff   :  { %11859 = vst [vmem:[#allocation111_spill] sm:$0xff] %v7416_v13  ;;  %5700 = vmatmul.msk.f32.gmra.mxu1 %vm122_vm0, %v7416_v13  ;;  %5828 = vmatmul.msk.f32.gmra.mxu3 %vm122_vm0, %v7416_v13 }
 0x200   :  { %v473_v39 = vpop.f32.mrf.mxu0  ;;  %v7424_v18 = vpop.f32.mrf.mxu2 }
 0x201   :  { %11860 = vst [vmem:[#allocation112_spill] sm:$0xff] %v7424_v18  ;;  %v474_v46 = vadd.f32 %v7272_v31, %v473_v39 }
 0x202   :  { %v7427_v21 = vpop.f32.mrf.mxu3 }
 0x203   :  { %11861 = vst [vmem:[#allocation113_spill] sm:$0xff] %v7427_v21  ;;  %v571_v5 = vmax.f32 %v474_v46, 0.0  ;;  %5846 = vmatmul.msk.f32.vlgmr.msrb.gmra.mxu0 %vm122_vm0, %v6568_v40  ;;  %v656_v21 = vld [vmem:[%s11587_s3 + $0x20] sm:$0xff] }
 0x204   :  { %v7431_v8 = vpop.f32.mrf.mxu1  ;;  %1759 = vmatpush.msrb.mxu1 %v656_v21 }
 0x205   :  { %v7433_v49 = vmin.f32 %v571_v5, 6.0  ;;  %5763 = vmatmul.msk.f32.gmra.mxu2 %vm122_vm0, %v7397_v57  ;;  %v657_v5 = vld [vmem:[%s11587_s3 + $0x28] sm:$0xff] }
 0x206   :  { %1968 = vmatpush.msra.mxu2 %v657_v5 }
 0x207   :  { %11862 = vst [vmem:[#allocation114_spill] sm:$0xff] %v7433_v49  ;;  %5701 = vmatmul.msk.f32.gmra.mxu1 %vm122_vm0, %v7433_v49  ;;  %5829 = vmatmul.msk.f32.gmra.mxu3 %vm122_vm0, %v7433_v49 }
 0x208   :  { %v476_v39 = vpop.f32.mrf.mxu0  ;;  %v7441_v18 = vpop.f32.mrf.mxu2 }
 0x209   :  { %11863 = vst [vmem:[#allocation115_spill] sm:$0xff] %v7441_v18  ;;  %v477_v46 = vadd.f32 %v7272_v31, %v476_v39 }
 0x20a   :  { %v7450_v57 = vpop.f32.mrf.mxu3 }
 0x20b   :  { %11864 = vst [vmem:[#allocation116_spill] sm:$0xff] %v7450_v57  ;;  %v572_v30 = vmax.f32 %v477_v46, 0.0  ;;  %5847 = vmatmul.msk.f32.gmra.mxu0 %vm122_vm0, %v6588_v51 }
 0x20c   :  { %v7454_v3 = vpop.f32.mrf.mxu1 }
 0x20d   :  { %11865 = vst [vmem:[#allocation117_spill] sm:$0xff] %v7454_v3  ;;  %v7456_v18 = vmin.f32 %v572_v30, 6.0  ;;  %5764 = vmatmul.msk.f32.gmra.mxu2 %vm122_vm0, %v7416_v13 }
 0x20f   :  { %11866 = vst [vmem:[#allocation118_spill] sm:$0xff] %v7456_v18  ;;  %5702 = vmatmul.msk.f32.gmra.mxu1 %vm122_vm0, %v7456_v18  ;;  %5830 = vmatmul.msk.f32.gmra.mxu3 %vm122_vm0, %v7456_v18 }
 0x210   :  { %v479_v39 = vpop.f32.mrf.mxu0  ;;  %v7464_v21 = vpop.f32.mrf.mxu2 }
 0x211   :  { %11867 = vst [vmem:[#allocation119_spill] sm:$0xff] %v7464_v21  ;;  %v480_v46 = vadd.f32 %v7272_v31, %v479_v39 }
 0x212   :  { %v7467_v5 = vpop.f32.mrf.mxu3 }
 0x213   :  { %11868 = vst [vmem:[#allocation120_spill] sm:$0xff] %v7467_v5  ;;  %v573_v57 = vmax.f32 %v480_v46, 0.0  ;;  %5848 = vmatmul.msk.f32.gmra.mxu0 %vm122_vm0, %v6601_v56 }
 0x214   :  { %v7471_v30 = vpop.f32.mrf.mxu1 }
 0x215   :  { %11869 = vst [vmem:[#allocation121_spill] sm:$0xff] %v7471_v30  ;;  %v7473_v3 = vmin.f32 %v573_v57, 6.0  ;;  %5765 = vmatmul.msk.f32.gmra.mxu2 %vm122_vm0, %v7433_v49 }
 0x217   :  { %11870 = vst [vmem:[#allocation122_spill] sm:$0xff] %v7473_v3  ;;  %5703 = vmatmul.msk.f32.gmra.mxu1 %vm122_vm0, %v7473_v3  ;;  %5831 = vmatmul.msk.f32.gmra.mxu3 %vm122_vm0, %v7473_v3 }
 0x218   :  { %v482_v39 = vpop.f32.mrf.mxu0  ;;  %v7481_v21 = vpop.f32.mrf.mxu2 }
 0x219   :  { %11871 = vst [vmem:[#allocation123_spill] sm:$0xff] %v7481_v21  ;;  %v483_v46 = vadd.f32 %v7272_v31, %v482_v39 }
 0x21a   :  { %v7484_v5 = vpop.f32.mrf.mxu3 }
 0x21b   :  { %11872 = vst [vmem:[#allocation124_spill] sm:$0xff] %v7484_v5  ;;  %v574_v13 = vmax.f32 %v483_v46, 0.0  ;;  %5849 = vmatmul.msk.f32.gmra.mxu0 %vm122_vm0, %v6614_v61 }
 0x21c   :  { %v7488_v57 = vpop.f32.mrf.mxu1 }
 0x21d   :  { %11873 = vst [vmem:[#allocation125_spill] sm:$0xff] %v7488_v57  ;;  %v7490_v30 = vmin.f32 %v574_v13, 6.0  ;;  %5766 = vmatmul.msk.f32.gmra.mxu2 %vm122_vm0, %v7456_v18 }
 0x21f   :  { %11874 = vst [vmem:[#allocation126_spill] sm:$0xff] %v7490_v30  ;;  %5704 = vmatmul.msk.f32.gmra.mxu1 %vm122_vm0, %v7490_v30  ;;  %5832 = vmatmul.msk.f32.gmra.mxu3 %vm122_vm0, %v7490_v30 }
 0x220   :  { %v485_v39 = vpop.f32.mrf.mxu0  ;;  %v7498_v21 = vpop.f32.mrf.mxu2 }
 0x221   :  { %11875 = vst [vmem:[#allocation127_spill] sm:$0xff] %v7498_v21  ;;  %v486_v46 = vadd.f32 %v7272_v31, %v485_v39 }
 0x222   :  { %v7501_v5 = vpop.f32.mrf.mxu3 }
 0x223   :  { %11876 = vst [vmem:[#allocation128_spill] sm:$0xff] %v7501_v5  ;;  %v575_v49 = vmax.f32 %v486_v46, 0.0  ;;  %5850 = vmatmul.msk.f32.gmra.mxu0 %vm122_vm0, %v6627_v2 }
 0x224   :  { %v7505_v13 = vpop.f32.mrf.mxu1 }
 0x225   :  { %11877 = vst [vmem:[#allocation129_spill] sm:$0xff] %v7505_v13  ;;  %v7507_v57 = vmin.f32 %v575_v49, 6.0  ;;  %5767 = vmatmul.msk.f32.gmra.mxu2 %vm122_vm0, %v7473_v3 }
 0x227   :  { %11878 = vst [vmem:[#allocation130_spill] sm:$0xff] %v7507_v57  ;;  %5705 = vmatmul.msk.f32.gmra.mxu1 %vm122_vm0, %v7507_v57  ;;  %5833 = vmatmul.msk.f32.gmra.mxu3 %vm122_vm0, %v7507_v57 }
 0x228   :  { %v488_v39 = vpop.f32.mrf.mxu0  ;;  %v7515_v21 = vpop.f32.mrf.mxu2 }
 0x229   :  { %11879 = vst [vmem:[#allocation131_spill] sm:$0xff] %v7515_v21  ;;  %v489_v46 = vadd.f32 %v7272_v31, %v488_v39 }
 0x22a   :  { %v7518_v5 = vpop.f32.mrf.mxu3 }
 0x22b   :  { %11880 = vst [vmem:[#allocation132_spill] sm:$0xff] %v7518_v5  ;;  %v576_v18 = vmax.f32 %v489_v46, 0.0  ;;  %5851 = vmatmul.msk.f32.gmra.mxu0 %vm122_vm0, %v6640_v7 }
 0x22c   :  { %v7522_v49 = vpop.f32.mrf.mxu1 }
 0x22d   :  { %11881 = vst [vmem:[#allocation133_spill] sm:$0xff] %v7522_v49  ;;  %v7524_v13 = vmin.f32 %v576_v18, 6.0  ;;  %5768 = vmatmul.msk.f32.gmra.mxu2 %vm122_vm0, %v7490_v30 }
 0x22f   :  { %11882 = vst [vmem:[#allocation134_spill] sm:$0xff] %v7524_v13  ;;  %5706 = vmatmul.msk.f32.gmra.mxu1 %vm122_vm0, %v7524_v13  ;;  %5834 = vmatmul.msk.f32.gmra.mxu3 %vm122_vm0, %v7524_v13 }
 0x230   :  { %v491_v39 = vpop.f32.mrf.mxu0  ;;  %v7532_v21 = vpop.f32.mrf.mxu2 }
 0x231   :  { %11883 = vst [vmem:[#allocation135_spill] sm:$0xff] %v7532_v21  ;;  %v492_v46 = vadd.f32 %v7272_v31, %v491_v39 }
 0x232   :  { %v7535_v5 = vpop.f32.mrf.mxu3 }
 0x233   :  { %11884 = vst [vmem:[#allocation136_spill] sm:$0xff] %v7535_v5  ;;  %v577_v3 = vmax.f32 %v492_v46, 0.0  ;;  %5852 = vmatmul.msk.f32.gmra.mxu0 %vm122_vm0, %v6653_v12 }
 0x234   :  { %v7539_v18 = vpop.f32.mrf.mxu1 }
 0x235   :  { %11885 = vst [vmem:[#allocation137_spill] sm:$0xff] %v7539_v18  ;;  %v7541_v49 = vmin.f32 %v577_v3, 6.0  ;;  %5769 = vmatmul.msk.f32.gmra.mxu2 %vm122_vm0, %v7507_v57 }
 0x237   :  { %11886 = vst [vmem:[#allocation138_spill] sm:$0xff] %v7541_v49  ;;  %5707 = vmatmul.msk.f32.gmra.mxu1 %vm122_vm0, %v7541_v49  ;;  %5835 = vmatmul.msk.f32.gmra.mxu3 %vm122_vm0, %v7541_v49 }
 0x238   :  { %v494_v39 = vpop.f32.mrf.mxu0  ;;  %v7549_v21 = vpop.f32.mrf.mxu2 }
 0x239   :  { %11887 = vst [vmem:[#allocation139_spill] sm:$0xff] %v7549_v21  ;;  %v495_v46 = vadd.f32 %v7272_v31, %v494_v39 }
 0x23a   :  { %v7552_v5 = vpop.f32.mrf.mxu3 }
 0x23b   :  { %11888 = vst [vmem:[#allocation140_spill] sm:$0xff] %v7552_v5  ;;  %v578_v30 = vmax.f32 %v495_v46, 0.0  ;;  %5853 = vmatmul.msk.f32.gmra.mxu0 %vm122_vm0, %v6666_v17 }
 0x23c   :  { %v7556_v3 = vpop.f32.mrf.mxu1 }
 0x23d   :  { %11889 = vst [vmem:[#allocation141_spill] sm:$0xff] %v7556_v3  ;;  %v7558_v18 = vmin.f32 %v578_v30, 6.0  ;;  %5770 = vmatmul.msk.f32.gmra.mxu2 %vm122_vm0, %v7524_v13 }
 0x23f   :  { %11890 = vst [vmem:[#allocation142_spill] sm:$0xff] %v7558_v18  ;;  %5708 = vmatmul.msk.f32.gmra.mxu1 %vm122_vm0, %v7558_v18  ;;  %5836 = vmatmul.msk.f32.gmra.mxu3 %vm122_vm0, %v7558_v18 }
 0x240   :  { %v497_v39 = vpop.f32.mrf.mxu0  ;;  %v7566_v21 = vpop.f32.mrf.mxu2 }
 0x241   :  { %11891 = vst [vmem:[#allocation143_spill] sm:$0xff] %v7566_v21  ;;  %v498_v46 = vadd.f32 %v7272_v31, %v497_v39 }
 0x242   :  { %v7569_v5 = vpop.f32.mrf.mxu3 }
 0x243   :  { %11892 = vst [vmem:[#allocation144_spill] sm:$0xff] %v7569_v5  ;;  %v579_v57 = vmax.f32 %v498_v46, 0.0  ;;  %5854 = vmatmul.msk.f32.gmra.mxu0 %vm122_vm0, %v6679_v22 }
 0x244   :  { %v7573_v30 = vpop.f32.mrf.mxu1 }
 0x245   :  { %11893 = vst [vmem:[#allocation145_spill] sm:$0xff] %v7573_v30  ;;  %v7575_v3 = vmin.f32 %v579_v57, 6.0  ;;  %5771 = vmatmul.msk.f32.gmra.mxu2 %vm122_vm0, %v7541_v49 }
 0x247   :  { %11894 = vst [vmem:[#allocation146_spill] sm:$0xff] %v7575_v3  ;;  %5709 = vmatmul.msk.f32.gmra.mxu1 %vm122_vm0, %v7575_v3  ;;  %5837 = vmatmul.msk.f32.gmra.mxu3 %vm122_vm0, %v7575_v3 }
 0x248   :  { %v500_v39 = vpop.f32.mrf.mxu0  ;;  %v7583_v21 = vpop.f32.mrf.mxu2 }
 0x249   :  { %11895 = vst [vmem:[#allocation147_spill] sm:$0xff] %v7583_v21  ;;  %v501_v46 = vadd.f32 %v7272_v31, %v500_v39 }
 0x24a   :  { %v7586_v5 = vpop.f32.mrf.mxu3 }
 0x24b   :  { %11896 = vst [vmem:[#allocation148_spill] sm:$0xff] %v7586_v5  ;;  %v580_v13 = vmax.f32 %v501_v46, 0.0  ;;  %5855 = vmatmul.msk.f32.gmra.mxu0 %vm122_vm0, %v6692_v27 }
 0x24c   :  { %v7590_v57 = vpop.f32.mrf.mxu1 }
 0x24d   :  { %11897 = vst [vmem:[#allocation149_spill] sm:$0xff] %v7590_v57  ;;  %v7592_v30 = vmin.f32 %v580_v13, 6.0  ;;  %5772 = vmatmul.msk.f32.gmra.mxu2 %vm122_vm0, %v7558_v18 }
 0x24f   :  { %11898 = vst [vmem:[#allocation150_spill] sm:$0xff] %v7592_v30  ;;  %5710 = vmatmul.msk.f32.gmra.mxu1 %vm122_vm0, %v7592_v30  ;;  %5838 = vmatmul.msk.f32.gmra.mxu3 %vm122_vm0, %v7592_v30 }
 0x250   :  { %v503_v39 = vpop.f32.mrf.mxu0  ;;  %v7600_v21 = vpop.f32.mrf.mxu2 }
 0x251   :  { %11899 = vst [vmem:[#allocation151_spill] sm:$0xff] %v7600_v21  ;;  %v504_v46 = vadd.f32 %v7272_v31, %v503_v39 }
 0x252   :  { %v7603_v5 = vpop.f32.mrf.mxu3 }
 0x253   :  { %11900 = vst [vmem:[#allocation152_spill] sm:$0xff] %v7603_v5  ;;  %v581_v49 = vmax.f32 %v504_v46, 0.0  ;;  %5856 = vmatmul.msk.f32.gmra.mxu0 %vm122_vm0, %v6705_v32 }
 0x254   :  { %v7607_v13 = vpop.f32.mrf.mxu1 }
 0x255   :  { %11901 = vst [vmem:[#allocation153_spill] sm:$0xff] %v7607_v13  ;;  %v7609_v57 = vmin.f32 %v581_v49, 6.0  ;;  %5773 = vmatmul.msk.f32.gmra.mxu2 %vm122_vm0, %v7575_v3 }
 0x257   :  { %11902 = vst [vmem:[#allocation154_spill] sm:$0xff] %v7609_v57  ;;  %5711 = vmatmul.msk.f32.gmra.mxu1 %vm122_vm0, %v7609_v57  ;;  %5839 = vmatmul.msk.f32.gmra.mxu3 %vm122_vm0, %v7609_v57 }
 0x258   :  { %v506_v39 = vpop.f32.mrf.mxu0  ;;  %v7617_v21 = vpop.f32.mrf.mxu2 }
 0x259   :  { %11903 = vst [vmem:[#allocation155_spill] sm:$0xff] %v7617_v21  ;;  %v507_v46 = vadd.f32 %v7272_v31, %v506_v39 }
 0x25a   :  { %v7620_v5 = vpop.f32.mrf.mxu3 }
 0x25b   :  { %11904 = vst [vmem:[#allocation156_spill] sm:$0xff] %v7620_v5  ;;  %v582_v18 = vmax.f32 %v507_v46, 0.0  ;;  %5857 = vmatmul.msk.f32.gmra.mxu0 %vm122_vm0, %v6718_v38 }
 0x25c   :  { %v7624_v49 = vpop.f32.mrf.mxu1 }
 0x25d   :  { %11905 = vst [vmem:[#allocation157_spill] sm:$0xff] %v7624_v49  ;;  %v7626_v13 = vmin.f32 %v582_v18, 6.0  ;;  %5774 = vmatmul.msk.f32.gmra.mxu2 %vm122_vm0, %v7592_v30 }
 0x25f   :  { %11906 = vst [vmem:[#allocation158_spill] sm:$0xff] %v7626_v13  ;;  %5712 = vmatmul.msk.f32.gmra.mxu1 %vm122_vm0, %v7626_v13  ;;  %5840 = vmatmul.msk.f32.gmra.mxu3 %vm122_vm0, %v7626_v13 }
 0x260   :  { %v509_v39 = vpop.f32.mrf.mxu0  ;;  %v7634_v21 = vpop.f32.mrf.mxu2 }
 0x261   :  { %11907 = vst [vmem:[#allocation159_spill] sm:$0xff] %v7634_v21  ;;  %v510_v46 = vadd.f32 %v7272_v31, %v509_v39 }
 0x262   :  { %v7637_v5 = vpop.f32.mrf.mxu3 }
 0x263   :  { %11908 = vst [vmem:[#allocation160_spill] sm:$0xff] %v7637_v5  ;;  %v583_v3 = vmax.f32 %v510_v46, 0.0  ;;  %5858 = vmatmul.msk.f32.gmra.mxu0 %vm122_vm0, %v6731_v44 }
 0x264   :  { %v7641_v18 = vpop.f32.mrf.mxu1 }
 0x265   :  { %11909 = vst [vmem:[#allocation161_spill] sm:$0xff] %v7641_v18  ;;  %v7643_v49 = vmin.f32 %v583_v3, 6.0  ;;  %5775 = vmatmul.msk.f32.gmra.mxu2 %vm122_vm0, %v7609_v57 }
 0x267   :  { %11910 = vst [vmem:[#allocation162_spill] sm:$0xff] %v7643_v49  ;;  %5713 = vmatmul.msk.f32.gmra.mxu1 %vm122_vm0, %v7643_v49  ;;  %5841 = vmatmul.msk.f32.gmra.mxu3 %vm122_vm0, %v7643_v49 }
 0x268   :  { %v512_v39 = vpop.f32.mrf.mxu0  ;;  %v7651_v21 = vpop.f32.mrf.mxu2 }
 0x269   :  { %11911 = vst [vmem:[#allocation163_spill] sm:$0xff] %v7651_v21  ;;  %v513_v46 = vadd.f32 %v7272_v31, %v512_v39 }
 0x26a   :  { %v7654_v5 = vpop.f32.mrf.mxu3 }
 0x26b   :  { %11912 = vst [vmem:[#allocation164_spill] sm:$0xff] %v7654_v5  ;;  %v584_v30 = vmax.f32 %v513_v46, 0.0  ;;  %5859 = vmatmul.msk.f32.gmra.mxu0 %vm122_vm0, %v6744_v50  ;;  %v689_v5 = vld [vmem:[%s11587_s3 + $0x128] sm:$0xff] }
 0x26c   :  { %v7658_v3 = vpop.f32.mrf.mxu1  ;;  %2383 = vmatpush.msra.mxu0 %v689_v5 }
 0x26d   :  { %11913 = vst [vmem:[#allocation165_spill] sm:$0xff] %v7658_v3  ;;  %v7660_v18 = vmin.f32 %v584_v30, 6.0  ;;  %5776 = vmatmul.msk.f32.gmra.mxu2 %vm122_vm0, %v7626_v13 }
 0x26f   :  { %11914 = vst [vmem:[#allocation166_spill] sm:$0xff] %v7660_v18  ;;  %5714 = vmatmul.msk.f32.gmra.mxu1 %vm122_vm0, %v7660_v18  ;;  %5842 = vmatmul.msk.f32.gmra.mxu3 %vm122_vm0, %v7660_v18 }
 0x270   :  { %v515_v39 = vpop.f32.mrf.mxu0  ;;  %v7668_v21 = vpop.f32.mrf.mxu2 }
 0x271   :  { %11915 = vst [vmem:[#allocation167_spill] sm:$0xff] %v7668_v21  ;;  %v516_v46 = vadd.f32 %v7272_v31, %v515_v39 }
 0x272   :  { %v7674_v30 = vpop.f32.mrf.mxu3 }
 0x273   :  { %11916 = vst [vmem:[#allocation168_spill] sm:$0xff] %v7674_v30  ;;  %v585_v3 = vmax.f32 %v516_v46, 0.0  ;;  %5860 = vmatmul.msk.f32.gmra.mxu0 %vm122_vm0, %v6760_v58 }
 0x274   :  { %v7678_v13 = vpop.f32.mrf.mxu1 }
 0x275   :  { %11917 = vst [vmem:[#allocation169_spill] sm:$0xff] %v7678_v13  ;;  %v7680_v57 = vmin.f32 %v585_v3, 6.0  ;;  %5777 = vmatmul.msk.f32.gmra.mxu2 %vm122_vm0, %v7643_v49 }
 0x277   :  { %11918 = vst [vmem:[#allocation170_spill] sm:$0xff] %v7680_v57  ;;  %5715 = vmatmul.msk.f32.gmra.mxu1 %vm122_vm0, %v7680_v57  ;;  %5843 = vmatmul.msk.f32.gmra.mxu3 %vm122_vm0, %v7680_v57 }
 0x278   :  { %v518_v39 = vpop.f32.mrf.mxu0  ;;  %v7688_v30 = vpop.f32.mrf.mxu2 }
 0x279   :  { %11919 = vst [vmem:[#allocation171_spill] sm:$0xff] %v7688_v30  ;;  %v519_v5 = vadd.f32 %v7272_v31, %v518_v39 }
 0x27a   :  { %v7691_v46 = vpop.f32.mrf.mxu3 }
 0x27b   :  { %11920 = vst [vmem:[#allocation172_spill] sm:$0xff] %v7691_v46  ;;  %v586_v21 = vmax.f32 %v519_v5, 0.0  ;;  %5861 = vmatmul.msk.f32.gmra.mxu0 %vm122_vm0, %v6773_v0  ;;  %v1019_v46 = vadd.f32 %v7431_v8, %v7083_v60  ;;  %v691_v8 = vld [vmem:[%s11587_s3 + $0x138] sm:$0xff] }
 0x27c   :  { %v7695_v3 = vpop.f32.mrf.mxu1  ;;  %2801 = vmatpush.msrb.mxu2 %v691_v8 }
 0x27d   :  { %11921 = vst [vmem:[#allocation173_spill] sm:$0xff] %v7695_v3  ;;  %v7697_v13 = vmin.f32 %v586_v21, 6.0  ;;  %5778 = vmatmul.msk.f32.gmra.mxu2 %vm122_vm0, %v7660_v18  ;;  %v1013_v3 = vadd.f32 %v7395_v23, %v7083_v60  ;;  %v1007_v23 = vadd.f32 %v7357_v52, %v7083_v60  ;;  %v1001_v52 = vadd.f32 %v7316_v35, %v7083_v60 }
 0x27e   :  { %v995_v35 = vadd.f32 %v7278_v45, %v7083_v60  ;;  %v989_v45 = vadd.f32 %v7235_v33, %v7083_v60  ;;  %v983_v33 = vadd.f32 %v7197_v10, %v7083_v60  ;;  %v977_v10 = vadd.f32 %v7147_v4, %v7083_v60 }
 0x27f   :  { %11922 = vst [vmem:[#allocation174_spill] sm:$0xff] %v7697_v13  ;;  %5716 = vmatmul.msk.f32.gmra.mxu1 %vm122_vm0, %v7697_v13  ;;  %5844 = vmatmul.msk.f32.gmra.mxu3 %vm122_vm0, %v7697_v13 }
 0x280   :  { %v7705_v31 = vpop.f32.mrf.mxu2  ;;  %v7707_v39 = vpop.f32.mrf.mxu0  ;;  %v3168_v4 = vmax.f32 %v977_v10, 0.0 }
 0x281   :  { %11923 = vst [vmem:[#allocation175_spill] sm:$0xff] %v7705_v31  ;;  %v690_v31 = vld [vmem:[%s11587_s3 + $0x130] sm:$0xff] }
 0x282   :  { %11924 = vst [vmem:[#allocation176_spill] sm:$0xff] %v7707_v39  ;;  %v7709_v5 = vpop.f32.mrf.mxu3  ;;  %v1016_v39 = vadd.f32 %v7414_v15, %v7083_v60  ;;  %2592 = vmatpush.msra.mxu1 %v690_v31  ;;  %v1010_v15 = vadd.f32 %v7376_v63, %v7083_v60  ;;  %v1004_v63 = vadd.f32 %v7335_v54, %v7083_v60 }
 0x283   :  { %11925 = vst [vmem:[#allocation177_spill] sm:$0xff] %v7709_v5  ;;  %5862 = vmatmul.msk.f32.gmra.mxu0 %vm122_vm0, %v6791_v9  ;;  %v998_v54 = vadd.f32 %v7297_v28, %v7083_v60  ;;  %v992_v28 = vadd.f32 %v7254_v36, %v7083_v60  ;;  %v986_v36 = vadd.f32 %v7216_v20, %v7083_v60 }
 0x284   :  { %v7713_v21 = vpop.f32.mrf.mxu1  ;;  %v3278_v31 = vmax.f32 %v1010_v15, 0.0  ;;  %v980_v20 = vadd.f32 %v7174_v55, %v7083_v60  ;;  %v974_v55 = vadd.f32 %v7117_v16, %v7083_v60  ;;  %v12028_v60 = vld [vmem:[#allocation105_spill] sm:$0xff] }
 0x285   :  { %11926 = vst [vmem:[#allocation178_spill] sm:$0xff] %v7713_v21  ;;  %5779 = vmatmul.msk.f32.gmra.mxu2 %vm122_vm0, %v7680_v57  ;;  %v3308_v21 = vmax.f32 %v1019_v46, 0.0  ;;  %v3288_v46 = vmax.f32 %v1013_v3, 0.0  ;;  %v3268_v3 = vmax.f32 %v1007_v23, 0.0  ;;  %v3248_v23 = vmax.f32 %v1001_v52, 0.0 }
 0x286   :  { %v3228_v52 = vmax.f32 %v995_v35, 0.0  ;;  %v3208_v35 = vmax.f32 %v989_v45, 0.0  ;;  %v3188_v45 = vmax.f32 %v983_v33, 0.0 }
 0x287   :  { %5845 = vmatmul.msk.f32.gmra.mxu3 %vm122_vm0, %v6582_v48  ;;  %5910 = vmatmul.msk.f32.vlgmr.msrb.gmra.mxu1 %vm122_vm0, %v6568_v40  ;;  %v3948_v18 = vmin.f32 %v3308_v21, 6.0  ;;  %v3928_v21 = vmin.f32 %v3288_v46, 6.0  ;;  %v3908_v46 = vmin.f32 %v3268_v3, 6.0  ;;  %v3888_v3 = vmin.f32 %v3248_v23, 6.0 }
 0x288   :  { %v7725_v5 = vpop.f32.mrf.mxu2  ;;  %v7727_v30 = vpop.f32.mrf.mxu0  ;;  %v3868_v23 = vmin.f32 %v3228_v52, 6.0  ;;  %v3848_v52 = vmin.f32 %v3208_v35, 6.0  ;;  %v3828_v33 = vmin.f32 %v3188_v45, 6.0  ;;  %v3158_v35 = vmax.f32 %v974_v55, 0.0 }
 0x289   :  { %11927 = vst [vmem:[#allocation179_spill] sm:$0xff] %v7725_v5 }
 0x28a   :  { %11928 = vst [vmem:[#allocation180_spill] sm:$0xff] %v7727_v30  ;;  %v7737_v57 = vpop.f32.mrf.mxu3  ;;  %v3298_v30 = vmax.f32 %v1016_v39, 0.0  ;;  %v3798_v10 = vmin.f32 %v3158_v35, 6.0 }
 0x28b   :  { %11929 = vst [vmem:[#allocation181_spill] sm:$0xff] %v7737_v57  ;;  %5863 = vmatmul.msk.f32.gmra.mxu0 %vm122_vm0, %v6811_v19 }
 0x28c   :  { %v7743_v5 = vpop.f32.mrf.mxu1  ;;  %v3938_v39 = vmin.f32 %v3298_v30, 6.0  ;;  %v3258_v30 = vmax.f32 %v1004_v63, 0.0  ;;  %v3238_v63 = vmax.f32 %v998_v54, 0.0  ;;  %v3218_v54 = vmax.f32 %v992_v28, 0.0 }
 0x28d   :  { %11930 = vst [vmem:[#allocation182_spill] sm:$0xff] %v7743_v5  ;;  %5780 = vmatmul.msk.f32.gmra.mxu2 %vm122_vm0, %v7697_v13  ;;  %v3198_v28 = vmax.f32 %v986_v36, 0.0  ;;  %v3178_v36 = vmax.f32 %v980_v20, 0.0 }
 0x28f   :  { %5911 = vmatmul.msk.f32.gmra.mxu1 %vm122_vm0, %v6588_v51  ;;  %6038 = vmatmul.msk.f32.vlgmr.msra.gmra.mxu3 %vm122_vm0, %v6568_v40 }
 0x290   :  { %4302 = vmatpush.msra.mxu3 %v3948_v18  ;;  %v7755_v8 = vpop.f32.mrf.mxu2  ;;  %v7757_v57 = vpop.f32.mrf.mxu0  ;;  %v3918_v18 = vmin.f32 %v3278_v31, 6.0  ;;  %v3898_v31 = vmin.f32 %v3258_v30, 6.0  ;;  %v3878_v30 = vmin.f32 %v3238_v63, 6.0  ;;  %v3858_v63 = vmin.f32 %v3218_v54, 6.0 }
 0x291   :  { %11931 = vst [vmem:[#allocation183_spill] sm:$0xff] %v7755_v8  ;;  %v3838_v54 = vmin.f32 %v3198_v28, 6.0  ;;  %v3808_v28 = vmin.f32 %v3168_v4, 6.0 }
 0x292   :  { %11932 = vst [vmem:[#allocation184_spill] sm:$0xff] %v7757_v57  ;;  %4303 = vmatpush.msra.mxu3 %v3938_v39  ;;  %v7761_v5 = vpop.f32.mrf.mxu3 }
 0x293   :  { %11933 = vst [vmem:[#allocation185_spill] sm:$0xff] %v7761_v5  ;;  %5864 = vmatmul.msk.f32.gmra.mxu0 %vm122_vm0, %v6830_v29 }
 0x294   :  { %4304 = vmatpush.msra.mxu3 %v3928_v21  ;;  %v7767_v15 = vpop.f32.mrf.mxu1 }
 0x295   :  { %11934 = vst [vmem:[#allocation186_spill] sm:$0xff] %v7767_v15  ;;  %5781 = vmatmul.msk.f32.gmra.mxu2 %vm122_vm0, %v6582_v48 }
 0x296   :  { %4305 = vmatpush.msra.mxu3 %v3918_v18 }
 0x297   :  { %5912 = vmatmul.msk.f32.gmra.mxu1 %vm122_vm0, %v6601_v56  ;;  %6039 = vmatmul.msk.f32.gmra.mxu3 %vm122_vm0, %v6588_v51 }
 0x298   :  { %4306 = vmatpush.msra.mxu3 %v3908_v46  ;;  %v7779_v39 = vpop.f32.mrf.mxu2  ;;  %v7781_v21 = vpop.f32.mrf.mxu0 }
 0x299   :  { %11935 = vst [vmem:[#allocation187_spill] sm:$0xff] %v7779_v39 }
 0x29a   :  { %11936 = vst [vmem:[#allocation188_spill] sm:$0xff] %v7781_v21  ;;  %4307 = vmatpush.msra.mxu3 %v3898_v31  ;;  %v7785_v18 = vpop.f32.mrf.mxu3 }
 0x29b   :  { %11937 = vst [vmem:[#allocation189_spill] sm:$0xff] %v7785_v18  ;;  %5865 = vmatmul.msk.f32.gmra.mxu0 %vm122_vm0, %v6849_v41 }
 0x29c   :  { %4308 = vmatpush.msra.mxu3 %v3888_v3  ;;  %v7791_v46 = vpop.f32.mrf.mxu1 }
 0x29d   :  { %11938 = vst [vmem:[#allocation190_spill] sm:$0xff] %v7791_v46  ;;  %5974 = vmatmul.msk.f32.vlgmr.msra.gmra.mxu2 %vm122_vm0, %v6568_v40 }
 0x29e   :  { %4309 = vmatpush.msra.mxu3 %v3878_v30 }
 0x29f   :  { %5913 = vmatmul.msk.f32.gmra.mxu1 %vm122_vm0, %v6614_v61  ;;  %6040 = vmatmul.msk.f32.gmra.mxu3 %vm122_vm0, %v6601_v56 }
 0x2a0   :  { %4310 = vmatpush.msra.mxu3 %v3868_v23  ;;  %v7803_v31 = vpop.f32.mrf.mxu2  ;;  %v7805_v3 = vpop.f32.mrf.mxu0 }
 0x2a1   :  { %11939 = vst [vmem:[#allocation191_spill] sm:$0xff] %v7803_v31 }
 0x2a2   :  { %11940 = vst [vmem:[#allocation192_spill] sm:$0xff] %v7805_v3  ;;  %4311 = vmatpush.msra.mxu3 %v3858_v63  ;;  %v7809_v30 = vpop.f32.mrf.mxu3  ;;  %v3818_v63 = vmin.f32 %v3178_v36, 6.0 }
 0x2a3   :  { %11941 = vst [vmem:[#allocation193_spill] sm:$0xff] %v7809_v30  ;;  %5866 = vmatmul.msk.f32.gmra.mxu0 %vm122_vm0, %v6868_v53 }
 0x2a4   :  { %4312 = vmatpush.msra.mxu3 %v3848_v52  ;;  %v7815_v23 = vpop.f32.mrf.mxu1 }
 0x2a5   :  { %11942 = vst [vmem:[#allocation194_spill] sm:$0xff] %v7815_v23  ;;  %5975 = vmatmul.msk.f32.gmra.mxu2 %vm122_vm0, %v6588_v51 }
 0x2a6   :  { %4313 = vmatpush.msra.mxu3 %v3838_v54 }
 0x2a7   :  { %5914 = vmatmul.msk.f32.gmra.mxu1 %vm122_vm0, %v6627_v2  ;;  %6041 = vmatmul.msk.f32.gmra.mxu3 %vm122_vm0, %v6614_v61 }
 0x2a8   :  { %4314 = vmatpush.msra.mxu3 %v3828_v33  ;;  %v7823_v16 = vpop.f32.mrf.mxu2  ;;  %v7825_v20 = vpop.f32.mrf.mxu0 }
 0x2a9   :  { %11943 = vst [vmem:[#allocation195_spill] sm:$0xff] %v7823_v16 }
 0x2aa   :  { %11944 = vst [vmem:[#allocation196_spill] sm:$0xff] %v7825_v20  ;;  %4315 = vmatpush.msra.mxu3 %v3818_v63  ;;  %v7827_v52 = vpop.f32.mrf.mxu3 }
 0x2ab   :  { %11945 = vst [vmem:[#allocation197_spill] sm:$0xff] %v7827_v52  ;;  %5867 = vmatmul.msk.f32.gmra.mxu0 %vm122_vm0, %v6887_v1 }
 0x2ac   :  { %4316 = vmatpush.msra.mxu3 %v3808_v28  ;;  %v7831_v45 = vpop.f32.mrf.mxu1 }
 0x2ad   :  { %11946 = vst [vmem:[#allocation198_spill] sm:$0xff] %v7831_v45  ;;  %5976 = vmatmul.msk.f32.gmra.mxu2 %vm122_vm0, %v6601_v56 }
 0x2ae   :  { %4317 = vmatpush.msra.mxu3 %v3798_v10 }
 0x2af   :  { %5915 = vmatmul.msk.f32.gmra.mxu1 %vm122_vm0, %v6640_v7  ;;  %6042 = vmatmul.msk.f32.gmra.mxu3 %vm122_vm0, %v6627_v2 }
 0x2b0   :  { %v7839_v55 = vpop.f32.mrf.mxu2  ;;  %v7841_v36 = vpop.f32.mrf.mxu0 }
 0x2b1   :  { %11947 = vst [vmem:[#allocation199_spill] sm:$0xff] %v7839_v55 }
 0x2b2   :  { %11948 = vst [vmem:[#allocation200_spill] sm:$0xff] %v7841_v36  ;;  %v7843_v54 = vpop.f32.mrf.mxu3 }
 0x2b3   :  { %11949 = vst [vmem:[#allocation201_spill] sm:$0xff] %v7843_v54  ;;  %5868 = vmatmul.msk.f32.gmra.mxu0 %vm122_vm0, %v6906_v14 }
 0x2b4   :  { %v7847_v4 = vpop.f32.mrf.mxu1 }
 0x2b5   :  { %11950 = vst [vmem:[#allocation202_spill] sm:$0xff] %v7847_v4  ;;  %5977 = vmatmul.msk.f32.gmra.mxu2 %vm122_vm0, %v6614_v61 }
 0x2b7   :  { %5916 = vmatmul.msk.f32.gmra.mxu1 %vm122_vm0, %v6653_v12  ;;  %6043 = vmatmul.msk.f32.gmra.mxu3 %vm122_vm0, %v6640_v7 }
 0x2b8   :  { %v7855_v33 = vpop.f32.mrf.mxu2  ;;  %v7857_v35 = vpop.f32.mrf.mxu0 }
 0x2b9   :  { %11951 = vst [vmem:[#allocation203_spill] sm:$0xff] %v7855_v33 }
 0x2ba   :  { %11952 = vst [vmem:[#allocation204_spill] sm:$0xff] %v7857_v35  ;;  %v7859_v63 = vpop.f32.mrf.mxu3 }
 0x2bb   :  { %11953 = vst [vmem:[#allocation205_spill] sm:$0xff] %v7859_v63  ;;  %5869 = vmatmul.msk.f32.gmra.mxu0 %vm122_vm0, %v6925_v34 }
 0x2bc   :  { %v7863_v28 = vpop.f32.mrf.mxu1 }
 0x2bd   :  { %11954 = vst [vmem:[#allocation206_spill] sm:$0xff] %v7863_v28  ;;  %5978 = vmatmul.msk.f32.gmra.mxu2 %vm122_vm0, %v6627_v2 }
 0x2bf   :  { %5917 = vmatmul.msk.f32.gmra.mxu1 %vm122_vm0, %v6666_v17  ;;  %6044 = vmatmul.msk.f32.gmra.mxu3 %vm122_vm0, %v6653_v12 }
 0x2c0   :  { %v7871_v10 = vpop.f32.mrf.mxu2  ;;  %v7873_v57 = vpop.f32.mrf.mxu0 }
 0x2c1   :  { %11955 = vst [vmem:[#allocation207_spill] sm:$0xff] %v7871_v10 }
 0x2c2   :  { %11956 = vst [vmem:[#allocation208_spill] sm:$0xff] %v7873_v57  ;;  %v7875_v21 = vpop.f32.mrf.mxu3 }
 0x2c3   :  { %11957 = vst [vmem:[#allocation209_spill] sm:$0xff] %v7875_v21  ;;  %5870 = vmatmul.msk.f32.gmra.mxu0 %vm122_vm0, %v6944_v59 }
 0x2c4   :  { %v7879_v3 = vpop.f32.mrf.mxu1 }
 0x2c5   :  { %11958 = vst [vmem:[#allocation210_spill] sm:$0xff] %v7879_v3  ;;  %5979 = vmatmul.msk.f32.gmra.mxu2 %vm122_vm0, %v6640_v7 }
 0x2c7   :  { %5918 = vmatmul.msk.f32.gmra.mxu1 %vm122_vm0, %v6679_v22  ;;  %6045 = vmatmul.msk.f32.gmra.mxu3 %vm122_vm0, %v6666_v17 }
 0x2c8   :  { %v7887_v20 = vpop.f32.mrf.mxu2  ;;  %v7889_v36 = vpop.f32.mrf.mxu0 }
 0x2c9   :  { %11959 = vst [vmem:[#allocation211_spill] sm:$0xff] %v7887_v20 }
 0x2ca   :  { %11960 = vst [vmem:[#allocation212_spill] sm:$0xff] %v7889_v36  ;;  %v7891_v35 = vpop.f32.mrf.mxu3 }
 0x2cb   :  { %11961 = vst [vmem:[#allocation213_spill] sm:$0xff] %v7891_v35  ;;  %5871 = vmatmul.msk.f32.gmra.mxu0 %vm122_vm0, %v6963_v24 }
 0x2cc   :  { %v7895_v57 = vpop.f32.mrf.mxu1 }
 0x2cd   :  { %11962 = vst [vmem:[#allocation214_spill] sm:$0xff] %v7895_v57  ;;  %5980 = vmatmul.msk.f32.gmra.mxu2 %vm122_vm0, %v6653_v12 }
 0x2cf   :  { %5919 = vmatmul.msk.f32.gmra.mxu1 %vm122_vm0, %v6692_v27  ;;  %6046 = vmatmul.msk.f32.gmra.mxu3 %vm122_vm0, %v6679_v22 }
 0x2d0   :  { %v7903_v5 = vpop.f32.mrf.mxu2  ;;  %v7905_v18 = vpop.f32.mrf.mxu0 }
 0x2d1   :  { %11963 = vst [vmem:[#allocation215_spill] sm:$0xff] %v7903_v5 }
 0x2d2   :  { %11964 = vst [vmem:[#allocation216_spill] sm:$0xff] %v7905_v18  ;;  %v7907_v36 = vpop.f32.mrf.mxu3 }
 0x2d3   :  { %11965 = vst [vmem:[#allocation217_spill] sm:$0xff] %v7907_v36  ;;  %5872 = vmatmul.msk.f32.gmra.mxu0 %vm122_vm0, %v6982_v6 }
 0x2d4   :  { %v7911_v30 = vpop.f32.mrf.mxu1 }
 0x2d5   :  { %11966 = vst [vmem:[#allocation218_spill] sm:$0xff] %v7911_v30  ;;  %5981 = vmatmul.msk.f32.gmra.mxu2 %vm122_vm0, %v6666_v17 }
 0x2d7   :  { %5920 = vmatmul.msk.f32.gmra.mxu1 %vm122_vm0, %v6705_v32  ;;  %6047 = vmatmul.msk.f32.gmra.mxu3 %vm122_vm0, %v6692_v27 }
 0x2d8   :  { %v7919_v52 = vpop.f32.mrf.mxu2  ;;  %v7921_v54 = vpop.f32.mrf.mxu0 }
 0x2d9   :  { %11967 = vst [vmem:[#allocation219_spill] sm:$0xff] %v7919_v52 }
 0x2da   :  { %11968 = vst [vmem:[#allocation220_spill] sm:$0xff] %v7921_v54  ;;  %v7923_v18 = vpop.f32.mrf.mxu3 }
 0x2db   :  { %11969 = vst [vmem:[#allocation221_spill] sm:$0xff] %v7923_v18  ;;  %5873 = vmatmul.msk.f32.gmra.mxu0 %vm122_vm0, %v7004_v47 }
 0x2dc   :  { %v7927_v63 = vpop.f32.mrf.mxu1 }
 0x2dd   :  { %11970 = vst [vmem:[#allocation222_spill] sm:$0xff] %v7927_v63  ;;  %5982 = vmatmul.msk.f32.gmra.mxu2 %vm122_vm0, %v6679_v22 }
 0x2df   :  { %5921 = vmatmul.msk.f32.gmra.mxu1 %vm122_vm0, %v6718_v38  ;;  %6048 = vmatmul.msk.f32.gmra.mxu3 %vm122_vm0, %v6705_v32 }
 0x2e0   :  { %v7935_v21 = vpop.f32.mrf.mxu2  ;;  %v7937_v35 = vpop.f32.mrf.mxu0 }
 0x2e1   :  { %11971 = vst [vmem:[#allocation223_spill] sm:$0xff] %v7935_v21 }
 0x2e2   :  { %11972 = vst [vmem:[#allocation224_spill] sm:$0xff] %v7937_v35  ;;  %v7939_v54 = vpop.f32.mrf.mxu3 }
 0x2e3   :  { %11973 = vst [vmem:[#allocation225_spill] sm:$0xff] %v7939_v54  ;;  %5874 = vmatmul.msk.f32.gmra.mxu0 %vm122_vm0, %v7030_v11 }
 0x2e4   :  { %v7943_v36 = vpop.f32.mrf.mxu1 }
 0x2e5   :  { %11974 = vst [vmem:[#allocation226_spill] sm:$0xff] %v7943_v36  ;;  %5983 = vmatmul.msk.f32.gmra.mxu2 %vm122_vm0, %v6692_v27 }
 0x2e7   :  { %5922 = vmatmul.msk.f32.gmra.mxu1 %vm122_vm0, %v6731_v44  ;;  %6049 = vmatmul.msk.f32.gmra.mxu3 %vm122_vm0, %v6718_v38 }
 0x2e8   :  { %v7951_v18 = vpop.f32.mrf.mxu2  ;;  %v7953_v31 = vpop.f32.mrf.mxu0 }
 0x2e9   :  { %11975 = vst [vmem:[#allocation227_spill] sm:$0xff] %v7951_v18 }
 0x2ea   :  { %11976 = vst [vmem:[#allocation228_spill] sm:$0xff] %v7953_v31  ;;  %v7955_v35 = vpop.f32.mrf.mxu3  ;;  %v679_v31 = vld [vmem:[%s11587_s3 + $0xd8] sm:$0xff] }
 0x2eb   :  { %11977 = vst [vmem:[#allocation229_spill] sm:$0xff] %v7955_v35  ;;  %5875 = vmatmul.msk.f32.gmra.mxu0 %vm122_vm0, %v7047_v62 }
 0x2ec   :  { %v7959_v54 = vpop.f32.mrf.mxu1  ;;  %2384 = vmatpush.msra.mxu0 %v679_v31 }
 0x2ed   :  { %11978 = vst [vmem:[#allocation230_spill] sm:$0xff] %v7959_v54  ;;  %5984 = vmatmul.msk.f32.gmra.mxu2 %vm122_vm0, %v6705_v32  ;;  %v12036_v32 = vld [vmem:[#allocation114_spill] sm:$0xff] }
 0x2ef   :  { %5923 = vmatmul.msk.f32.gmra.mxu1 %vm122_vm0, %v6744_v50  ;;  %6050 = vmatmul.msk.f32.gmra.mxu3 %vm122_vm0, %v6731_v44 }
 0x2f0   :  { %v7967_v16 = vpop.f32.mrf.mxu2  ;;  %v7969_v55 = vpop.f32.mrf.mxu0 }
 0x2f1   :  { %11979 = vst [vmem:[#allocation231_spill] sm:$0xff] %v7967_v16 }
 0x2f2   :  { %11980 = vst [vmem:[#allocation232_spill] sm:$0xff] %v7969_v55  ;;  %v7974_v35 = vpop.f32.mrf.mxu3 }
 0x2f3   :  { %11981 = vst [vmem:[#allocation233_spill] sm:$0xff] %v7974_v35  ;;  %5876 = vmatmul.msk.f32.gmra.mxu0 %vm122_vm0, %v7067_v43 }
 0x2f4   :  { %v7978_v33 = vpop.f32.mrf.mxu1 }
 0x2f5   :  { %11982 = vst [vmem:[#allocation234_spill] sm:$0xff] %v7978_v33  ;;  %5985 = vmatmul.msk.f32.gmra.mxu2 %vm122_vm0, %v6718_v38  ;;  %v8251_v38 = vld [vmem:[%s11588_s4] sm:$0xff] }
 0x2f7   :  { %5924 = vmatmul.msk.f32.gmra.mxu1 %vm122_vm0, %v6760_v58  ;;  %6051 = vmatmul.msk.f32.gmra.mxu3 %vm122_vm0, %v6744_v50 }
 0x2f8   :  { %v7986_v55 = vpop.f32.mrf.mxu2  ;;  %v7988_v10 = vpop.f32.mrf.mxu0 }
 0x2f9   :  { %11983 = vst [vmem:[#allocation235_spill] sm:$0xff] %v7986_v55 }
 0x2fa   :  { %11984 = vst [vmem:[#allocation236_spill] sm:$0xff] %v7988_v10  ;;  %v7990_v35 = vpop.f32.mrf.mxu3 }
 0x2fb   :  { %11985 = vst [vmem:[#allocation237_spill] sm:$0xff] %v7990_v35  ;;  %5877 = vmatmul.msk.f32.gmra.mxu0 %vm122_vm0, %v7090_v37 }
 0x2fc   :  { %v7994_v31 = vpop.f32.mrf.mxu1 }
 0x2fd   :  { %11986 = vst [vmem:[#allocation238_spill] sm:$0xff] %v7994_v31  ;;  %5986 = vmatmul.msk.f32.gmra.mxu2 %vm122_vm0, %v6731_v44 }
 0x2ff   :  { %5925 = vmatmul.msk.f32.gmra.mxu1 %vm122_vm0, %v6773_v0  ;;  %6052 = vmatmul.msk.f32.gmra.mxu3 %vm122_vm0, %v6760_v58 }
 0x300   :  { %v8002_v20 = vpop.f32.mrf.mxu2  ;;  %v8004_v5 = vpop.f32.mrf.mxu0 }
 0x301   :  { %11987 = vst [vmem:[#allocation239_spill] sm:$0xff] %v8002_v20 }
 0x302   :  { %11988 = vst [vmem:[#allocation240_spill] sm:$0xff] %v8004_v5  ;;  %v8006_v10 = vpop.f32.mrf.mxu3  ;;  %v680_v5 = vld [vmem:[%s11587_s3 + $0xe0] sm:$0xff] }
 0x303   :  { %11989 = vst [vmem:[#allocation241_spill] sm:$0xff] %v8006_v10  ;;  %5878 = vmatmul.msk.f32.gmra.mxu0 %vm122_vm0, %v7119_v42  ;;  %v681_v10 = vld [vmem:[%s11587_s3 + $0xe8] sm:$0xff]  ;;  %2593 = vmatpush.msra.mxu1 %v680_v5 }
 0x304   :  { %v8010_v35 = vpop.f32.mrf.mxu1  ;;  %2802 = vmatpush.msrb.mxu2 %v681_v10 }
 0x305   :  { %5987 = vmatmul.msk.f32.gmra.mxu2 %vm122_vm0, %v6744_v50 }
 0x307   :  { %5926 = vmatmul.msk.f32.gmra.mxu1 %vm122_vm0, %v6791_v9  ;;  %6053 = vmatmul.msk.f32.gmra.mxu3 %vm122_vm0, %v6773_v0 }
 0x308   :  { %v8018_v52 = vpop.f32.mrf.mxu2  ;;  %v8020_v21 = vpop.f32.mrf.mxu0 }
 0x309   :  { %11990 = vst [vmem:[#allocation242_spill] sm:$0xff] %v8018_v52 }
 0x30a   :  { %11991 = vst [vmem:[#allocation243_spill] sm:$0xff] %v8020_v21  ;;  %v8028_v18 = vpop.f32.mrf.mxu3 }
 0x30b   :  { %11992 = vst [vmem:[#allocation244_spill] sm:$0xff] %v8028_v18  ;;  %5879 = vmatmul.msk.f32.gmra.mxu0 %vm122_vm0, %v7149_v25 }
 0x30c   :  { %v8032_v16 = vpop.f32.mrf.mxu1 }
 0x30d   :  { %5988 = vmatmul.msk.f32.gmra.mxu2 %vm122_vm0, %v6760_v58  ;;  %v12031_v58 = vld [vmem:[#allocation108_spill] sm:$0xff] }
 0x30f   :  { %5927 = vmatmul.msk.f32.gmra.mxu1 %vm122_vm0, %v6811_v19  ;;  %6054 = vmatmul.msk.f32.gmra.mxu3 %vm122_vm0, %v6791_v9 }
 0x310   :  { %v8040_v21 = vpop.f32.mrf.mxu2  ;;  %v8042_v55 = vpop.f32.mrf.mxu0 }
 0x311   :  { %11993 = vst [vmem:[#allocation245_spill] sm:$0xff] %v8040_v21 }
 0x312   :  { %11994 = vst [vmem:[#allocation246_spill] sm:$0xff] %v8042_v55  ;;  %v8044_v5 = vpop.f32.mrf.mxu3 }
 0x313   :  { %11995 = vst [vmem:[#allocation247_spill] sm:$0xff] %v8044_v5  ;;  %5880 = vmatmul.msk.f32.gmra.mxu0 %vm122_vm0, %v7176_v26  ;;  %v11999_v5 = vld [vmem:[#allocation78_spill] sm:$0xff] }
 0x314   :  { %v8048_v10 = vpop.f32.mrf.mxu1 }
 0x315   :  { %5989 = vmatmul.msk.f32.gmra.mxu2 %vm122_vm0, %v6773_v0 }
 0x317   :  { %5928 = vmatmul.msk.f32.gmra.mxu1 %vm122_vm0, %v6830_v29  ;;  %6055 = vmatmul.msk.f32.gmra.mxu3 %vm122_vm0, %v6811_v19 }
 0x318   :  { %v8056_v18 = vpop.f32.mrf.mxu2  ;;  %v8058_v20 = vpop.f32.mrf.mxu0 }
 0x319   :  { %11996 = vst [vmem:[#allocation248_spill] sm:$0xff] %v8056_v18 }
 0x31a   :  { %11997 = vst [vmem:[#allocation249_spill] sm:$0xff] %v8058_v20  ;;  %v8060_v55 = vpop.f32.mrf.mxu3 }
 0x31b   :  { %11998 = vst [vmem:[#allocation250_spill] sm:$0xff] %v8060_v55  ;;  %5881 = vmatmul.msk.f32.gmra.mxu0 %vm122_vm0, %v11999_v5  ;;  %v12003_v55 = vld [vmem:[#allocation81_spill] sm:$0xff] }
 0x31c   :  { %v8064_v52 = vpop.f32.mrf.mxu1 }
 0x31d   :  { %5990 = vmatmul.msk.f32.gmra.mxu2 %vm122_vm0, %v6791_v9 }
 0x31f   :  { %5929 = vmatmul.msk.f32.gmra.mxu1 %vm122_vm0, %v6849_v41  ;;  %6056 = vmatmul.msk.f32.gmra.mxu3 %vm122_vm0, %v6830_v29 }
 0x320   :  { %v8072_v21 = vpop.f32.mrf.mxu0  ;;  %v8074_v18 = vpop.f32.mrf.mxu2 }
 0x321   :  { %12000 = vst [vmem:[#allocation251_spill] sm:$0xff] %v8072_v21 }
 0x322   :  { %12001 = vst [vmem:[#allocation252_spill] sm:$0xff] %v8074_v18  ;;  %v8076_v20 = vpop.f32.mrf.mxu3  ;;  %v12039_v18 = vld [vmem:[#allocation118_spill] sm:$0xff] }
 0x323   :  { %12002 = vst [vmem:[#allocation253_spill] sm:$0xff] %v8076_v20  ;;  %5882 = vmatmul.msk.f32.gmra.mxu0 %vm122_vm0, %v12003_v55  ;;  %v12007_v20 = vld [vmem:[#allocation84_spill] sm:$0xff] }
 0x324   :  { %v8080_v8 = vpop.f32.mrf.mxu1 }
 0x325   :  { %5991 = vmatmul.msk.f32.gmra.mxu2 %vm122_vm0, %v6811_v19 }
 0x327   :  { %5930 = vmatmul.msk.f32.gmra.mxu1 %vm122_vm0, %v6868_v53  ;;  %6057 = vmatmul.msk.f32.gmra.mxu3 %vm122_vm0, %v6849_v41 }
 0x328   :  { %v8088_v39 = vpop.f32.mrf.mxu0  ;;  %v8090_v21 = vpop.f32.mrf.mxu2 }
 0x329   :  { %12004 = vst [vmem:[#allocation254_spill] sm:$0xff] %v8088_v39 }
 0x32a   :  { %12005 = vst [vmem:[#allocation255_spill] sm:$0xff] %v8090_v21  ;;  %v8092_v15 = vpop.f32.mrf.mxu3 }
 0x32b   :  { %12006 = vst [vmem:[#allocation256_spill] sm:$0xff] %v8092_v15  ;;  %5883 = vmatmul.msk.f32.gmra.mxu0 %vm122_vm0, %v12007_v20  ;;  %v12010_v15 = vld [vmem:[#allocation87_spill] sm:$0xff] }
 0x32c   :  { %v8096_v46 = vpop.f32.mrf.mxu1 }
 0x32d   :  { %5992 = vmatmul.msk.f32.gmra.mxu2 %vm122_vm0, %v6830_v29 }
 0x32f   :  { %5931 = vmatmul.msk.f32.gmra.mxu1 %vm122_vm0, %v6887_v1  ;;  %6058 = vmatmul.msk.f32.gmra.mxu3 %vm122_vm0, %v6868_v53 }
 0x330   :  { %v8104_v23 = vpop.f32.mrf.mxu0  ;;  %v8106_v39 = vpop.f32.mrf.mxu2 }
 0x331   :  { %12008 = vst [vmem:[#allocation257_spill] sm:$0xff] %v8104_v23 }
 0x332   :  { %v8108_v45 = vpop.f32.mrf.mxu3 }
 0x333   :  { %12009 = vst [vmem:[#allocation258_spill] sm:$0xff] %v8108_v45  ;;  %5884 = vmatmul.msk.f32.gmra.mxu0 %vm122_vm0, %v12010_v15  ;;  %v12013_v45 = vld [vmem:[#allocation90_spill] sm:$0xff] }
 0x334   :  { %v8112_v4 = vpop.f32.mrf.mxu1 }
 0x335   :  { %5993 = vmatmul.msk.f32.gmra.mxu2 %vm122_vm0, %v6849_v41 }
 0x337   :  { %5932 = vmatmul.msk.f32.gmra.mxu1 %vm122_vm0, %v6906_v14  ;;  %6059 = vmatmul.msk.f32.gmra.mxu3 %vm122_vm0, %v6887_v1 }
 0x338   :  { %v8120_v28 = vpop.f32.mrf.mxu0  ;;  %v8122_v23 = vpop.f32.mrf.mxu2 }
 0x339   :  { %12011 = vst [vmem:[#allocation259_spill] sm:$0xff] %v8120_v28 }
 0x33a   :  { %v8124_v3 = vpop.f32.mrf.mxu3 }
 0x33b   :  { %12012 = vst [vmem:[#allocation260_spill] sm:$0xff] %v8124_v3  ;;  %5885 = vmatmul.msk.f32.gmra.mxu0 %vm122_vm0, %v12013_v45  ;;  %v12016_v3 = vld [vmem:[#allocation93_spill] sm:$0xff] }
 0x33c   :  { %v8128_v57 = vpop.f32.mrf.mxu1 }
 0x33d   :  { %5994 = vmatmul.msk.f32.gmra.mxu2 %vm122_vm0, %v6868_v53 }
 0x33f   :  { %5933 = vmatmul.msk.f32.gmra.mxu1 %vm122_vm0, %v6925_v34  ;;  %6060 = vmatmul.msk.f32.gmra.mxu3 %vm122_vm0, %v6906_v14 }
 0x340   :  { %v8136_v30 = vpop.f32.mrf.mxu0  ;;  %v8138_v28 = vpop.f32.mrf.mxu2 }
 0x341   :  { %12014 = vst [vmem:[#allocation261_spill] sm:$0xff] %v8136_v30 }
 0x342   :  { %v8140_v63 = vpop.f32.mrf.mxu3 }
 0x343   :  { %12015 = vst [vmem:[#allocation262_spill] sm:$0xff] %v8140_v63  ;;  %5886 = vmatmul.msk.f32.gmra.mxu0 %vm122_vm0, %v12016_v3  ;;  %v12019_v63 = vld [vmem:[#allocation96_spill] sm:$0xff] }
 0x344   :  { %v8144_v36 = vpop.f32.mrf.mxu1 }
 0x345   :  { %5995 = vmatmul.msk.f32.gmra.mxu2 %vm122_vm0, %v6887_v1 }
 0x347   :  { %5934 = vmatmul.msk.f32.gmra.mxu1 %vm122_vm0, %v6944_v59  ;;  %6061 = vmatmul.msk.f32.gmra.mxu3 %vm122_vm0, %v6925_v34 }
 0x348   :  { %v8152_v54 = vpop.f32.mrf.mxu0  ;;  %v8154_v30 = vpop.f32.mrf.mxu2 }
 0x349   :  { %12017 = vst [vmem:[#allocation263_spill] sm:$0xff] %v8152_v54 }
 0x34a   :  { %v8156_v33 = vpop.f32.mrf.mxu3 }
 0x34b   :  { %12018 = vst [vmem:[#allocation264_spill] sm:$0xff] %v8156_v33  ;;  %5887 = vmatmul.msk.f32.gmra.mxu0 %vm122_vm0, %v12019_v63  ;;  %v12022_v33 = vld [vmem:[#allocation99_spill] sm:$0xff] }
 0x34c   :  { %v8160_v31 = vpop.f32.mrf.mxu1 }
 0x34d   :  { %5996 = vmatmul.msk.f32.gmra.mxu2 %vm122_vm0, %v6906_v14 }
 0x34f   :  { %5935 = vmatmul.msk.f32.gmra.mxu1 %vm122_vm0, %v6963_v24  ;;  %6062 = vmatmul.msk.f32.gmra.mxu3 %vm122_vm0, %v6944_v59 }
 0x350   :  { %v8168_v1 = vpop.f32.mrf.mxu0  ;;  %v8170_v54 = vpop.f32.mrf.mxu2 }
 0x351   :  { %12020 = vst [vmem:[#allocation265_spill] sm:$0xff] %v8168_v1 }
 0x352   :  { %v8172_v53 = vpop.f32.mrf.mxu3 }
 0x353   :  { %12021 = vst [vmem:[#allocation266_spill] sm:$0xff] %v8172_v53  ;;  %5888 = vmatmul.msk.f32.gmra.mxu0 %vm122_vm0, %v12022_v33  ;;  %v12025_v53 = vld [vmem:[#allocation102_spill] sm:$0xff] }
 0x354   :  { %v1791_v41 = vpop.f32.mrf.mxu1 }
 0x355   :  { %5997 = vmatmul.msk.f32.gmra.mxu2 %vm122_vm0, %v6925_v34 }
 0x357   :  { %5936 = vmatmul.msk.f32.gmra.mxu1 %vm122_vm0, %v6982_v6  ;;  %6063 = vmatmul.msk.f32.gmra.mxu3 %vm122_vm0, %v6963_v24 }
 0x358   :  { %v8182_v14 = vpop.f32.mrf.mxu0  ;;  %v8184_v1 = vpop.f32.mrf.mxu2 }
 0x359   :  { %12023 = vst [vmem:[#allocation267_spill] sm:$0xff] %v8182_v14 }
 0x35a   :  { %v8186_v29 = vpop.f32.mrf.mxu3 }
 0x35b   :  { %12024 = vst [vmem:[#allocation268_spill] sm:$0xff] %v8186_v29  ;;  %5889 = vmatmul.msk.f32.gmra.mxu0 %vm122_vm0, %v12025_v53  ;;  %v669_v29 = vld [vmem:[%s11587_s3 + $0x88] sm:$0xff] }
 0x35c   :  { %v1794_v19 = vpop.f32.mrf.mxu1  ;;  %2385 = vmatpush.msra.mxu0 %v669_v29 }
 0x35d   :  { %5998 = vmatmul.msk.f32.gmra.mxu2 %vm122_vm0, %v6944_v59  ;;  %v659_v59 = vld [vmem:[%s11587_s3 + $0x38] sm:$0xff] }
 0x35e   :  { %2386 = vmatpush.msra.mxu0 %v659_v59 }
 0x35f   :  { %5937 = vmatmul.msk.f32.gmra.mxu1 %vm122_vm0, %v7004_v47  ;;  %6064 = vmatmul.msk.f32.gmra.mxu3 %vm122_vm0, %v6982_v6 }
 0x360   :  { %v8196_v34 = vpop.f32.mrf.mxu0  ;;  %v8198_v14 = vpop.f32.mrf.mxu2 }
 0x361   :  { %12026 = vst [vmem:[#allocation269_spill] sm:$0xff] %v8196_v34 }
 0x362   :  { %v8203_v9 = vpop.f32.mrf.mxu3 }
 0x363   :  { %12027 = vst [vmem:[#allocation270_spill] sm:$0xff] %v8203_v9  ;;  %5890 = vmatmul.msk.f32.gmra.mxu0 %vm122_vm0, %v12028_v60 }
 0x364   :  { %v1797_v0 = vpop.f32.mrf.mxu1 }
 0x365   :  { %5999 = vmatmul.msk.f32.gmra.mxu2 %vm122_vm0, %v6963_v24  ;;  %v12033_v24 = vld [vmem:[#allocation111_spill] sm:$0xff] }
 0x367   :  { %5938 = vmatmul.msk.f32.gmra.mxu1 %vm122_vm0, %v7030_v11  ;;  %6065 = vmatmul.msk.f32.gmra.mxu3 %vm122_vm0, %v7004_v47 }
 0x368   :  { %v8216_v29 = vpop.f32.mrf.mxu0  ;;  %v8218_v9 = vpop.f32.mrf.mxu2 }
 0x369   :  { %12029 = vst [vmem:[#allocation271_spill] sm:$0xff] %v8216_v29 }
 0x36a   :  { %v8220_v34 = vpop.f32.mrf.mxu3 }
 0x36b   :  { %12030 = vst [vmem:[#allocation272_spill] sm:$0xff] %v8220_v34  ;;  %5891 = vmatmul.msk.f32.gmra.mxu0 %vm122_vm0, %v12031_v58 }
 0x36c   :  { %v1800_v50 = vpop.f32.mrf.mxu1 }
 0x36d   :  { %6000 = vmatmul.msk.f32.gmra.mxu2 %vm122_vm0, %v6982_v6 }
 0x36f   :  { %5939 = vmatmul.msk.f32.gmra.mxu1 %vm122_vm0, %v7047_v62  ;;  %6066 = vmatmul.msk.f32.gmra.mxu3 %vm122_vm0, %v7030_v11 }
 0x370   :  { %v8230_v59 = vpop.f32.mrf.mxu0  ;;  %v8232_v29 = vpop.f32.mrf.mxu2 }
 0x371   :  { %12032 = vst [vmem:[#allocation273_spill] sm:$0xff] %v8230_v59 }
 0x372   :  { %v8236_v44 = vpop.f32.mrf.mxu3 }
 0x373   :  { %5892 = vmatmul.msk.f32.gmra.mxu0 %vm122_vm0, %v12033_v24  ;;  %12034 = vst [vmem:[#allocation274_spill] sm:$0xff] %v8236_v44  ;;  %v8254_v44 = vperm.slane %v8251_v38, 4 }
 0x374   :  { %v1803_v34 = vpop.f32.mrf.mxu1 }
 0x375   :  { %6001 = vmatmul.msk.f32.gmra.mxu2 %vm122_vm0, %v7004_v47  ;;  %v1804_v47 = vadd.f32 %v1803_v34, %v8254_v44  ;;  %v1798_v7 = vadd.f32 %v1797_v0, %v8254_v44  ;;  %v1789_v0 = vadd.f32 %v8160_v31, %v8254_v44 }
 0x377   :  { %5940 = vmatmul.msk.f32.gmra.mxu1 %vm122_vm0, %v7067_v43  ;;  %6067 = vmatmul.msk.f32.gmra.mxu3 %vm122_vm0, %v7047_v62  ;;  %v3142_v34 = vmax.f32 %v1804_v47, 0.0 }
 0x378   :  { %v8244_v6 = vpop.f32.mrf.mxu0  ;;  %v8246_v59 = vpop.f32.mrf.mxu2 }
 0x379   :  { %12035 = vst [vmem:[#allocation275_spill] sm:$0xff] %v8244_v6  ;;  %v1801_v6 = vadd.f32 %v1800_v50, %v8254_v44  ;;  %v3782_v21 = vmin.f32 %v3142_v34, 6.0  ;;  %v3092_v34 = vmax.f32 %v1789_v0, 0.0 }
 0x37a   :  { %v8263_v17 = vpop.f32.mrf.mxu3 }
 0x37b   :  { %5893 = vmatmul.msk.f32.gmra.mxu0 %vm122_vm0, %v12036_v32  ;;  %12037 = vst [vmem:[#allocation276_spill] sm:$0xff] %v8263_v17  ;;  %v3132_v50 = vmax.f32 %v1801_v6, 0.0  ;;  %v3122_v17 = vmax.f32 %v1798_v7, 0.0 }
 0x37c   :  { %v1806_v27 = vpop.f32.mrf.mxu1 }
 0x37d   :  { %v1807_v22 = vadd.f32 %v1806_v27, %v8254_v44  ;;  %6002 = vmatmul.msk.f32.gmra.mxu2 %vm122_vm0, %v7030_v11  ;;  %v1795_v11 = vadd.f32 %v1794_v19, %v8254_v44  ;;  %v3772_v47 = vmin.f32 %v3132_v50, 6.0  ;;  %v3762_v19 = vmin.f32 %v3122_v17, 6.0  ;;  %v12042_v50 = vld [vmem:[#allocation122_spill] sm:$0xff] }
 0x37f   :  { %v3152_v12 = vmax.f32 %v1807_v22, 0.0  ;;  %5941 = vmatmul.msk.f32.gmra.mxu1 %vm122_vm0, %v7090_v37  ;;  %6068 = vmatmul.msk.f32.gmra.mxu3 %vm122_vm0, %v7067_v43  ;;  %v1792_v22 = vadd.f32 %v1791_v41, %v8254_v44 }
 0x380   :  { %v8270_v2 = vpop.f32.mrf.mxu0  ;;  %v8272_v27 = vpop.f32.mrf.mxu2 }
 0x381   :  { %12038 = vst [vmem:[#allocation277_spill] sm:$0xff] %v8270_v2  ;;  %v3792_v61 = vmin.f32 %v3152_v12, 6.0  ;;  %v3112_v12 = vmax.f32 %v1795_v11, 0.0  ;;  %v3102_v7 = vmax.f32 %v1792_v22, 0.0  ;;  %v670_v11 = vld [vmem:[%s11587_s3 + $0x90] sm:$0xff]  ;;  %v1780_v22 = vadd.f32 %v8112_v4, %v8254_v44 }
 0x382   :  { %v8294_v31 = vpop.f32.mrf.mxu3  ;;  %2594 = vmatpush.msra.mxu1 %v670_v11  ;;  %v1774_v4 = vadd.f32 %v8080_v8, %v8254_v44  ;;  %v1768_v8 = vadd.f32 %v8048_v10, %v8254_v44  ;;  %v1762_v10 = vadd.f32 %v8010_v35, %v8254_v44 }
 0x383   :  { %5894 = vmatmul.msk.f32.gmra.mxu0 %vm122_vm0, %v12039_v18  ;;  %12041 = vst [vmem:[#allocation279_spill] sm:$0xff] %v8294_v31  ;;  %v3752_v17 = vmin.f32 %v3112_v12, 6.0  ;;  %v3742_v2 = vmin.f32 %v3102_v7, 6.0  ;;  %v3732_v12 = vmin.f32 %v3092_v34, 6.0  ;;  %v12045_v34 = vld [vmem:[#allocation126_spill] sm:$0xff] }
 0x384   :  { %4602 = vmatpush.msrb.mxu0 %v3792_v61  ;;  %v8278_v56 = vpop.f32.mrf.mxu1  ;;  %v1786_v61 = vadd.f32 %v8144_v36, %v8254_v44  ;;  %v1783_v36 = vadd.f32 %v8128_v57, %v8254_v44  ;;  %v1777_v57 = vadd.f32 %v8096_v46, %v8254_v44  ;;  %v1771_v46 = vadd.f32 %v8064_v52, %v8254_v44 }
 0x385   :  { %6003 = vmatmul.msk.f32.gmra.mxu2 %vm122_vm0, %v7047_v62  ;;  %v1765_v52 = vadd.f32 %v8032_v16, %v8254_v44 }
 0x386   :  { %4603 = vmatpush.msrb.mxu0 %v3782_v21  ;;  %v671_v21 = vld [vmem:[%s11587_s3 + $0x98] sm:$0xff]  ;;  %v3072_v0 = vmax.f32 %v1783_v36, 0.0 }
 0x387   :  { %5942 = vmatmul.msk.f32.gmra.mxu1 %vm122_vm0, %v7119_v42  ;;  %6069 = vmatmul.msk.f32.gmra.mxu3 %vm122_vm0, %v7090_v37  ;;  %v3012_v16 = vmax.f32 %v1765_v52, 0.0 }
 0x388   :  { %4604 = vmatpush.msrb.mxu0 %v3772_v47  ;;  %v8290_v41 = vpop.f32.mrf.mxu0  ;;  %v8292_v6 = vpop.f32.mrf.mxu2  ;;  %2803 = vmatpush.msrb.mxu2 %v671_v21  ;;  %v3082_v47 = vmax.f32 %v1786_v61, 0.0  ;;  %v3062_v61 = vmax.f32 %v1780_v22, 0.0  ;;  %v3712_v21 = vmin.f32 %v3072_v0, 6.0 }
 0x389   :  { %12040 = vst [vmem:[#allocation278_spill] sm:$0xff] %v8290_v41  ;;  %v3652_v35 = vmin.f32 %v3012_v16, 6.0  ;;  %v12055_v16 = vld [vmem:[#allocation138_spill] sm:$0xff] }
 0x38a   :  { %4605 = vmatpush.msrb.mxu0 %v3762_v19  ;;  %v3722_v7 = vmin.f32 %v3082_v47, 6.0  ;;  %v8326_v36 = vpop.f32.mrf.mxu3  ;;  %v3702_v22 = vmin.f32 %v3062_v61, 6.0 }
 0x38b   :  { %5895 = vmatmul.msk.f32.gmra.mxu0 %vm122_vm0, %v12042_v50  ;;  %12044 = vst [vmem:[#allocation281_spill] sm:$0xff] %v8326_v36  ;;  %v12066_v36 = vld [vmem:[#allocation150_spill] sm:$0xff] }
 0x38c   :  { %4606 = vmatpush.msrb.mxu0 %v3752_v17  ;;  %v8308_v41 = vpop.f32.mrf.mxu1  ;;  %v3042_v17 = vmax.f32 %v1774_v4, 0.0 }
 0x38d   :  { %6004 = vmatmul.msk.f32.gmra.mxu2 %vm122_vm0, %v7067_v43 }
 0x38e   :  { %4607 = vmatpush.msrb.mxu0 %v3742_v2  ;;  %v3052_v2 = vmax.f32 %v1777_v57, 0.0  ;;  %v3032_v57 = vmax.f32 %v1771_v46, 0.0  ;;  %v3682_v4 = vmin.f32 %v3042_v17, 6.0 }
 0x38f   :  { %5943 = vmatmul.msk.f32.gmra.mxu1 %vm122_vm0, %v7149_v25  ;;  %6070 = vmatmul.msk.f32.gmra.mxu3 %vm122_vm0, %v7119_v42 }
 0x390   :  { %4608 = vmatpush.msrb.mxu0 %v3732_v12  ;;  %v8320_v19 = vpop.f32.mrf.mxu0  ;;  %v8322_v11 = vpop.f32.mrf.mxu2  ;;  %v3692_v0 = vmin.f32 %v3052_v2, 6.0  ;;  %v3022_v12 = vmax.f32 %v1768_v8, 0.0  ;;  %v3672_v46 = vmin.f32 %v3032_v57, 6.0  ;;  %v12047_v2 = vld [vmem:[#allocation130_spill] sm:$0xff] }
 0x391   :  { %12043 = vst [vmem:[#allocation280_spill] sm:$0xff] %v8320_v19  ;;  %v12051_v57 = vld [vmem:[#allocation134_spill] sm:$0xff] }
 0x392   :  { %4609 = vmatpush.msrb.mxu0 %v3722_v7  ;;  %v8352_v31 = vpop.f32.mrf.mxu3 }
 0x393   :  { %5896 = vmatmul.msk.f32.gmra.mxu0 %vm122_vm0, %v12045_v34  ;;  %12048 = vst [vmem:[#allocation283_spill] sm:$0xff] %v8352_v31 }
 0x394   :  { %4610 = vmatpush.msrb.mxu0 %v3712_v21  ;;  %v8332_v47 = vpop.f32.mrf.mxu1  ;;  %v3002_v21 = vmax.f32 %v1762_v10, 0.0 }
 0x395   :  { %6005 = vmatmul.msk.f32.gmra.mxu2 %vm122_vm0, %v7090_v37 }
 0x396   :  { %4611 = vmatpush.msrb.mxu0 %v3702_v22  ;;  %v3662_v22 = vmin.f32 %v3022_v12, 6.0  ;;  %v3642_v8 = vmin.f32 %v3002_v21, 6.0 }
 0x397   :  { %5944 = vmatmul.msk.f32.gmra.mxu1 %vm122_vm0, %v7176_v26  ;;  %6071 = vmatmul.msk.f32.gmra.mxu3 %vm122_vm0, %v7149_v25 }
 0x398   :  { %4612 = vmatpush.msrb.mxu0 %v3692_v0  ;;  %v8344_v61 = vpop.f32.mrf.mxu0  ;;  %v8346_v7 = vpop.f32.mrf.mxu2 }
 0x399   :  { %12046 = vst [vmem:[#allocation282_spill] sm:$0xff] %v8344_v61 }
 0x39a   :  { %4613 = vmatpush.msrb.mxu0 %v3682_v4  ;;  %v8370_v10 = vpop.f32.mrf.mxu3 }
 0x39b   :  { %5897 = vmatmul.msk.f32.gmra.mxu0 %vm122_vm0, %v12047_v2  ;;  %12052 = vst [vmem:[#allocation286_spill] sm:$0xff] %v8370_v10 }
 0x39c   :  { %4614 = vmatpush.msrb.mxu0 %v3672_v46  ;;  %v8350_v19 = vpop.f32.mrf.mxu1 }
 0x39d   :  { %6006 = vmatmul.msk.f32.gmra.mxu2 %vm122_vm0, %v7119_v42  ;;  %v12074_v42 = vld [vmem:[#allocation158_spill] sm:$0xff] }
 0x39e   :  { %4615 = vmatpush.msrb.mxu0 %v3662_v22 }
 0x39f   :  { %5945 = vmatmul.msk.f32.gmra.mxu1 %vm122_vm0, %v11999_v5  ;;  %6072 = vmatmul.msk.f32.gmra.mxu3 %vm122_vm0, %v7176_v26 }
 0x3a0   :  { %4616 = vmatpush.msrb.mxu0 %v3652_v35  ;;  %v8360_v17 = vpop.f32.mrf.mxu0  ;;  %v8362_v52 = vpop.f32.mrf.mxu2 }
 0x3a1   :  { %12049 = vst [vmem:[#allocation284_spill] sm:$0xff] %v8360_v17 }
 0x3a2   :  { %12050 = vst [vmem:[#allocation285_spill] sm:$0xff] %v8362_v52  ;;  %4617 = vmatpush.msrb.mxu0 %v3642_v8  ;;  %v8394_v35 = vpop.f32.mrf.mxu3  ;;  %v12059_v8 = vld [vmem:[#allocation142_spill] sm:$0xff] }
 0x3a3   :  { %5898 = vmatmul.msk.f32.gmra.mxu0 %vm122_vm0, %v12051_v57  ;;  %12058 = vst [vmem:[#allocation291_spill] sm:$0xff] %v8394_v35  ;;  %v12063_v35 = vld [vmem:[#allocation146_spill] sm:$0xff] }
 0x3a4   :  { %v8366_v0 = vpop.f32.mrf.mxu1  ;;  %v12081_v52 = vld [vmem:[#allocation166_spill] sm:$0xff] }
 0x3a5   :  { %6007 = vmatmul.msk.f32.gmra.mxu2 %vm122_vm0, %v7149_v25 }
 0x3a7   :  { %5946 = vmatmul.msk.f32.gmra.mxu1 %vm122_vm0, %v12003_v55  ;;  %6073 = vmatmul.msk.f32.gmra.mxu3 %vm122_vm0, %v11999_v5 }
 0x3a8   :  { %v8376_v12 = vpop.f32.mrf.mxu0  ;;  %v8378_v4 = vpop.f32.mrf.mxu2 }
 0x3a9   :  { %12053 = vst [vmem:[#allocation287_spill] sm:$0xff] %v8376_v12 }
 0x3aa   :  { %12054 = vst [vmem:[#allocation288_spill] sm:$0xff] %v8378_v4  ;;  %v8410_v17 = vpop.f32.mrf.mxu3 }
 0x3ab   :  { %5899 = vmatmul.msk.f32.gmra.mxu0 %vm122_vm0, %v12055_v16  ;;  %12062 = vst [vmem:[#allocation294_spill] sm:$0xff] %v8410_v17 }
 0x3ac   :  { %v8382_v46 = vpop.f32.mrf.mxu1 }
 0x3ad   :  { %6008 = vmatmul.msk.f32.gmra.mxu2 %vm122_vm0, %v7176_v26  ;;  %v12070_v26 = vld [vmem:[#allocation154_spill] sm:$0xff] }
 0x3af   :  { %5947 = vmatmul.msk.f32.gmra.mxu1 %vm122_vm0, %v12007_v20  ;;  %6074 = vmatmul.msk.f32.gmra.mxu3 %vm122_vm0, %v12003_v55 }
 0x3b0   :  { %v8390_v21 = vpop.f32.mrf.mxu0  ;;  %v8392_v22 = vpop.f32.mrf.mxu2 }
 0x3b1   :  { %12056 = vst [vmem:[#allocation289_spill] sm:$0xff] %v8390_v21 }
 0x3b2   :  { %12057 = vst [vmem:[#allocation290_spill] sm:$0xff] %v8392_v22  ;;  %v12084_v22 = vld [vmem:[#allocation170_spill] sm:$0xff] }
 0x3b3   :  { %5900 = vmatmul.msk.f32.gmra.mxu0 %vm122_vm0, %v12059_v8 }
 0x3b4   :  { %v8398_v10 = vpop.f32.mrf.mxu1 }
 0x3b5   :  { %6009 = vmatmul.msk.f32.gmra.mxu2 %vm122_vm0, %v11999_v5  ;;  %v8430_v5 = vpop.f32.mrf.mxu3 }
 0x3b6   :  { %12067 = vst [vmem:[#allocation297_spill] sm:$0xff] %v8430_v5 }
 0x3b7   :  { %5948 = vmatmul.msk.f32.gmra.mxu1 %vm122_vm0, %v12010_v15  ;;  %6075 = vmatmul.msk.f32.gmra.mxu3 %vm122_vm0, %v12007_v20 }
 0x3b8   :  { %v8406_v31 = vpop.f32.mrf.mxu0  ;;  %v8408_v61 = vpop.f32.mrf.mxu2 }
 0x3b9   :  { %12060 = vst [vmem:[#allocation292_spill] sm:$0xff] %v8406_v31 }
 0x3ba   :  { %12061 = vst [vmem:[#allocation293_spill] sm:$0xff] %v8408_v61 }
 0x3bb   :  { %5901 = vmatmul.msk.f32.gmra.mxu0 %vm122_vm0, %v12063_v35 }
 0x3bc   :  { %v8414_v12 = vpop.f32.mrf.mxu1 }
 0x3bd   :  { %6010 = vmatmul.msk.f32.gmra.mxu2 %vm122_vm0, %v12003_v55  ;;  %v8448_v5 = vpop.f32.mrf.mxu3 }
 0x3be   :  { %12071 = vst [vmem:[#allocation300_spill] sm:$0xff] %v8448_v5 }
 0x3bf   :  { %5949 = vmatmul.msk.f32.gmra.mxu1 %vm122_vm0, %v12013_v45  ;;  %6076 = vmatmul.msk.f32.gmra.mxu3 %vm122_vm0, %v12010_v15 }
 0x3c0   :  { %v8422_v21 = vpop.f32.mrf.mxu0  ;;  %v8424_v31 = vpop.f32.mrf.mxu2 }
 0x3c1   :  { %12064 = vst [vmem:[#allocation295_spill] sm:$0xff] %v8422_v21 }
 0x3c2   :  { %12065 = vst [vmem:[#allocation296_spill] sm:$0xff] %v8424_v31 }
 0x3c3   :  { %5902 = vmatmul.msk.f32.gmra.mxu0 %vm122_vm0, %v12066_v36 }
 0x3c4   :  { %v8428_v17 = vpop.f32.mrf.mxu1 }
 0x3c5   :  { %6011 = vmatmul.msk.f32.gmra.mxu2 %vm122_vm0, %v12007_v20 }
 0x3c7   :  { %5950 = vmatmul.msk.f32.gmra.mxu1 %vm122_vm0, %v12016_v3  ;;  %6077 = vmatmul.msk.f32.gmra.mxu3 %vm122_vm0, %v12013_v45 }
 0x3c8   :  { %v8438_v55 = vpop.f32.mrf.mxu0  ;;  %v8440_v21 = vpop.f32.mrf.mxu2 }
 0x3c9   :  { %12068 = vst [vmem:[#allocation298_spill] sm:$0xff] %v8438_v55 }
 0x3ca   :  { %12069 = vst [vmem:[#allocation299_spill] sm:$0xff] %v8440_v21 }
 0x3cb   :  { %5903 = vmatmul.msk.f32.gmra.mxu0 %vm122_vm0, %v12070_v26 }
 0x3cc   :  { %v8444_v25 = vpop.f32.mrf.mxu1 }
 0x3cd   :  { %6012 = vmatmul.msk.f32.gmra.mxu2 %vm122_vm0, %v12010_v15 }
 0x3cf   :  { %5951 = vmatmul.msk.f32.gmra.mxu1 %vm122_vm0, %v12019_v63  ;;  %6078 = vmatmul.msk.f32.gmra.mxu3 %vm122_vm0, %v12016_v3 }
 0x3d0   :  { %v8454_v20 = vpop.f32.mrf.mxu0  ;;  %v8456_v55 = vpop.f32.mrf.mxu2 }
 0x3d1   :  { %12072 = vst [vmem:[#allocation301_spill] sm:$0xff] %v8454_v20  ;;  %v8472_v20 = vpop.f32.mrf.mxu3 }
 0x3d2   :  { %12073 = vst [vmem:[#allocation302_spill] sm:$0xff] %v8456_v55 }
 0x3d3   :  { %5904 = vmatmul.msk.f32.gmra.mxu0 %vm122_vm0, %v12074_v42  ;;  %12077 = vst [vmem:[#allocation305_spill] sm:$0xff] %v8472_v20  ;;  %v660_v20 = vld [vmem:[%s11587_s3 + $0x40] sm:$0xff] }
 0x3d4   :  { %v8460_v37 = vpop.f32.mrf.mxu1  ;;  %2595 = vmatpush.msra.mxu1 %v660_v20 }
 0x3d5   :  { %6013 = vmatmul.msk.f32.gmra.mxu2 %vm122_vm0, %v12013_v45 }
 0x3d7   :  { %5952 = vmatmul.msk.f32.gmra.mxu1 %vm122_vm0, %v12022_v33  ;;  %6079 = vmatmul.msk.f32.gmra.mxu3 %vm122_vm0, %v12019_v63 }
 0x3d8   :  { %v8468_v5 = vpop.f32.mrf.mxu0  ;;  %v8470_v15 = vpop.f32.mrf.mxu2 }
 0x3d9   :  { %12075 = vst [vmem:[#allocation303_spill] sm:$0xff] %v8468_v5  ;;  %v8489_v62 = vpop.f32.mrf.mxu3 }
 0x3da   :  { %12076 = vst [vmem:[#allocation304_spill] sm:$0xff] %v8470_v15 }
 0x3db   :  { %5905 = vmatmul.msk.f32.gmra.mxu0 %vm122_vm0, %v7643_v49  ;;  %12080 = vst [vmem:[#allocation308_spill] sm:$0xff] %v8489_v62 }
 0x3dc   :  { %v1842_v43 = vpop.f32.mrf.mxu1 }
 0x3dd   :  { %6014 = vmatmul.msk.f32.gmra.mxu2 %vm122_vm0, %v12016_v3 }
 0x3df   :  { %5953 = vmatmul.msk.f32.gmra.mxu1 %vm122_vm0, %v12025_v53  ;;  %6080 = vmatmul.msk.f32.gmra.mxu3 %vm122_vm0, %v12022_v33 }
 0x3e0   :  { %v8482_v45 = vpop.f32.mrf.mxu0  ;;  %v8484_v5 = vpop.f32.mrf.mxu2 }
 0x3e1   :  { %12078 = vst [vmem:[#allocation306_spill] sm:$0xff] %v8482_v45  ;;  %v8505_v61 = vpop.f32.mrf.mxu3 }
 0x3e2   :  { %12079 = vst [vmem:[#allocation307_spill] sm:$0xff] %v8484_v5 }
 0x3e3   :  { %5906 = vmatmul.msk.f32.gmra.mxu0 %vm122_vm0, %v12081_v52  ;;  %12085 = vst [vmem:[#allocation311_spill] sm:$0xff] %v8505_v61 }
 0x3e4   :  { %v1845_v3 = vpop.f32.mrf.mxu1 }
 0x3e5   :  { %6015 = vmatmul.msk.f32.gmra.mxu2 %vm122_vm0, %v12019_v63 }
 0x3e7   :  { %5954 = vmatmul.msk.f32.gmra.mxu1 %vm122_vm0, %v12028_v60  ;;  %6081 = vmatmul.msk.f32.gmra.mxu3 %vm122_vm0, %v12025_v53 }
 0x3e8   :  { %v8499_v45 = vpop.f32.mrf.mxu0  ;;  %v8501_v4 = vpop.f32.mrf.mxu2 }
 0x3e9   :  { %12082 = vst [vmem:[#allocation309_spill] sm:$0xff] %v8499_v45  ;;  %v8521_v61 = vpop.f32.mrf.mxu3 }
 0x3ea   :  { %12083 = vst [vmem:[#allocation310_spill] sm:$0xff] %v8501_v4 }
 0x3eb   :  { %5907 = vmatmul.msk.f32.gmra.mxu0 %vm122_vm0, %v12084_v22  ;;  %12088 = vst [vmem:[#allocation314_spill] sm:$0xff] %v8521_v61 }
 0x3ec   :  { %v1848_v62 = vpop.f32.mrf.mxu1 }
 0x3ed   :  { %6016 = vmatmul.msk.f32.gmra.mxu2 %vm122_vm0, %v12022_v33  ;;  %v8528_v33 = vperm.slane %v8251_v38, 5 }
 0x3ef   :  { %5955 = vmatmul.msk.f32.gmra.mxu1 %vm122_vm0, %v12031_v58  ;;  %6082 = vmatmul.msk.f32.gmra.mxu3 %vm122_vm0, %v12028_v60  ;;  %12089 = vst [vmem:[#allocation315_spill] sm:$0xff] %v8528_v33  ;;  %v2016_v21 = vadd.f32 %v8346_v7, %v8528_v33  ;;  %v2013_v61 = vadd.f32 %v8322_v11, %v8528_v33 }
 0x3f0   :  { %v8513_v20 = vpop.f32.mrf.mxu0  ;;  %v8515_v45 = vpop.f32.mrf.mxu2  ;;  %v2010_v38 = vadd.f32 %v8292_v6, %v8528_v33  ;;  %v1849_v7 = vadd.f32 %v1848_v62, %v8254_v44 }
 0x3f1   :  { %12086 = vst [vmem:[#allocation312_spill] sm:$0xff] %v8513_v20  ;;  %v3143_v11 = vmax.f32 %v2013_v61, 0.0  ;;  %v8560_v62 = vpop.f32.mrf.mxu3 }
 0x3f2   :  { %12087 = vst [vmem:[#allocation313_spill] sm:$0xff] %v8515_v45 }
 0x3f3   :  { %5908 = vmatmul.msk.f32.gmra.mxu0 %vm122_vm0, %v7697_v13  ;;  %12093 = vst [vmem:[#allocation319_spill] sm:$0xff] %v8560_v62 }
 0x3f4   :  { %v1851_v63 = vpop.f32.mrf.mxu1 }
 0x3f5   :  { %6017 = vmatmul.msk.f32.gmra.mxu2 %vm122_vm0, %v12025_v53  ;;  %v1852_v53 = vadd.f32 %v1851_v63, %v8254_v44 }
 0x3f7   :  { %5956 = vmatmul.msk.f32.gmra.mxu1 %vm122_vm0, %v12033_v24  ;;  %6083 = vmatmul.msk.f32.gmra.mxu3 %vm122_vm0, %v12031_v58  ;;  %v3302_v5 = vmax.f32 %v1852_v53, 0.0  ;;  %v2004_v53 = vadd.f32 %v8246_v59, %v8528_v33  ;;  %v1840_v59 = vadd.f32 %v8460_v37, %v8254_v44  ;;  %v1995_v37 = vadd.f32 %v8198_v14, %v8528_v33 }
 0x3f8   :  { %v8530_v20 = vpop.f32.mrf.mxu0  ;;  %v8532_v31 = vpop.f32.mrf.mxu2  ;;  %v1992_v14 = vadd.f32 %v8184_v1, %v8528_v33 }
 0x3f9   :  { %12090 = vst [vmem:[#allocation316_spill] sm:$0xff] %v8530_v20  ;;  %v3153_v20 = vmax.f32 %v2016_v21, 0.0  ;;  %v3133_v21 = vmax.f32 %v2010_v38, 0.0  ;;  %v3942_v61 = vmin.f32 %v3302_v5, 6.0 }
 0x3fa   :  { %12091 = vst [vmem:[#allocation317_spill] sm:$0xff] %v8532_v31  ;;  %v1843_v31 = vadd.f32 %v1842_v43, %v8254_v44  ;;  %v1998_v43 = vadd.f32 %v8218_v9, %v8528_v33 }
 0x3fb   :  { %5909 = vmatmul.msk.f32.gmra.mxu0 %vm122_vm0, %v6582_v48  ;;  %v3793_v45 = vmin.f32 %v3153_v20, 6.0  ;;  %v3292_v48 = vmax.f32 %v1849_v7, 0.0  ;;  %v3113_v20 = vmax.f32 %v2004_v53, 0.0  ;;  %v3773_v5 = vmin.f32 %v3133_v21, 6.0 }
 0x3fc   :  { %v1854_v55 = vpop.f32.mrf.mxu1  ;;  %v3272_v7 = vmax.f32 %v1843_v31, 0.0  ;;  %v3093_v31 = vmax.f32 %v1998_v43, 0.0  ;;  %v1989_v21 = vadd.f32 %v8170_v54, %v8528_v33  ;;  %v1986_v54 = vadd.f32 %v8154_v30, %v8528_v33 }
 0x3fd   :  { %v1855_v15 = vadd.f32 %v1854_v55, %v8254_v44  ;;  %6018 = vmatmul.msk.f32.gmra.mxu2 %vm122_vm0, %v12028_v60  ;;  %v2007_v55 = vadd.f32 %v8272_v27, %v8528_v33  ;;  %v1846_v60 = vadd.f32 %v1845_v3, %v8254_v44  ;;  %v2001_v27 = vadd.f32 %v8232_v29, %v8528_v33 }
 0x3fe   :  { %v1837_v29 = vadd.f32 %v8444_v25, %v8254_v44  ;;  %v3753_v53 = vmin.f32 %v3113_v20, 6.0  ;;  %v3073_v20 = vmax.f32 %v1992_v14, 0.0 }
 0x3ff   :  { %v3312_v63 = vmax.f32 %v1855_v15, 0.0  ;;  %5957 = vmatmul.msk.f32.gmra.mxu1 %vm122_vm0, %v12036_v32  ;;  %6084 = vmatmul.msk.f32.gmra.mxu3 %vm122_vm0, %v12033_v24  ;;  %v3123_v3 = vmax.f32 %v2007_v55, 0.0  ;;  %v3282_v62 = vmax.f32 %v1846_v60, 0.0  ;;  %v3103_v60 = vmax.f32 %v2001_v27, 0.0 }
 0x400   :  { %v8554_v4 = vpop.f32.mrf.mxu0  ;;  %v8556_v6 = vpop.f32.mrf.mxu2  ;;  %v3262_v55 = vmax.f32 %v1840_v59, 0.0  ;;  %v3083_v27 = vmax.f32 %v1995_v37, 0.0  ;;  %v3063_v37 = vmax.f32 %v1989_v21, 0.0  ;;  %v3713_v14 = vmin.f32 %v3073_v20, 6.0 }
 0x401   :  { %12092 = vst [vmem:[#allocation318_spill] sm:$0xff] %v8554_v4  ;;  %v3952_v15 = vmin.f32 %v3312_v63, 6.0  ;;  %v3783_v4 = vmin.f32 %v3143_v11, 6.0  ;;  %v3932_v63 = vmin.f32 %v3292_v48, 6.0  ;;  %v3763_v9 = vmin.f32 %v3123_v3, 6.0 }
 0x402   :  { %v3922_v11 = vmin.f32 %v3282_v62, 6.0  ;;  %v3912_v62 = vmin.f32 %v3272_v7, 6.0  ;;  %v3743_v1 = vmin.f32 %v3103_v60, 6.0  ;;  %v1828_v3 = vadd.f32 %v8398_v10, %v8254_v44 }
 0x403   :  { %6102 = vmatmul.msk.f32.vlgmr.msra.gmra.mxu0 %vm122_vm0, %v6568_v40  ;;  %4622 = vmatpush.msrb.mxu1 %v3952_v15  ;;  %v3252_v15 = vmax.f32 %v1837_v29, 0.0  ;;  %v1825_v29 = vadd.f32 %v8382_v46, %v8254_v44  ;;  %v1983_v10 = vadd.f32 %v8138_v28, %v8528_v33  ;;  %v3723_v30 = vmin.f32 %v3083_v27, 6.0 }
 0x404   :  { %4682 = vmatpush.msra.mxu0 %v3793_v45  ;;  %v8569_v38 = vpop.f32.mrf.mxu1  ;;  %v1834_v45 = vadd.f32 %v8428_v17, %v8254_v44  ;;  %v1831_v17 = vadd.f32 %v8414_v12, %v8254_v44  ;;  %v3902_v12 = vmin.f32 %v3262_v55, 6.0  ;;  %v1822_v60 = vadd.f32 %v8366_v0, %v8254_v44 }
 0x405   :  { %6019 = vmatmul.msk.f32.gmra.mxu2 %vm122_vm0, %v12031_v58  ;;  %4623 = vmatpush.msrb.mxu1 %v3942_v61  ;;  %v8598_v61 = vpop.f32.mrf.mxu3  ;;  %v1980_v28 = vadd.f32 %v8122_v23, %v8528_v33  ;;  %v1977_v0 = vadd.f32 %v8106_v39, %v8528_v33  ;;  %v1816_v23 = vadd.f32 %v8332_v47, %v8254_v44  ;;  %v12140_v58 = vld [vmem:[#allocation64_spill] sm:$0xff] }
 0x406   :  { %4683 = vmatpush.msra.mxu0 %v3783_v4  ;;  %v661_v4 = vld [vmem:[%s11587_s3 + $0x48] sm:$0xff]  ;;  %12095 = vst [vmem:[#allocation321_spill] sm:$0xff] %v8598_v61  ;;  %v3242_v59 = vmax.f32 %v1834_v45, 0.0  ;;  %v3232_v7 = vmax.f32 %v1831_v17, 0.0  ;;  %v3043_v17 = vmax.f32 %v1983_v10, 0.0  ;;  %v3202_v21 = vmax.f32 %v1822_v60, 0.0 }
 0x407   :  { %5958 = vmatmul.msk.f32.gmra.mxu1 %vm122_vm0, %v12039_v18  ;;  %6085 = vmatmul.msk.f32.gmra.mxu3 %vm122_vm0, %v12036_v32  ;;  %v1810_v10 = vadd.f32 %v8278_v56, %v8254_v44 }
 0x408   :  { %4624 = vmatpush.msrb.mxu1 %v3932_v63  ;;  %4684 = vmatpush.msra.mxu0 %v3773_v5  ;;  %v8585_v48 = vpop.f32.mrf.mxu0  ;;  %v8587_v25 = vpop.f32.mrf.mxu2  ;;  %v3733_v5 = vmin.f32 %v3093_v31, 6.0  ;;  %v3892_v63 = vmin.f32 %v3252_v15, 6.0  ;;  %v3882_v46 = vmin.f32 %v3242_v59, 6.0  ;;  %v1819_v31 = vadd.f32 %v8350_v19, %v8254_v44  ;;  %v12097_v15 = vld [vmem:[#allocation7_spill] sm:$0xff] }
 0x409   :  { %12094 = vst [vmem:[#allocation320_spill] sm:$0xff] %v8585_v48  ;;  %2804 = vmatpush.msrb.mxu2 %v661_v4  ;;  %v3212_v4 = vmax.f32 %v1825_v29, 0.0  ;;  %v3033_v59 = vmax.f32 %v1980_v28, 0.0  ;;  %v3162_v56 = vmax.f32 %v1810_v10, 0.0 }
 0x40a   :  { %4625 = vmatpush.msrb.mxu1 %v3922_v11  ;;  %4685 = vmatpush.msra.mxu0 %v3763_v9  ;;  %v3222_v9 = vmax.f32 %v1828_v3, 0.0  ;;  %v3053_v11 = vmax.f32 %v1986_v54, 0.0  ;;  %v1813_v54 = vadd.f32 %v8308_v41, %v8254_v44  ;;  %v3192_v47 = vmax.f32 %v1819_v31, 0.0 }
 0x40b   :  { %6103 = vmatmul.msk.f32.gmra.mxu0 %vm122_vm0, %v6588_v51  ;;  %v3852_v20 = vmin.f32 %v3212_v4, 6.0  ;;  %v3842_v41 = vmin.f32 %v3202_v21, 6.0 }
 0x40c   :  { %4626 = vmatpush.msrb.mxu1 %v3912_v62  ;;  %4686 = vmatpush.msra.mxu0 %v3753_v53  ;;  %v8604_v43 = vpop.f32.mrf.mxu1  ;;  %v3872_v53 = vmin.f32 %v3232_v7, 6.0  ;;  %v3703_v62 = vmin.f32 %v3063_v37, 6.0  ;;  %v3862_v27 = vmin.f32 %v3222_v9, 6.0  ;;  %v3693_v39 = vmin.f32 %v3053_v11, 6.0 }
 0x40d   :  { %6020 = vmatmul.msk.f32.gmra.mxu2 %vm122_vm0, %v12033_v24  ;;  %v3023_v7 = vmax.f32 %v1977_v0, 0.0  ;;  %v3182_v37 = vmax.f32 %v1816_v23, 0.0  ;;  %v3172_v28 = vmax.f32 %v1813_v54, 0.0  ;;  %v3832_v11 = vmin.f32 %v3192_v47, 6.0 }
 0x40e   :  { %4627 = vmatpush.msrb.mxu1 %v3902_v12  ;;  %4687 = vmatpush.msra.mxu0 %v3743_v1  ;;  %v12098_v1 = vld [vmem:[#allocation255_spill] sm:$0xff]  ;;  %v8638_v12 = vpop.f32.mrf.mxu3 }
 0x40f   :  { %5959 = vmatmul.msk.f32.gmra.mxu1 %vm122_vm0, %v12042_v50  ;;  %6086 = vmatmul.msk.f32.gmra.mxu3 %vm122_vm0, %v12039_v18  ;;  %v1974_v3 = vadd.f32 %v12098_v1, %v8528_v33  ;;  %12099 = vst [vmem:[#allocation7_spill] sm:$0xff] %v8638_v12  ;;  %v3663_v4 = vmin.f32 %v3023_v7, 6.0 }
 0x410   :  { %4628 = vmatpush.msrb.mxu1 %v3892_v63  ;;  %4688 = vmatpush.msra.mxu0 %v3733_v5  ;;  %v8620_v45 = vpop.f32.mrf.mxu0  ;;  %v8622_v55 = vpop.f32.mrf.mxu2  ;;  %v12100_v5 = vld [vmem:[#allocation252_spill] sm:$0xff]  ;;  %v3683_v63 = vmin.f32 %v3043_v17, 6.0 }
 0x411   :  { %12096 = vst [vmem:[#allocation322_spill] sm:$0xff] %v8620_v45  ;;  %v1971_v29 = vadd.f32 %v12100_v5, %v8528_v33  ;;  %v3013_v9 = vmax.f32 %v1974_v3, 0.0  ;;  %v12109_v5 = vld [vmem:[#allocation10_spill] sm:$0xff] }
 0x412   :  { %4629 = vmatpush.msrb.mxu1 %v3882_v46  ;;  %4689 = vmatpush.msra.mxu0 %v3723_v30  ;;  %v3673_v46 = vmin.f32 %v3033_v59, 6.0  ;;  %v12106_v59 = vld [vmem:[#allocation9_spill] sm:$0xff] }
 0x413   :  { %6104 = vmatmul.msk.f32.gmra.mxu0 %vm122_vm0, %v12097_v15  ;;  %v3003_v31 = vmax.f32 %v1971_v29, 0.0  ;;  %v3653_v17 = vmin.f32 %v3013_v9, 6.0 }
 0x414   :  { %4630 = vmatpush.msrb.mxu1 %v3872_v53  ;;  %4690 = vmatpush.msra.mxu0 %v3713_v14  ;;  %v8634_v19 = vpop.f32.mrf.mxu1  ;;  %v12102_v14 = vld [vmem:[#allocation8_spill] sm:$0xff]  ;;  %v3822_v53 = vmin.f32 %v3182_v37, 6.0  ;;  %v12112_v37 = vld [vmem:[#allocation11_spill] sm:$0xff] }
 0x415   :  { %6021 = vmatmul.msk.f32.gmra.mxu2 %vm122_vm0, %v12036_v32  ;;  %v3643_v21 = vmin.f32 %v3003_v31, 6.0 }
 0x416   :  { %4631 = vmatpush.msrb.mxu1 %v3862_v27  ;;  %4691 = vmatpush.msra.mxu0 %v3703_v62  ;;  %v3812_v62 = vmin.f32 %v3172_v28, 6.0  ;;  %v8662_v23 = vpop.f32.mrf.mxu3  ;;  %v3802_v27 = vmin.f32 %v3162_v56, 6.0  ;;  %v12114_v28 = vld [vmem:[#allocation12_spill] sm:$0xff] }
 0x417   :  { %5960 = vmatmul.msk.f32.gmra.mxu1 %vm122_vm0, %v12045_v34  ;;  %6087 = vmatmul.msk.f32.gmra.mxu3 %vm122_vm0, %v12042_v50  ;;  %12103 = vst [vmem:[#allocation252_spill] sm:$0xff] %v8662_v23 }
 0x418   :  { %4632 = vmatpush.msrb.mxu1 %v3852_v20  ;;  %4692 = vmatpush.msra.mxu0 %v3693_v39  ;;  %v8652_v30 = vpop.f32.mrf.mxu0  ;;  %v8654_v60 = vpop.f32.mrf.mxu2 }
 0x419   :  { %12101 = vst [vmem:[#allocation255_spill] sm:$0xff] %v8652_v30 }
 0x41a   :  { %4633 = vmatpush.msrb.mxu1 %v3842_v41  ;;  %4693 = vmatpush.msra.mxu0 %v3683_v63 }
 0x41b   :  { %6105 = vmatmul.msk.f32.gmra.mxu0 %vm122_vm0, %v12102_v14 }
 0x41c   :  { %4634 = vmatpush.msrb.mxu1 %v3832_v11  ;;  %4694 = vmatpush.msra.mxu0 %v3673_v46  ;;  %v8658_v0 = vpop.f32.mrf.mxu1 }
 0x41d   :  { %6022 = vmatmul.msk.f32.gmra.mxu2 %vm122_vm0, %v12039_v18 }
 0x41e   :  { %4635 = vmatpush.msrb.mxu1 %v3822_v53  ;;  %4695 = vmatpush.msra.mxu0 %v3663_v4  ;;  %v8686_v20 = vpop.f32.mrf.mxu3  ;;  %v12117_v53 = vld [vmem:[#allocation13_spill] sm:$0xff] }
 0x41f   :  { %5961 = vmatmul.msk.f32.gmra.mxu1 %vm122_vm0, %v12047_v2  ;;  %6088 = vmatmul.msk.f32.gmra.mxu3 %vm122_vm0, %v12045_v34  ;;  %12108 = vst [vmem:[#allocation324_spill] sm:$0xff] %v8686_v20  ;;  %v12123_v20 = vld [vmem:[#allocation15_spill] sm:$0xff] }
 0x420   :  { %4636 = vmatpush.msrb.mxu1 %v3812_v62  ;;  %4696 = vmatpush.msra.mxu0 %v3653_v17  ;;  %v8668_v1 = vpop.f32.mrf.mxu0  ;;  %v8670_v3 = vpop.f32.mrf.mxu2 }
 0x421   :  { %12104 = vst [vmem:[#allocation8_spill] sm:$0xff] %v8668_v1 }
 0x422   :  { %12105 = vst [vmem:[#allocation323_spill] sm:$0xff] %v8670_v3  ;;  %4637 = vmatpush.msrb.mxu1 %v3802_v27  ;;  %4697 = vmatpush.msra.mxu0 %v3643_v21 }
 0x423   :  { %6106 = vmatmul.msk.f32.gmra.mxu0 %vm122_vm0, %v12106_v59 }
 0x424   :  { %v8674_v39 = vpop.f32.mrf.mxu1 }
 0x425   :  { %6023 = vmatmul.msk.f32.gmra.mxu2 %vm122_vm0, %v12042_v50  ;;  %v12138_v50 = vld [vmem:[#allocation6_spill] sm:$0xff] }
 0x426   :  { %v8702_v10 = vpop.f32.mrf.mxu3 }
 0x427   :  { %5962 = vmatmul.msk.f32.gmra.mxu1 %vm122_vm0, %v12051_v57  ;;  %6089 = vmatmul.msk.f32.gmra.mxu3 %vm122_vm0, %v12047_v2  ;;  %12111 = vst [vmem:[#allocation325_spill] sm:$0xff] %v8702_v10 }
 0x428   :  { %v8682_v54 = vpop.f32.mrf.mxu0  ;;  %v8684_v47 = vpop.f32.mrf.mxu2 }
 0x429   :  { %12107 = vst [vmem:[#allocation9_spill] sm:$0xff] %v8682_v54 }
 0x42b   :  { %6107 = vmatmul.msk.f32.gmra.mxu0 %vm122_vm0, %v12109_v5 }
 0x42c   :  { %v8690_v29 = vpop.f32.mrf.mxu1 }
 0x42d   :  { %6024 = vmatmul.msk.f32.gmra.mxu2 %vm122_vm0, %v12045_v34 }
 0x42e   :  { %v8722_v31 = vpop.f32.mrf.mxu3 }
 0x42f   :  { %5963 = vmatmul.msk.f32.gmra.mxu1 %vm122_vm0, %v12055_v16  ;;  %6090 = vmatmul.msk.f32.gmra.mxu3 %vm122_vm0, %v12051_v57  ;;  %12115 = vst [vmem:[#allocation327_spill] sm:$0xff] %v8722_v31  ;;  %v12120_v31 = vld [vmem:[#allocation14_spill] sm:$0xff] }
 0x430   :  { %v8698_v7 = vpop.f32.mrf.mxu0  ;;  %v8700_v63 = vpop.f32.mrf.mxu2 }
 0x431   :  { %12110 = vst [vmem:[#allocation10_spill] sm:$0xff] %v8698_v7 }
 0x433   :  { %6108 = vmatmul.msk.f32.gmra.mxu0 %vm122_vm0, %v12112_v37 }
 0x434   :  { %v8706_v41 = vpop.f32.mrf.mxu1 }
 0x435   :  { %6025 = vmatmul.msk.f32.gmra.mxu2 %vm122_vm0, %v12047_v2  ;;  %v2064_v2 = vadd.f32 %v8654_v60, %v8528_v33  ;;  %v2058_v60 = vadd.f32 %v8587_v25, %v8528_v33 }
 0x436   :  { %v8740_v62 = vpop.f32.mrf.mxu3 }
 0x437   :  { %5964 = vmatmul.msk.f32.gmra.mxu1 %vm122_vm0, %v12059_v8  ;;  %6091 = vmatmul.msk.f32.gmra.mxu3 %vm122_vm0, %v12055_v16  ;;  %12118 = vst [vmem:[#allocation329_spill] sm:$0xff] %v8740_v62 }
 0x438   :  { %v8714_v9 = vpop.f32.mrf.mxu0  ;;  %v8716_v46 = vpop.f32.mrf.mxu2 }
 0x439   :  { %12113 = vst [vmem:[#allocation326_spill] sm:$0xff] %v8714_v9  ;;  %v12128_v9 = vld [vmem:[#allocation17_spill] sm:$0xff] }
 0x43b   :  { %6109 = vmatmul.msk.f32.gmra.mxu0 %vm122_vm0, %v12114_v28  ;;  %v12157_v28 = vld [vmem:[#allocation310_spill] sm:$0xff] }
 0x43c   :  { %v8720_v11 = vpop.f32.mrf.mxu1  ;;  %v2046_v37 = vadd.f32 %v12157_v28, %v8528_v33  ;;  %v12160_v28 = vld [vmem:[#allocation157_spill] sm:$0xff] }
 0x43d   :  { %6026 = vmatmul.msk.f32.gmra.mxu2 %vm122_vm0, %v12051_v57 }
 0x43e   :  { %v8764_v23 = vpop.f32.mrf.mxu3  ;;  %v3253_v3 = vmax.f32 %v2046_v37, 0.0  ;;  %v12166_v37 = vld [vmem:[#allocation302_spill] sm:$0xff] }
 0x43f   :  { %5965 = vmatmul.msk.f32.gmra.mxu1 %vm122_vm0, %v12063_v35  ;;  %6092 = vmatmul.msk.f32.gmra.mxu3 %vm122_vm0, %v12059_v8  ;;  %12122 = vst [vmem:[#allocation332_spill] sm:$0xff] %v8764_v23  ;;  %v12126_v23 = vld [vmem:[#allocation16_spill] sm:$0xff] }
 0x440   :  { %v8730_v4 = vpop.f32.mrf.mxu0  ;;  %v8732_v56 = vpop.f32.mrf.mxu2 }
 0x441   :  { %12116 = vst [vmem:[#allocation328_spill] sm:$0xff] %v8730_v4 }
 0x443   :  { %6110 = vmatmul.msk.f32.gmra.mxu0 %vm122_vm0, %v12117_v53 }
 0x444   :  { %v8736_v17 = vpop.f32.mrf.mxu1 }
 0x445   :  { %6027 = vmatmul.msk.f32.gmra.mxu2 %vm122_vm0, %v12055_v16 }
 0x446   :  { %v8780_v30 = vpop.f32.mrf.mxu3 }
 0x447   :  { %5966 = vmatmul.msk.f32.gmra.mxu1 %vm122_vm0, %v12066_v36  ;;  %6093 = vmatmul.msk.f32.gmra.mxu3 %vm122_vm0, %v12063_v35  ;;  %12125 = vst [vmem:[#allocation334_spill] sm:$0xff] %v8780_v30 }
 0x448   :  { %v8746_v21 = vpop.f32.mrf.mxu0  ;;  %v8748_v27 = vpop.f32.mrf.mxu2 }
 0x449   :  { %12119 = vst [vmem:[#allocation330_spill] sm:$0xff] %v8746_v21 }
 0x44b   :  { %6111 = vmatmul.msk.f32.gmra.mxu0 %vm122_vm0, %v12120_v31 }
 0x44c   :  { %v8752_v61 = vpop.f32.mrf.mxu1 }
 0x44d   :  { %6028 = vmatmul.msk.f32.gmra.mxu2 %vm122_vm0, %v12059_v8  ;;  %v12137_v8 = vld [vmem:[#allocation20_spill] sm:$0xff] }
 0x44e   :  { %v8796_v4 = vpop.f32.mrf.mxu3 }
 0x44f   :  { %5967 = vmatmul.msk.f32.gmra.mxu1 %vm122_vm0, %v12070_v26  ;;  %6094 = vmatmul.msk.f32.gmra.mxu3 %vm122_vm0, %v12066_v36  ;;  %12129 = vst [vmem:[#allocation336_spill] sm:$0xff] %v8796_v4 }
 0x450   :  { %v8760_v62 = vpop.f32.mrf.mxu0  ;;  %v8762_v12 = vpop.f32.mrf.mxu2 }
 0x451   :  { %12121 = vst [vmem:[#allocation331_spill] sm:$0xff] %v8760_v62 }
 0x453   :  { %6112 = vmatmul.msk.f32.gmra.mxu0 %vm122_vm0, %v12123_v20 }
 0x454   :  { %v8768_v10 = vpop.f32.mrf.mxu1 }
 0x455   :  { %6029 = vmatmul.msk.f32.gmra.mxu2 %vm122_vm0, %v12063_v35 }
 0x456   :  { %v8812_v4 = vpop.f32.mrf.mxu3 }
 0x457   :  { %5968 = vmatmul.msk.f32.gmra.mxu1 %vm122_vm0, %v12074_v42  ;;  %6095 = vmatmul.msk.f32.gmra.mxu3 %vm122_vm0, %v12070_v26  ;;  %12132 = vst [vmem:[#allocation338_spill] sm:$0xff] %v8812_v4 }
 0x458   :  { %v8776_v48 = vpop.f32.mrf.mxu0  ;;  %v8778_v45 = vpop.f32.mrf.mxu2 }
 0x459   :  { %12124 = vst [vmem:[#allocation333_spill] sm:$0xff] %v8776_v48  ;;  %v12131_v48 = vld [vmem:[#allocation18_spill] sm:$0xff] }
 0x45b   :  { %6113 = vmatmul.msk.f32.gmra.mxu0 %vm122_vm0, %v12126_v23 }
 0x45c   :  { %v1890_v1 = vpop.f32.mrf.mxu1 }
 0x45d   :  { %6030 = vmatmul.msk.f32.gmra.mxu2 %vm122_vm0, %v12066_v36  ;;  %v12134_v36 = vld [vmem:[#allocation19_spill] sm:$0xff]  ;;  %v1891_v32 = vadd.f32 %v1890_v1, %v8254_v44 }
 0x45f   :  { %5969 = vmatmul.msk.f32.gmra.mxu1 %vm122_vm0, %v7643_v49  ;;  %6096 = vmatmul.msk.f32.gmra.mxu3 %vm122_vm0, %v12074_v42 }
 0x460   :  { %v8790_v54 = vpop.f32.mrf.mxu0  ;;  %v8792_v7 = vpop.f32.mrf.mxu2 }
 0x461   :  { %12127 = vst [vmem:[#allocation335_spill] sm:$0xff] %v8790_v54 }
 0x463   :  { %6114 = vmatmul.msk.f32.gmra.mxu0 %vm122_vm0, %v12128_v9 }
 0x464   :  { %v1893_v30 = vpop.f32.mrf.mxu1 }
 0x465   :  { %6031 = vmatmul.msk.f32.gmra.mxu2 %vm122_vm0, %v12070_v26 }
 0x467   :  { %5970 = vmatmul.msk.f32.gmra.mxu1 %vm122_vm0, %v12081_v52  ;;  %6097 = vmatmul.msk.f32.gmra.mxu3 %vm122_vm0, %v7643_v49 }
 0x468   :  { %v8804_v21 = vpop.f32.mrf.mxu0  ;;  %v8806_v62 = vpop.f32.mrf.mxu2 }
 0x469   :  { %12130 = vst [vmem:[#allocation337_spill] sm:$0xff] %v8804_v21 }
 0x46b   :  { %6115 = vmatmul.msk.f32.gmra.mxu0 %vm122_vm0, %v12131_v48  ;;  %v12144_v48 = vld [vmem:[#allocation21_spill] sm:$0xff] }
 0x46c   :  { %v1896_v54 = vpop.f32.mrf.mxu1 }
 0x46d   :  { %6032 = vmatmul.msk.f32.gmra.mxu2 %vm122_vm0, %v12074_v42 }
 0x46f   :  { %5971 = vmatmul.msk.f32.gmra.mxu1 %vm122_vm0, %v12084_v22  ;;  %6098 = vmatmul.msk.f32.gmra.mxu3 %vm122_vm0, %v12081_v52 }
 0x470   :  { %v8818_v26 = vpop.f32.mrf.mxu0  ;;  %v8820_v21 = vpop.f32.mrf.mxu2 }
 0x471   :  { %12133 = vst [vmem:[#allocation339_spill] sm:$0xff] %v8818_v26  ;;  %v8834_v26 = vpop.f32.mrf.mxu3 }
 0x472   :  { %12136 = vst [vmem:[#allocation341_spill] sm:$0xff] %v8834_v26 }
 0x473   :  { %6116 = vmatmul.msk.f32.gmra.mxu0 %vm122_vm0, %v12134_v36 }
 0x474   :  { %v1899_v35 = vpop.f32.mrf.mxu1 }
 0x475   :  { %6033 = vmatmul.msk.f32.gmra.mxu2 %vm122_vm0, %v7643_v49  ;;  %v1900_v16 = vadd.f32 %v1899_v35, %v8254_v44  ;;  %v2061_v35 = vadd.f32 %v8622_v55, %v8528_v33  ;;  %v12142_v55 = vld [vmem:[#allocation137_spill] sm:$0xff] }
 0x477   :  { %5972 = vmatmul.msk.f32.gmra.mxu1 %vm122_vm0, %v7697_v13  ;;  %6099 = vmatmul.msk.f32.gmra.mxu3 %vm122_vm0, %v12084_v22  ;;  %v3462_v26 = vmax.f32 %v1900_v16, 0.0  ;;  %v2055_v16 = vadd.f32 %v8556_v6, %v8528_v33  ;;  %v12147_v6 = vld [vmem:[#allocation145_spill] sm:$0xff] }
 0x478   :  { %v8830_v4 = vpop.f32.mrf.mxu0  ;;  %v8832_v42 = vpop.f32.mrf.mxu2  ;;  %v8883_v9 = vadd.f32 %v12147_v6, %v12140_v58  ;;  %v12150_v6 = vld [vmem:[#allocation173_spill] sm:$0xff] }
 0x479   :  { %12135 = vst [vmem:[#allocation340_spill] sm:$0xff] %v8830_v4  ;;  %v1897_v4 = vadd.f32 %v1896_v54, %v8254_v44  ;;  %v3313_v54 = vmax.f32 %v2064_v2, 0.0  ;;  %v1888_v2 = vadd.f32 %v8768_v10, %v8254_v44  ;;  %v1064_v23 = vadd.f32 %v12150_v6, %v12140_v58 }
 0x47a   :  { %v3283_v20 = vmax.f32 %v2055_v16, 0.0  ;;  %v12153_v16 = vld [vmem:[#allocation153_spill] sm:$0xff] }
 0x47b   :  { %6117 = vmatmul.msk.f32.gmra.mxu0 %vm122_vm0, %v12137_v8  ;;  %v3452_v24 = vmax.f32 %v1897_v4, 0.0  ;;  %v12141_v8 = vld [vmem:[#allocation129_spill] sm:$0xff]  ;;  %v3953_v10 = vmin.f32 %v3313_v54, 6.0  ;;  %v8911_v6 = vadd.f32 %v12153_v16, %v12140_v58  ;;  %v3458_v16 = vmax.f32 %v1064_v23, 0.0 }
 0x47c   :  { %v1902_v57 = vpop.f32.mrf.mxu1  ;;  %v8861_v36 = vadd.f32 %v12141_v8, %v12140_v58  ;;  %v4102_v8 = vmin.f32 %v3462_v26, 6.0  ;;  %v12146_v4 = vld [vmem:[#allocation141_spill] sm:$0xff]  ;;  %v1885_v26 = vadd.f32 %v8752_v61, %v8254_v44  ;;  %v3422_v61 = vmax.f32 %v1888_v2, 0.0 }
 0x47d   :  { %v1903_v49 = vadd.f32 %v1902_v57, %v8254_v44  ;;  %6034 = vmatmul.msk.f32.gmra.mxu2 %vm122_vm0, %v12081_v52  ;;  %v1894_v57 = vadd.f32 %v1893_v30, %v8254_v44  ;;  %v8865_v30 = vadd.f32 %v12142_v55, %v12140_v58  ;;  %v8879_v55 = vadd.f32 %v12146_v4, %v12140_v58  ;;  %v12149_v4 = vld [vmem:[#allocation149_spill] sm:$0xff] }
 0x47e   :  { %v1879_v2 = vadd.f32 %v8720_v11, %v8254_v44  ;;  %v8932_v23 = vld [vmem:[%s11589_s5] sm:$0xff] }
 0x47f   :  { %v3472_v34 = vmax.f32 %v1903_v49, 0.0  ;;  %5973 = vmatmul.msk.f32.gmra.mxu1 %vm122_vm0, %v12138_v50  ;;  %6100 = vmatmul.msk.f32.gmra.mxu3 %vm122_vm0, %v7697_v13  ;;  %v3442_v25 = vmax.f32 %v1894_v57, 0.0  ;;  %v4092_v57 = vmin.f32 %v3452_v24, 6.0  ;;  %v1882_v24 = vadd.f32 %v8736_v17, %v8254_v44 }
 0x480   :  { %v8852_v18 = vpop.f32.mrf.mxu2  ;;  %v8854_v52 = vpop.f32.mrf.mxu0 }
 0x481   :  { %12139 = vst [vmem:[#allocation342_spill] sm:$0xff] %v8854_v52  ;;  %v4112_v49 = vmin.f32 %v3472_v34, 6.0  ;;  %v8869_v52 = vpop.f32.mrf.mxu3  ;;  %v3303_v34 = vmax.f32 %v2061_v35, 0.0  ;;  %v3432_v35 = vmax.f32 %v1891_v32, 0.0  ;;  %v4082_v54 = vmin.f32 %v3442_v25, 6.0 }
 0x482   :  { %12143 = vst [vmem:[#allocation64_spill] sm:$0xff] %v8869_v52  ;;  %v12148_v52 = vld [vmem:[#allocation178_spill] sm:$0xff]  ;;  %v3412_v25 = vmax.f32 %v1885_v26, 0.0  ;;  %v3402_v11 = vmax.f32 %v1882_v24, 0.0  ;;  %v4062_v26 = vmin.f32 %v3422_v61, 6.0 }
 0x483   :  { %6118 = vmatmul.msk.f32.gmra.mxu0 %vm122_vm0, %v12144_v48  ;;  %4642 = vmatpush.msra.mxu2 %v4112_v49  ;;  %v1067_v48 = vadd.f32 %v12148_v52, %v12140_v58  ;;  %v3293_v49 = vmax.f32 %v2058_v60, 0.0  ;;  %v12151_v52 = vld [vmem:[#allocation317_spill] sm:$0xff]  ;;  %v3943_v32 = vmin.f32 %v3303_v34, 6.0 }
 0x484   :  { %v8875_v1 = vpop.f32.mrf.mxu1  ;;  %v2052_v60 = vadd.f32 %v12151_v52, %v8528_v33  ;;  %v12154_v52 = vld [vmem:[#allocation169_spill] sm:$0xff] }
 0x485   :  { %12145 = vst [vmem:[#allocation129_spill] sm:$0xff] %v8875_v1  ;;  %6035 = vmatmul.msk.f32.gmra.mxu2 %vm122_vm0, %v12084_v22  ;;  %v8893_v1 = vadd.f32 %v12149_v4, %v12140_v58  ;;  %v1061_v22 = vadd.f32 %v12154_v52, %v12140_v58  ;;  %v3468_v31 = vmax.f32 %v1067_v48, 0.0  ;;  %v12155_v34 = vld [vmem:[#allocation313_spill] sm:$0xff]  ;;  %v3933_v17 = vmin.f32 %v3293_v49, 6.0  ;;  %v12158_v48 = vld [vmem:[#allocation23_spill] sm:$0xff] }
 0x486   :  { %4643 = vmatpush.msra.mxu2 %v4102_v8  ;;  %v2049_v53 = vadd.f32 %v12155_v34, %v8528_v33  ;;  %v3273_v52 = vmax.f32 %v2052_v60, 0.0  ;;  %v3923_v34 = vmin.f32 %v3283_v20, 6.0  ;;  %v1876_v49 = vadd.f32 %v8706_v41, %v8254_v44  ;;  %v12161_v20 = vld [vmem:[#allocation161_spill] sm:$0xff]  ;;  %v12162_v41 = vld [vmem:[#allocation307_spill] sm:$0xff] }
 0x487   :  { %6101 = vmatmul.msk.f32.gmra.mxu3 %vm122_vm0, %v12138_v50  ;;  %6166 = vmatmul.msk.f32.vlgmr.msra.gmra.mxu1 %vm122_vm0, %v6568_v40  ;;  %v8936_v60 = vadd.f32 %v12160_v28, %v12140_v58  ;;  %v2043_v24 = vadd.f32 %v12162_v41, %v8528_v33  ;;  %v12164_v28 = vld [vmem:[#allocation304_spill] sm:$0xff]  ;;  %v1873_v41 = vadd.f32 %v8690_v29, %v8254_v44 }
 0x488   :  { %4644 = vmatpush.msra.mxu2 %v4092_v57  ;;  %4702 = vmatpush.msra.mxu1 %v3953_v10  ;;  %v8905_v8 = vpop.f32.mrf.mxu2  ;;  %v8907_v4 = vpop.f32.mrf.mxu0  ;;  %v4072_v10 = vmin.f32 %v3432_v35, 6.0  ;;  %v12156_v57 = vld [vmem:[#allocation165_spill] sm:$0xff]  ;;  %v3263_v61 = vmax.f32 %v2049_v53, 0.0 }
 0x489   :  { %12152 = vst [vmem:[#allocation137_spill] sm:$0xff] %v8907_v4  ;;  %v1058_v4 = vadd.f32 %v12156_v57, %v12140_v58  ;;  %v3392_v57 = vmax.f32 %v1879_v2, 0.0  ;;  %v4042_v2 = vmin.f32 %v3402_v11, 6.0 }
 0x48a   :  { %4645 = vmatpush.msra.mxu2 %v4082_v54  ;;  %4703 = vmatpush.msra.mxu1 %v3943_v32  ;;  %v1055_v32 = vadd.f32 %v12161_v20, %v12140_v58  ;;  %v8942_v54 = vpop.f32.mrf.mxu3  ;;  %v3913_v20 = vmin.f32 %v3273_v52, 6.0  ;;  %v2037_v52 = vadd.f32 %v12166_v37, %v8528_v33  ;;  %v3903_v29 = vmin.f32 %v3263_v61, 6.0  ;;  %v12169_v61 = vld [vmem:[#allocation296_spill] sm:$0xff] }
 0x48b   :  { %6119 = vmatmul.msk.f32.gmra.mxu0 %vm122_vm0, %v12158_v48  ;;  %12163 = vst [vmem:[#allocation145_spill] sm:$0xff] %v8942_v54  ;;  %v2040_v48 = vadd.f32 %v12164_v28, %v8528_v33  ;;  %v3438_v53 = vmax.f32 %v1058_v4, 0.0  ;;  %v1870_v28 = vadd.f32 %v8674_v39, %v8254_v44  ;;  %v4032_v11 = vmin.f32 %v3392_v57, 6.0 }
 0x48c   :  { %4646 = vmatpush.msra.mxu2 %v4072_v10  ;;  %4704 = vmatpush.msra.mxu1 %v3933_v17  ;;  %v8927_v35 = vpop.f32.mrf.mxu1  ;;  %v3448_v17 = vmax.f32 %v1061_v22, 0.0  ;;  %v4108_v10 = vmin.f32 %v3468_v31, 6.0  ;;  %v4098_v22 = vmin.f32 %v3458_v16, 6.0  ;;  %v3382_v31 = vmax.f32 %v1876_v49, 0.0  ;;  %v12167_v16 = vld [vmem:[#allocation299_spill] sm:$0xff] }
 0x48d   :  { %12159 = vst [vmem:[#allocation141_spill] sm:$0xff] %v8927_v35  ;;  %6036 = vmatmul.msk.f32.gmra.mxu2 %vm122_vm0, %v7697_v13  ;;  %v4052_v35 = vmin.f32 %v3412_v25, 6.0  ;;  %v3428_v54 = vmax.f32 %v1055_v32, 0.0  ;;  %v2034_v49 = vadd.f32 %v12167_v16, %v8528_v33  ;;  %v3372_v37 = vmax.f32 %v1873_v41, 0.0  ;;  %v12173_v16 = vld [vmem:[#allocation290_spill] sm:$0xff] }
 0x48e   :  { %4647 = vmatpush.msra.mxu2 %v4062_v26  ;;  %4705 = vmatpush.msra.mxu1 %v3923_v34  ;;  %v3243_v26 = vmax.f32 %v2043_v24, 0.0  ;;  %v4088_v4 = vmin.f32 %v3448_v17, 6.0  ;;  %v12168_v24 = vld [vmem:[#allocation26_spill] sm:$0xff]  ;;  %v3418_v39 = vmax.f32 %v8936_v60, 0.0  ;;  %v4078_v32 = vmin.f32 %v3438_v53, 6.0 }
 0x48f   :  { %6167 = vmatmul.msk.f32.gmra.mxu1 %vm122_vm0, %v6588_v51  ;;  %4298 = vmatmul.f32.vlgmr.msrb.gmra.mxu3 %v8932_v23  ;;  %v2031_v17 = vadd.f32 %v12169_v61, %v8528_v33  ;;  %v1864_v41 = vadd.f32 %v8634_v19, %v8254_v44  ;;  %v3362_v60 = vmax.f32 %v1870_v28, 0.0  ;;  %v3408_v53 = vmax.f32 %v8911_v6, 0.0  ;;  %v12174_v61 = vld [vmem:[#allocation288_spill] sm:$0xff] }
 0x490   :  { %4322 = vmatpush.msrb.mxu3 %v4108_v10  ;;  %4648 = vmatpush.msra.mxu2 %v4052_v35  ;;  %v8953_v25 = vpop.f32.mrf.mxu2  ;;  %v8955_v34 = vpop.f32.mrf.mxu0  ;;  %v3233_v35 = vmax.f32 %v2040_v48, 0.0  ;;  %v3893_v10 = vmin.f32 %v3253_v3, 6.0  ;;  %v3223_v3 = vmax.f32 %v2037_v52, 0.0  ;;  %v3883_v48 = vmin.f32 %v3243_v26, 6.0 }
 0x491   :  { %12165 = vst [vmem:[#allocation178_spill] sm:$0xff] %v8955_v34  ;;  %4706 = vmatpush.msra.mxu1 %v3913_v20  ;;  %v1867_v34 = vadd.f32 %v8658_v0, %v8254_v44  ;;  %v4022_v20 = vmin.f32 %v3382_v31, 6.0  ;;  %v8975_v0 = vld [vmem:[%s11589_s5 + $0x8] sm:$0xff]  ;;  %v12171_v31 = vld [vmem:[#allocation293_spill] sm:$0xff]  ;;  %v1861_v52 = vadd.f32 %v8604_v43, %v8254_v44  ;;  %v4012_v19 = vmin.f32 %v3372_v37, 6.0 }
 0x492   :  { %4323 = vmatpush.msrb.mxu3 %v4098_v22  ;;  %4649 = vmatpush.msra.mxu2 %v4042_v2  ;;  %v4068_v22 = vmin.f32 %v3428_v54, 6.0  ;;  %v2028_v2 = vadd.f32 %v12171_v31, %v8528_v33  ;;  %v8986_v28 = vpop.f32.mrf.mxu3  ;;  %v3398_v6 = vmax.f32 %v8893_v1, 0.0  ;;  %v4058_v54 = vmin.f32 %v3418_v39, 6.0 }
 0x493   :  { %4707 = vmatpush.msra.mxu1 %v3903_v29  ;;  %6120 = vmatmul.msk.f32.gmra.mxu0 %vm122_vm0, %v12168_v24  ;;  %v3213_v29 = vmax.f32 %v2034_v49, 0.0  ;;  %v3352_v26 = vmax.f32 %v1867_v34, 0.0  ;;  %12172 = vst [vmem:[#allocation173_spill] sm:$0xff] %v8986_v28  ;;  %v3203_v49 = vmax.f32 %v2031_v17, 0.0  ;;  %v3863_v34 = vmin.f32 %v3223_v3, 6.0 }
 0x494   :  { %4324 = vmatpush.msrb.mxu3 %v4088_v4  ;;  %4650 = vmatpush.msra.mxu2 %v4032_v11  ;;  %v8970_v57 = vpop.f32.mrf.mxu1  ;;  %v3873_v4 = vmin.f32 %v3233_v35, 6.0  ;;  %v2025_v11 = vadd.f32 %v12173_v16, %v8528_v33  ;;  %v3342_v37 = vmax.f32 %v1864_v41, 0.0  ;;  %v3388_v1 = vmax.f32 %v8883_v9, 0.0  ;;  %v12178_v16 = vld [vmem:[#allocation285_spill] sm:$0xff] }
 0x495   :  { %12170 = vst [vmem:[#allocation149_spill] sm:$0xff] %v8970_v57  ;;  %4708 = vmatpush.msra.mxu1 %v3893_v10  ;;  %6037 = vmatmul.msk.f32.gmra.mxu2 %vm122_vm0, %v12138_v50  ;;  %v1858_v10 = vadd.f32 %v8569_v38, %v8254_v44  ;;  %v4048_v39 = vmin.f32 %v3408_v53, 6.0  ;;  %v2022_v17 = vadd.f32 %v12174_v61, %v8528_v33  ;;  %v3332_v31 = vmax.f32 %v1861_v52, 0.0  ;;  %v12175_v38 = vld [vmem:[#allocation133_spill] sm:$0xff] }
 0x496   :  { %4325 = vmatpush.msrb.mxu3 %v4078_v32  ;;  %4651 = vmatpush.msra.mxu2 %v4022_v20  ;;  %v4002_v32 = vmin.f32 %v3362_v60, 6.0  ;;  %v3992_v3 = vmin.f32 %v3352_v26, 6.0  ;;  %v1034_v41 = vadd.f32 %v12175_v38, %v12140_v58  ;;  %v3378_v60 = vmax.f32 %v8879_v55, 0.0  ;;  %v12176_v53 = vld [vmem:[#allocation29_spill] sm:$0xff] }
 0x497   :  { %4709 = vmatpush.msra.mxu1 %v3883_v48  ;;  %4318 = vmatmul.f32.vlgmr.msra.gmra.mxu3 %v8975_v0  ;;  %v3193_v48 = vmax.f32 %v2028_v2, 0.0  ;;  %v2109_v9 = vadd.f32 %v8953_v25, %v8528_v33  ;;  %v3183_v2 = vmax.f32 %v2025_v11, 0.0  ;;  %v3322_v52 = vmax.f32 %v1858_v10, 0.0 }
 0x498   :  { %6168 = vmatmul.msk.f32.gmra.mxu1 %vm122_vm0, %v12097_v15  ;;  %4326 = vmatpush.msrb.mxu3 %v4068_v22  ;;  %v2111_v35 = vpop.f32.mrf.mxu2  ;;  %v8994_v43 = vpop.f32.mrf.mxu0  ;;  %v3853_v22 = vmin.f32 %v3213_v29, 6.0  ;;  %v3843_v29 = vmin.f32 %v3203_v49, 6.0  ;;  %v3982_v26 = vmin.f32 %v3342_v37, 6.0  ;;  %v2019_v55 = vadd.f32 %v12178_v16, %v8528_v33 }
 0x499   :  { %4652 = vmatpush.msra.mxu2 %v4012_v19  ;;  %4710 = vmatpush.msra.mxu1 %v3873_v4  ;;  %v2112_v20 = vadd.f32 %v2111_v35, %v8528_v33  ;;  %v4038_v4 = vmin.f32 %v3398_v6, 6.0  ;;  %v2106_v6 = vadd.f32 %v8905_v8, %v8528_v33  ;;  %v3368_v35 = vmax.f32 %v8865_v30, 0.0  ;;  %v12180_v30 = vld [vmem:[#allocation125_spill] sm:$0xff] }
 0x49a   :  { %4327 = vmatpush.msrb.mxu3 %v4058_v54  ;;  %v4028_v54 = vmin.f32 %v3388_v1, 6.0  ;;  %v3173_v11 = vmax.f32 %v2022_v17, 0.0  ;;  %v3833_v49 = vmin.f32 %v3193_v48, 6.0  ;;  %v4018_v10 = vmin.f32 %v3378_v60, 6.0 }
 0x49b   :  { %4653 = vmatpush.msra.mxu2 %v4002_v32  ;;  %4711 = vmatpush.msra.mxu1 %v3863_v34  ;;  %v3473_v25 = vmax.f32 %v2112_v20, 0.0  ;;  %v3972_v34 = vmin.f32 %v3332_v31, 6.0  ;;  %v2103_v37 = vadd.f32 %v8852_v18, %v8528_v33  ;;  %v3463_v32 = vmax.f32 %v2109_v9, 0.0  ;;  %v12181_v31 = vld [vmem:[#allocation121_spill] sm:$0xff]  ;;  %v9033_v9 = vpop.f32.mrf.mxu3 }
 0x49c   :  { %6121 = vmatmul.msk.f32.gmra.mxu0 %vm122_vm0, %v12176_v53  ;;  %4328 = vmatpush.msrb.mxu3 %v4048_v39  ;;  %v9009_v19 = vpop.f32.mrf.mxu1  ;;  %v1028_v1 = vadd.f32 %v12180_v30, %v12140_v58  ;;  %v3358_v39 = vmax.f32 %v1034_v41, 0.0  ;;  %v3823_v61 = vmin.f32 %v3183_v2, 6.0  ;;  %v3962_v17 = vmin.f32 %v3322_v52, 6.0  ;;  %12182 = vst [vmem:[#allocation169_spill] sm:$0xff] %v9033_v9  ;;  %v12236_v9 = vld [vmem:[#allocation48_spill] sm:$0xff] }
 0x49d   :  { %12177 = vst [vmem:[#allocation317_spill] sm:$0xff] %v9009_v19  ;;  %4654 = vmatpush.msra.mxu2 %v3992_v3  ;;  %4712 = vmatpush.msra.mxu1 %v3853_v22  ;;  %v3163_v20 = vmax.f32 %v2019_v55, 0.0  ;;  %v2100_v18 = vadd.f32 %v8832_v42, %v8528_v33  ;;  %v3453_v48 = vmax.f32 %v2106_v6, 0.0  ;;  %v4113_v22 = vmin.f32 %v3473_v25, 6.0  ;;  %v12183_v42 = vld [vmem:[#allocation32_spill] sm:$0xff] }
 0x49e   :  { %6230 = vmatmul.msk.f32.vlgmr.msrb.gmra.mxu2 %vm122_vm0, %v6568_v40  ;;  %4329 = vmatpush.msrb.mxu3 %v4038_v4  ;;  %v1025_v3 = vadd.f32 %v12181_v31, %v12140_v58  ;;  %v3348_v38 = vmax.f32 %v8861_v36, 0.0  ;;  %v4008_v60 = vmin.f32 %v3368_v35, 6.0  ;;  %v3813_v4 = vmin.f32 %v3173_v11, 6.0 }
 0x49f   :  { %4655 = vmatpush.msra.mxu2 %v3982_v26  ;;  %4713 = vmatpush.msra.mxu1 %v3843_v29  ;;  %v2097_v41 = vadd.f32 %v8820_v21, %v8528_v33  ;;  %v3443_v2 = vmax.f32 %v2103_v37, 0.0  ;;  %v4103_v29 = vmin.f32 %v3463_v32, 6.0  ;;  %v12185_v26 = vld [vmem:[#allocation24_spill] sm:$0xff]  ;;  %v3338_v55 = vmax.f32 %v1028_v1, 0.0 }
 0x4a0   :  { %6169 = vmatmul.msk.f32.gmra.mxu1 %vm122_vm0, %v12102_v14  ;;  %4330 = vmatpush.msrb.mxu3 %v4028_v54  ;;  %v9022_v8 = vpop.f32.mrf.mxu2  ;;  %v9024_v40 = vpop.f32.mrf.mxu0  ;;  %v1115_v36 = vadd.f32 %v12185_v26, %v12140_v58  ;;  %v12186_v54 = vld [vmem:[#allocation117_spill] sm:$0xff]  ;;  %v3998_v6 = vmin.f32 %v3358_v39, 6.0  ;;  %v3803_v25 = vmin.f32 %v3163_v20, 6.0  ;;  %v2094_v21 = vadd.f32 %v8806_v62, %v8528_v33 }
 0x4a1   :  { %12179 = vst [vmem:[#allocation153_spill] sm:$0xff] %v9022_v8  ;;  %4656 = vmatpush.msra.mxu2 %v3972_v34  ;;  %4714 = vmatpush.msra.mxu1 %v3833_v49  ;;  %v1022_v16 = vadd.f32 %v12186_v54, %v12140_v58  ;;  %v3433_v35 = vmax.f32 %v2100_v18, 0.0  ;;  %v4093_v11 = vmin.f32 %v3453_v48, 6.0  ;;  %v3328_v49 = vmax.f32 %v1025_v3, 0.0  ;;  %v12190_v3 = vld [vmem:[#allocation230_spill] sm:$0xff] }
 0x4a2   :  { %4331 = vmatpush.msrb.mxu3 %v4018_v10  ;;  %v3988_v34 = vmin.f32 %v3348_v38, 6.0  ;;  %v12187_v10 = vld [vmem:[#allocation238_spill] sm:$0xff]  ;;  %v2091_v32 = vadd.f32 %v8792_v7, %v8528_v33  ;;  %v3423_v30 = vmax.f32 %v2097_v41, 0.0  ;;  %v4083_v1 = vmin.f32 %v3443_v2, 6.0 }
 0x4a3   :  { %4657 = vmatpush.msra.mxu2 %v3962_v17  ;;  %4715 = vmatpush.msra.mxu1 %v3823_v61  ;;  %v1112_v37 = vadd.f32 %v12187_v10, %v12140_v58  ;;  %v3628_v61 = vmax.f32 %v1115_v36, 0.0  ;;  %v3318_v17 = vmax.f32 %v1022_v16, 0.0  ;;  %v3978_v20 = vmin.f32 %v3338_v55, 6.0  ;;  %v12193_v54 = vld [vmem:[#allocation226_spill] sm:$0xff]  ;;  %v9073_v55 = vpop.f32.mrf.mxu3 }
 0x4a4   :  { %6122 = vmatmul.msk.f32.gmra.mxu0 %vm122_vm0, %v12183_v42  ;;  %v9039_v52 = vpop.f32.mrf.mxu1  ;;  %4332 = vmatpush.msrb.mxu3 %v4008_v60  ;;  %v2088_v7 = vadd.f32 %v8778_v45, %v8528_v33  ;;  %v3413_v48 = vmax.f32 %v2094_v21, 0.0  ;;  %v3968_v31 = vmin.f32 %v3328_v49, 6.0  ;;  %v1106_v38 = vadd.f32 %v12190_v3, %v12140_v58  ;;  %12194 = vst [vmem:[#allocation157_spill] sm:$0xff] %v9073_v55 }
 0x4a5   :  { %4722 = vmatpush.msrb.mxu2 %v4113_v22  ;;  %12184 = vst [vmem:[#allocation313_spill] sm:$0xff] %v9039_v52  ;;  %4716 = vmatpush.msra.mxu1 %v3813_v4  ;;  %v4073_v22 = vmin.f32 %v3433_v35, 6.0  ;;  %v3618_v60 = vmax.f32 %v1112_v37, 0.0  ;;  %v2085_v4 = vadd.f32 %v8762_v12, %v8528_v33  ;;  %v3403_v41 = vmax.f32 %v2091_v32, 0.0  ;;  %v12195_v35 = vld [vmem:[#allocation222_spill] sm:$0xff] }
 0x4a6   :  { %6231 = vmatmul.msk.f32.gmra.mxu2 %vm122_vm0, %v6588_v51  ;;  %4333 = vmatpush.msrb.mxu3 %v3998_v6  ;;  %v12189_v51 = vld [vmem:[#allocation234_spill] sm:$0xff]  ;;  %v4063_v2 = vmin.f32 %v3423_v30, 6.0  ;;  %v4268_v45 = vmin.f32 %v3628_v61, 6.0  ;;  %v3958_v36 = vmin.f32 %v3318_v17, 6.0  ;;  %v1103_v16 = vadd.f32 %v12193_v54, %v12140_v58 }
 0x4a7   :  { %4723 = vmatpush.msrb.mxu2 %v4103_v29  ;;  %4717 = vmatpush.msra.mxu1 %v3803_v25  ;;  %v1109_v18 = vadd.f32 %v12189_v51, %v12140_v58  ;;  %v12191_v29 = vld [vmem:[#allocation35_spill] sm:$0xff]  ;;  %v2082_v12 = vadd.f32 %v8748_v27, %v8528_v33  ;;  %v3393_v25 = vmax.f32 %v2088_v7, 0.0  ;;  %v4053_v21 = vmin.f32 %v3413_v48, 6.0  ;;  %v12198_v7 = vld [vmem:[#allocation214_spill] sm:$0xff] }
 0x4a8   :  { %v9053_v62 = vpop.f32.mrf.mxu2  ;;  %v9055_v39 = vpop.f32.mrf.mxu0  ;;  %6170 = vmatmul.msk.f32.gmra.mxu1 %vm122_vm0, %v12106_v59  ;;  %4334 = vmatpush.msrb.mxu3 %v3988_v34  ;;  %v3598_v49 = vmax.f32 %v1106_v38, 0.0  ;;  %v9084_v34 = vld [vmem:[%s11589_s5 + $0x10] sm:$0xff]  ;;  %v4258_v10 = vmin.f32 %v3618_v60, 6.0  ;;  %v2079_v27 = vadd.f32 %v8732_v56, %v8528_v33  ;;  %v3383_v37 = vmax.f32 %v2085_v4, 0.0  ;;  %v12280_v52 = vld [vmem:[#allocation82_spill] sm:$0xff] }
 0x4a9   :  { %4724 = vmatpush.msrb.mxu2 %v4093_v11  ;;  %12188 = vst [vmem:[#allocation165_spill] sm:$0xff] %v9053_v62  ;;  %v3608_v6 = vmax.f32 %v1109_v18, 0.0  ;;  %v1100_v11 = vadd.f32 %v12195_v35, %v12140_v58  ;;  %v4043_v32 = vmin.f32 %v3403_v41, 6.0  ;;  %v3588_v17 = vmax.f32 %v1103_v16, 0.0 }
 0x4aa   :  { %4335 = vmatpush.msrb.mxu3 %v3978_v20  ;;  %v2076_v56 = vadd.f32 %v8716_v46, %v8528_v33  ;;  %v3373_v51 = vmax.f32 %v2082_v12, 0.0  ;;  %v4033_v18 = vmin.f32 %v3393_v25, 6.0  ;;  %v1094_v48 = vadd.f32 %v12198_v7, %v12140_v58  ;;  %v12200_v46 = vld [vmem:[#allocation210_spill] sm:$0xff] }
 0x4ab   :  { %4725 = vmatpush.msrb.mxu2 %v4083_v1  ;;  %v4248_v20 = vmin.f32 %v3608_v6, 6.0  ;;  %v2073_v3 = vadd.f32 %v8700_v63, %v8528_v33  ;;  %v3363_v38 = vmax.f32 %v2079_v27, 0.0  ;;  %v4023_v60 = vmin.f32 %v3383_v37, 6.0  ;;  %v12202_v63 = vld [vmem:[#allocation206_spill] sm:$0xff] }
 0x4ac   :  { %6123 = vmatmul.msk.f32.gmra.mxu0 %vm122_vm0, %v12191_v29  ;;  %v9069_v26 = vpop.f32.mrf.mxu1  ;;  %4336 = vmatpush.msrb.mxu3 %v3968_v31  ;;  %v4238_v31 = vmin.f32 %v3598_v49, 6.0  ;;  %v1091_v41 = vadd.f32 %v12200_v46, %v12140_v58  ;;  %v2070_v54 = vadd.f32 %v8684_v47, %v8528_v33  ;;  %v3353_v16 = vmax.f32 %v2076_v56, 0.0 }
 0x4ad   :  { %4726 = vmatpush.msrb.mxu2 %v4073_v22  ;;  %12192 = vst [vmem:[#allocation310_spill] sm:$0xff] %v9069_v26  ;;  %v3578_v22 = vmax.f32 %v1100_v11, 0.0  ;;  %v4013_v6 = vmin.f32 %v3373_v51, 6.0  ;;  %v1088_v12 = vadd.f32 %v12202_v63, %v12140_v58  ;;  %v3558_v25 = vmax.f32 %v1094_v48, 0.0  ;;  %v12204_v11 = vld [vmem:[#allocation323_spill] sm:$0xff]  ;;  %v12208_v51 = vld [vmem:[#allocation198_spill] sm:$0xff] }
 0x4ae   :  { %6232 = vmatmul.msk.f32.gmra.mxu2 %vm122_vm0, %v12097_v15  ;;  %4337 = vmatpush.msrb.mxu3 %v3958_v36  ;;  %v12197_v15 = vld [vmem:[#allocation218_spill] sm:$0xff]  ;;  %v4228_v36 = vmin.f32 %v3588_v17, 6.0  ;;  %v2067_v49 = vadd.f32 %v12204_v11, %v8528_v33  ;;  %v4003_v27 = vmin.f32 %v3363_v38, 6.0  ;;  %v3548_v17 = vmax.f32 %v1091_v41, 0.0  ;;  %v12210_v38 = vld [vmem:[#allocation41_spill] sm:$0xff] }
 0x4af   :  { %4727 = vmatpush.msrb.mxu2 %v4063_v2  ;;  %v1097_v61 = vadd.f32 %v12197_v15, %v12140_v58  ;;  %4338 = vmatmul.f32.vlgmr.msrb.gmra.mxu3 %v9084_v34  ;;  %v4218_v35 = vmin.f32 %v3578_v22, 6.0  ;;  %v3993_v56 = vmin.f32 %v3353_v16, 6.0  ;;  %v3538_v7 = vmax.f32 %v1088_v12, 0.0 }
 0x4b0   :  { %4342 = vmatpush.msra.mxu3 %v4268_v45  ;;  %v9088_v30 = vpop.f32.mrf.mxu2  ;;  %v9090_v1 = vpop.f32.mrf.mxu0  ;;  %6171 = vmatmul.msk.f32.gmra.mxu1 %vm122_vm0, %v12109_v5  ;;  %v12201_v45 = vld [vmem:[#allocation38_spill] sm:$0xff]  ;;  %v4198_v48 = vmin.f32 %v3558_v25, 6.0  ;;  %v3323_v22 = vmax.f32 %v2067_v49, 0.0  ;;  %v12215_v49 = vld [vmem:[#allocation12_spill] sm:$0xff] }
 0x4b1   :  { %4728 = vmatpush.msrb.mxu2 %v4053_v21  ;;  %12196 = vst [vmem:[#allocation161_spill] sm:$0xff] %v9088_v30  ;;  %v3568_v2 = vmax.f32 %v1097_v61, 0.0  ;;  %v9113_v21 = vpop.f32.mrf.mxu3  ;;  %v12207_v61 = vld [vmem:[#allocation11_spill] sm:$0xff]  ;;  %v4178_v63 = vmin.f32 %v3538_v7, 6.0  ;;  %v12219_v7 = vld [vmem:[#allocation73_spill] sm:$0xff] }
 0x4b2   :  { %4343 = vmatpush.msra.mxu3 %v4258_v10  ;;  %12203 = vst [vmem:[#allocation304_spill] sm:$0xff] %v9113_v21  ;;  %v3343_v10 = vmax.f32 %v2073_v3, 0.0  ;;  %v3963_v12 = vmin.f32 %v3323_v22, 6.0  ;;  %v12220_v22 = vld [vmem:[#allocation44_spill] sm:$0xff] }
 0x4b3   :  { %4729 = vmatpush.msrb.mxu2 %v4043_v32  ;;  %v12206_v32 = vld [vmem:[#allocation202_spill] sm:$0xff] }
 0x4b4   :  { %4344 = vmatpush.msra.mxu3 %v4248_v20  ;;  %v9103_v4 = vpop.f32.mrf.mxu1  ;;  %6124 = vmatmul.msk.f32.gmra.mxu0 %vm122_vm0, %v12201_v45  ;;  %v1085_v15 = vadd.f32 %v12206_v32, %v12140_v58  ;;  %v3333_v20 = vmax.f32 %v2070_v54, 0.0  ;;  %v12212_v54 = vld [vmem:[#allocation190_spill] sm:$0xff] }
 0x4b5   :  { %4730 = vmatpush.msrb.mxu2 %v4033_v18  ;;  %12199 = vst [vmem:[#allocation307_spill] sm:$0xff] %v9103_v4  ;;  %v1082_v18 = vadd.f32 %v12208_v51, %v12140_v58  ;;  %v1076_v16 = vadd.f32 %v12212_v54, %v12140_v58 }
 0x4b6   :  { %4345 = vmatpush.msra.mxu3 %v4238_v31  ;;  %6233 = vmatmul.msk.f32.gmra.mxu2 %vm122_vm0, %v12102_v14  ;;  %v4208_v14 = vmin.f32 %v3568_v2, 6.0  ;;  %v3983_v31 = vmin.f32 %v3343_v10, 6.0  ;;  %v3528_v41 = vmax.f32 %v1085_v15, 0.0  ;;  %v4188_v2 = vmin.f32 %v3548_v17, 6.0  ;;  %v12216_v10 = vld [vmem:[#allocation186_spill] sm:$0xff] }
 0x4b7   :  { %4731 = vmatpush.msrb.mxu2 %v4023_v60  ;;  %v12211_v60 = vld [vmem:[#allocation194_spill] sm:$0xff] }
 0x4b8   :  { %4346 = vmatpush.msra.mxu3 %v4228_v36  ;;  %v9119_v47 = vpop.f32.mrf.mxu2  ;;  %v9121_v37 = vpop.f32.mrf.mxu0  ;;  %6172 = vmatmul.msk.f32.gmra.mxu1 %vm122_vm0, %v12207_v61  ;;  %v1079_v46 = vadd.f32 %v12211_v60, %v12140_v58  ;;  %v3973_v36 = vmin.f32 %v3333_v20, 6.0  ;;  %v4168_v32 = vmin.f32 %v3528_v41, 6.0  ;;  %v9152_v15 = vld [vmem:[%s11588_s4] sm:$0xff] }
 0x4b9   :  { %4732 = vmatpush.msrb.mxu2 %v4013_v6  ;;  %12205 = vst [vmem:[#allocation302_spill] sm:$0xff] %v9119_v47  ;;  %v3518_v6 = vmax.f32 %v1082_v18, 0.0  ;;  %v9143_v11 = vpop.f32.mrf.mxu3  ;;  %v9155_v17 = vperm.slane %v9152_v15, 1 }
 0x4ba   :  { %4347 = vmatpush.msra.mxu3 %v4218_v35  ;;  %12214 = vst [vmem:[#allocation296_spill] sm:$0xff] %v9143_v11 }
 0x4bb   :  { %4733 = vmatpush.msrb.mxu2 %v4003_v27  ;;  %v3508_v27 = vmax.f32 %v1079_v46, 0.0  ;;  %v4158_v51 = vmin.f32 %v3518_v6, 6.0  ;;  %v12221_v46 = vld [vmem:[#allocation70_spill] sm:$0xff]  ;;  %v1156_v28 = vadd.f32 %v12236_v9, %v9155_v17  ;;  %v1189_v26 = vadd.f32 %v12280_v52, %v9155_v17  ;;  %v12285_v52 = vld [vmem:[#allocation76_spill] sm:$0xff] }
 0x4bc   :  { %4348 = vmatpush.msra.mxu3 %v4208_v14  ;;  %v9129_v3 = vpop.f32.mrf.mxu1  ;;  %6125 = vmatmul.msk.f32.gmra.mxu0 %vm122_vm0, %v12210_v38  ;;  %v12217_v14 = vld [vmem:[#allocation182_spill] sm:$0xff]  ;;  %v1177_v41 = vadd.f32 %v12221_v46, %v9155_v17  ;;  %v12230_v46 = vld [vmem:[#allocation57_spill] sm:$0xff] }
 0x4bd   :  { %4734 = vmatpush.msrb.mxu2 %v3993_v56  ;;  %12209 = vst [vmem:[#allocation299_spill] sm:$0xff] %v9129_v3  ;;  %v1070_v20 = vadd.f32 %v12217_v14, %v12140_v58  ;;  %v3498_v56 = vmax.f32 %v1076_v16, 0.0  ;;  %v4148_v60 = vmin.f32 %v3508_v27, 6.0  ;;  %v12223_v16 = vld [vmem:[#allocation67_spill] sm:$0xff] }
 0x4be   :  { %4349 = vmatpush.msra.mxu3 %v4198_v48  ;;  %6234 = vmatmul.msk.f32.gmra.mxu2 %vm122_vm0, %v12106_v59  ;;  %v1073_v59 = vadd.f32 %v12216_v10, %v12140_v58  ;;  %v1180_v48 = vadd.f32 %v12219_v7, %v9155_v17  ;;  %v1174_v6 = vadd.f32 %v12223_v16, %v9155_v17 }
 0x4bf   :  { %4735 = vmatpush.msrb.mxu2 %v3983_v31  ;;  %v3478_v58 = vmax.f32 %v1070_v20, 0.0 }
 0x4c0   :  { %4350 = vmatpush.msra.mxu3 %v4188_v2  ;;  %v9139_v25 = vpop.f32.mrf.mxu2  ;;  %v9141_v35 = vpop.f32.mrf.mxu0  ;;  %6173 = vmatmul.msk.f32.gmra.mxu1 %vm122_vm0, %v12215_v49  ;;  %v3488_v31 = vmax.f32 %v1073_v59, 0.0  ;;  %v4138_v2 = vmin.f32 %v3498_v56, 6.0  ;;  %v12225_v59 = vld [vmem:[#allocation63_spill] sm:$0xff]  ;;  %v12228_v56 = vld [vmem:[#allocation60_spill] sm:$0xff]  ;;  %v3129_v7 = vmax.f32 %v1174_v6, 0.0 }
 0x4c1   :  { %4736 = vmatpush.msrb.mxu2 %v3973_v36  ;;  %12213 = vst [vmem:[#allocation26_spill] sm:$0xff] %v9139_v25  ;;  %v1171_v27 = vadd.f32 %v12225_v59, %v9155_v17  ;;  %v4118_v14 = vmin.f32 %v3478_v58, 6.0 }
 0x4c2   :  { %4351 = vmatpush.msra.mxu3 %v4178_v63  ;;  %v3149_v63 = vmax.f32 %v1180_v48, 0.0  ;;  %v4128_v10 = vmin.f32 %v3488_v31, 6.0  ;;  %v9190_v31 = vld [vmem:[%s11589_s5 + $0x18] sm:$0xff] }
 0x4c3   :  { %4737 = vmatpush.msrb.mxu2 %v3963_v12  ;;  %v12224_v12 = vld [vmem:[#allocation13_spill] sm:$0xff]  ;;  %v3119_v58 = vmax.f32 %v1171_v27, 0.0  ;;  %v12234_v27 = vld [vmem:[#allocation51_spill] sm:$0xff] }
 0x4c4   :  { %4352 = vmatpush.msra.mxu3 %v4168_v32  ;;  %v9159_v18 = vpop.f32.mrf.mxu1  ;;  %6126 = vmatmul.msk.f32.gmra.mxu0 %vm122_vm0, %v12220_v22  ;;  %v9179_v32 = vpop.f32.mrf.mxu3  ;;  %v3789_v48 = vmin.f32 %v3149_v63, 6.0  ;;  %v12232_v63 = vld [vmem:[#allocation54_spill] sm:$0xff] }
 0x4c5   :  { %12218 = vst [vmem:[#allocation293_spill] sm:$0xff] %v9159_v18 }
 0x4c6   :  { %4353 = vmatpush.msra.mxu3 %v4158_v51  ;;  %6235 = vmatmul.msk.f32.gmra.mxu2 %vm122_vm0, %v12109_v5  ;;  %v3139_v5 = vmax.f32 %v1177_v41, 0.0  ;;  %12226 = vst [vmem:[#allocation288_spill] sm:$0xff] %v9179_v32  ;;  %v1168_v51 = vadd.f32 %v12228_v56, %v9155_v17  ;;  %v1165_v41 = vadd.f32 %v12230_v46, %v9155_v17  ;;  %v12233_v56 = vld [vmem:[#allocation14_spill] sm:$0xff]  ;;  %v12242_v32 = vld [vmem:[#allocation15_spill] sm:$0xff] }
 0x4c8   :  { %4354 = vmatpush.msra.mxu3 %v4148_v60  ;;  %v9169_v36 = vpop.f32.mrf.mxu2  ;;  %v9171_v54 = vpop.f32.mrf.mxu0  ;;  %6174 = vmatmul.msk.f32.gmra.mxu1 %vm122_vm0, %v12224_v12  ;;  %v12229_v60 = vld [vmem:[#allocation47_spill] sm:$0xff]  ;;  %v3109_v59 = vmax.f32 %v1168_v51, 0.0  ;;  %v12238_v51 = vld [vmem:[#allocation50_spill] sm:$0xff] }
 0x4c9   :  { %12222 = vst [vmem:[#allocation290_spill] sm:$0xff] %v9169_v36 }
 0x4ca   :  { %4355 = vmatpush.msra.mxu3 %v4138_v2  ;;  %v3779_v2 = vmin.f32 %v3139_v5, 6.0  ;;  %v1159_v5 = vadd.f32 %v12234_v27, %v9155_v17  ;;  %v3749_v21 = vmin.f32 %v3109_v59, 6.0 }
 0x4cc   :  { %4356 = vmatpush.msra.mxu3 %v4128_v10  ;;  %v9181_v20 = vpop.f32.mrf.mxu1  ;;  %6127 = vmatmul.msk.f32.gmra.mxu0 %vm122_vm0, %v12229_v60  ;;  %v1162_v10 = vadd.f32 %v12232_v63, %v9155_v17  ;;  %v9211_v63 = vpop.f32.mrf.mxu3  ;;  %v3079_v27 = vmax.f32 %v1159_v5, 0.0  ;;  %v12243_v5 = vld [vmem:[#allocation39_spill] sm:$0xff] }
 0x4cd   :  { %12227 = vst [vmem:[#allocation133_spill] sm:$0xff] %v9181_v20 }
 0x4ce   :  { %4357 = vmatpush.msra.mxu3 %v4118_v14  ;;  %6236 = vmatmul.msk.f32.gmra.mxu2 %vm122_vm0, %v12207_v61  ;;  %v3769_v14 = vmin.f32 %v3129_v7, 6.0  ;;  %v3099_v61 = vmax.f32 %v1165_v41, 0.0  ;;  %v3089_v55 = vmax.f32 %v1162_v10, 0.0  ;;  %12237 = vst [vmem:[#allocation125_spill] sm:$0xff] %v9211_v63  ;;  %v12239_v7 = vld [vmem:[#allocation45_spill] sm:$0xff]  ;;  %v12241_v10 = vld [vmem:[#allocation42_spill] sm:$0xff] }
 0x4cf   :  { %4358 = vmatmul.f32.vlgmr.msra.gmra.mxu3 %v9190_v31  ;;  %v1150_v59 = vadd.f32 %v12241_v10, %v9155_v17  ;;  %v12246_v10 = vld [vmem:[#allocation53_spill] sm:$0xff] }
 0x4d0   :  { %4362 = vmatpush.msrb.mxu3 %v3789_v48  ;;  %v9196_v16 = vpop.f32.mrf.mxu2  ;;  %v9198_v6 = vpop.f32.mrf.mxu0  ;;  %6175 = vmatmul.msk.f32.gmra.mxu1 %vm122_vm0, %v12233_v56  ;;  %v3759_v48 = vmin.f32 %v3119_v58, 6.0  ;;  %v3739_v41 = vmin.f32 %v3099_v61, 6.0  ;;  %v3729_v11 = vmin.f32 %v3089_v55, 6.0  ;;  %v1147_v61 = vadd.f32 %v12243_v5, %v9155_v17 }
 0x4d1   :  { %12231 = vst [vmem:[#allocation29_spill] sm:$0xff] %v9196_v16  ;;  %v3049_v8 = vmax.f32 %v1150_v59, 0.0 }
 0x4d2   :  { %4363 = vmatpush.msrb.mxu3 %v3779_v2  ;;  %v1153_v2 = vadd.f32 %v12239_v7, %v9155_v17  ;;  %v3719_v7 = vmin.f32 %v3079_v27, 6.0  ;;  %v12250_v27 = vld [vmem:[#allocation30_spill] sm:$0xff] }
 0x4d3   :  { %v1138_v59 = vadd.f32 %v12250_v27, %v9155_v17  ;;  %v12255_v27 = vld [vmem:[#allocation56_spill] sm:$0xff] }
 0x4d4   :  { %4364 = vmatpush.msrb.mxu3 %v3769_v14  ;;  %v9207_v46 = vpop.f32.mrf.mxu1  ;;  %6128 = vmatmul.msk.f32.gmra.mxu0 %vm122_vm0, %v12238_v51  ;;  %v3069_v14 = vmax.f32 %v1156_v28, 0.0  ;;  %v12247_v28 = vld [vmem:[#allocation33_spill] sm:$0xff]  ;;  %v9237_v5 = vpop.f32.mrf.mxu3 }
 0x4d5   :  { %12235 = vst [vmem:[#allocation285_spill] sm:$0xff] %v9207_v46  ;;  %v1141_v55 = vadd.f32 %v12247_v28, %v9155_v17  ;;  %v3009_v25 = vmax.f32 %v1138_v59, 0.0 }
 0x4d6   :  { %4365 = vmatpush.msrb.mxu3 %v3759_v48  ;;  %6237 = vmatmul.msk.f32.gmra.mxu2 %vm122_vm0, %v12215_v49  ;;  %v3059_v48 = vmax.f32 %v1153_v2, 0.0  ;;  %v12245_v49 = vld [vmem:[#allocation36_spill] sm:$0xff]  ;;  %v3709_v62 = vmin.f32 %v3069_v14, 6.0  ;;  %12248 = vst [vmem:[#allocation24_spill] sm:$0xff] %v9237_v5 }
 0x4d7   :  { %v1144_v63 = vadd.f32 %v12245_v49, %v9155_v17  ;;  %v12251_v49 = vld [vmem:[#allocation16_spill] sm:$0xff]  ;;  %v3019_v28 = vmax.f32 %v1141_v55, 0.0  ;;  %v12257_v55 = vld [vmem:[#allocation115_spill] sm:$0xff] }
 0x4d8   :  { %4366 = vmatpush.msrb.mxu3 %v3749_v21  ;;  %v9219_v58 = vpop.f32.mrf.mxu2  ;;  %v9221_v9 = vpop.f32.mrf.mxu0  ;;  %6176 = vmatmul.msk.f32.gmra.mxu1 %vm122_vm0, %v12242_v32  ;;  %v3699_v30 = vmin.f32 %v3059_v48, 6.0 }
 0x4d9   :  { %12240 = vst [vmem:[#allocation121_spill] sm:$0xff] %v9219_v58  ;;  %v3029_v14 = vmax.f32 %v1144_v63, 0.0  ;;  %v3659_v16 = vmin.f32 %v3019_v28, 6.0 }
 0x4da   :  { %4367 = vmatpush.msrb.mxu3 %v3739_v41  ;;  %v3039_v41 = vmax.f32 %v1147_v61, 0.0  ;;  %v12252_v61 = vld [vmem:[#allocation27_spill] sm:$0xff] }
 0x4db   :  { %v1135_v48 = vadd.f32 %v12252_v61, %v9155_v17  ;;  %v3669_v36 = vmin.f32 %v3029_v14, 6.0  ;;  %v3649_v14 = vmin.f32 %v3009_v25, 6.0  ;;  %v12263_v25 = vld [vmem:[#allocation59_spill] sm:$0xff] }
 0x4dc   :  { %4368 = vmatpush.msrb.mxu3 %v3729_v11  ;;  %v9229_v21 = vpop.f32.mrf.mxu1  ;;  %6129 = vmatmul.msk.f32.gmra.mxu0 %vm122_vm0, %v12246_v10  ;;  %v3679_v5 = vmin.f32 %v3039_v41, 6.0  ;;  %v1222_v41 = vadd.f32 %v12257_v55, %v9155_v17 }
 0x4dd   :  { %12244 = vst [vmem:[#allocation32_spill] sm:$0xff] %v9229_v21  ;;  %v2999_v63 = vmax.f32 %v1135_v48, 0.0  ;;  %v12261_v48 = vld [vmem:[#allocation112_spill] sm:$0xff] }
 0x4de   :  { %4369 = vmatpush.msrb.mxu3 %v3719_v7  ;;  %6238 = vmatmul.msk.f32.gmra.mxu2 %vm122_vm0, %v12224_v12  ;;  %v3689_v7 = vmin.f32 %v3049_v8, 6.0  ;;  %v12256_v8 = vld [vmem:[#allocation119_spill] sm:$0xff]  ;;  %v1219_v28 = vadd.f32 %v12261_v48, %v9155_v17  ;;  %v3289_v55 = vmax.f32 %v1222_v41, 0.0 }
 0x4e0   :  { %4370 = vmatpush.msrb.mxu3 %v3709_v62  ;;  %v9241_v11 = vpop.f32.mrf.mxu2  ;;  %v9243_v2 = vpop.f32.mrf.mxu0  ;;  %6177 = vmatmul.msk.f32.gmra.mxu1 %vm122_vm0, %v12251_v49  ;;  %v12253_v62 = vld [vmem:[#allocation123_spill] sm:$0xff] }
 0x4e1   :  { %12249 = vst [vmem:[#allocation117_spill] sm:$0xff] %v9241_v11  ;;  %v1228_v12 = vadd.f32 %v12253_v62, %v9155_v17  ;;  %v9267_v62 = vpop.f32.mrf.mxu3 }
 0x4e2   :  { %4371 = vmatpush.msrb.mxu3 %v3699_v30  ;;  %v1225_v30 = vadd.f32 %v12256_v8, %v9155_v17  ;;  %12259 = vst [vmem:[#allocation230_spill] sm:$0xff] %v9267_v62  ;;  %v12262_v8 = vld [vmem:[#allocation109_spill] sm:$0xff]  ;;  %v12264_v62 = vld [vmem:[#allocation106_spill] sm:$0xff] }
 0x4e4   :  { %4372 = vmatpush.msrb.mxu3 %v3689_v7  ;;  %v9253_v47 = vpop.f32.mrf.mxu1  ;;  %6130 = vmatmul.msk.f32.gmra.mxu0 %vm122_vm0, %v12255_v27  ;;  %v3309_v7 = vmax.f32 %v1228_v12, 0.0  ;;  %v1216_v12 = vadd.f32 %v12262_v8, %v9155_v17 }
 0x4e5   :  { %12254 = vst [vmem:[#allocation238_spill] sm:$0xff] %v9253_v47 }
 0x4e6   :  { %4373 = vmatpush.msrb.mxu3 %v3679_v5  ;;  %6239 = vmatmul.msk.f32.gmra.mxu2 %vm122_vm0, %v12233_v56  ;;  %v12260_v5 = vld [vmem:[#allocation17_spill] sm:$0xff]  ;;  %v3299_v56 = vmax.f32 %v1225_v30, 0.0  ;;  %v3949_v58 = vmin.f32 %v3309_v7, 6.0  ;;  %v12265_v30 = vld [vmem:[#allocation103_spill] sm:$0xff]  ;;  %v3269_v41 = vmax.f32 %v1216_v12, 0.0  ;;  %v3929_v7 = vmin.f32 %v3289_v55, 6.0 }
 0x4e8   :  { %4374 = vmatpush.msrb.mxu3 %v3669_v36  ;;  %v9263_v61 = vpop.f32.mrf.mxu2  ;;  %v9265_v59 = vpop.f32.mrf.mxu0  ;;  %6178 = vmatmul.msk.f32.gmra.mxu1 %vm122_vm0, %v12260_v5  ;;  %v3639_v36 = vmin.f32 %v2999_v63, 6.0  ;;  %v3939_v33 = vmin.f32 %v3299_v56, 6.0  ;;  %v1210_v63 = vadd.f32 %v12265_v30, %v9155_v17  ;;  %v12270_v56 = vld [vmem:[#allocation97_spill] sm:$0xff]  ;;  %v12271_v30 = vld [vmem:[#allocation62_spill] sm:$0xff] }
 0x4e9   :  { %12258 = vst [vmem:[#allocation234_spill] sm:$0xff] %v9263_v61  ;;  %v3279_v61 = vmax.f32 %v1219_v28, 0.0  ;;  %v1204_v8 = vadd.f32 %v12270_v56, %v9155_v17 }
 0x4ea   :  { %4375 = vmatpush.msrb.mxu3 %v3659_v16  ;;  %v1213_v16 = vadd.f32 %v12264_v62, %v9155_v17  ;;  %v3249_v12 = vmax.f32 %v1210_v63, 0.0 }
 0x4eb   :  { %v3229_v63 = vmax.f32 %v1204_v8, 0.0 }
 0x4ec   :  { %4376 = vmatpush.msrb.mxu3 %v3649_v14  ;;  %v9275_v11 = vpop.f32.mrf.mxu1  ;;  %6131 = vmatmul.msk.f32.gmra.mxu0 %vm122_vm0, %v12263_v25  ;;  %v3259_v28 = vmax.f32 %v1213_v16, 0.0 }
 0x4ed   :  { %v3869_v8 = vmin.f32 %v3229_v63, 6.0 }
 0x4ee   :  { %4377 = vmatpush.msrb.mxu3 %v3639_v36  ;;  %6240 = vmatmul.msk.f32.gmra.mxu2 %vm122_vm0, %v12242_v32  ;;  %v12267_v36 = vld [vmem:[#allocation18_spill] sm:$0xff]  ;;  %v3919_v32 = vmin.f32 %v3279_v61, 6.0  ;;  %v3899_v16 = vmin.f32 %v3259_v28, 6.0  ;;  %v12273_v61 = vld [vmem:[#allocation91_spill] sm:$0xff] }
 0x4ef   :  { %4378 = vmatmul.f32.vlgmr.msrb.gmra.mxu3 %v8932_v23  ;;  %v9294_v23 = vpop.f32.mrf.mxu3 }
 0x4f0   :  { %4382 = vmatpush.msra.mxu3 %v3949_v58  ;;  %v9286_v14 = vpop.f32.mrf.mxu2  ;;  %v9288_v48 = vpop.f32.mrf.mxu0  ;;  %6179 = vmatmul.msk.f32.gmra.mxu1 %vm122_vm0, %v12267_v36  ;;  %v12268_v58 = vld [vmem:[#allocation100_spill] sm:$0xff]  ;;  %12269 = vst [vmem:[#allocation226_spill] sm:$0xff] %v9294_v23  ;;  %v12275_v23 = vld [vmem:[#allocation19_spill] sm:$0xff] }
 0x4f1   :  { %12266 = vst [vmem:[#allocation35_spill] sm:$0xff] %v9286_v14  ;;  %v1207_v62 = vadd.f32 %v12268_v58, %v9155_v17  ;;  %v12272_v14 = vld [vmem:[#allocation94_spill] sm:$0xff] }
 0x4f2   :  { %4383 = vmatpush.msra.mxu3 %v3939_v33  ;;  %v3909_v33 = vmin.f32 %v3269_v41, 6.0  ;;  %v1201_v57 = vadd.f32 %v12272_v14, %v9155_v17  ;;  %v3889_v41 = vmin.f32 %v3249_v12, 6.0  ;;  %v12276_v14 = vld [vmem:[#allocation88_spill] sm:$0xff] }
 0x4f3   :  { %v3239_v58 = vmax.f32 %v1207_v62, 0.0  ;;  %v1195_v62 = vadd.f32 %v12276_v14, %v9155_v17 }
 0x4f4   :  { %4384 = vmatpush.msra.mxu3 %v3929_v7  ;;  %v9298_v55 = vpop.f32.mrf.mxu1  ;;  %6132 = vmatmul.msk.f32.gmra.mxu0 %vm122_vm0, %v12271_v30  ;;  %v1198_v7 = vadd.f32 %v12273_v61, %v9155_v17  ;;  %v3219_v28 = vmax.f32 %v1201_v57, 0.0 }
 0x4f5   :  { %v3199_v14 = vmax.f32 %v1195_v62, 0.0  ;;  %v1183_v62 = vadd.f32 %v12285_v52, %v9155_v17 }
 0x4f6   :  { %4385 = vmatpush.msra.mxu3 %v3919_v32  ;;  %6241 = vmatmul.msk.f32.gmra.mxu2 %vm122_vm0, %v12251_v49  ;;  %v12277_v49 = vld [vmem:[#allocation85_spill] sm:$0xff]  ;;  %v3209_v61 = vmax.f32 %v1198_v7, 0.0  ;;  %v3859_v57 = vmin.f32 %v3219_v28, 6.0  ;;  %v3179_v28 = vmax.f32 %v1189_v26, 0.0  ;;  %v12290_v26 = vld [vmem:[#allocation179_spill] sm:$0xff] }
 0x4f7   :  { %v1192_v19 = vadd.f32 %v12277_v49, %v9155_v17  ;;  %v3159_v3 = vmax.f32 %v1183_v62, 0.0 }
 0x4f8   :  { %4386 = vmatpush.msra.mxu3 %v3909_v33  ;;  %v9308_v32 = vpop.f32.mrf.mxu2  ;;  %v9310_v56 = vpop.f32.mrf.mxu0  ;;  %6180 = vmatmul.msk.f32.gmra.mxu1 %vm122_vm0, %v12275_v23  ;;  %v3879_v33 = vmin.f32 %v3239_v58, 6.0  ;;  %v12281_v58 = vld [vmem:[#allocation79_spill] sm:$0xff]  ;;  %v3819_v18 = vmin.f32 %v3179_v28, 6.0 }
 0x4f9   :  { %12274 = vst [vmem:[#allocation222_spill] sm:$0xff] %v9308_v32  ;;  %v12279_v32 = vld [vmem:[#allocation66_spill] sm:$0xff]  ;;  %v1186_v7 = vadd.f32 %v12281_v58, %v9155_v17  ;;  %v3189_v63 = vmax.f32 %v1192_v19, 0.0 }
 0x4fa   :  { %4387 = vmatpush.msra.mxu3 %v3899_v16  ;;  %v9320_v16 = vpop.f32.mrf.mxu3 }
 0x4fb   :  { %12278 = vst [vmem:[#allocation218_spill] sm:$0xff] %v9320_v16  ;;  %v12284_v16 = vld [vmem:[#allocation20_spill] sm:$0xff]  ;;  %v3169_v58 = vmax.f32 %v1186_v7, 0.0  ;;  %v3829_v19 = vmin.f32 %v3189_v63, 6.0 }
 0x4fc   :  { %4388 = vmatpush.msra.mxu3 %v3889_v41  ;;  %v9318_v12 = vpop.f32.mrf.mxu1  ;;  %6133 = vmatmul.msk.f32.gmra.mxu0 %vm122_vm0, %v12279_v32  ;;  %v3849_v41 = vmin.f32 %v3209_v61, 6.0 }
 0x4fd   :  { %v3809_v7 = vmin.f32 %v3169_v58, 6.0  ;;  %v12298_v58 = vld [vmem:[#allocation167_spill] sm:$0xff] }
 0x4fe   :  { %4389 = vmatpush.msra.mxu3 %v3879_v33  ;;  %6242 = vmatmul.msk.f32.gmra.mxu2 %vm122_vm0, %v12260_v5  ;;  %v12286_v5 = vld [vmem:[#allocation187_spill] sm:$0xff] }
 0x4ff   :  { %v1276_v4 = vadd.f32 %v12286_v5, %v9155_v17  ;;  %v12294_v5 = vld [vmem:[#allocation175_spill] sm:$0xff] }
 0x500   :  { %4390 = vmatpush.msra.mxu3 %v3869_v8  ;;  %v9330_v33 = vpop.f32.mrf.mxu2  ;;  %v9332_v49 = vpop.f32.mrf.mxu0  ;;  %6181 = vmatmul.msk.f32.gmra.mxu1 %vm122_vm0, %v12284_v16  ;;  %v3839_v8 = vmin.f32 %v3199_v14, 6.0  ;;  %v1270_v14 = vadd.f32 %v12290_v26, %v9155_v17  ;;  %v1267_v62 = vadd.f32 %v12294_v5, %v9155_v17  ;;  %v12299_v5 = vld [vmem:[#allocation72_spill] sm:$0xff] }
 0x501   :  { %12282 = vst [vmem:[#allocation214_spill] sm:$0xff] %v9330_v33  ;;  %v12289_v33 = vld [vmem:[#allocation69_spill] sm:$0xff] }
 0x502   :  { %4391 = vmatpush.msra.mxu3 %v3859_v57  ;;  %12283 = vst [vmem:[#allocation210_spill] sm:$0xff] %v9332_v49  ;;  %v12288_v57 = vld [vmem:[#allocation183_spill] sm:$0xff]  ;;  %v9348_v52 = vpop.f32.mrf.mxu3 }
 0x503   :  { %v1273_v49 = vadd.f32 %v12288_v57, %v9155_v17  ;;  %12291 = vst [vmem:[#allocation206_spill] sm:$0xff] %v9348_v52  ;;  %v3799_v57 = vmin.f32 %v3159_v3, 6.0  ;;  %v3449_v52 = vmax.f32 %v1270_v14, 0.0  ;;  %v12300_v3 = vld [vmem:[#allocation163_spill] sm:$0xff] }
 0x504   :  { %4392 = vmatpush.msra.mxu3 %v3849_v41  ;;  %v9340_v61 = vpop.f32.mrf.mxu1  ;;  %6134 = vmatmul.msk.f32.gmra.mxu0 %vm122_vm0, %v12289_v33  ;;  %v3469_v41 = vmax.f32 %v1276_v4, 0.0  ;;  %v12296_v4 = vld [vmem:[#allocation171_spill] sm:$0xff] }
 0x505   :  { %12287 = vst [vmem:[#allocation38_spill] sm:$0xff] %v9340_v61  ;;  %v3459_v28 = vmax.f32 %v1273_v49, 0.0  ;;  %v1264_v26 = vadd.f32 %v12296_v4, %v9155_v17  ;;  %v1258_v49 = vadd.f32 %v12300_v3, %v9155_v17  ;;  %v4089_v14 = vmin.f32 %v3449_v52, 6.0  ;;  %v12306_v52 = vld [vmem:[#allocation155_spill] sm:$0xff] }
 0x506   :  { %4393 = vmatpush.msra.mxu3 %v3839_v8  ;;  %6243 = vmatmul.msk.f32.gmra.mxu2 %vm122_vm0, %v12267_v36  ;;  %v4109_v36 = vmin.f32 %v3469_v41, 6.0  ;;  %v12307_v3 = vld [vmem:[#allocation151_spill] sm:$0xff] }
 0x507   :  { %v4099_v61 = vmin.f32 %v3459_v28, 6.0 }
 0x508   :  { %4394 = vmatpush.msra.mxu3 %v3829_v19  ;;  %v9352_v63 = vpop.f32.mrf.mxu2  ;;  %v9354_v8 = vpop.f32.mrf.mxu0  ;;  %v12295_v19 = vld [vmem:[#allocation21_spill] sm:$0xff] }
 0x509   :  { %12292 = vst [vmem:[#allocation323_spill] sm:$0xff] %v9352_v63  ;;  %6182 = vmatmul.msk.f32.gmra.mxu1 %vm122_vm0, %v12295_v19  ;;  %v3439_v63 = vmax.f32 %v1267_v62, 0.0  ;;  %v12303_v62 = vld [vmem:[#allocation159_spill] sm:$0xff] }
 0x50a   :  { %4395 = vmatpush.msra.mxu3 %v3819_v18  ;;  %12293 = vst [vmem:[#allocation202_spill] sm:$0xff] %v9354_v8  ;;  %v1261_v8 = vadd.f32 %v12298_v58, %v9155_v17  ;;  %v1255_v28 = vadd.f32 %v12303_v62, %v9155_v17  ;;  %v9379_v58 = vpop.f32.mrf.mxu3  ;;  %v12308_v62 = vld [vmem:[#allocation75_spill] sm:$0xff] }
 0x50b   :  { %12304 = vst [vmem:[#allocation194_spill] sm:$0xff] %v9379_v58 }
 0x50c   :  { %4396 = vmatpush.msra.mxu3 %v3809_v7  ;;  %v9362_v18 = vpop.f32.mrf.mxu1  ;;  %6135 = vmatmul.msk.f32.gmra.mxu0 %vm122_vm0, %v12299_v5  ;;  %v3429_v7 = vmax.f32 %v1264_v26, 0.0  ;;  %v3419_v4 = vmax.f32 %v1261_v8, 0.0  ;;  %v1252_v26 = vadd.f32 %v12306_v52, %v9155_v17  ;;  %v12310_v8 = vld [vmem:[#allocation147_spill] sm:$0xff] }
 0x50d   :  { %12297 = vst [vmem:[#allocation11_spill] sm:$0xff] %v9362_v18 }
 0x50e   :  { %4397 = vmatpush.msra.mxu3 %v3799_v57  ;;  %6244 = vmatmul.msk.f32.gmra.mxu2 %vm122_vm0, %v12275_v23  ;;  %v3409_v23 = vmax.f32 %v1258_v49, 0.0  ;;  %v4059_v18 = vmin.f32 %v3419_v4, 6.0  ;;  %v3389_v58 = vmax.f32 %v1252_v26, 0.0  ;;  %v12314_v26 = vld [vmem:[#allocation139_spill] sm:$0xff] }
 0x50f   :  { %4398 = vmatmul.f32.vlgmr.msra.gmra.mxu3 %v8975_v0  ;;  %v12305_v0 = vld [vmem:[#allocation23_spill] sm:$0xff] }
 0x510   :  { %4402 = vmatpush.msrb.mxu3 %v4109_v36  ;;  %v9373_v41 = vpop.f32.mrf.mxu2  ;;  %v9375_v57 = vpop.f32.mrf.mxu0  ;;  %v4079_v36 = vmin.f32 %v3439_v63, 6.0  ;;  %v4049_v20 = vmin.f32 %v3409_v23, 6.0  ;;  %v1240_v23 = vadd.f32 %v12314_v26, %v9155_v17 }
 0x511   :  { %12301 = vst [vmem:[#allocation198_spill] sm:$0xff] %v9373_v41  ;;  %6183 = vmatmul.msk.f32.gmra.mxu1 %vm122_vm0, %v12305_v0  ;;  %v3399_v41 = vmax.f32 %v1255_v28, 0.0 }
 0x512   :  { %4403 = vmatpush.msrb.mxu3 %v4099_v61  ;;  %12302 = vst [vmem:[#allocation41_spill] sm:$0xff] %v9375_v57  ;;  %v4069_v61 = vmin.f32 %v3429_v7, 6.0  ;;  %v1249_v57 = vadd.f32 %v12307_v3, %v9155_v17  ;;  %v12312_v7 = vld [vmem:[#allocation143_spill] sm:$0xff]  ;;  %v4029_v3 = vmin.f32 %v3389_v58, 6.0  ;;  %v3349_v26 = vmax.f32 %v1240_v23, 0.0 }
 0x513   :  { %v1243_v28 = vadd.f32 %v12312_v7, %v9155_v17  ;;  %v12320_v58 = vld [vmem:[#allocation127_spill] sm:$0xff] }
 0x514   :  { %4404 = vmatpush.msrb.mxu3 %v4089_v14  ;;  %6136 = vmatmul.msk.f32.gmra.mxu0 %vm122_vm0, %v12308_v62  ;;  %v1246_v14 = vadd.f32 %v12310_v8, %v9155_v17  ;;  %v3379_v4 = vmax.f32 %v1249_v57, 0.0 }
 0x515   :  { %v9389_v63 = vpop.f32.mrf.mxu1  ;;  %v3359_v7 = vmax.f32 %v1243_v28, 0.0 }
 0x516   :  { %4405 = vmatpush.msrb.mxu3 %v4079_v36  ;;  %12309 = vst [vmem:[#allocation190_spill] sm:$0xff] %v9389_v63  ;;  %6245 = vmatmul.msk.f32.gmra.mxu2 %vm122_vm0, %v12284_v16  ;;  %v4039_v36 = vmin.f32 %v3399_v41, 6.0  ;;  %v9405_v16 = vpop.f32.mrf.mxu3  ;;  %v4019_v57 = vmin.f32 %v3379_v4, 6.0  ;;  %v12317_v41 = vld [vmem:[#allocation78_spill] sm:$0xff]  ;;  %v12326_v63 = vld [vmem:[#allocation81_spill] sm:$0xff] }
 0x517   :  { %12315 = vst [vmem:[#allocation182_spill] sm:$0xff] %v9405_v16  ;;  %v3999_v4 = vmin.f32 %v3359_v7, 6.0  ;;  %v3989_v16 = vmin.f32 %v3349_v26, 6.0  ;;  %v12329_v26 = vld [vmem:[#allocation239_spill] sm:$0xff] }
 0x518   :  { %4406 = vmatpush.msrb.mxu3 %v4069_v61  ;;  %v9395_v49 = vpop.f32.mrf.mxu2  ;;  %v3369_v61 = vmax.f32 %v1246_v14, 0.0 }
 0x519   :  { %12311 = vst [vmem:[#allocation12_spill] sm:$0xff] %v9395_v49  ;;  %6184 = vmatmul.msk.f32.gmra.mxu1 %vm122_vm0, %v12168_v24  ;;  %v9401_v52 = vpop.f32.mrf.mxu0 }
 0x51a   :  { %4407 = vmatpush.msrb.mxu3 %v4059_v18  ;;  %12313 = vst [vmem:[#allocation186_spill] sm:$0xff] %v9401_v52  ;;  %v12316_v18 = vld [vmem:[#allocation135_spill] sm:$0xff]  ;;  %v4009_v14 = vmin.f32 %v3369_v61, 6.0 }
 0x51b   :  { %v1237_v8 = vadd.f32 %v12316_v18, %v9155_v17  ;;  %v12319_v52 = vld [vmem:[#allocation131_spill] sm:$0xff] }
 0x51c   :  { %4408 = vmatpush.msrb.mxu3 %v4049_v20  ;;  %6137 = vmatmul.msk.f32.gmra.mxu0 %vm122_vm0, %v12317_v41  ;;  %v1234_v49 = vadd.f32 %v12319_v52, %v9155_v17  ;;  %v12323_v52 = vld [vmem:[#allocation248_spill] sm:$0xff] }
 0x51d   :  { %v9411_v20 = vpop.f32.mrf.mxu1  ;;  %v3339_v28 = vmax.f32 %v1237_v8, 0.0  ;;  %v1324_v23 = vadd.f32 %v12323_v52, %v9155_v17  ;;  %v12331_v52 = vld [vmem:[#allocation235_spill] sm:$0xff] }
 0x51e   :  { %4409 = vmatpush.msrb.mxu3 %v4039_v36  ;;  %12318 = vst [vmem:[#allocation73_spill] sm:$0xff] %v9411_v20  ;;  %6246 = vmatmul.msk.f32.gmra.mxu2 %vm122_vm0, %v12295_v19  ;;  %v1231_v36 = vadd.f32 %v12320_v58, %v9155_v17  ;;  %v3329_v61 = vmax.f32 %v1234_v49, 0.0  ;;  %v12324_v19 = vld [vmem:[#allocation245_spill] sm:$0xff]  ;;  %v9429_v7 = vpop.f32.mrf.mxu3 }
 0x51f   :  { %v3979_v8 = vmin.f32 %v3339_v28, 6.0  ;;  %12325 = vst [vmem:[#allocation67_spill] sm:$0xff] %v9429_v7 }
 0x520   :  { %4410 = vmatpush.msrb.mxu3 %v4029_v3  ;;  %v3319_v58 = vmax.f32 %v1231_v36, 0.0  ;;  %v3969_v49 = vmin.f32 %v3329_v61, 6.0  ;;  %v1315_v36 = vadd.f32 %v12329_v26, %v9155_v17 }
 0x521   :  { %6185 = vmatmul.msk.f32.gmra.mxu1 %vm122_vm0, %v12176_v53  ;;  %v9421_v3 = vpop.f32.mrf.mxu0  ;;  %v9423_v18 = vpop.f32.mrf.mxu2 }
 0x522   :  { %4411 = vmatpush.msrb.mxu3 %v4019_v57  ;;  %12321 = vst [vmem:[#allocation44_spill] sm:$0xff] %v9421_v3  ;;  %v1321_v57 = vadd.f32 %v12324_v19, %v9155_v17  ;;  %v3599_v26 = vmax.f32 %v1315_v36, 0.0  ;;  %v12338_v36 = vld [vmem:[#allocation223_spill] sm:$0xff] }
 0x523   :  { %12322 = vst [vmem:[#allocation70_spill] sm:$0xff] %v9423_v18  ;;  %v3629_v18 = vmax.f32 %v1324_v23, 0.0  ;;  %v1312_v23 = vadd.f32 %v12331_v52, %v9155_v17 }
 0x524   :  { %4412 = vmatpush.msrb.mxu3 %v4009_v14  ;;  %6138 = vmatmul.msk.f32.gmra.mxu0 %vm122_vm0, %v12326_v63  ;;  %v12327_v14 = vld [vmem:[#allocation242_spill] sm:$0xff]  ;;  %v3619_v28 = vmax.f32 %v1321_v57, 0.0 }
 0x525   :  { %v1318_v3 = vadd.f32 %v12327_v14, %v9155_v17  ;;  %v9435_v20 = vpop.f32.mrf.mxu1  ;;  %v4269_v61 = vmin.f32 %v3629_v18, 6.0  ;;  %v3589_v52 = vmax.f32 %v1312_v23, 0.0 }
 0x526   :  { %4413 = vmatpush.msrb.mxu3 %v3999_v4  ;;  %12328 = vst [vmem:[#allocation13_spill] sm:$0xff] %v9435_v20  ;;  %6247 = vmatmul.msk.f32.gmra.mxu2 %vm122_vm0, %v12305_v0  ;;  %v3959_v4 = vmin.f32 %v3319_v58, 6.0  ;;  %v12333_v0 = vld [vmem:[#allocation231_spill] sm:$0xff]  ;;  %v4259_v57 = vmin.f32 %v3619_v28, 6.0  ;;  %v12334_v58 = vld [vmem:[#allocation84_spill] sm:$0xff]  ;;  %v1303_v28 = vadd.f32 %v12338_v36, %v9155_v17 }
 0x527   :  { %v3609_v19 = vmax.f32 %v1318_v3, 0.0 }
 0x528   :  { %4414 = vmatpush.msrb.mxu3 %v3989_v16  ;;  %v3559_v36 = vmax.f32 %v1303_v28, 0.0 }
 0x529   :  { %6186 = vmatmul.msk.f32.gmra.mxu1 %vm122_vm0, %v12183_v42  ;;  %v9443_v16 = vpop.f32.mrf.mxu0  ;;  %v9447_v14 = vpop.f32.mrf.mxu2  ;;  %v4249_v3 = vmin.f32 %v3609_v19, 6.0 }
 0x52a   :  { %4415 = vmatpush.msrb.mxu3 %v3979_v8  ;;  %12330 = vst [vmem:[#allocation63_spill] sm:$0xff] %v9443_v16  ;;  %v1309_v8 = vadd.f32 %v12333_v0, %v9155_v17  ;;  %v4239_v0 = vmin.f32 %v3599_v26, 6.0  ;;  %v12343_v26 = vld [vmem:[#allocation87_spill] sm:$0xff] }
 0x52b   :  { %12332 = vst [vmem:[#allocation60_spill] sm:$0xff] %v9447_v14 }
 0x52c   :  { %4416 = vmatpush.msrb.mxu3 %v3969_v49  ;;  %6139 = vmatmul.msk.f32.gmra.mxu0 %vm122_vm0, %v12334_v58  ;;  %v12335_v49 = vld [vmem:[#allocation227_spill] sm:$0xff] }
 0x52d   :  { %v1306_v16 = vadd.f32 %v12335_v49, %v9155_v17  ;;  %v9456_v18 = vpop.f32.mrf.mxu1  ;;  %v4229_v49 = vmin.f32 %v3589_v52, 6.0 }
 0x52e   :  { %4417 = vmatpush.msrb.mxu3 %v3959_v4  ;;  %12336 = vst [vmem:[#allocation47_spill] sm:$0xff] %v9456_v18  ;;  %v9458_v4 = vpop.f32.mrf.mxu3  ;;  %6248 = vmatmul.msk.f32.gmra.mxu2 %vm122_vm0, %v12168_v24  ;;  %v12342_v24 = vld [vmem:[#allocation215_spill] sm:$0xff]  ;;  %v12362_v18 = vld [vmem:[#allocation93_spill] sm:$0xff] }
 0x52f   :  { %4418 = vmatmul.f32.vlgmr.msrb.gmra.mxu3 %v9084_v34  ;;  %12337 = vst [vmem:[#allocation57_spill] sm:$0xff] %v9458_v4  ;;  %v12339_v34 = vld [vmem:[#allocation219_spill] sm:$0xff]  ;;  %v3569_v19 = vmax.f32 %v1306_v16, 0.0  ;;  %v1297_v4 = vadd.f32 %v12342_v24, %v9155_v17 }
 0x530   :  { %4422 = vmatpush.msra.mxu3 %v4269_v61  ;;  %v3579_v61 = vmax.f32 %v1309_v8, 0.0  ;;  %v1300_v23 = vadd.f32 %v12339_v34, %v9155_v17 }
 0x531   :  { %6187 = vmatmul.msk.f32.gmra.mxu1 %vm122_vm0, %v12191_v29  ;;  %v9470_v7 = vpop.f32.mrf.mxu2  ;;  %v4209_v16 = vmin.f32 %v3569_v19, 6.0  ;;  %v3539_v28 = vmax.f32 %v1297_v4, 0.0 }
 0x532   :  { %4423 = vmatpush.msra.mxu3 %v4259_v57  ;;  %v9468_v57 = vpop.f32.mrf.mxu0  ;;  %12341 = vst [vmem:[#allocation14_spill] sm:$0xff] %v9470_v7  ;;  %v4219_v8 = vmin.f32 %v3579_v61, 6.0  ;;  %v3549_v34 = vmax.f32 %v1300_v23, 0.0  ;;  %v4199_v61 = vmin.f32 %v3559_v36, 6.0  ;;  %v12348_v23 = vld [vmem:[#allocation203_spill] sm:$0xff] }
 0x533   :  { %12340 = vst [vmem:[#allocation54_spill] sm:$0xff] %v9468_v57  ;;  %v1288_v19 = vadd.f32 %v12348_v23, %v9155_v17 }
 0x534   :  { %4424 = vmatpush.msra.mxu3 %v4249_v3  ;;  %6140 = vmatmul.msk.f32.gmra.mxu0 %vm122_vm0, %v12343_v26  ;;  %v12344_v3 = vld [vmem:[#allocation211_spill] sm:$0xff]  ;;  %v4189_v57 = vmin.f32 %v3549_v34, 6.0 }
 0x535   :  { %v1294_v14 = vadd.f32 %v12344_v3, %v9155_v17  ;;  %v9478_v52 = vpop.f32.mrf.mxu1  ;;  %v3509_v23 = vmax.f32 %v1288_v19, 0.0 }
 0x536   :  { %4425 = vmatpush.msra.mxu3 %v4239_v0  ;;  %12345 = vst [vmem:[#allocation51_spill] sm:$0xff] %v9478_v52  ;;  %6249 = vmatmul.msk.f32.gmra.mxu2 %vm122_vm0, %v12176_v53  ;;  %v12346_v0 = vld [vmem:[#allocation207_spill] sm:$0xff] }
 0x537   :  { %v1291_v24 = vadd.f32 %v12346_v0, %v9155_v17  ;;  %v3529_v3 = vmax.f32 %v1294_v14, 0.0  ;;  %v12351_v53 = vld [vmem:[#allocation199_spill] sm:$0xff]  ;;  %v12352_v0 = vld [vmem:[#allocation90_spill] sm:$0xff] }
 0x538   :  { %4426 = vmatpush.msra.mxu3 %v4229_v49  ;;  %v9484_v49 = vpop.f32.mrf.mxu3  ;;  %v1285_v4 = vadd.f32 %v12351_v53, %v9155_v17  ;;  %v12356_v53 = vld [vmem:[#allocation68_spill] sm:$0xff] }
 0x539   :  { %12347 = vst [vmem:[#allocation48_spill] sm:$0xff] %v9484_v49  ;;  %6188 = vmatmul.msk.f32.gmra.mxu1 %vm122_vm0, %v12201_v45  ;;  %v9492_v7 = vpop.f32.mrf.mxu2  ;;  %v3519_v36 = vmax.f32 %v1291_v24, 0.0  ;;  %v12353_v49 = vld [vmem:[#allocation195_spill] sm:$0xff]  ;;  %v4169_v14 = vmin.f32 %v3529_v3, 6.0  ;;  %v4149_v3 = vmin.f32 %v3509_v23, 6.0 }
 0x53a   :  { %4427 = vmatpush.msra.mxu3 %v4219_v8  ;;  %v9490_v8 = vpop.f32.mrf.mxu0  ;;  %12350 = vst [vmem:[#allocation45_spill] sm:$0xff] %v9492_v7  ;;  %v1282_v20 = vadd.f32 %v12353_v49, %v9155_v17  ;;  %v12355_v24 = vld [vmem:[#allocation191_spill] sm:$0xff] }
 0x53b   :  { %12349 = vst [vmem:[#allocation50_spill] sm:$0xff] %v9490_v8  ;;  %v9503_v8 = vperm.slane %v9152_v15, 2 }
 0x53c   :  { %4428 = vmatpush.msra.mxu3 %v4209_v16  ;;  %v4179_v16 = vmin.f32 %v3539_v28, 6.0  ;;  %6141 = vmatmul.msk.f32.gmra.mxu0 %vm122_vm0, %v12352_v0  ;;  %v3499_v28 = vmax.f32 %v1285_v4, 0.0  ;;  %v3489_v19 = vmax.f32 %v1282_v20, 0.0 }
 0x53d   :  { %v9500_v34 = vpop.f32.mrf.mxu1  ;;  %v1389_v49 = vadd.f32 %v12356_v53, %v9503_v8 }
 0x53e   :  { %4429 = vmatpush.msra.mxu3 %v4199_v61  ;;  %12354 = vst [vmem:[#allocation42_spill] sm:$0xff] %v9500_v34  ;;  %6250 = vmatmul.msk.f32.gmra.mxu2 %vm122_vm0, %v12183_v42  ;;  %v4159_v61 = vmin.f32 %v3519_v36, 6.0  ;;  %v12359_v42 = vld [vmem:[#allocation65_spill] sm:$0xff]  ;;  %v4139_v36 = vmin.f32 %v3499_v28, 6.0  ;;  %v4129_v20 = vmin.f32 %v3489_v19, 6.0  ;;  %v12365_v28 = vld [vmem:[#allocation55_spill] sm:$0xff] }
 0x53f   :  { %v1386_v7 = vadd.f32 %v12359_v42, %v9503_v8  ;;  %v3150_v53 = vmax.f32 %v1389_v49, 0.0 }
 0x540   :  { %4430 = vmatpush.msra.mxu3 %v4189_v57  ;;  %v1279_v57 = vadd.f32 %v12355_v24, %v9155_v17  ;;  %v9519_v17 = vpop.f32.mrf.mxu3 }
 0x541   :  { %6189 = vmatmul.msk.f32.gmra.mxu1 %vm122_vm0, %v12210_v38  ;;  %v9515_v15 = vpop.f32.mrf.mxu2  ;;  %12360 = vst [vmem:[#allocation36_spill] sm:$0xff] %v9519_v17  ;;  %v3140_v42 = vmax.f32 %v1386_v7, 0.0  ;;  %v12368_v7 = vld [vmem:[#allocation52_spill] sm:$0xff] }
 0x542   :  { %4431 = vmatpush.msra.mxu3 %v4179_v16  ;;  %v9513_v16 = vpop.f32.mrf.mxu0  ;;  %12358 = vst [vmem:[#allocation39_spill] sm:$0xff] %v9515_v15  ;;  %v3479_v4 = vmax.f32 %v1279_v57, 0.0  ;;  %v12371_v15 = vld [vmem:[#allocation96_spill] sm:$0xff] }
 0x543   :  { %12357 = vst [vmem:[#allocation15_spill] sm:$0xff] %v9513_v16 }
 0x544   :  { %4432 = vmatpush.msra.mxu3 %v4169_v14  ;;  %v12361_v14 = vld [vmem:[#allocation61_spill] sm:$0xff]  ;;  %6142 = vmatmul.msk.f32.gmra.mxu0 %vm122_vm0, %v12362_v18  ;;  %v4119_v57 = vmin.f32 %v3479_v4, 6.0 }
 0x545   :  { %v1383_v24 = vadd.f32 %v12361_v14, %v9503_v8  ;;  %v9525_v23 = vpop.f32.mrf.mxu1  ;;  %v3790_v14 = vmin.f32 %v3150_v53, 6.0  ;;  %v12369_v4 = vld [vmem:[#allocation49_spill] sm:$0xff] }
 0x546   :  { %4433 = vmatpush.msra.mxu3 %v4159_v61  ;;  %12363 = vst [vmem:[#allocation53_spill] sm:$0xff] %v9525_v23  ;;  %v12364_v61 = vld [vmem:[#allocation58_spill] sm:$0xff]  ;;  %6251 = vmatmul.msk.f32.gmra.mxu2 %vm122_vm0, %v12191_v29  ;;  %v3780_v29 = vmin.f32 %v3140_v42, 6.0 }
 0x547   :  { %v1380_v16 = vadd.f32 %v12364_v61, %v9503_v8  ;;  %v3130_v49 = vmax.f32 %v1383_v24, 0.0  ;;  %v1374_v61 = vadd.f32 %v12368_v7, %v9503_v8  ;;  %v1371_v24 = vadd.f32 %v12369_v4, %v9503_v8  ;;  %v12373_v7 = vld [vmem:[#allocation46_spill] sm:$0xff] }
 0x548   :  { %4434 = vmatpush.msra.mxu3 %v4149_v3  ;;  %v1377_v3 = vadd.f32 %v12365_v28, %v9503_v8  ;;  %v9544_v28 = vpop.f32.mrf.mxu3 }
 0x549   :  { %6190 = vmatmul.msk.f32.gmra.mxu1 %vm122_vm0, %v12220_v22  ;;  %v3120_v17 = vmax.f32 %v1380_v16, 0.0  ;;  %12370 = vst [vmem:[#allocation16_spill] sm:$0xff] %v9544_v28  ;;  %v1368_v16 = vadd.f32 %v12373_v7, %v9503_v8  ;;  %v3100_v42 = vmax.f32 %v1374_v61, 0.0  ;;  %v12377_v61 = vld [vmem:[#allocation40_spill] sm:$0xff] }
 0x54a   :  { %4435 = vmatpush.msra.mxu3 %v4139_v36  ;;  %v9535_v19 = vpop.f32.mrf.mxu0  ;;  %v9537_v36 = vpop.f32.mrf.mxu2  ;;  %v3110_v53 = vmax.f32 %v1377_v3, 0.0 }
 0x54b   :  { %12366 = vst [vmem:[#allocation33_spill] sm:$0xff] %v9535_v19  ;;  %v3080_v7 = vmax.f32 %v1368_v16, 0.0  ;;  %v3740_v28 = vmin.f32 %v3100_v42, 6.0  ;;  %v12383_v16 = vld [vmem:[#allocation31_spill] sm:$0xff] }
 0x54c   :  { %4436 = vmatpush.msra.mxu3 %v4129_v20  ;;  %12367 = vst [vmem:[#allocation30_spill] sm:$0xff] %v9537_v36  ;;  %v3770_v20 = vmin.f32 %v3130_v49, 6.0  ;;  %6143 = vmatmul.msk.f32.gmra.mxu0 %vm122_vm0, %v12371_v15  ;;  %v3090_v49 = vmax.f32 %v1371_v24, 0.0  ;;  %v3750_v4 = vmin.f32 %v3110_v53, 6.0  ;;  %v12379_v53 = vld [vmem:[#allocation99_spill] sm:$0xff]  ;;  %v1353_v42 = vadd.f32 %v12383_v16, %v9503_v8 }
 0x54d   :  { %v3720_v52 = vmin.f32 %v3080_v7, 6.0 }
 0x54e   :  { %4437 = vmatpush.msra.mxu3 %v4119_v57  ;;  %v9548_v57 = vpop.f32.mrf.mxu1  ;;  %6252 = vmatmul.msk.f32.gmra.mxu2 %vm122_vm0, %v12201_v45  ;;  %v12378_v45 = vld [vmem:[#allocation37_spill] sm:$0xff]  ;;  %v3730_v24 = vmin.f32 %v3090_v49, 6.0  ;;  %v3030_v16 = vmax.f32 %v1353_v42, 0.0 }
 0x54f   :  { %4438 = vmatmul.f32.vlgmr.msra.gmra.mxu3 %v9190_v31  ;;  %12372 = vst [vmem:[#allocation27_spill] sm:$0xff] %v9548_v57  ;;  %v12374_v31 = vld [vmem:[#allocation43_spill] sm:$0xff] }
 0x550   :  { %4442 = vmatpush.msrb.mxu3 %v3790_v14  ;;  %v3760_v14 = vmin.f32 %v3120_v17, 6.0  ;;  %v1365_v3 = vadd.f32 %v12374_v31, %v9503_v8  ;;  %v1362_v17 = vadd.f32 %v12377_v61, %v9503_v8  ;;  %v9572_v61 = vpop.f32.mrf.mxu3 }
 0x551   :  { %6191 = vmatmul.msk.f32.gmra.mxu1 %vm122_vm0, %v12229_v60  ;;  %12382 = vst [vmem:[#allocation115_spill] sm:$0xff] %v9572_v61 }
 0x552   :  { %4443 = vmatpush.msrb.mxu3 %v3780_v29  ;;  %v9558_v29 = vpop.f32.mrf.mxu0  ;;  %v9560_v19 = vpop.f32.mrf.mxu2  ;;  %v3070_v31 = vmax.f32 %v1365_v3, 0.0 }
 0x553   :  { %12375 = vst [vmem:[#allocation123_spill] sm:$0xff] %v9558_v29  ;;  %v12381_v29 = vld [vmem:[#allocation34_spill] sm:$0xff] }
 0x554   :  { %4444 = vmatpush.msrb.mxu3 %v3770_v20  ;;  %12376 = vst [vmem:[#allocation56_spill] sm:$0xff] %v9560_v19  ;;  %v1359_v20 = vadd.f32 %v12378_v45, %v9503_v8  ;;  %6144 = vmatmul.msk.f32.gmra.mxu0 %vm122_vm0, %v12379_v53  ;;  %v1356_v36 = vadd.f32 %v12381_v29, %v9503_v8  ;;  %v3060_v19 = vmax.f32 %v1362_v17, 0.0  ;;  %v3710_v49 = vmin.f32 %v3070_v31, 6.0  ;;  %v12386_v29 = vld [vmem:[#allocation28_spill] sm:$0xff]  ;;  %v12388_v31 = vld [vmem:[#allocation102_spill] sm:$0xff] }
 0x555   :  { %v1350_v17 = vadd.f32 %v12386_v29, %v9503_v8  ;;  %v12393_v29 = vld [vmem:[#allocation113_spill] sm:$0xff] }
 0x556   :  { %4445 = vmatpush.msrb.mxu3 %v3760_v14  ;;  %v9568_v14 = vpop.f32.mrf.mxu1  ;;  %6253 = vmatmul.msk.f32.gmra.mxu2 %vm122_vm0, %v12210_v38  ;;  %v3050_v3 = vmax.f32 %v1359_v20, 0.0  ;;  %v3040_v7 = vmax.f32 %v1356_v36, 0.0  ;;  %v3700_v45 = vmin.f32 %v3060_v19, 6.0  ;;  %v12387_v38 = vld [vmem:[#allocation25_spill] sm:$0xff]  ;;  %v12391_v19 = vld [vmem:[#allocation116_spill] sm:$0xff] }
 0x557   :  { %12380 = vst [vmem:[#allocation119_spill] sm:$0xff] %v9568_v14  ;;  %v1437_v36 = vadd.f32 %v12391_v19, %v9503_v8  ;;  %v12397_v19 = vld [vmem:[#allocation105_spill] sm:$0xff] }
 0x558   :  { %4446 = vmatpush.msrb.mxu3 %v3750_v4  ;;  %v3690_v20 = vmin.f32 %v3050_v3, 6.0  ;;  %v3680_v34 = vmin.f32 %v3040_v7, 6.0  ;;  %v3670_v3 = vmin.f32 %v3030_v16, 6.0 }
 0x559   :  { %6192 = vmatmul.msk.f32.gmra.mxu1 %vm122_vm0, %v12238_v51  ;;  %v3310_v16 = vmax.f32 %v1437_v36, 0.0 }
 0x55a   :  { %4447 = vmatpush.msrb.mxu3 %v3740_v28  ;;  %v9580_v28 = vpop.f32.mrf.mxu0  ;;  %v9582_v4 = vpop.f32.mrf.mxu2 }
 0x55b   :  { %12384 = vst [vmem:[#allocation17_spill] sm:$0xff] %v9580_v28  ;;  %v12390_v28 = vld [vmem:[#allocation22_spill] sm:$0xff] }
 0x55c   :  { %4448 = vmatpush.msrb.mxu3 %v3730_v24  ;;  %12385 = vst [vmem:[#allocation112_spill] sm:$0xff] %v9582_v4  ;;  %v1347_v24 = vadd.f32 %v12387_v38, %v9503_v8  ;;  %6145 = vmatmul.msk.f32.gmra.mxu0 %vm122_vm0, %v12388_v31  ;;  %v1344_v61 = vadd.f32 %v12390_v28, %v9503_v8  ;;  %v3020_v4 = vmax.f32 %v1350_v17, 0.0  ;;  %v12396_v38 = vld [vmem:[#allocation110_spill] sm:$0xff] }
 0x55d   :  { %v1434_v28 = vadd.f32 %v12393_v29, %v9503_v8 }
 0x55e   :  { %4449 = vmatpush.msrb.mxu3 %v3720_v52  ;;  %v9590_v52 = vpop.f32.mrf.mxu1  ;;  %6254 = vmatmul.msk.f32.gmra.mxu2 %vm122_vm0, %v12220_v22  ;;  %v3010_v42 = vmax.f32 %v1347_v24, 0.0  ;;  %v3000_v22 = vmax.f32 %v1344_v61, 0.0  ;;  %v1431_v24 = vadd.f32 %v12396_v38, %v9503_v8  ;;  %v12400_v61 = vld [vmem:[#allocation104_spill] sm:$0xff] }
 0x55f   :  { %12389 = vst [vmem:[#allocation109_spill] sm:$0xff] %v9590_v52  ;;  %v3300_v29 = vmax.f32 %v1434_v28, 0.0  ;;  %v12430_v52 = vld [vmem:[#allocation118_spill] sm:$0xff] }
 0x560   :  { %4450 = vmatpush.msrb.mxu3 %v3710_v49  ;;  %v9598_v49 = vpop.f32.mrf.mxu3  ;;  %v3290_v36 = vmax.f32 %v1431_v24, 0.0  ;;  %v9633_v24 = vld [vmem:[%s11589_s5] sm:$0xff] }
 0x561   :  { %12392 = vst [vmem:[#allocation59_spill] sm:$0xff] %v9598_v49  ;;  %6193 = vmatmul.msk.f32.gmra.mxu1 %vm122_vm0, %v12246_v10  ;;  %v3940_v38 = vmin.f32 %v3300_v29, 6.0  ;;  %v12406_v29 = vld [vmem:[#allocation108_spill] sm:$0xff] }
 0x562   :  { %4451 = vmatpush.msrb.mxu3 %v3700_v45  ;;  %v9604_v17 = vpop.f32.mrf.mxu0  ;;  %v9606_v7 = vpop.f32.mrf.mxu2  ;;  %v3660_v45 = vmin.f32 %v3020_v4, 6.0  ;;  %v1425_v4 = vadd.f32 %v12400_v61, %v9503_v8  ;;  %v12407_v61 = vld [vmem:[#allocation95_spill] sm:$0xff] }
 0x563   :  { %12394 = vst [vmem:[#allocation106_spill] sm:$0xff] %v9604_v17  ;;  %v3640_v17 = vmin.f32 %v3000_v22, 6.0 }
 0x564   :  { %4452 = vmatpush.msrb.mxu3 %v3690_v20  ;;  %12395 = vst [vmem:[#allocation103_spill] sm:$0xff] %v9606_v7  ;;  %v3650_v20 = vmin.f32 %v3010_v42, 6.0  ;;  %6146 = vmatmul.msk.f32.gmra.mxu0 %vm122_vm0, %v12397_v19  ;;  %v3950_v42 = vmin.f32 %v3310_v16, 6.0  ;;  %v12408_v7 = vld [vmem:[#allocation92_spill] sm:$0xff] }
 0x566   :  { %4453 = vmatpush.msrb.mxu3 %v3680_v34  ;;  %v12398_v34 = vld [vmem:[#allocation107_spill] sm:$0xff]  ;;  %v9614_v23 = vpop.f32.mrf.mxu1  ;;  %6255 = vmatmul.msk.f32.gmra.mxu2 %vm122_vm0, %v12229_v60 }
 0x567   :  { %v1428_v49 = vadd.f32 %v12398_v34, %v9503_v8  ;;  %12399 = vst [vmem:[#allocation18_spill] sm:$0xff] %v9614_v23 }
 0x568   :  { %4454 = vmatpush.msrb.mxu3 %v3670_v3  ;;  %v12401_v3 = vld [vmem:[#allocation101_spill] sm:$0xff]  ;;  %v9628_v60 = vpop.f32.mrf.mxu3 }
 0x569   :  { %6194 = vmatmul.msk.f32.gmra.mxu1 %vm122_vm0, %v12255_v27  ;;  %v3280_v28 = vmax.f32 %v1428_v49, 0.0  ;;  %12404 = vst [vmem:[#allocation62_spill] sm:$0xff] %v9628_v60  ;;  %v3930_v49 = vmin.f32 %v3290_v36, 6.0 }
 0x56a   :  { %4455 = vmatpush.msrb.mxu3 %v3660_v45  ;;  %v1422_v45 = vadd.f32 %v12401_v3, %v9503_v8  ;;  %v9624_v34 = vpop.f32.mrf.mxu0  ;;  %v9626_v22 = vpop.f32.mrf.mxu2 }
 0x56b   :  { %12402 = vst [vmem:[#allocation100_spill] sm:$0xff] %v9624_v34  ;;  %v3920_v34 = vmin.f32 %v3280_v28, 6.0 }
 0x56c   :  { %4456 = vmatpush.msrb.mxu3 %v3650_v20  ;;  %12403 = vst [vmem:[#allocation97_spill] sm:$0xff] %v9626_v22  ;;  %v3270_v20 = vmax.f32 %v1425_v4, 0.0  ;;  %6147 = vmatmul.msk.f32.gmra.mxu0 %vm122_vm0, %v12406_v29  ;;  %v3260_v3 = vmax.f32 %v1422_v45, 0.0 }
 0x56e   :  { %4457 = vmatpush.msrb.mxu3 %v3640_v17  ;;  %v12405_v17 = vld [vmem:[#allocation98_spill] sm:$0xff]  ;;  %v9642_v60 = vpop.f32.mrf.mxu1  ;;  %6256 = vmatmul.msk.f32.gmra.mxu2 %vm122_vm0, %v12238_v51  ;;  %v3910_v36 = vmin.f32 %v3270_v20, 6.0  ;;  %v3900_v28 = vmin.f32 %v3260_v3, 6.0  ;;  %v12414_v20 = vld [vmem:[#allocation111_spill] sm:$0xff] }
 0x56f   :  { %4458 = vmatmul.f32.vlgmr.msrb.gmra.mxu3 %v9633_v24  ;;  %v1419_v16 = vadd.f32 %v12405_v17, %v9503_v8  ;;  %v1413_v17 = vadd.f32 %v12408_v7, %v9503_v8  ;;  %v12412_v51 = vld [vmem:[#allocation86_spill] sm:$0xff] }
 0x570   :  { %4462 = vmatpush.msra.mxu3 %v3950_v42  ;;  %v1416_v42 = vadd.f32 %v12407_v61, %v9503_v8  ;;  %v1407_v57 = vadd.f32 %v12412_v51, %v9503_v8  ;;  %v12417_v51 = vld [vmem:[#allocation77_spill] sm:$0xff] }
 0x571   :  { %v3250_v4 = vmax.f32 %v1419_v16, 0.0  ;;  %6195 = vmatmul.msk.f32.gmra.mxu1 %vm122_vm0, %v12263_v25  ;;  %v3230_v7 = vmax.f32 %v1413_v17, 0.0  ;;  %v12416_v17 = vld [vmem:[#allocation80_spill] sm:$0xff] }
 0x572   :  { %4463 = vmatpush.msra.mxu3 %v3940_v38  ;;  %v12409_v38 = vld [vmem:[#allocation89_spill] sm:$0xff]  ;;  %v3240_v45 = vmax.f32 %v1416_v42, 0.0  ;;  %v9652_v22 = vpop.f32.mrf.mxu0 }
 0x573   :  { %v1410_v61 = vadd.f32 %v12409_v38, %v9503_v8  ;;  %12410 = vst [vmem:[#allocation94_spill] sm:$0xff] %v9652_v22  ;;  %v3890_v16 = vmin.f32 %v3250_v4, 6.0  ;;  %v12415_v38 = vld [vmem:[#allocation83_spill] sm:$0xff]  ;;  %v1401_v4 = vadd.f32 %v12416_v17, %v9503_v8 }
 0x574   :  { %4464 = vmatpush.msra.mxu3 %v3930_v49  ;;  %v9654_v49 = vpop.f32.mrf.mxu2  ;;  %6148 = vmatmul.msk.f32.gmra.mxu0 %vm122_vm0, %v12414_v20  ;;  %v1404_v42 = vadd.f32 %v12415_v38, %v9503_v8  ;;  %v3880_v14 = vmin.f32 %v3240_v45, 6.0  ;;  %v1398_v38 = vadd.f32 %v12417_v51, %v9503_v8  ;;  %v12423_v51 = vld [vmem:[#allocation71_spill] sm:$0xff] }
 0x575   :  { %12411 = vst [vmem:[#allocation91_spill] sm:$0xff] %v9654_v49  ;;  %v3220_v3 = vmax.f32 %v1410_v61, 0.0  ;;  %v3190_v17 = vmax.f32 %v1401_v4, 0.0 }
 0x576   :  { %4465 = vmatpush.msra.mxu3 %v3920_v34  ;;  %v9658_v34 = vpop.f32.mrf.mxu3  ;;  %v9664_v22 = vpop.f32.mrf.mxu1  ;;  %6257 = vmatmul.msk.f32.gmra.mxu2 %vm122_vm0, %v12246_v10  ;;  %v3200_v61 = vmax.f32 %v1404_v42, 0.0  ;;  %v12420_v10 = vld [vmem:[#allocation74_spill] sm:$0xff]  ;;  %v1392_v42 = vadd.f32 %v12423_v51, %v9503_v8 }
 0x577   :  { %12413 = vst [vmem:[#allocation19_spill] sm:$0xff] %v9658_v34  ;;  %v3860_v45 = vmin.f32 %v3220_v3, 6.0  ;;  %v1395_v49 = vadd.f32 %v12420_v10, %v9503_v8  ;;  %v3180_v3 = vmax.f32 %v1398_v38, 0.0 }
 0x578   :  { %4466 = vmatpush.msra.mxu3 %v3910_v36  ;;  %v3210_v36 = vmax.f32 %v1407_v57, 0.0  ;;  %v3840_v46 = vmin.f32 %v3200_v61, 6.0  ;;  %v3160_v38 = vmax.f32 %v1392_v42, 0.0 }
 0x579   :  { %6196 = vmatmul.msk.f32.gmra.mxu1 %vm122_vm0, %v12271_v30  ;;  %v3170_v4 = vmax.f32 %v1395_v49, 0.0  ;;  %v3820_v61 = vmin.f32 %v3180_v3, 6.0 }
 0x57a   :  { %4467 = vmatpush.msra.mxu3 %v3900_v28  ;;  %v3870_v28 = vmin.f32 %v3230_v7, 6.0  ;;  %v9674_v34 = vpop.f32.mrf.mxu0  ;;  %v3850_v57 = vmin.f32 %v3210_v36, 6.0  ;;  %v12422_v7 = vld [vmem:[#allocation114_spill] sm:$0xff]  ;;  %v3830_v36 = vmin.f32 %v3190_v17, 6.0  ;;  %v3800_v42 = vmin.f32 %v3160_v38, 6.0 }
 0x57b   :  { %12418 = vst [vmem:[#allocation88_spill] sm:$0xff] %v9674_v34  ;;  %v3810_v49 = vmin.f32 %v3170_v4, 6.0 }
 0x57c   :  { %4468 = vmatpush.msra.mxu3 %v3890_v16  ;;  %v9676_v16 = vpop.f32.mrf.mxu2  ;;  %6149 = vmatmul.msk.f32.gmra.mxu0 %vm122_vm0, %v12422_v7 }
 0x57d   :  { %12419 = vst [vmem:[#allocation85_spill] sm:$0xff] %v9676_v16 }
 0x57e   :  { %4469 = vmatpush.msra.mxu3 %v3880_v14  ;;  %v9680_v14 = vpop.f32.mrf.mxu3  ;;  %v9686_v34 = vpop.f32.mrf.mxu1  ;;  %6258 = vmatmul.msk.f32.gmra.mxu2 %vm122_vm0, %v12255_v27 }
 0x57f   :  { %12421 = vst [vmem:[#allocation66_spill] sm:$0xff] %v9680_v14 }
 0x580   :  { %4470 = vmatpush.msra.mxu3 %v3870_v28  ;;  %v12424_v28 = vld [vmem:[#allocation181_spill] sm:$0xff] }
 0x581   :  { %v1485_v16 = vadd.f32 %v12424_v28, %v9503_v8  ;;  %6197 = vmatmul.msk.f32.gmra.mxu1 %vm122_vm0, %v12279_v32  ;;  %v12428_v28 = vld [vmem:[#allocation172_spill] sm:$0xff] }
 0x582   :  { %4471 = vmatpush.msra.mxu3 %v3860_v45  ;;  %v12425_v45 = vld [vmem:[#allocation177_spill] sm:$0xff]  ;;  %v9696_v51 = vpop.f32.mrf.mxu0  ;;  %v1479_v14 = vadd.f32 %v12428_v28, %v9503_v8 }
 0x583   :  { %v1482_v10 = vadd.f32 %v12425_v45, %v9503_v8  ;;  %12426 = vst [vmem:[#allocation82_spill] sm:$0xff] %v9696_v51  ;;  %v3470_v27 = vmax.f32 %v1485_v16, 0.0  ;;  %v12432_v51 = vld [vmem:[#allocation164_spill] sm:$0xff] }
 0x584   :  { %4472 = vmatpush.msra.mxu3 %v3850_v57  ;;  %v9698_v57 = vpop.f32.mrf.mxu2  ;;  %6150 = vmatmul.msk.f32.gmra.mxu0 %vm122_vm0, %v12430_v52  ;;  %v12434_v16 = vld [vmem:[#allocation160_spill] sm:$0xff] }
 0x585   :  { %12427 = vst [vmem:[#allocation79_spill] sm:$0xff] %v9698_v57  ;;  %v3460_v45 = vmax.f32 %v1482_v10, 0.0  ;;  %v3450_v57 = vmax.f32 %v1479_v14, 0.0  ;;  %v4110_v21 = vmin.f32 %v3470_v27, 6.0  ;;  %v1470_v4 = vadd.f32 %v12434_v16, %v9503_v8  ;;  %v9725_v14 = vld [vmem:[%s11589_s5 + $0x8] sm:$0xff] }
 0x586   :  { %4473 = vmatpush.msra.mxu3 %v3840_v46  ;;  %v12429_v46 = vld [vmem:[#allocation168_spill] sm:$0xff]  ;;  %v9706_v3 = vpop.f32.mrf.mxu1  ;;  %v9710_v28 = vpop.f32.mrf.mxu3  ;;  %6259 = vmatmul.msk.f32.gmra.mxu2 %vm122_vm0, %v12263_v25  ;;  %v12439_v16 = vld [vmem:[#allocation122_spill] sm:$0xff] }
 0x587   :  { %v1476_v17 = vadd.f32 %v12429_v46, %v9503_v8  ;;  %12431 = vst [vmem:[#allocation20_spill] sm:$0xff] %v9706_v3  ;;  %v12437_v25 = vld [vmem:[#allocation156_spill] sm:$0xff]  ;;  %v4090_v46 = vmin.f32 %v3450_v57, 6.0 }
 0x588   :  { %4474 = vmatpush.msra.mxu3 %v3830_v36  ;;  %v1473_v36 = vadd.f32 %v12432_v51, %v9503_v8  ;;  %12433 = vst [vmem:[#allocation76_spill] sm:$0xff] %v9710_v28  ;;  %v1467_v27 = vadd.f32 %v12437_v25, %v9503_v8  ;;  %v12442_v57 = vld [vmem:[#allocation144_spill] sm:$0xff] }
 0x589   :  { %v3440_v10 = vmax.f32 %v1476_v17, 0.0  ;;  %6198 = vmatmul.msk.f32.gmra.mxu1 %vm122_vm0, %v12289_v33  ;;  %v12438_v17 = vld [vmem:[#allocation152_spill] sm:$0xff] }
 0x58a   :  { %4475 = vmatpush.msra.mxu3 %v3820_v61  ;;  %v4100_v61 = vmin.f32 %v3460_v45, 6.0  ;;  %v9718_v38 = vpop.f32.mrf.mxu0  ;;  %v3420_v45 = vmax.f32 %v1470_v4, 0.0 }
 0x58b   :  { %12435 = vst [vmem:[#allocation187_spill] sm:$0xff] %v9718_v38  ;;  %v12441_v38 = vld [vmem:[#allocation148_spill] sm:$0xff] }
 0x58c   :  { %4476 = vmatpush.msra.mxu3 %v3810_v49  ;;  %v9720_v51 = vpop.f32.mrf.mxu2  ;;  %v3430_v49 = vmax.f32 %v1473_v36, 0.0  ;;  %6151 = vmatmul.msk.f32.gmra.mxu0 %vm122_vm0, %v12439_v16  ;;  %v1461_v28 = vadd.f32 %v12441_v38, %v9503_v8  ;;  %v1458_v36 = vadd.f32 %v12442_v57, %v9503_v8  ;;  %v12448_v57 = vld [vmem:[#allocation126_spill] sm:$0xff] }
 0x58d   :  { %12436 = vst [vmem:[#allocation183_spill] sm:$0xff] %v9720_v51  ;;  %v3410_v51 = vmax.f32 %v1467_v27, 0.0  ;;  %v12446_v27 = vld [vmem:[#allocation140_spill] sm:$0xff] }
 0x58e   :  { %4477 = vmatpush.msra.mxu3 %v3800_v42  ;;  %v4080_v42 = vmin.f32 %v3440_v10, 6.0  ;;  %v9734_v3 = vpop.f32.mrf.mxu1  ;;  %v4070_v23 = vmin.f32 %v3430_v49, 6.0  ;;  %6260 = vmatmul.msk.f32.gmra.mxu2 %vm122_vm0, %v12271_v30  ;;  %v4060_v10 = vmin.f32 %v3420_v45, 6.0  ;;  %v1455_v49 = vadd.f32 %v12446_v27, %v9503_v8 }
 0x58f   :  { %4478 = vmatmul.f32.vlgmr.msra.gmra.mxu3 %v9725_v14  ;;  %12440 = vst [vmem:[#allocation69_spill] sm:$0xff] %v9734_v3  ;;  %v3390_v30 = vmax.f32 %v1461_v28, 0.0  ;;  %v3380_v45 = vmax.f32 %v1458_v36, 0.0  ;;  %v12450_v3 = vld [vmem:[#allocation132_spill] sm:$0xff] }
 0x590   :  { %4482 = vmatpush.msrb.mxu3 %v4110_v21  ;;  %v1464_v21 = vadd.f32 %v12438_v17, %v9503_v8  ;;  %v12447_v17 = vld [vmem:[#allocation136_spill] sm:$0xff] }
 0x591   :  { %6199 = vmatmul.msk.f32.gmra.mxu1 %vm122_vm0, %v12299_v5  ;;  %v12451_v28 = vld [vmem:[#allocation128_spill] sm:$0xff] }
 0x592   :  { %4483 = vmatpush.msrb.mxu3 %v4100_v61  ;;  %v3400_v4 = vmax.f32 %v1464_v21, 0.0  ;;  %v9742_v61 = vpop.f32.mrf.mxu3  ;;  %v9746_v25 = vpop.f32.mrf.mxu0  ;;  %v1452_v21 = vadd.f32 %v12447_v17, %v9503_v8  ;;  %v12456_v17 = vld [vmem:[#allocation120_spill] sm:$0xff] }
 0x593   :  { %12443 = vst [vmem:[#allocation179_spill] sm:$0xff] %v9742_v61  ;;  %v3370_v61 = vmax.f32 %v1455_v49, 0.0 }
 0x594   :  { %4484 = vmatpush.msrb.mxu3 %v4090_v46  ;;  %12444 = vst [vmem:[#allocation175_spill] sm:$0xff] %v9746_v25  ;;  %v9748_v38 = vpop.f32.mrf.mxu2  ;;  %v4050_v46 = vmin.f32 %v3410_v51, 6.0  ;;  %6152 = vmatmul.msk.f32.gmra.mxu0 %vm122_vm0, %v12448_v57  ;;  %v1449_v25 = vadd.f32 %v12450_v3, %v9503_v8  ;;  %v1446_v51 = vadd.f32 %v12451_v28, %v9503_v8  ;;  %v3360_v36 = vmax.f32 %v1452_v21, 0.0  ;;  %v12454_v3 = vld [vmem:[#allocation124_spill] sm:$0xff]  ;;  %v12457_v28 = vld [vmem:[#allocation130_spill] sm:$0xff] }
 0x595   :  { %12445 = vst [vmem:[#allocation21_spill] sm:$0xff] %v9748_v38  ;;  %v4030_v38 = vmin.f32 %v3390_v30, 6.0  ;;  %v1443_v49 = vadd.f32 %v12454_v3, %v9503_v8  ;;  %v1440_v21 = vadd.f32 %v12456_v17, %v9503_v8 }
 0x596   :  { %4485 = vmatpush.msrb.mxu3 %v4080_v42  ;;  %v4040_v42 = vmin.f32 %v3400_v4, 6.0  ;;  %6261 = vmatmul.msk.f32.gmra.mxu2 %vm122_vm0, %v12279_v32  ;;  %v4020_v4 = vmin.f32 %v3380_v45, 6.0  ;;  %v3350_v30 = vmax.f32 %v1449_v25, 0.0  ;;  %v3340_v45 = vmax.f32 %v1446_v51, 0.0 }
 0x597   :  { %v3330_v3 = vmax.f32 %v1443_v49, 0.0  ;;  %v3320_v51 = vmax.f32 %v1440_v21, 0.0 }
 0x598   :  { %4486 = vmatpush.msrb.mxu3 %v4070_v23  ;;  %v9756_v23 = vpop.f32.mrf.mxu1  ;;  %v3990_v25 = vmin.f32 %v3350_v30, 6.0 }
 0x599   :  { %12449 = vst [vmem:[#allocation171_spill] sm:$0xff] %v9756_v23  ;;  %6200 = vmatmul.msk.f32.gmra.mxu1 %vm122_vm0, %v12308_v62  ;;  %v3970_v30 = vmin.f32 %v3330_v3, 6.0  ;;  %v12468_v3 = vld [vmem:[#allocation225_spill] sm:$0xff] }
 0x59a   :  { %4487 = vmatpush.msrb.mxu3 %v4060_v10  ;;  %v9766_v10 = vpop.f32.mrf.mxu0  ;;  %v9772_v32 = vpop.f32.mrf.mxu3 }
 0x59b   :  { %12452 = vst [vmem:[#allocation167_spill] sm:$0xff] %v9766_v10 }
 0x59c   :  { %4488 = vmatpush.msrb.mxu3 %v4050_v46  ;;  %v9768_v27 = vpop.f32.mrf.mxu2  ;;  %v4010_v46 = vmin.f32 %v3370_v61, 6.0  ;;  %12455 = vst [vmem:[#allocation163_spill] sm:$0xff] %v9772_v32  ;;  %6153 = vmatmul.msk.f32.gmra.mxu0 %vm122_vm0, %v12457_v28  ;;  %v12460_v61 = vld [vmem:[#allocation241_spill] sm:$0xff]  ;;  %v12465_v32 = vld [vmem:[#allocation134_spill] sm:$0xff] }
 0x59d   :  { %12453 = vst [vmem:[#allocation72_spill] sm:$0xff] %v9768_v27 }
 0x59e   :  { %4489 = vmatpush.msrb.mxu3 %v4040_v42  ;;  %v4000_v42 = vmin.f32 %v3360_v36, 6.0  ;;  %6262 = vmatmul.msk.f32.gmra.mxu2 %vm122_vm0, %v12289_v33  ;;  %v3980_v36 = vmin.f32 %v3340_v45, 6.0  ;;  %v12464_v33 = vld [vmem:[#allocation233_spill] sm:$0xff]  ;;  %v3960_v45 = vmin.f32 %v3320_v51, 6.0 }
 0x5a0   :  { %4490 = vmatpush.msrb.mxu3 %v4030_v38  ;;  %v12458_v38 = vld [vmem:[#allocation244_spill] sm:$0xff]  ;;  %v9780_v10 = vpop.f32.mrf.mxu1 }
 0x5a1   :  { %v1533_v23 = vadd.f32 %v12458_v38, %v9503_v8  ;;  %12459 = vst [vmem:[#allocation159_spill] sm:$0xff] %v9780_v10  ;;  %6201 = vmatmul.msk.f32.gmra.mxu1 %vm122_vm0, %v12317_v41 }
 0x5a2   :  { %4491 = vmatpush.msrb.mxu3 %v4020_v4  ;;  %v1530_v4 = vadd.f32 %v12460_v61, %v9503_v8  ;;  %v9790_v10 = vpop.f32.mrf.mxu0  ;;  %v4379_v21 = vpop.f32.mrf.mxu3 }
 0x5a3   :  { %v3630_v38 = vmax.f32 %v1533_v23, 0.0  ;;  %12462 = vst [vmem:[#allocation23_spill] sm:$0xff] %v9790_v10 }
 0x5a4   :  { %4492 = vmatpush.msrb.mxu3 %v4010_v46  ;;  %v12461_v46 = vld [vmem:[#allocation237_spill] sm:$0xff]  ;;  %v9792_v49 = vpop.f32.mrf.mxu2  ;;  %v3620_v61 = vmax.f32 %v1530_v4, 0.0  ;;  %6154 = vmatmul.msk.f32.gmra.mxu0 %vm122_vm0, %v12465_v32  ;;  %v1518_v4 = vadd.f32 %v12468_v3, %v9503_v8 }
 0x5a5   :  { %v1527_v17 = vadd.f32 %v12461_v46, %v9503_v8  ;;  %12463 = vst [vmem:[#allocation155_spill] sm:$0xff] %v9792_v49  ;;  %v4270_v27 = vmin.f32 %v3630_v38, 6.0  ;;  %v12469_v38 = vld [vmem:[#allocation221_spill] sm:$0xff]  ;;  %v12473_v49 = vld [vmem:[#allocation138_spill] sm:$0xff] }
 0x5a6   :  { %4493 = vmatpush.msrb.mxu3 %v4000_v42  ;;  %v1524_v42 = vadd.f32 %v12464_v33, %v9503_v8  ;;  %6263 = vmatmul.msk.f32.gmra.mxu2 %vm122_vm0, %v12299_v5  ;;  %v4260_v51 = vmin.f32 %v3620_v61, 6.0  ;;  %v1515_v5 = vadd.f32 %v12469_v38, %v9503_v8 }
 0x5a7   :  { %v3610_v23 = vmax.f32 %v1527_v17, 0.0  ;;  %v9811_v17 = vld [vmem:[%s11589_s5 + $0x10] sm:$0xff] }
 0x5a8   :  { %4494 = vmatpush.msrb.mxu3 %v3990_v25  ;;  %v12466_v25 = vld [vmem:[#allocation229_spill] sm:$0xff]  ;;  %v9800_v10 = vpop.f32.mrf.mxu1  ;;  %v3570_v38 = vmax.f32 %v1515_v5, 0.0 }
 0x5a9   :  { %v1521_v46 = vadd.f32 %v12466_v25, %v9503_v8  ;;  %12467 = vst [vmem:[#allocation151_spill] sm:$0xff] %v9800_v10  ;;  %6202 = vmatmul.msk.f32.gmra.mxu1 %vm122_vm0, %v12326_v63  ;;  %v4250_v33 = vmin.f32 %v3610_v23, 6.0  ;;  %v3580_v25 = vmax.f32 %v1518_v4, 0.0  ;;  %v12474_v10 = vld [vmem:[#allocation213_spill] sm:$0xff] }
 0x5aa   :  { %4495 = vmatpush.msrb.mxu3 %v3980_v36  ;;  %v3600_v36 = vmax.f32 %v1524_v42, 0.0  ;;  %v1509_v47 = vadd.f32 %v12474_v10, %v9503_v8  ;;  %v12477_v4 = vld [vmem:[#allocation209_spill] sm:$0xff] }
 0x5ab   :  { %v12478_v10 = vld [vmem:[#allocation205_spill] sm:$0xff] }
 0x5ac   :  { %4496 = vmatpush.msrb.mxu3 %v3970_v30  ;;  %v3590_v30 = vmax.f32 %v1521_v46, 0.0  ;;  %v9818_v42 = vpop.f32.mrf.mxu2  ;;  %v4240_v3 = vmin.f32 %v3600_v36, 6.0  ;;  %6155 = vmatmul.msk.f32.gmra.mxu0 %vm122_vm0, %v12473_v49  ;;  %v1506_v36 = vadd.f32 %v12477_v4, %v9503_v8  ;;  %v1503_v5 = vadd.f32 %v12478_v10, %v9503_v8 }
 0x5ad   :  { %12471 = vst [vmem:[#allocation147_spill] sm:$0xff] %v9818_v42 }
 0x5ae   :  { %4497 = vmatpush.msrb.mxu3 %v3960_v45  ;;  %v9816_v45 = vpop.f32.mrf.mxu0  ;;  %v4230_v46 = vmin.f32 %v3590_v30, 6.0  ;;  %6264 = vmatmul.msk.f32.gmra.mxu2 %vm122_vm0, %v12308_v62  ;;  %v3550_v30 = vmax.f32 %v1509_v47, 0.0  ;;  %v12481_v62 = vld [vmem:[#allocation201_spill] sm:$0xff]  ;;  %v3530_v10 = vmax.f32 %v1503_v5, 0.0 }
 0x5af   :  { %4498 = vmatmul.f32.vlgmr.msrb.gmra.mxu3 %v9811_v17  ;;  %12470 = vst [vmem:[#allocation75_spill] sm:$0xff] %v9816_v45  ;;  %v4399_v45 = vpop.f32.mrf.mxu3 }
 0x5b0   :  { %4502 = vmatpush.msra.mxu3 %v4270_v27  ;;  %v12472_v27 = vld [vmem:[#allocation217_spill] sm:$0xff]  ;;  %v9826_v23 = vpop.f32.mrf.mxu1  ;;  %v4190_v47 = vmin.f32 %v3550_v30, 6.0  ;;  %v4170_v30 = vmin.f32 %v3530_v10, 6.0 }
 0x5b1   :  { %v1512_v61 = vadd.f32 %v12472_v27, %v9503_v8  ;;  %12475 = vst [vmem:[#allocation143_spill] sm:$0xff] %v9826_v23  ;;  %v4220_v27 = vmin.f32 %v3580_v25, 6.0  ;;  %6203 = vmatmul.msk.f32.gmra.mxu1 %vm122_vm0, %v12334_v58  ;;  %v12482_v25 = vld [vmem:[#allocation142_spill] sm:$0xff] }
 0x5b2   :  { %4503 = vmatpush.msra.mxu3 %v4260_v51  ;;  %v9830_v51 = vadd.f32 %v4399_v45, %v4379_v21  ;;  %v1500_v21 = vadd.f32 %v12481_v62, %v9503_v8  ;;  %v3540_v45 = vmax.f32 %v1506_v36, 0.0 }
 0x5b4   :  { %4504 = vmatpush.msra.mxu3 %v4250_v33  ;;  %12476 = vst [vmem:[#allocation139_spill] sm:$0xff] %v9830_v51  ;;  %v3560_v33 = vmax.f32 %v1512_v61, 0.0  ;;  %v9840_v23 = vpop.f32.mrf.mxu2  ;;  %6156 = vmatmul.msk.f32.gmra.mxu0 %vm122_vm0, %v12482_v25  ;;  %v3520_v36 = vmax.f32 %v1500_v21, 0.0 }
 0x5b5   :  { %12480 = vst [vmem:[#allocation78_spill] sm:$0xff] %v9840_v23  ;;  %v12491_v23 = vld [vmem:[#allocation146_spill] sm:$0xff] }
 0x5b6   :  { %4505 = vmatpush.msra.mxu3 %v4240_v3  ;;  %v4210_v3 = vmin.f32 %v3570_v38, 6.0  ;;  %v9838_v42 = vpop.f32.mrf.mxu0  ;;  %v4200_v61 = vmin.f32 %v3560_v33, 6.0  ;;  %6265 = vmatmul.msk.f32.gmra.mxu2 %vm122_vm0, %v12317_v41  ;;  %v4180_v33 = vmin.f32 %v3540_v45, 6.0  ;;  %v9865_v41 = vld [vmem:[%s11588_s4] sm:$0xff] }
 0x5b7   :  { %12479 = vst [vmem:[#allocation135_spill] sm:$0xff] %v9838_v42  ;;  %v9868_v21 = vperm.slane %v9865_v41, 3  ;;  %v12489_v45 = vld [vmem:[#allocation185_spill] sm:$0xff]  ;;  %v12493_v42 = vld [vmem:[#allocation232_spill] sm:$0xff] }
 0x5b8   :  { %4506 = vmatpush.msra.mxu3 %v4230_v46  ;;  %v12483_v46 = vld [vmem:[#allocation197_spill] sm:$0xff]  ;;  %v9848_v38 = vpop.f32.mrf.mxu1 }
 0x5b9   :  { %v1497_v4 = vadd.f32 %v12483_v46, %v9503_v8  ;;  %12484 = vst [vmem:[#allocation131_spill] sm:$0xff] %v9848_v38  ;;  %6204 = vmatmul.msk.f32.gmra.mxu1 %vm122_vm0, %v12343_v26 }
 0x5ba   :  { %4507 = vmatpush.msra.mxu3 %v4220_v27  ;;  %v12485_v27 = vld [vmem:[#allocation193_spill] sm:$0xff] }
 0x5bb   :  { %v1494_v62 = vadd.f32 %v12485_v27, %v9503_v8  ;;  %v3510_v5 = vmax.f32 %v1497_v4, 0.0  ;;  %v12490_v4 = vld [vmem:[#allocation236_spill] sm:$0xff] }
 0x5bc   :  { %4508 = vmatpush.msra.mxu3 %v4210_v3  ;;  %v12486_v3 = vld [vmem:[#allocation189_spill] sm:$0xff]  ;;  %v1598_v10 = vadd.f32 %v12490_v4, %v9868_v21  ;;  %6157 = vmatmul.msk.f32.gmra.mxu0 %vm122_vm0, %v12491_v23 }
 0x5bd   :  { %v1491_v46 = vadd.f32 %v12486_v3, %v9503_v8  ;;  %v3500_v27 = vmax.f32 %v1494_v62, 0.0  ;;  %v4160_v3 = vmin.f32 %v3520_v36, 6.0  ;;  %v12494_v36 = vld [vmem:[#allocation228_spill] sm:$0xff] }
 0x5be   :  { %4509 = vmatpush.msra.mxu3 %v4200_v61  ;;  %v9858_v51 = vpop.f32.mrf.mxu0  ;;  %v9860_v61 = vpop.f32.mrf.mxu2  ;;  %6266 = vmatmul.msk.f32.gmra.mxu2 %vm122_vm0, %v12326_v63 }
 0x5bf   :  { %12487 = vst [vmem:[#allocation127_spill] sm:$0xff] %v9858_v51  ;;  %v1595_v51 = vadd.f32 %v12493_v42, %v9868_v21  ;;  %v4140_v62 = vmin.f32 %v3500_v27, 6.0  ;;  %v12497_v42 = vld [vmem:[#allocation224_spill] sm:$0xff] }
 0x5c0   :  { %4510 = vmatpush.msra.mxu3 %v4190_v47  ;;  %12488 = vst [vmem:[#allocation248_spill] sm:$0xff] %v9860_v61  ;;  %v1488_v47 = vadd.f32 %v12489_v45, %v9503_v8  ;;  %v4150_v61 = vmin.f32 %v3510_v5, 6.0  ;;  %v9876_v38 = vpop.f32.mrf.mxu1  ;;  %v3151_v45 = vmax.f32 %v1598_v10, 0.0  ;;  %v1589_v4 = vadd.f32 %v12497_v42, %v9868_v21  ;;  %v12505_v42 = vld [vmem:[#allocation208_spill] sm:$0xff] }
 0x5c1   :  { %12492 = vst [vmem:[#allocation245_spill] sm:$0xff] %v9876_v38  ;;  %6205 = vmatmul.msk.f32.gmra.mxu1 %vm122_vm0, %v12352_v0  ;;  %v3141_v63 = vmax.f32 %v1595_v51, 0.0  ;;  %v12499_v38 = vld [vmem:[#allocation150_spill] sm:$0xff]  ;;  %v9905_v51 = vld [vmem:[%s11589_s5 + $0x18] sm:$0xff] }
 0x5c2   :  { %4511 = vmatpush.msra.mxu3 %v4180_v33  ;;  %v3490_v33 = vmax.f32 %v1491_v46, 0.0  ;;  %v3480_v8 = vmax.f32 %v1488_v47, 0.0  ;;  %v3791_v10 = vmin.f32 %v3151_v45, 6.0 }
 0x5c3   :  { %v3781_v23 = vmin.f32 %v3141_v63, 6.0 }
 0x5c4   :  { %4512 = vmatpush.msra.mxu3 %v4170_v30  ;;  %v1592_v30 = vadd.f32 %v12494_v36, %v9868_v21  ;;  %v4130_v46 = vmin.f32 %v3490_v33, 6.0  ;;  %v4120_v47 = vmin.f32 %v3480_v8, 6.0  ;;  %6158 = vmatmul.msk.f32.gmra.mxu0 %vm122_vm0, %v12499_v38  ;;  %v12502_v8 = vld [vmem:[#allocation212_spill] sm:$0xff] }
 0x5c6   :  { %4513 = vmatpush.msra.mxu3 %v4160_v3  ;;  %v9886_v5 = vpop.f32.mrf.mxu0  ;;  %v9888_v3 = vpop.f32.mrf.mxu2  ;;  %v3131_v36 = vmax.f32 %v1592_v30, 0.0  ;;  %6267 = vmatmul.msk.f32.gmra.mxu2 %vm122_vm0, %v12334_v58  ;;  %v1580_v30 = vadd.f32 %v12502_v8, %v9868_v21 }
 0x5c7   :  { %12495 = vst [vmem:[#allocation81_spill] sm:$0xff] %v9886_v5  ;;  %v3121_v5 = vmax.f32 %v1589_v4, 0.0  ;;  %v1577_v4 = vadd.f32 %v12505_v42, %v9868_v21 }
 0x5c8   :  { %4514 = vmatpush.msra.mxu3 %v4150_v61  ;;  %12496 = vst [vmem:[#allocation242_spill] sm:$0xff] %v9888_v3  ;;  %v12498_v61 = vld [vmem:[#allocation220_spill] sm:$0xff]  ;;  %v9896_v33 = vpop.f32.mrf.mxu1  ;;  %v3091_v8 = vmax.f32 %v1580_v30, 0.0 }
 0x5c9   :  { %v1586_v27 = vadd.f32 %v12498_v61, %v9868_v21  ;;  %12500 = vst [vmem:[#allocation239_spill] sm:$0xff] %v9896_v33  ;;  %v12501_v3 = vld [vmem:[#allocation216_spill] sm:$0xff]  ;;  %6206 = vmatmul.msk.f32.gmra.mxu1 %vm122_vm0, %v12362_v18 }
 0x5ca   :  { %4515 = vmatpush.msra.mxu3 %v4140_v62  ;;  %v1583_v62 = vadd.f32 %v12501_v3, %v9868_v21  ;;  %v12506_v61 = vld [vmem:[#allocation204_spill] sm:$0xff] }
 0x5cb   :  { %v3111_v45 = vmax.f32 %v1586_v27, 0.0  ;;  %v12509_v33 = vld [vmem:[#allocation200_spill] sm:$0xff] }
 0x5cc   :  { %4516 = vmatpush.msra.mxu3 %v4130_v46  ;;  %v3771_v46 = vmin.f32 %v3131_v36, 6.0  ;;  %v3101_v63 = vmax.f32 %v1583_v62, 0.0  ;;  %v12507_v36 = vld [vmem:[#allocation154_spill] sm:$0xff] }
 0x5cd   :  { %v3751_v27 = vmin.f32 %v3111_v45, 6.0  ;;  %6159 = vmatmul.msk.f32.gmra.mxu0 %vm122_vm0, %v12507_v36  ;;  %v3731_v45 = vmin.f32 %v3091_v8, 6.0  ;;  %v12515_v8 = vld [vmem:[#allocation158_spill] sm:$0xff] }
 0x5ce   :  { %4517 = vmatpush.msra.mxu3 %v4120_v47  ;;  %v9912_v3 = vpop.f32.mrf.mxu0  ;;  %v9914_v58 = vpop.f32.mrf.mxu2  ;;  %v3761_v47 = vmin.f32 %v3121_v5, 6.0  ;;  %v3741_v38 = vmin.f32 %v3101_v63, 6.0  ;;  %6268 = vmatmul.msk.f32.gmra.mxu2 %vm122_vm0, %v12343_v26  ;;  %v12510_v5 = vld [vmem:[#allocation196_spill] sm:$0xff] }
 0x5cf   :  { %4518 = vmatmul.f32.vlgmr.msra.gmra.mxu3 %v9905_v51  ;;  %12503 = vst [vmem:[#allocation235_spill] sm:$0xff] %v9912_v3  ;;  %v3081_v3 = vmax.f32 %v1577_v4, 0.0  ;;  %v1568_v62 = vadd.f32 %v12510_v5, %v9868_v21  ;;  %v12514_v26 = vld [vmem:[#allocation188_spill] sm:$0xff] }
 0x5d0   :  { %4522 = vmatpush.msrb.mxu3 %v3791_v10  ;;  %12504 = vst [vmem:[#allocation231_spill] sm:$0xff] %v9914_v58  ;;  %v1574_v10 = vadd.f32 %v12506_v61, %v9868_v21  ;;  %v1571_v58 = vadd.f32 %v12509_v33, %v9868_v21  ;;  %v12513_v33 = vld [vmem:[#allocation192_spill] sm:$0xff]  ;;  %v1562_v61 = vadd.f32 %v12514_v26, %v9868_v21 }
 0x5d1   :  { %6207 = vmatmul.msk.f32.gmra.mxu1 %vm122_vm0, %v12371_v15  ;;  %v1565_v4 = vadd.f32 %v12513_v33, %v9868_v21  ;;  %v12517_v5 = vld [vmem:[#allocation184_spill] sm:$0xff] }
 0x5d2   :  { %4523 = vmatpush.msrb.mxu3 %v3781_v23  ;;  %v9922_v23 = vpop.f32.mrf.mxu1  ;;  %v3071_v30 = vmax.f32 %v1574_v10, 0.0  ;;  %v3061_v63 = vmax.f32 %v1571_v58, 0.0 }
 0x5d3   :  { %12508 = vst [vmem:[#allocation84_spill] sm:$0xff] %v9922_v23  ;;  %v3041_v23 = vmax.f32 %v1565_v4, 0.0  ;;  %v12521_v4 = vld [vmem:[#allocation176_spill] sm:$0xff] }
 0x5d4   :  { %4524 = vmatpush.msrb.mxu3 %v3771_v46  ;;  %v3711_v10 = vmin.f32 %v3071_v30, 6.0 }
 0x5d5   :  { %6160 = vmatmul.msk.f32.gmra.mxu0 %vm122_vm0, %v12515_v8  ;;  %v3681_v26 = vmin.f32 %v3041_v23, 6.0  ;;  %v12526_v23 = vld [vmem:[#allocation271_spill] sm:$0xff] }
 0x5d6   :  { %4525 = vmatpush.msrb.mxu3 %v3761_v47  ;;  %v9932_v46 = vpop.f32.mrf.mxu0  ;;  %v9934_v42 = vpop.f32.mrf.mxu2  ;;  %v3721_v47 = vmin.f32 %v3081_v3, 6.0  ;;  %6269 = vmatmul.msk.f32.gmra.mxu2 %vm122_vm0, %v12352_v0  ;;  %v12518_v3 = vld [vmem:[#allocation180_spill] sm:$0xff]  ;;  %v12522_v0 = vld [vmem:[#allocation275_spill] sm:$0xff] }
 0x5d7   :  { %12511 = vst [vmem:[#allocation227_spill] sm:$0xff] %v9932_v46  ;;  %v3701_v46 = vmin.f32 %v3061_v63, 6.0  ;;  %v1556_v58 = vadd.f32 %v12518_v3, %v9868_v21  ;;  %v1553_v63 = vadd.f32 %v12521_v4, %v9868_v21 }
 0x5d8   :  { %4526 = vmatpush.msrb.mxu3 %v3751_v27  ;;  %12512 = vst [vmem:[#allocation223_spill] sm:$0xff] %v9934_v42  ;;  %v3051_v27 = vmax.f32 %v1568_v62, 0.0  ;;  %v1559_v42 = vadd.f32 %v12517_v5, %v9868_v21  ;;  %v3031_v62 = vmax.f32 %v1562_v61, 0.0 }
 0x5d9   :  { %6208 = vmatmul.msk.f32.gmra.mxu1 %vm122_vm0, %v12379_v53  ;;  %v3011_v5 = vmax.f32 %v1556_v58, 0.0 }
 0x5da   :  { %4527 = vmatpush.msrb.mxu3 %v3741_v38  ;;  %v9942_v38 = vpop.f32.mrf.mxu1  ;;  %v3691_v30 = vmin.f32 %v3051_v27, 6.0  ;;  %v3671_v61 = vmin.f32 %v3031_v62, 6.0  ;;  %v12523_v27 = vld [vmem:[#allocation162_spill] sm:$0xff] }
 0x5db   :  { %12516 = vst [vmem:[#allocation219_spill] sm:$0xff] %v9942_v38  ;;  %v3651_v62 = vmin.f32 %v3011_v5, 6.0  ;;  %v12531_v5 = vld [vmem:[#allocation166_spill] sm:$0xff] }
 0x5dc   :  { %4528 = vmatpush.msrb.mxu3 %v3731_v45 }
 0x5dd   :  { %6161 = vmatmul.msk.f32.gmra.mxu0 %vm122_vm0, %v12523_v27 }
 0x5de   :  { %4529 = vmatpush.msrb.mxu3 %v3721_v47  ;;  %v9952_v45 = vpop.f32.mrf.mxu0  ;;  %v9954_v33 = vpop.f32.mrf.mxu2  ;;  %v3021_v47 = vmax.f32 %v1559_v42, 0.0  ;;  %6270 = vmatmul.msk.f32.gmra.mxu2 %vm122_vm0, %v12362_v18  ;;  %v1640_v42 = vadd.f32 %v12526_v23, %v9868_v21  ;;  %v12530_v18 = vld [vmem:[#allocation267_spill] sm:$0xff] }
 0x5df   :  { %12519 = vst [vmem:[#allocation215_spill] sm:$0xff] %v9952_v45 }
 0x5e0   :  { %4530 = vmatpush.msrb.mxu3 %v3711_v10  ;;  %12520 = vst [vmem:[#allocation87_spill] sm:$0xff] %v9954_v33  ;;  %v1646_v10 = vadd.f32 %v12522_v0, %v9868_v21  ;;  %v3001_v33 = vmax.f32 %v1553_v63, 0.0  ;;  %v3661_v45 = vmin.f32 %v3021_v47, 6.0 }
 0x5e1   :  { %6209 = vmatmul.msk.f32.gmra.mxu1 %vm122_vm0, %v12388_v31 }
 0x5e2   :  { %4531 = vmatpush.msrb.mxu3 %v3701_v46  ;;  %v12524_v46 = vld [vmem:[#allocation273_spill] sm:$0xff]  ;;  %v9964_v38 = vpop.f32.mrf.mxu1  ;;  %v3311_v58 = vmax.f32 %v1646_v10, 0.0  ;;  %v3641_v47 = vmin.f32 %v3001_v33, 6.0  ;;  %v12534_v33 = vld [vmem:[#allocation263_spill] sm:$0xff] }
 0x5e3   :  { %v1643_v3 = vadd.f32 %v12524_v46, %v9868_v21  ;;  %12525 = vst [vmem:[#allocation211_spill] sm:$0xff] %v9964_v38  ;;  %v3291_v46 = vmax.f32 %v1640_v42, 0.0  ;;  %v1628_v42 = vadd.f32 %v12534_v33, %v9868_v21 }
 0x5e4   :  { %4532 = vmatpush.msrb.mxu3 %v3691_v30  ;;  %v12527_v30 = vld [vmem:[#allocation269_spill] sm:$0xff]  ;;  %v3951_v10 = vmin.f32 %v3311_v58, 6.0 }
 0x5e5   :  { %v1637_v4 = vadd.f32 %v12527_v30, %v9868_v21  ;;  %6162 = vmatmul.msk.f32.gmra.mxu0 %vm122_vm0, %v12531_v5  ;;  %v3251_v33 = vmax.f32 %v1628_v42, 0.0 }
 0x5e6   :  { %4533 = vmatpush.msrb.mxu3 %v3681_v26  ;;  %v3301_v26 = vmax.f32 %v1643_v3, 0.0  ;;  %v9974_v0 = vpop.f32.mrf.mxu0  ;;  %v9976_v63 = vpop.f32.mrf.mxu2  ;;  %6271 = vmatmul.msk.f32.gmra.mxu2 %vm122_vm0, %v12371_v15  ;;  %v12538_v15 = vld [vmem:[#allocation259_spill] sm:$0xff] }
 0x5e7   :  { %12528 = vst [vmem:[#allocation207_spill] sm:$0xff] %v9974_v0  ;;  %v3281_v30 = vmax.f32 %v1637_v4, 0.0  ;;  %v12535_v4 = vld [vmem:[#allocation261_spill] sm:$0xff] }
 0x5e8   :  { %4534 = vmatpush.msrb.mxu3 %v3671_v61  ;;  %12529 = vst [vmem:[#allocation203_spill] sm:$0xff] %v9976_v63  ;;  %v1634_v61 = vadd.f32 %v12530_v18, %v9868_v21  ;;  %v3941_v3 = vmin.f32 %v3301_v26, 6.0  ;;  %v1625_v26 = vadd.f32 %v12535_v4, %v9868_v21  ;;  %v1622_v63 = vadd.f32 %v12538_v15, %v9868_v21 }
 0x5e9   :  { %6210 = vmatmul.msk.f32.gmra.mxu1 %vm122_vm0, %v12397_v19  ;;  %v3921_v18 = vmin.f32 %v3281_v30, 6.0 }
 0x5ea   :  { %4535 = vmatpush.msrb.mxu3 %v3661_v45  ;;  %v12532_v45 = vld [vmem:[#allocation265_spill] sm:$0xff]  ;;  %v9984_v38 = vpop.f32.mrf.mxu1  ;;  %v3271_v58 = vmax.f32 %v1634_v61, 0.0  ;;  %v3241_v4 = vmax.f32 %v1625_v26, 0.0  ;;  %v3231_v42 = vmax.f32 %v1622_v63, 0.0 }
 0x5eb   :  { %v1631_v23 = vadd.f32 %v12532_v45, %v9868_v21  ;;  %12533 = vst [vmem:[#allocation199_spill] sm:$0xff] %v9984_v38 }
 0x5ec   :  { %4536 = vmatpush.msrb.mxu3 %v3651_v62  ;;  %v3931_v62 = vmin.f32 %v3291_v46, 6.0  ;;  %v3911_v61 = vmin.f32 %v3271_v58, 6.0  ;;  %v12539_v46 = vld [vmem:[#allocation170_spill] sm:$0xff]  ;;  %v3891_v58 = vmin.f32 %v3251_v33, 6.0  ;;  %v3871_v63 = vmin.f32 %v3231_v42, 6.0 }
 0x5ed   :  { %6163 = vmatmul.msk.f32.gmra.mxu0 %vm122_vm0, %v12539_v46  ;;  %v12547_v33 = vld [vmem:[#allocation246_spill] sm:$0xff] }
 0x5ee   :  { %4537 = vmatpush.msrb.mxu3 %v3641_v47  ;;  %v3261_v47 = vmax.f32 %v1631_v23, 0.0  ;;  %v9997_v45 = vpop.f32.mrf.mxu2  ;;  %6272 = vmatmul.msk.f32.gmra.mxu2 %vm122_vm0, %v12379_v53  ;;  %v12546_v53 = vld [vmem:[#allocation249_spill] sm:$0xff] }
 0x5ef   :  { %4538 = vmatmul.f32.vlgmr.msrb.gmra.mxu3 %v9633_v24  ;;  %12537 = vst [vmem:[#allocation195_spill] sm:$0xff] %v9997_v45 }
 0x5f0   :  { %4542 = vmatpush.msra.mxu3 %v3951_v10  ;;  %v9995_v10 = vpop.f32.mrf.mxu0  ;;  %v3901_v23 = vmin.f32 %v3261_v47, 6.0  ;;  %v3881_v47 = vmin.f32 %v3241_v4, 6.0 }
 0x5f1   :  { %12536 = vst [vmem:[#allocation90_spill] sm:$0xff] %v9995_v10  ;;  %6211 = vmatmul.msk.f32.gmra.mxu1 %vm122_vm0, %v12406_v29 }
 0x5f2   :  { %4543 = vmatpush.msra.mxu3 %v3941_v3  ;;  %v12540_v3 = vld [vmem:[#allocation257_spill] sm:$0xff]  ;;  %v10005_v30 = vpop.f32.mrf.mxu1 }
 0x5f3   :  { %v1619_v38 = vadd.f32 %v12540_v3, %v9868_v21  ;;  %12541 = vst [vmem:[#allocation191_spill] sm:$0xff] %v10005_v30  ;;  %v1610_v30 = vadd.f32 %v12546_v53, %v9868_v21 }
 0x5f4   :  { %4544 = vmatpush.msra.mxu3 %v3931_v62  ;;  %v12542_v62 = vld [vmem:[#allocation254_spill] sm:$0xff] }
 0x5f5   :  { %v1616_v15 = vadd.f32 %v12542_v62, %v9868_v21  ;;  %v3221_v26 = vmax.f32 %v1619_v38, 0.0  ;;  %6164 = vmatmul.msk.f32.gmra.mxu0 %vm122_vm0, %v7697_v13 }
 0x5f6   :  { %4545 = vmatpush.msra.mxu3 %v3921_v18  ;;  %v12543_v18 = vld [vmem:[#allocation251_spill] sm:$0xff]  ;;  %6273 = vmatmul.msk.f32.gmra.mxu2 %vm122_vm0, %v12388_v31 }
 0x5f7   :  { %v1613_v3 = vadd.f32 %v12543_v18, %v9868_v21  ;;  %v3211_v62 = vmax.f32 %v1616_v15, 0.0  ;;  %v3861_v38 = vmin.f32 %v3221_v26, 6.0  ;;  %v3191_v15 = vmax.f32 %v1610_v30, 0.0  ;;  %v12553_v30 = vld [vmem:[#allocation316_spill] sm:$0xff] }
 0x5f8   :  { %4546 = vmatpush.msra.mxu3 %v3911_v61  ;;  %v10015_v45 = vpop.f32.mrf.mxu0  ;;  %v10017_v61 = vpop.f32.mrf.mxu2  ;;  %v10036_v26 = vperm.slane %v9865_v41, 6 }
 0x5f9   :  { %12544 = vst [vmem:[#allocation68_spill] sm:$0xff] %v10015_v45  ;;  %v3201_v18 = vmax.f32 %v1613_v3, 0.0  ;;  %v3851_v42 = vmin.f32 %v3211_v62, 6.0  ;;  %6212 = vmatmul.msk.f32.gmra.mxu1 %vm122_vm0, %v12414_v20  ;;  %v1694_v62 = vadd.f32 %v12553_v30, %v9868_v21 }
 0x5fa   :  { %4547 = vmatpush.msra.mxu3 %v3901_v23  ;;  %12545 = vst [vmem:[#allocation65_spill] sm:$0xff] %v10017_v61  ;;  %v1607_v23 = vadd.f32 %v12547_v33, %v9868_v21  ;;  %v10025_v4 = vpop.f32.mrf.mxu1 }
 0x5fb   :  { %12548 = vst [vmem:[#allocation61_spill] sm:$0xff] %v10025_v4  ;;  %v12554_v4 = vld [vmem:[#allocation281_spill] sm:$0xff]  ;;  %v3471_v30 = vmax.f32 %v1694_v62, 0.0 }
 0x5fc   :  { %4548 = vmatpush.msra.mxu3 %v3891_v58  ;;  %v12549_v58 = vld [vmem:[#allocation243_spill] sm:$0xff]  ;;  %v3181_v3 = vmax.f32 %v1607_v23, 0.0  ;;  %v2225_v0 = vadd.f32 %v12554_v4, %v10036_v26  ;;  %v12555_v23 = vld [vmem:[#allocation312_spill] sm:$0xff] }
 0x5fd   :  { %v1604_v53 = vadd.f32 %v12549_v58, %v9868_v21  ;;  %v3831_v58 = vmin.f32 %v3191_v15, 6.0  ;;  %6165 = vmatmul.msk.f32.gmra.mxu0 %vm122_vm0, %v12138_v50 }
 0x5fe   :  { %4549 = vmatpush.msra.mxu3 %v3881_v47  ;;  %v12550_v47 = vld [vmem:[#allocation240_spill] sm:$0xff]  ;;  %v3821_v10 = vmin.f32 %v3181_v3, 6.0  ;;  %6274 = vmatmul.msk.f32.gmra.mxu2 %vm122_vm0, %v12397_v19 }
 0x5ff   :  { %v1601_v33 = vadd.f32 %v12550_v47, %v9868_v21  ;;  %v1691_v47 = vadd.f32 %v12555_v23, %v9868_v21 }
 0x600   :  { %4550 = vmatpush.msra.mxu3 %v3871_v63  ;;  %v3841_v63 = vmin.f32 %v3201_v18, 6.0  ;;  %v10038_v61 = vpop.f32.mrf.mxu0  ;;  %v10040_v31 = vpop.f32.mrf.mxu2 }
 0x601   :  { %12551 = vst [vmem:[#allocation93_spill] sm:$0xff] %v10038_v61  ;;  %v3161_v18 = vmax.f32 %v1601_v33, 0.0  ;;  %v3154_v61 = vmax.f32 %v2225_v0, 0.0  ;;  %v12560_v33 = vld [vmem:[#allocation306_spill] sm:$0xff]  ;;  %6213 = vmatmul.msk.f32.gmra.mxu1 %vm122_vm0, %v12422_v7  ;;  %v12563_v0 = vld [vmem:[#allocation303_spill] sm:$0xff] }
 0x602   :  { %4551 = vmatpush.msra.mxu3 %v3861_v38  ;;  %12552 = vst [vmem:[#allocation58_spill] sm:$0xff] %v10040_v31  ;;  %v3171_v38 = vmax.f32 %v1604_v53, 0.0  ;;  %v12556_v31 = vld [vmem:[#allocation279_spill] sm:$0xff]  ;;  %v10052_v45 = vpop.f32.mrf.mxu1  ;;  %v12558_v53 = vld [vmem:[#allocation309_spill] sm:$0xff]  ;;  %v1685_v3 = vadd.f32 %v12560_v33, %v9868_v21 }
 0x603   :  { %12557 = vst [vmem:[#allocation55_spill] sm:$0xff] %v10052_v45  ;;  %v1688_v15 = vadd.f32 %v12558_v53, %v9868_v21  ;;  %v12561_v53 = vld [vmem:[#allocation274_spill] sm:$0xff]  ;;  %v3794_v46 = vmin.f32 %v3154_v61, 6.0 }
 0x604   :  { %4552 = vmatpush.msra.mxu3 %v3851_v42  ;;  %v2222_v42 = vadd.f32 %v12556_v31, %v10036_v26  ;;  %v3811_v4 = vmin.f32 %v3171_v38, 6.0  ;;  %v3461_v31 = vmax.f32 %v1691_v47, 0.0  ;;  %v2216_v62 = vadd.f32 %v12561_v53, %v10036_v26  ;;  %v12564_v47 = vld [vmem:[#allocation272_spill] sm:$0xff]  ;;  %v12568_v61 = vld [vmem:[#allocation298_spill] sm:$0xff] }
 0x605   :  { %v3451_v38 = vmax.f32 %v1688_v15, 0.0  ;;  %v2213_v33 = vadd.f32 %v12564_v47, %v10036_v26  ;;  %4618 = vmatmul.f32.vlgmr.msrb.gmra.mxu0 %v9633_v24 }
 0x606   :  { %4553 = vmatpush.msra.mxu3 %v3841_v63  ;;  %v12559_v63 = vld [vmem:[#allocation276_spill] sm:$0xff]  ;;  %v3144_v45 = vmax.f32 %v2222_v42, 0.0  ;;  %v3441_v42 = vmax.f32 %v1685_v3, 0.0  ;;  %v4101_v5 = vmin.f32 %v3461_v31, 6.0  ;;  %4762 = vmatpush.msrb.mxu0 %v3794_v46 }
 0x607   :  { %v2219_v23 = vadd.f32 %v12559_v63, %v10036_v26  ;;  %v4111_v63 = vmin.f32 %v3471_v30, 6.0  ;;  %v4091_v47 = vmin.f32 %v3451_v38, 6.0  ;;  %6275 = vmatmul.msk.f32.gmra.mxu2 %vm122_vm0, %v12406_v29  ;;  %v12569_v3 = vld [vmem:[#allocation268_spill] sm:$0xff] }
 0x608   :  { %4554 = vmatpush.msra.mxu3 %v3831_v58  ;;  %v3801_v58 = vmin.f32 %v3161_v18, 6.0  ;;  %v10066_v50 = vpop.f32.mrf.mxu0  ;;  %v10068_v19 = vpop.f32.mrf.mxu2  ;;  %v12565_v18 = vld [vmem:[#allocation301_spill] sm:$0xff]  ;;  %v3784_v15 = vmin.f32 %v3144_v45, 6.0  ;;  %v2207_v31 = vadd.f32 %v12569_v3, %v10036_v26  ;;  %v12570_v45 = vld [vmem:[#allocation295_spill] sm:$0xff] }
 0x609   :  { %12562 = vst [vmem:[#allocation52_spill] sm:$0xff] %v10068_v19  ;;  %v3134_v13 = vmax.f32 %v2219_v23, 0.0  ;;  %v1679_v53 = vadd.f32 %v12565_v18, %v9868_v21  ;;  %v1676_v23 = vadd.f32 %v12568_v61, %v9868_v21  ;;  %v1673_v46 = vadd.f32 %v12570_v45, %v9868_v21  ;;  %6214 = vmatmul.msk.f32.gmra.mxu1 %vm122_vm0, %v12430_v52 }
 0x60a   :  { %4555 = vmatpush.msra.mxu3 %v3821_v10  ;;  %v1682_v10 = vadd.f32 %v12563_v0, %v9868_v21  ;;  %v3124_v0 = vmax.f32 %v2216_v62, 0.0  ;;  %v10079_v30 = vpop.f32.mrf.mxu1  ;;  %4763 = vmatpush.msrb.mxu0 %v3784_v15 }
 0x60b   :  { %12567 = vst [vmem:[#allocation49_spill] sm:$0xff] %v10079_v30  ;;  %v3774_v62 = vmin.f32 %v3134_v13, 6.0  ;;  %v3421_v18 = vmax.f32 %v1679_v53, 0.0  ;;  %v12573_v13 = vld [vmem:[#allocation292_spill] sm:$0xff]  ;;  %v3411_v61 = vmax.f32 %v1676_v23, 0.0  ;;  %v12576_v30 = vld [vmem:[#allocation262_spill] sm:$0xff] }
 0x60c   :  { %4556 = vmatpush.msra.mxu3 %v3811_v4  ;;  %v12566_v4 = vld [vmem:[#allocation270_spill] sm:$0xff]  ;;  %v1670_v15 = vadd.f32 %v12573_v13, %v9868_v21  ;;  %v2198_v13 = vadd.f32 %v12576_v30, %v10036_v26  ;;  %v12580_v30 = vld [vmem:[#allocation284_spill] sm:$0xff] }
 0x60d   :  { %v2210_v19 = vadd.f32 %v12566_v4, %v10036_v26  ;;  %4764 = vmatpush.msrb.mxu0 %v3774_v62  ;;  %v3401_v62 = vmax.f32 %v1673_v46, 0.0  ;;  %v12579_v46 = vld [vmem:[#allocation260_spill] sm:$0xff] }
 0x60e   :  { %4557 = vmatpush.msra.mxu3 %v3801_v58  ;;  %v3431_v58 = vmax.f32 %v1682_v10, 0.0  ;;  %v12571_v10 = vld [vmem:[#allocation266_spill] sm:$0xff]  ;;  %4698 = vmatmul.f32.vlgmr.msra.gmra.mxu0 %v9633_v24  ;;  %v2195_v24 = vadd.f32 %v12579_v46, %v10036_v26 }
 0x60f   :  { %4558 = vmatmul.f32.vlgmr.msra.gmra.mxu3 %v9725_v14  ;;  %v4081_v14 = vmin.f32 %v3441_v42, 6.0  ;;  %v2204_v38 = vadd.f32 %v12571_v10, %v10036_v26  ;;  %v3104_v29 = vmax.f32 %v2210_v19, 0.0  ;;  %v12574_v42 = vld [vmem:[#allocation264_spill] sm:$0xff]  ;;  %v12575_v19 = vld [vmem:[#allocation289_spill] sm:$0xff]  ;;  %v4061_v10 = vmin.f32 %v3421_v18, 6.0  ;;  %6276 = vmatmul.msk.f32.gmra.mxu2 %vm122_vm0, %v12414_v20 }
 0x610   :  { %4562 = vmatpush.msrb.mxu3 %v4111_v63  ;;  %v3114_v63 = vmax.f32 %v2213_v33, 0.0  ;;  %v10094_v4 = vpop.f32.mrf.mxu0  ;;  %v10096_v33 = vpop.f32.mrf.mxu2  ;;  %v4071_v53 = vmin.f32 %v3431_v58, 6.0  ;;  %v2201_v3 = vadd.f32 %v12574_v42, %v10036_v26  ;;  %v4051_v42 = vmin.f32 %v3411_v61, 6.0 }
 0x611   :  { %12572 = vst [vmem:[#allocation96_spill] sm:$0xff] %v10096_v33  ;;  %v3084_v23 = vmax.f32 %v2204_v38, 0.0  ;;  %v3744_v58 = vmin.f32 %v3104_v29, 6.0  ;;  %v1661_v38 = vadd.f32 %v12580_v30, %v9868_v21  ;;  %6215 = vmatmul.msk.f32.gmra.mxu1 %vm122_vm0, %v12439_v16  ;;  %v3064_v20 = vmax.f32 %v2198_v13, 0.0  ;;  %v12585_v13 = vld [vmem:[#allocation280_spill] sm:$0xff] }
 0x612   :  { %4563 = vmatpush.msrb.mxu3 %v4101_v5  ;;  %v3764_v5 = vmin.f32 %v3124_v0, 6.0  ;;  %v3754_v45 = vmin.f32 %v3114_v63, 6.0  ;;  %v1667_v0 = vadd.f32 %v12575_v19, %v9868_v21  ;;  %v3074_v18 = vmax.f32 %v2201_v3, 0.0  ;;  %v12583_v3 = vld [vmem:[#allocation282_spill] sm:$0xff] }
 0x613   :  { %v3724_v19 = vmin.f32 %v3084_v23, 6.0  ;;  %v1655_v23 = vadd.f32 %v12585_v13, %v9868_v21  ;;  %v10144_v13 = vperm.slane %v9865_v41, 7 }
 0x614   :  { %4564 = vmatpush.msrb.mxu3 %v4091_v47  ;;  %v3094_v47 = vmax.f32 %v2207_v31, 0.0  ;;  %4765 = vmatpush.msrb.mxu0 %v3764_v5  ;;  %v12578_v31 = vld [vmem:[#allocation287_spill] sm:$0xff]  ;;  %v3391_v5 = vmax.f32 %v1670_v15, 0.0  ;;  %v3381_v29 = vmax.f32 %v1667_v0, 0.0  ;;  %v12581_v15 = vld [vmem:[#allocation258_spill] sm:$0xff]  ;;  %v12584_v0 = vld [vmem:[#allocation256_spill] sm:$0xff] }
 0x615   :  { %v1664_v63 = vadd.f32 %v12578_v31, %v9868_v21  ;;  %v2192_v61 = vadd.f32 %v12581_v15, %v10036_v26  ;;  %v3714_v30 = vmin.f32 %v3074_v18, 6.0  ;;  %v2434_v41 = vadd.f32 %v9310_v56, %v10144_v13 }
 0x616   :  { %4565 = vmatpush.msrb.mxu3 %v4081_v14  ;;  %4766 = vmatpush.msrb.mxu0 %v3754_v45  ;;  %v10107_v14 = vpop.f32.mrf.mxu1  ;;  %v4041_v45 = vmin.f32 %v3401_v62, 6.0  ;;  %v4031_v31 = vmin.f32 %v3391_v5, 6.0  ;;  %v2189_v62 = vadd.f32 %v12584_v0, %v10036_v26  ;;  %v4021_v15 = vmin.f32 %v3381_v29, 6.0 }
 0x617   :  { %12577 = vst [vmem:[#allocation46_spill] sm:$0xff] %v10107_v14  ;;  %v12586_v14 = vld [vmem:[#allocation253_spill] sm:$0xff]  ;;  %v3704_v5 = vmin.f32 %v3064_v20, 6.0  ;;  %6277 = vmatmul.msk.f32.gmra.mxu2 %vm122_vm0, %v12422_v7  ;;  %v3341_v20 = vmax.f32 %v1655_v23, 0.0  ;;  %v12591_v7 = vld [vmem:[#allocation247_spill] sm:$0xff] }
 0x618   :  { %4566 = vmatpush.msrb.mxu3 %v4071_v53  ;;  %v3734_v53 = vmin.f32 %v3094_v47, 6.0  ;;  %4767 = vmatpush.msrb.mxu0 %v3744_v58  ;;  %v1658_v47 = vadd.f32 %v12583_v3, %v9868_v21  ;;  %v3371_v58 = vmax.f32 %v1664_v63, 0.0  ;;  %v10125_v46 = vpop.f32.mrf.mxu0  ;;  %v2186_v3 = vadd.f32 %v12586_v14, %v10036_v26  ;;  %v12590_v14 = vld [vmem:[#allocation277_spill] sm:$0xff] }
 0x619   :  { %v3044_v63 = vmax.f32 %v2192_v61, 0.0  ;;  %v1649_v61 = vadd.f32 %v12590_v14, %v9868_v21  ;;  %6216 = vmatmul.msk.f32.gmra.mxu1 %vm122_vm0, %v12448_v57 }
 0x61a   :  { %4567 = vmatpush.msrb.mxu3 %v4061_v10  ;;  %4768 = vmatpush.msrb.mxu0 %v3734_v53  ;;  %v10121_v10 = vpop.f32.mrf.mxu2  ;;  %v3361_v53 = vmax.f32 %v1661_v38, 0.0  ;;  %v4011_v18 = vmin.f32 %v3371_v58, 6.0  ;;  %v12589_v38 = vld [vmem:[#allocation250_spill] sm:$0xff]  ;;  %v3024_v58 = vmax.f32 %v2186_v3, 0.0 }
 0x61b   :  { %12582 = vst [vmem:[#allocation43_spill] sm:$0xff] %v10121_v10  ;;  %v2183_v29 = vadd.f32 %v12589_v38, %v10036_v26  ;;  %v3321_v3 = vmax.f32 %v1649_v61, 0.0  ;;  %v2428_v61 = vadd.f32 %v9265_v59, %v10144_v13 }
 0x61c   :  { %4568 = vmatpush.msrb.mxu3 %v4051_v42  ;;  %v3054_v42 = vmax.f32 %v2195_v24, 0.0  ;;  %4769 = vmatpush.msrb.mxu0 %v3724_v19  ;;  %v3351_v24 = vmax.f32 %v1658_v47, 0.0  ;;  %v3034_v19 = vmax.f32 %v2189_v62, 0.0  ;;  %v2180_v47 = vadd.f32 %v12591_v7, %v10036_v26  ;;  %v12592_v62 = vld [vmem:[#allocation340_spill] sm:$0xff] }
 0x61d   :  { %v2431_v7 = vadd.f32 %v9288_v48, %v10144_v13 }
 0x61e   :  { %4569 = vmatpush.msrb.mxu3 %v4041_v45  ;;  %4770 = vmatpush.msrb.mxu0 %v3714_v30  ;;  %v10133_v33 = vpop.f32.mrf.mxu1  ;;  %v12588_v45 = vld [vmem:[#allocation278_spill] sm:$0xff]  ;;  %v4001_v30 = vmin.f32 %v3361_v53, 6.0  ;;  %v3991_v53 = vmin.f32 %v3351_v24, 6.0  ;;  %v3674_v38 = vmin.f32 %v3034_v19, 6.0  ;;  %v3664_v24 = vmin.f32 %v3024_v58, 6.0 }
 0x61f   :  { %12587 = vst [vmem:[#allocation40_spill] sm:$0xff] %v10133_v33  ;;  %v1652_v0 = vadd.f32 %v12588_v45, %v9868_v21  ;;  %v3014_v45 = vmax.f32 %v2183_v29, 0.0  ;;  %6278 = vmatmul.msk.f32.gmra.mxu2 %vm122_vm0, %v12430_v52 }
 0x620   :  { %4570 = vmatpush.msrb.mxu3 %v4031_v31  ;;  %v3694_v31 = vmin.f32 %v3054_v42, 6.0  ;;  %4771 = vmatpush.msrb.mxu0 %v3704_v5  ;;  %v1742_v42 = vadd.f32 %v12592_v62, %v9868_v21  ;;  %v12594_v62 = vld [vmem:[#allocation337_spill] sm:$0xff] }
 0x621   :  { %v3331_v23 = vmax.f32 %v1652_v0, 0.0  ;;  %v3004_v0 = vmax.f32 %v2180_v47, 0.0  ;;  %v1736_v56 = vadd.f32 %v12594_v62, %v9868_v21  ;;  %v3654_v48 = vmin.f32 %v3014_v45, 6.0  ;;  %v12596_v47 = vld [vmem:[#allocation335_spill] sm:$0xff]  ;;  %6217 = vmatmul.msk.f32.gmra.mxu1 %vm122_vm0, %v12457_v28 }
 0x622   :  { %4571 = vmatpush.msrb.mxu3 %v4021_v15  ;;  %v3684_v15 = vmin.f32 %v3044_v63, 6.0  ;;  %4772 = vmatpush.msrb.mxu0 %v3694_v31  ;;  %v10152_v5 = vpop.f32.mrf.mxu2  ;;  %v3981_v63 = vmin.f32 %v3341_v20, 6.0  ;;  %v10160_v31 = vpop.f32.mrf.mxu0  ;;  %v3155_v20 = vmax.f32 %v2434_v41, 0.0  ;;  %v1733_v58 = vadd.f32 %v12596_v47, %v9868_v21  ;;  %v10194_v47 = vld [vmem:[%s11589_s5] sm:$0xff] }
 0x623   :  { %v3971_v19 = vmin.f32 %v3331_v23, 6.0  ;;  %v3644_v59 = vmin.f32 %v3004_v0, 6.0  ;;  %v12597_v23 = vld [vmem:[#allocation333_spill] sm:$0xff]  ;;  %v3611_v41 = vmax.f32 %v1736_v56, 0.0  ;;  %v2419_v0 = vadd.f32 %v9198_v6, %v10144_v13 }
 0x624   :  { %4572 = vmatpush.msrb.mxu3 %v4011_v18  ;;  %v12593_v18 = vld [vmem:[#allocation339_spill] sm:$0xff]  ;;  %4773 = vmatpush.msrb.mxu0 %v3684_v15  ;;  %v1730_v52 = vadd.f32 %v12597_v23, %v9868_v21  ;;  %v2416_v6 = vadd.f32 %v9171_v54, %v10144_v13  ;;  %v2413_v23 = vadd.f32 %v9141_v35, %v10144_v13  ;;  %v12603_v54 = vld [vmem:[#allocation326_spill] sm:$0xff] }
 0x625   :  { %v1739_v14 = vadd.f32 %v12593_v18, %v9868_v21  ;;  %v12605_v35 = vld [vmem:[#allocation10_spill] sm:$0xff] }
 0x626   :  { %4573 = vmatpush.msrb.mxu3 %v4001_v30  ;;  %v3631_v30 = vmax.f32 %v1742_v42, 0.0  ;;  %4774 = vmatpush.msrb.mxu0 %v3674_v38  ;;  %v10164_v29 = vpop.f32.mrf.mxu1  ;;  %v2425_v42 = vadd.f32 %v9243_v2, %v10144_v13  ;;  %v3145_v38 = vmax.f32 %v2431_v7, 0.0  ;;  %v12599_v2 = vld [vmem:[#allocation331_spill] sm:$0xff] }
 0x627   :  { %12595 = vst [vmem:[#allocation37_spill] sm:$0xff] %v10164_v29  ;;  %v3621_v15 = vmax.f32 %v1739_v14, 0.0  ;;  %v2422_v14 = vadd.f32 %v9221_v9, %v10144_v13  ;;  %v1727_v7 = vadd.f32 %v12599_v2, %v9868_v21  ;;  %v12600_v9 = vld [vmem:[#allocation330_spill] sm:$0xff]  ;;  %6279 = vmatmul.msk.f32.gmra.mxu2 %vm122_vm0, %v12439_v16  ;;  %v3095_v2 = vmax.f32 %v2416_v6, 0.0 }
 0x628   :  { %4574 = vmatpush.msrb.mxu3 %v3991_v53  ;;  %4775 = vmatpush.msrb.mxu0 %v3664_v24  ;;  %v3961_v53 = vmin.f32 %v3321_v3, 6.0  ;;  %v4271_v45 = vmin.f32 %v3631_v30, 6.0  ;;  %v3135_v3 = vmax.f32 %v2428_v61, 0.0  ;;  %v3601_v24 = vmax.f32 %v1733_v58, 0.0 }
 0x629   :  { %v4261_v62 = vmin.f32 %v3621_v15, 6.0  ;;  %v3125_v56 = vmax.f32 %v2425_v42, 0.0  ;;  %v3785_v30 = vmin.f32 %v3145_v38, 6.0  ;;  %v3591_v61 = vmax.f32 %v1730_v52, 0.0  ;;  %6218 = vmatmul.msk.f32.gmra.mxu1 %vm122_vm0, %v12465_v32 }
 0x62a   :  { %4575 = vmatpush.msrb.mxu3 %v3981_v63  ;;  %4776 = vmatpush.msrb.mxu0 %v3654_v48  ;;  %v10178_v18 = vpop.f32.mrf.mxu2  ;;  %v3795_v63 = vmin.f32 %v3155_v20, 6.0  ;;  %v4251_v20 = vmin.f32 %v3611_v41, 6.0  ;;  %v3115_v58 = vmax.f32 %v2422_v14, 0.0  ;;  %v10199_v15 = vpop.f32.mrf.mxu0  ;;  %v3581_v38 = vmax.f32 %v1727_v7, 0.0 }
 0x62b   :  { %12598 = vst [vmem:[#allocation99_spill] sm:$0xff] %v10178_v18  ;;  %v3105_v52 = vmax.f32 %v2419_v0, 0.0  ;;  %v3765_v41 = vmin.f32 %v3125_v56, 6.0  ;;  %v4231_v16 = vmin.f32 %v3591_v61, 6.0  ;;  %v2407_v56 = vadd.f32 %v9090_v1, %v10144_v13  ;;  %v12608_v1 = vld [vmem:[#allocation8_spill] sm:$0xff] }
 0x62c   :  { %4576 = vmatpush.msrb.mxu3 %v3971_v19  ;;  %4777 = vmatpush.msrb.mxu0 %v3644_v59  ;;  %v1724_v19 = vadd.f32 %v12600_v9, %v9868_v21  ;;  %v4241_v59 = vmin.f32 %v3601_v24, 6.0  ;;  %v3755_v7 = vmin.f32 %v3115_v58, 6.0  ;;  %v1715_v24 = vadd.f32 %v12605_v35, %v9868_v21 }
 0x62d   :  { %4778 = vmatmul.f32.vlgmr.msrb.gmra.mxu0 %v10194_v47  ;;  %v4221_v0 = vmin.f32 %v3581_v38, 6.0  ;;  %v3745_v9 = vmin.f32 %v3105_v52, 6.0  ;;  %v2404_v58 = vadd.f32 %v9055_v39, %v10144_v13  ;;  %v3065_v52 = vmax.f32 %v2407_v56, 0.0  ;;  %v12609_v39 = vld [vmem:[#allocation255_spill] sm:$0xff] }
 0x62e   :  { %4577 = vmatpush.msrb.mxu3 %v3961_v53  ;;  %4842 = vmatpush.msra.mxu0 %v3795_v63  ;;  %v10189_v48 = vpop.f32.mrf.mxu1  ;;  %v12602_v53 = vld [vmem:[#allocation328_spill] sm:$0xff]  ;;  %v3571_v14 = vmax.f32 %v1724_v19, 0.0  ;;  %v2410_v63 = vadd.f32 %v9121_v37, %v10144_v13  ;;  %v12606_v19 = vld [vmem:[#allocation9_spill] sm:$0xff]  ;;  %v3541_v38 = vmax.f32 %v1715_v24, 0.0 }
 0x62f   :  { %4578 = vmatmul.f32.vlgmr.msrb.gmra.mxu3 %v9811_v17  ;;  %12601 = vst [vmem:[#allocation34_spill] sm:$0xff] %v10189_v48  ;;  %v3775_v17 = vmin.f32 %v3135_v3, 6.0  ;;  %v1721_v42 = vadd.f32 %v12602_v53, %v9868_v21  ;;  %v1712_v61 = vadd.f32 %v12606_v19, %v9868_v21  ;;  %v3735_v53 = vmin.f32 %v3095_v2, 6.0  ;;  %6280 = vmatmul.msk.f32.gmra.mxu2 %vm122_vm0, %v12448_v57  ;;  %v10248_v19 = vld [vmem:[%s11588_s4 + $0x8] sm:$0x3] }
 0x630   :  { %4582 = vmatpush.msra.mxu3 %v4271_v45  ;;  %4843 = vmatpush.msra.mxu0 %v3785_v30  ;;  %v1718_v45 = vadd.f32 %v12603_v54, %v9868_v21  ;;  %v3085_v30 = vmax.f32 %v2413_v23, 0.0  ;;  %v4211_v37 = vmin.f32 %v3571_v14, 6.0  ;;  %v2401_v23 = vadd.f32 %v9024_v40, %v10144_v13 }
 0x631   :  { %6219 = vmatmul.msk.f32.gmra.mxu1 %vm122_vm0, %v12473_v49  ;;  %v1706_v57 = vadd.f32 %v12609_v39, %v9868_v21  ;;  %v3055_v40 = vmax.f32 %v2404_v58, 0.0  ;;  %v12617_v39 = vld [vmem:[#allocation342_spill] sm:$0xff] }
 0x632   :  { %4583 = vmatpush.msra.mxu3 %v4261_v62  ;;  %4844 = vmatpush.msra.mxu0 %v3775_v17  ;;  %v10211_v3 = vpop.f32.mrf.mxu2  ;;  %v3561_v62 = vmax.f32 %v1721_v42, 0.0  ;;  %v3075_v17 = vmax.f32 %v2410_v63, 0.0  ;;  %v1709_v42 = vadd.f32 %v12608_v1, %v9868_v21  ;;  %v10231_v54 = vpop.f32.mrf.mxu0  ;;  %v2398_v63 = vadd.f32 %v8994_v43, %v10144_v13  ;;  %v12613_v43 = vld [vmem:[#allocation320_spill] sm:$0xff] }
 0x633   :  { %12604 = vst [vmem:[#allocation31_spill] sm:$0xff] %v10211_v3 }
 0x634   :  { %4584 = vmatpush.msra.mxu3 %v4251_v20  ;;  %4845 = vmatpush.msra.mxu0 %v3765_v41  ;;  %v3551_v20 = vmax.f32 %v1718_v45, 0.0  ;;  %v3725_v41 = vmin.f32 %v3085_v30, 6.0  ;;  %v3531_v45 = vmax.f32 %v1712_v61, 0.0  ;;  %v3715_v2 = vmin.f32 %v3075_v17, 6.0  ;;  %v12615_v17 = vld [vmem:[#allocation137_spill] sm:$0xff] }
 0x635   :  { %v3521_v24 = vmax.f32 %v1709_v42, 0.0  ;;  %v3045_v30 = vmax.f32 %v2401_v23, 0.0  ;;  %v1700_v61 = vadd.f32 %v12613_v43, %v9868_v21  ;;  %v3035_v1 = vmax.f32 %v2398_v63, 0.0 }
 0x636   :  { %4585 = vmatpush.msra.mxu3 %v4241_v59  ;;  %4846 = vmatpush.msra.mxu0 %v3755_v7  ;;  %v10221_v6 = vpop.f32.mrf.mxu1  ;;  %v4201_v59 = vmin.f32 %v3561_v62, 6.0  ;;  %v4191_v14 = vmin.f32 %v3551_v20, 6.0  ;;  %v12611_v7 = vld [vmem:[#allocation322_spill] sm:$0xff]  ;;  %v4181_v62 = vmin.f32 %v3541_v38, 6.0  ;;  %v3511_v20 = vmax.f32 %v1706_v57, 0.0 }
 0x637   :  { %12607 = vst [vmem:[#allocation28_spill] sm:$0xff] %v10221_v6  ;;  %v1703_v35 = vadd.f32 %v12611_v7, %v9868_v21  ;;  %v3695_v42 = vmin.f32 %v3055_v40, 6.0  ;;  %6281 = vmatmul.msk.f32.gmra.mxu2 %vm122_vm0, %v12457_v28  ;;  %v12616_v38 = vld [vmem:[#allocation318_spill] sm:$0xff]  ;;  %v2389_v57 = vadd.f32 %v12617_v39, %v10144_v13  ;;  %v1951_v63 = vadd.f32 %v9318_v12, %v8254_v44 }
 0x638   :  { %4586 = vmatpush.msra.mxu3 %v4231_v16  ;;  %4847 = vmatpush.msra.mxu0 %v3745_v9  ;;  %v3705_v9 = vmin.f32 %v3065_v52, 6.0  ;;  %v4161_v52 = vmin.f32 %v3521_v24, 6.0  ;;  %v3491_v28 = vmax.f32 %v1700_v61, 0.0  ;;  %v1948_v24 = vadd.f32 %v9298_v55, %v8254_v44 }
 0x639   :  { %v3501_v23 = vmax.f32 %v1703_v35, 0.0  ;;  %6220 = vmatmul.msk.f32.gmra.mxu1 %vm122_vm0, %v12482_v25  ;;  %v3675_v35 = vmin.f32 %v3035_v1, 6.0  ;;  %v3632_v43 = vmax.f32 %v1951_v63, 0.0 }
 0x63a   :  { %4587 = vmatpush.msra.mxu3 %v4221_v0  ;;  %4848 = vmatpush.msra.mxu0 %v3735_v53  ;;  %v10237_v16 = vpop.f32.mrf.mxu2  ;;  %v12612_v0 = vld [vmem:[#allocation178_spill] sm:$0xff]  ;;  %v2392_v53 = vadd.f32 %v12615_v17, %v10144_v13  ;;  %v4131_v61 = vmin.f32 %v3491_v28, 6.0  ;;  %v3622_v1 = vmax.f32 %v1948_v24, 0.0 }
 0x63b   :  { %12610 = vst [vmem:[#allocation25_spill] sm:$0xff] %v10237_v16  ;;  %v2395_v56 = vadd.f32 %v12612_v0, %v10144_v13  ;;  %v4141_v0 = vmin.f32 %v3501_v23, 6.0  ;;  %v12622_v23 = vld [vmem:[#allocation32_spill] sm:$0xff]  ;;  %v12680_v16 = vld [vmem:[#allocation30_spill] sm:$0xff] }
 0x63c   :  { %4588 = vmatpush.msra.mxu3 %v4211_v37  ;;  %4849 = vmatpush.msra.mxu0 %v3725_v41  ;;  %v4171_v37 = vmin.f32 %v3531_v45, 6.0  ;;  %v10261_v41 = vperm.slane %v10248_v19, 0  ;;  %v3015_v7 = vmax.f32 %v2392_v53, 0.0  ;;  %v12620_v53 = vld [vmem:[#allocation238_spill] sm:$0xff]  ;;  %v4262_v24 = vmin.f32 %v3622_v1, 6.0 }
 0x63d   :  { %v3025_v45 = vmax.f32 %v2395_v56, 0.0 }
 0x63e   :  { %4589 = vmatpush.msra.mxu3 %v4201_v59  ;;  %4850 = vmatpush.msra.mxu0 %v3715_v2  ;;  %v10252_v58 = vpop.f32.mrf.mxu1  ;;  %v1697_v59 = vadd.f32 %v12616_v38, %v9868_v21  ;;  %v4151_v21 = vmin.f32 %v3511_v20, 6.0  ;;  %v2643_v40 = vadd.f32 %v9686_v34, %v10261_v41  ;;  %v2640_v56 = vadd.f32 %v9664_v22, %v10261_v41 }
 0x63f   :  { %12614 = vst [vmem:[#allocation102_spill] sm:$0xff] %v10252_v58  ;;  %v1945_v34 = vadd.f32 %v9275_v11, %v8254_v44  ;;  %v2637_v55 = vadd.f32 %v9642_v60, %v10261_v41  ;;  %v3655_v17 = vmin.f32 %v3015_v7, 6.0  ;;  %v1942_v22 = vadd.f32 %v12620_v53, %v8254_v44  ;;  %6282 = vmatmul.msk.f32.gmra.mxu2 %vm122_vm0, %v12465_v32 }
 0x640   :  { %4590 = vmatpush.msra.mxu3 %v4191_v14  ;;  %4851 = vmatpush.msra.mxu0 %v3705_v9  ;;  %v3685_v14 = vmin.f32 %v3045_v30, 6.0  ;;  %v3481_v12 = vmax.f32 %v1697_v59, 0.0  ;;  %v3005_v30 = vmax.f32 %v2389_v57, 0.0  ;;  %v3665_v9 = vmin.f32 %v3025_v45, 6.0  ;;  %v12623_v45 = vld [vmem:[#allocation146_spill] sm:$0xff] }
 0x641   :  { %v3156_v20 = vmax.f32 %v2643_v40, 0.0  ;;  %v3146_v59 = vmax.f32 %v2640_v56, 0.0  ;;  %v3612_v39 = vmax.f32 %v1945_v34, 0.0  ;;  %v4272_v57 = vmin.f32 %v3632_v43, 6.0  ;;  %6221 = vmatmul.msk.f32.gmra.mxu1 %vm122_vm0, %v12623_v45  ;;  %v12626_v40 = vld [vmem:[#allocation285_spill] sm:$0xff] }
 0x642   :  { %4591 = vmatpush.msra.mxu3 %v4181_v62  ;;  %4852 = vmatpush.msra.mxu0 %v3695_v42  ;;  %v10271_v2 = vpop.f32.mrf.mxu2  ;;  %v10275_v62 = vpop.f32.mrf.mxu0  ;;  %v4121_v11 = vmin.f32 %v3481_v12, 6.0  ;;  %v12621_v42 = vld [vmem:[#allocation18_spill] sm:$0xff]  ;;  %v3645_v60 = vmin.f32 %v3005_v30, 6.0  ;;  %v3136_v32 = vmax.f32 %v2637_v55, 0.0  ;;  %v1936_v7 = vadd.f32 %v12626_v40, %v8254_v44  ;;  %v12627_v12 = vld [vmem:[#allocation119_spill] sm:$0xff] }
 0x643   :  { %12618 = vst [vmem:[#allocation22_spill] sm:$0xff] %v10271_v2  ;;  %v2634_v38 = vadd.f32 %v12621_v42, %v10261_v41  ;;  %v3796_v28 = vmin.f32 %v3156_v20, 6.0  ;;  %v3786_v30 = vmin.f32 %v3146_v59, 6.0  ;;  %v12629_v20 = vld [vmem:[#allocation27_spill] sm:$0xff]  ;;  %v12632_v59 = vld [vmem:[#allocation53_spill] sm:$0xff] }
 0x644   :  { %4592 = vmatpush.msra.mxu3 %v4171_v37  ;;  %4853 = vmatpush.msra.mxu0 %v3685_v14  ;;  %v12624_v14 = vld [vmem:[#allocation109_spill] sm:$0xff]  ;;  %v3582_v42 = vmax.f32 %v1936_v7, 0.0 }
 0x645   :  { %v2631_v63 = vadd.f32 %v12624_v14, %v10261_v41  ;;  %v3126_v56 = vmax.f32 %v2634_v38, 0.0 }
 0x646   :  { %4593 = vmatpush.msra.mxu3 %v4161_v52  ;;  %4854 = vmatpush.msra.mxu0 %v3675_v35  ;;  %v10283_v37 = vpop.f32.mrf.mxu1  ;;  %v1939_v52 = vadd.f32 %v12622_v23, %v8254_v44  ;;  %v3602_v35 = vmax.f32 %v1942_v22, 0.0  ;;  %v3776_v22 = vmin.f32 %v3136_v32, 6.0  ;;  %v12634_v32 = vld [vmem:[#allocation150_spill] sm:$0xff] }
 0x647   :  { %12619 = vst [vmem:[#allocation116_spill] sm:$0xff] %v10283_v37  ;;  %v3116_v53 = vmax.f32 %v2631_v63, 0.0  ;;  %6283 = vmatmul.msk.f32.gmra.mxu2 %vm122_vm0, %v12473_v49 }
 0x648   :  { %4594 = vmatpush.msra.mxu3 %v4151_v21  ;;  %4855 = vmatpush.msra.mxu0 %v3665_v9  ;;  %v12628_v9 = vld [vmem:[#allocation133_spill] sm:$0xff]  ;;  %v3592_v43 = vmax.f32 %v1939_v52, 0.0  ;;  %v4242_v38 = vmin.f32 %v3602_v35, 6.0  ;;  %v3766_v52 = vmin.f32 %v3126_v56, 6.0  ;;  %v4222_v56 = vmin.f32 %v3582_v42, 6.0 }
 0x649   :  { %v1933_v34 = vadd.f32 %v12628_v9, %v8254_v44  ;;  %6222 = vmatmul.msk.f32.gmra.mxu1 %vm122_vm0, %v12634_v32  ;;  %v3756_v7 = vmin.f32 %v3116_v53, 6.0  ;;  %v12642_v42 = vld [vmem:[#allocation313_spill] sm:$0xff] }
 0x64a   :  { %4595 = vmatpush.msra.mxu3 %v4141_v0  ;;  %4856 = vmatpush.msra.mxu0 %v3655_v17  ;;  %v10297_v21 = vpop.f32.mrf.mxu2  ;;  %v2628_v0 = vadd.f32 %v12627_v12, %v10261_v41  ;;  %v10306_v55 = vpop.f32.mrf.mxu0  ;;  %v2625_v17 = vadd.f32 %v12629_v20, %v10261_v41  ;;  %v4232_v63 = vmin.f32 %v3592_v43, 6.0 }
 0x64b   :  { %12625 = vst [vmem:[#allocation113_spill] sm:$0xff] %v10297_v21  ;;  %v3572_v14 = vmax.f32 %v1933_v34, 0.0 }
 0x64c   :  { %4596 = vmatpush.msra.mxu3 %v4131_v61  ;;  %4857 = vmatpush.msra.mxu0 %v3645_v60  ;;  %v4252_v61 = vmin.f32 %v3612_v39, 6.0  ;;  %v2622_v60 = vadd.f32 %v12632_v59, %v10261_v41  ;;  %v3106_v23 = vmax.f32 %v2628_v0, 0.0  ;;  %v12633_v39 = vld [vmem:[#allocation299_spill] sm:$0xff]  ;;  %v3096_v49 = vmax.f32 %v2625_v17, 0.0 }
 0x64d   :  { %4858 = vmatmul.f32.vlgmr.msra.gmra.mxu0 %v10194_v47  ;;  %v4212_v53 = vmin.f32 %v3572_v14, 6.0 }
 0x64e   :  { %4597 = vmatpush.msra.mxu3 %v4121_v11  ;;  %4922 = vmatpush.msrb.mxu0 %v3796_v28  ;;  %v10311_v1 = vpop.f32.mrf.mxu1  ;;  %v12635_v28 = vld [vmem:[#allocation42_spill] sm:$0xff]  ;;  %v3086_v34 = vmax.f32 %v2622_v60, 0.0  ;;  %v3746_v43 = vmin.f32 %v3106_v23, 6.0  ;;  %v3736_v59 = vmin.f32 %v3096_v49, 6.0 }
 0x64f   :  { %4598 = vmatmul.f32.vlgmr.msra.gmra.mxu3 %v9905_v51  ;;  %12630 = vst [vmem:[#allocation110_spill] sm:$0xff] %v10311_v1  ;;  %v12631_v51 = vld [vmem:[#allocation293_spill] sm:$0xff]  ;;  %v2619_v40 = vadd.f32 %v12635_v28, %v10261_v41  ;;  %6284 = vmatmul.msk.f32.gmra.mxu2 %vm122_vm0, %v12482_v25 }
 0x650   :  { %4662 = vmatpush.msrb.mxu3 %v4272_v57  ;;  %4923 = vmatpush.msrb.mxu0 %v3786_v30  ;;  %v1930_v11 = vadd.f32 %v12631_v51, %v8254_v44  ;;  %v1927_v57 = vadd.f32 %v12633_v39, %v8254_v44  ;;  %v12638_v30 = vld [vmem:[#allocation51_spill] sm:$0xff]  ;;  %v3726_v28 = vmin.f32 %v3086_v34, 6.0 }
 0x651   :  { %v2616_v9 = vadd.f32 %v12638_v30, %v10261_v41  ;;  %6223 = vmatmul.msk.f32.gmra.mxu1 %vm122_vm0, %v12507_v36 }
 0x652   :  { %4663 = vmatpush.msrb.mxu3 %v4262_v24  ;;  %4924 = vmatpush.msrb.mxu0 %v3776_v22  ;;  %v10325_v35 = vpop.f32.mrf.mxu2  ;;  %v12637_v24 = vld [vmem:[#allocation307_spill] sm:$0xff]  ;;  %v3562_v0 = vmax.f32 %v1930_v11, 0.0  ;;  %v3552_v17 = vmax.f32 %v1927_v57, 0.0  ;;  %v10339_v39 = vpop.f32.mrf.mxu0  ;;  %v12643_v57 = vld [vmem:[#allocation13_spill] sm:$0xff] }
 0x653   :  { %12636 = vst [vmem:[#allocation105_spill] sm:$0xff] %v10325_v35  ;;  %v1924_v12 = vadd.f32 %v12637_v24, %v8254_v44  ;;  %v12640_v22 = vld [vmem:[#allocation47_spill] sm:$0xff]  ;;  %v2610_v14 = vadd.f32 %v12643_v57, %v10261_v41  ;;  %v12691_v35 = vld [vmem:[#allocation60_spill] sm:$0xff] }
 0x654   :  { %4664 = vmatpush.msrb.mxu3 %v4252_v61  ;;  %4925 = vmatpush.msrb.mxu0 %v3766_v52  ;;  %v12639_v61 = vld [vmem:[#allocation310_spill] sm:$0xff]  ;;  %v2613_v51 = vadd.f32 %v12640_v22, %v10261_v41  ;;  %v1918_v52 = vadd.f32 %v12642_v42, %v8254_v44  ;;  %v4202_v23 = vmin.f32 %v3562_v0, 6.0  ;;  %v4192_v24 = vmin.f32 %v3552_v17, 6.0 }
 0x655   :  { %v1921_v20 = vadd.f32 %v12639_v61, %v8254_v44  ;;  %v3542_v60 = vmax.f32 %v1924_v12, 0.0  ;;  %v12645_v12 = vld [vmem:[#allocation73_spill] sm:$0xff] }
 0x656   :  { %4665 = vmatpush.msrb.mxu3 %v4242_v38  ;;  %4926 = vmatpush.msrb.mxu0 %v3756_v7  ;;  %v3076_v38 = vmax.f32 %v2619_v40, 0.0  ;;  %v10335_v11 = vpop.f32.mrf.mxu1  ;;  %v12644_v40 = vld [vmem:[#allocation317_spill] sm:$0xff]  ;;  %v2607_v0 = vadd.f32 %v12645_v12, %v10261_v41  ;;  %v3056_v25 = vmax.f32 %v2613_v51, 0.0  ;;  %v10366_v12 = vperm.slane %v10248_v19, 1 }
 0x657   :  { %12641 = vst [vmem:[#allocation107_spill] sm:$0xff] %v10335_v11  ;;  %v1915_v49 = vadd.f32 %v12644_v40, %v8254_v44  ;;  %v3532_v7 = vmax.f32 %v1921_v20, 0.0  ;;  %v4182_v61 = vmin.f32 %v3542_v60, 6.0  ;;  %v12648_v20 = vld [vmem:[#allocation190_spill] sm:$0xff]  ;;  %v12651_v60 = vld [vmem:[#allocation129_spill] sm:$0xff]  ;;  %6285 = vmatmul.msk.f32.gmra.mxu2 %vm122_vm0, %v12623_v45 }
 0x658   :  { %4666 = vmatpush.msrb.mxu3 %v4232_v63  ;;  %4927 = vmatpush.msrb.mxu0 %v3746_v43  ;;  %v3066_v63 = vmax.f32 %v2616_v9, 0.0  ;;  %v12647_v9 = vld [vmem:[#allocation149_spill] sm:$0xff]  ;;  %v3522_v43 = vmax.f32 %v1918_v52, 0.0  ;;  %v2604_v17 = vadd.f32 %v12648_v20, %v10261_v41  ;;  %v3696_v40 = vmin.f32 %v3056_v25, 6.0  ;;  %v12653_v25 = vld [vmem:[#allocation315_spill] sm:$0xff] }
 0x659   :  { %v1912_v34 = vadd.f32 %v12647_v9, %v8254_v44  ;;  %v3512_v51 = vmax.f32 %v1915_v49, 0.0  ;;  %v12652_v49 = vld [vmem:[#allocation38_spill] sm:$0xff]  ;;  %6224 = vmatmul.msk.f32.gmra.mxu1 %vm122_vm0, %v12515_v8 }
 0x65a   :  { %4667 = vmatpush.msrb.mxu3 %v4222_v56  ;;  %4928 = vmatpush.msrb.mxu0 %v3736_v59  ;;  %v3716_v56 = vmin.f32 %v3076_v38, 6.0  ;;  %v10351_v30 = vpop.f32.mrf.mxu2  ;;  %v3706_v22 = vmin.f32 %v3066_v63, 6.0  ;;  %v12649_v59 = vld [vmem:[#allocation141_spill] sm:$0xff]  ;;  %v4172_v38 = vmin.f32 %v3532_v7, 6.0  ;;  %v4162_v63 = vmin.f32 %v3522_v43, 6.0  ;;  %v10376_v19 = vpop.f32.mrf.mxu0 }
 0x65b   :  { %12646 = vst [vmem:[#allocation104_spill] sm:$0xff] %v10351_v30  ;;  %v1909_v42 = vadd.f32 %v12649_v59, %v8254_v44  ;;  %v2598_v7 = vadd.f32 %v12652_v49, %v10261_v41 }
 0x65c   :  { %4668 = vmatpush.msrb.mxu3 %v4212_v53  ;;  %4929 = vmatpush.msrb.mxu0 %v3726_v28  ;;  %v3046_v53 = vmax.f32 %v2610_v14, 0.0  ;;  %v3036_v28 = vmax.f32 %v2607_v0, 0.0  ;;  %v3502_v14 = vmax.f32 %v1912_v34, 0.0  ;;  %v3026_v0 = vmax.f32 %v2604_v17, 0.0  ;;  %v12655_v34 = vld [vmem:[#allocation72_spill] sm:$0xff] }
 0x65d   :  { %v3492_v20 = vmax.f32 %v1909_v42, 0.0  ;;  %v2852_v43 = vadd.f32 %v12655_v34, %v10366_v12  ;;  %v12660_v34 = vld [vmem:[#allocation183_spill] sm:$0xff] }
 0x65e   :  { %4669 = vmatpush.msrb.mxu3 %v4202_v23  ;;  %4930 = vmatpush.msrb.mxu0 %v3716_v56  ;;  %v12650_v23 = vld [vmem:[#allocation11_spill] sm:$0xff]  ;;  %v10361_v52 = vpop.f32.mrf.mxu1  ;;  %v12654_v56 = vld [vmem:[#allocation12_spill] sm:$0xff]  ;;  %v3676_v59 = vmin.f32 %v3036_v28, 6.0  ;;  %v4142_v42 = vmin.f32 %v3502_v14, 6.0  ;;  %v2846_v28 = vadd.f32 %v12660_v34, %v10366_v12 }
 0x65f   :  { %v2601_v57 = vadd.f32 %v12650_v23, %v10261_v41  ;;  %v2160_v9 = vadd.f32 %v12654_v56, %v12653_v25  ;;  %v3666_v56 = vmin.f32 %v3026_v0, 6.0  ;;  %6286 = vmatmul.msk.f32.gmra.mxu2 %vm122_vm0, %v12634_v32 }
 0x660   :  { %4670 = vmatpush.msrb.mxu3 %v4192_v24  ;;  %4931 = vmatpush.msrb.mxu0 %v3706_v22  ;;  %v1906_v24 = vadd.f32 %v12651_v60, %v8254_v44  ;;  %v4152_v44 = vmin.f32 %v3512_v51, 6.0  ;;  %v12656_v22 = vld [vmem:[#allocation198_spill] sm:$0xff]  ;;  %v12658_v51 = vld [vmem:[#allocation21_spill] sm:$0xff]  ;;  %v12659_v60 = vld [vmem:[#allocation323_spill] sm:$0xff] }
 0x661   :  { %v3016_v45 = vmax.f32 %v2601_v57, 0.0  ;;  %v2157_v17 = vadd.f32 %v12656_v22, %v12653_v25  ;;  %v2849_v23 = vadd.f32 %v12658_v51, %v10366_v12  ;;  %v2154_v49 = vadd.f32 %v12659_v60, %v12653_v25  ;;  %v12662_v51 = vld [vmem:[#allocation79_spill] sm:$0xff]  ;;  %6225 = vmatmul.msk.f32.gmra.mxu1 %vm122_vm0, %v12523_v27 }
 0x662   :  { %4671 = vmatpush.msrb.mxu3 %v4182_v61  ;;  %v3686_v61 = vmin.f32 %v3046_v53, 6.0  ;;  %4932 = vmatpush.msrb.mxu0 %v3696_v40  ;;  %v3482_v53 = vmax.f32 %v1906_v24, 0.0  ;;  %v3006_v40 = vmax.f32 %v2598_v7, 0.0  ;;  %v4132_v57 = vmin.f32 %v3492_v20, 6.0  ;;  %v12661_v24 = vld [vmem:[#allocation214_spill] sm:$0xff] }
 0x663   :  { %v2151_v14 = vadd.f32 %v12661_v24, %v12653_v25  ;;  %v3656_v22 = vmin.f32 %v3016_v45, 6.0  ;;  %v3623_v18 = vmax.f32 %v2157_v17, 0.0  ;;  %v2843_v0 = vadd.f32 %v12662_v51, %v10366_v12  ;;  %v12663_v20 = vld [vmem:[#allocation222_spill] sm:$0xff]  ;;  %v12664_v45 = vld [vmem:[#allocation85_spill] sm:$0xff] }
 0x664   :  { %4672 = vmatpush.msrb.mxu3 %v4172_v38  ;;  %4933 = vmatpush.msrb.mxu0 %v3686_v61  ;;  %v10382_v38 = vpop.f32.mrf.mxu2  ;;  %v3157_v61 = vmax.f32 %v2852_v43, 0.0  ;;  %v4122_v7 = vmin.f32 %v3482_v53, 6.0  ;;  %v2148_v43 = vadd.f32 %v12663_v20, %v12653_v25  ;;  %v2840_v17 = vadd.f32 %v12664_v45, %v10366_v12  ;;  %v10420_v20 = vpop.f32.mrf.mxu3  ;;  %v12671_v45 = vld [vmem:[#allocation117_spill] sm:$0xff] }
 0x665   :  { %12657 = vst [vmem:[#allocation101_spill] sm:$0xff] %v10382_v38  ;;  %v4263_v34 = vmin.f32 %v3623_v18, 6.0  ;;  %v12668_v18 = vld [vmem:[#allocation234_spill] sm:$0xff] }
 0x666   :  { %4673 = vmatpush.msrb.mxu3 %v4162_v63  ;;  %v3633_v63 = vmax.f32 %v2160_v9, 0.0  ;;  %4934 = vmatpush.msrb.mxu0 %v3676_v59  ;;  %v3147_v9 = vmax.f32 %v2849_v23, 0.0  ;;  %v3646_v59 = vmin.f32 %v3006_v40, 6.0  ;;  %v3797_v53 = vmin.f32 %v3157_v61, 6.0  ;;  %v12665_v23 = vld [vmem:[#allocation35_spill] sm:$0xff]  ;;  %v10415_v61 = vld [vmem:[%s11589_s5 + $0x18] sm:$0xff] }
 0x667   :  { %v2145_v32 = vadd.f32 %v12665_v23, %v12653_v25  ;;  %v12667_v40 = vld [vmem:[#allocation91_spill] sm:$0xff]  ;;  %12669 = vst [vmem:[#allocation108_spill] sm:$0xff] %v10420_v20  ;;  %6287 = vmatmul.msk.f32.gmra.mxu2 %vm122_vm0, %v12507_v36  ;;  %v12675_v20 = vld [vmem:[#allocation166_spill] sm:$0xff] }
 0x668   :  { %4674 = vmatpush.msrb.mxu3 %v4152_v44  ;;  %4935 = vmatpush.msrb.mxu0 %v3666_v56  ;;  %v10392_v44 = vpop.f32.mrf.mxu1  ;;  %v4273_v60 = vmin.f32 %v3633_v63, 6.0  ;;  %v3137_v56 = vmax.f32 %v2846_v28, 0.0  ;;  %v3127_v63 = vmax.f32 %v2843_v0, 0.0  ;;  %v10410_v28 = vpop.f32.mrf.mxu0  ;;  %v12670_v0 = vld [vmem:[#allocation97_spill] sm:$0xff] }
 0x669   :  { %v3583_v23 = vmax.f32 %v2145_v32, 0.0  ;;  %v12674_v32 = vld [vmem:[#allocation112_spill] sm:$0xff]  ;;  %6226 = vmatmul.msk.f32.gmra.mxu1 %vm122_vm0, %v12675_v20 }
 0x66a   :  { %4675 = vmatpush.msrb.mxu3 %v4142_v42  ;;  %v3613_v42 = vmax.f32 %v2154_v49, 0.0  ;;  %4936 = vmatpush.msrb.mxu0 %v3656_v22  ;;  %v2837_v49 = vadd.f32 %v12667_v40, %v10366_v12  ;;  %v3787_v22 = vmin.f32 %v3147_v9, 6.0  ;;  %v2834_v9 = vadd.f32 %v12670_v0, %v10366_v12 }
 0x66b   :  { %v4223_v36 = vmin.f32 %v3583_v23, 6.0 }
 0x66c   :  { %4676 = vmatpush.msrb.mxu3 %v4132_v57  ;;  %v3603_v57 = vmax.f32 %v2151_v14, 0.0  ;;  %4937 = vmatpush.msrb.mxu0 %v3646_v59  ;;  %v10406_v24 = vpop.f32.mrf.mxu2  ;;  %v2142_v14 = vadd.f32 %v12668_v18, %v12653_v25  ;;  %v4253_v51 = vmin.f32 %v3613_v42, 6.0  ;;  %v3117_v59 = vmax.f32 %v2840_v17, 0.0  ;;  %v12673_v17 = vld [vmem:[#allocation121_spill] sm:$0xff] }
 0x66d   :  { %12666 = vst [vmem:[#allocation98_spill] sm:$0xff] %v10406_v24  ;;  %4938 = vmatmul.f32.vlgmr.msrb.gmra.mxu0 %v10194_v47  ;;  %v3767_v18 = vmin.f32 %v3127_v63, 6.0 }
 0x66e   :  { %4677 = vmatpush.msrb.mxu3 %v4122_v7  ;;  %5002 = vmatpush.msra.mxu0 %v3797_v53  ;;  %v3593_v7 = vmax.f32 %v2148_v43, 0.0  ;;  %v2139_v53 = vadd.f32 %v12671_v45, %v12653_v25  ;;  %v4243_v40 = vmin.f32 %v3603_v57, 6.0  ;;  %v12672_v43 = vld [vmem:[#allocation103_spill] sm:$0xff]  ;;  %v2828_v57 = vadd.f32 %v12674_v32, %v10366_v12 }
 0x66f   :  { %4678 = vmatmul.f32.vlgmr.msrb.gmra.mxu3 %v10415_v61  ;;  %v2831_v42 = vadd.f32 %v12672_v43, %v10366_v12  ;;  %v3097_v45 = vmax.f32 %v2834_v9, 0.0  ;;  %v12679_v9 = vld [vmem:[#allocation290_spill] sm:$0xff]  ;;  %6288 = vmatmul.msk.f32.gmra.mxu2 %vm122_vm0, %v12515_v8 }
 0x670   :  { %4742 = vmatpush.msra.mxu3 %v4273_v60  ;;  %v3777_v60 = vmin.f32 %v3137_v56, 6.0  ;;  %5003 = vmatpush.msra.mxu0 %v3787_v22  ;;  %v10427_v3 = vpop.f32.mrf.mxu1  ;;  %v2136_v56 = vadd.f32 %v12673_v17, %v12653_v25  ;;  %v3573_v22 = vmax.f32 %v2142_v14, 0.0  ;;  %v4233_v0 = vmin.f32 %v3593_v7, 6.0  ;;  %v12678_v14 = vld [vmem:[#allocation56_spill] sm:$0xff]  ;;  %v10449_v2 = vpop.f32.mrf.mxu0 }
 0x671   :  { %v2825_v7 = vadd.f32 %v12678_v14, %v10366_v12  ;;  %v3737_v23 = vmin.f32 %v3097_v45, 6.0 }
 0x672   :  { %4743 = vmatpush.msra.mxu3 %v4263_v34  ;;  %v3107_v34 = vmax.f32 %v2837_v49, 0.0  ;;  %5004 = vmatpush.msra.mxu0 %v3777_v60  ;;  %v12676_v49 = vld [vmem:[#allocation29_spill] sm:$0xff]  ;;  %v3563_v60 = vmax.f32 %v2139_v53, 0.0  ;;  %v4213_v32 = vmin.f32 %v3573_v22, 6.0  ;;  %v3077_v53 = vmax.f32 %v2828_v57, 0.0  ;;  %v12684_v57 = vld [vmem:[#allocation302_spill] sm:$0xff] }
 0x673   :  { %v2133_v63 = vadd.f32 %v12676_v49, %v12653_v25  ;;  %v2822_v49 = vadd.f32 %v12680_v16, %v10366_v12  ;;  %v2124_v45 = vadd.f32 %v12684_v57, %v12653_v25 }
 0x674   :  { %4744 = vmatpush.msra.mxu3 %v4253_v51  ;;  %v3757_v51 = vmin.f32 %v3117_v59, 6.0  ;;  %5005 = vmatpush.msra.mxu0 %v3767_v18  ;;  %v10441_v43 = vpop.f32.mrf.mxu2  ;;  %v3747_v17 = vmin.f32 %v3107_v34, 6.0  ;;  %v2130_v59 = vadd.f32 %v12679_v9, %v12653_v25  ;;  %v3553_v18 = vmax.f32 %v2136_v56, 0.0  ;;  %v12683_v56 = vld [vmem:[#allocation39_spill] sm:$0xff] }
 0x675   :  { %12677 = vst [vmem:[#allocation95_spill] sm:$0xff] %v10441_v43  ;;  %v4203_v34 = vmin.f32 %v3563_v60, 6.0  ;;  %v2819_v22 = vadd.f32 %v12683_v56, %v10366_v12  ;;  %v12685_v60 = vld [vmem:[#allocation45_spill] sm:$0xff] }
 0x676   :  { %4745 = vmatpush.msra.mxu3 %v4243_v40  ;;  %v3087_v40 = vmax.f32 %v2831_v42, 0.0  ;;  %5006 = vmatpush.msra.mxu0 %v3757_v51  ;;  %v3543_v42 = vmax.f32 %v2133_v63, 0.0  ;;  %v10453_v51 = vpop.f32.mrf.mxu3  ;;  %v4193_v63 = vmin.f32 %v3553_v18, 6.0  ;;  %v2816_v9 = vadd.f32 %v12685_v60, %v10366_v12 }
 0x677   :  { %12682 = vst [vmem:[#allocation92_spill] sm:$0xff] %v10453_v51  ;;  %v12686_v51 = vld [vmem:[#allocation170_spill] sm:$0xff]  ;;  %6289 = vmatmul.msk.f32.gmra.mxu2 %vm122_vm0, %v12523_v27 }
 0x678   :  { %4746 = vmatpush.msra.mxu3 %v4233_v0  ;;  %5007 = vmatpush.msra.mxu0 %v3747_v17  ;;  %v12681_v0 = vld [vmem:[#allocation26_spill] sm:$0xff]  ;;  %v10455_v21 = vpop.f32.mrf.mxu1  ;;  %v3727_v16 = vmin.f32 %v3087_v40, 6.0  ;;  %v3533_v17 = vmax.f32 %v2130_v59, 0.0  ;;  %v4183_v8 = vmin.f32 %v3543_v42, 6.0 }
 0x679   :  { %v2127_v14 = vadd.f32 %v12681_v0, %v12653_v25  ;;  %v3057_v0 = vmax.f32 %v2822_v49, 0.0  ;;  %6227 = vmatmul.msk.f32.gmra.mxu1 %vm122_vm0, %v12686_v51  ;;  %v12689_v59 = vld [vmem:[#allocation14_spill] sm:$0xff]  ;;  %v12690_v49 = vld [vmem:[#allocation165_spill] sm:$0xff] }
 0x67a   :  { %4747 = vmatpush.msra.mxu3 %v4223_v36  ;;  %v3067_v36 = vmax.f32 %v2825_v7, 0.0  ;;  %5008 = vmatpush.msra.mxu0 %v3737_v23  ;;  %v12687_v7 = vld [vmem:[#allocation161_spill] sm:$0xff]  ;;  %v2813_v18 = vadd.f32 %v12689_v59, %v10366_v12  ;;  %v4173_v60 = vmin.f32 %v3533_v17, 6.0 }
 0x67b   :  { %v2121_v40 = vadd.f32 %v12687_v7, %v12653_v25  ;;  %v3523_v23 = vmax.f32 %v2127_v14, 0.0  ;;  %v2810_v7 = vadd.f32 %v12691_v35, %v10366_v12  ;;  %v3037_v14 = vmax.f32 %v2816_v9, 0.0  ;;  %v12695_v9 = vld [vmem:[#allocation19_spill] sm:$0xff] }
 0x67c   :  { %4748 = vmatpush.msra.mxu3 %v4213_v32  ;;  %v3717_v32 = vmin.f32 %v3077_v53, 6.0  ;;  %5009 = vmatpush.msra.mxu0 %v3727_v16  ;;  %v10469_v56 = vpop.f32.mrf.mxu2  ;;  %v3707_v57 = vmin.f32 %v3067_v36, 6.0  ;;  %v2118_v53 = vadd.f32 %v12690_v49, %v12653_v25  ;;  %v3513_v16 = vmax.f32 %v2124_v45, 0.0  ;;  %v12694_v45 = vld [vmem:[#allocation70_spill] sm:$0xff]  ;;  %v10485_v49 = vpop.f32.mrf.mxu0 }
 0x67d   :  { %12688 = vst [vmem:[#allocation89_spill] sm:$0xff] %v10469_v56  ;;  %v3697_v42 = vmin.f32 %v3057_v0, 6.0  ;;  %v3503_v38 = vmax.f32 %v2121_v40, 0.0  ;;  %v4163_v59 = vmin.f32 %v3523_v23, 6.0  ;;  %v2807_v17 = vadd.f32 %v12694_v45, %v10366_v12 }
 0x67e   :  { %4749 = vmatpush.msra.mxu3 %v4203_v34  ;;  %v3047_v34 = vmax.f32 %v2819_v22, 0.0  ;;  %5010 = vmatpush.msra.mxu0 %v3717_v32  ;;  %v10479_v22 = vpop.f32.mrf.mxu3  ;;  %v3027_v32 = vmax.f32 %v2813_v18, 0.0  ;;  %v3493_v35 = vmax.f32 %v2118_v53, 0.0  ;;  %v2369_v0 = vadd.f32 %v12695_v9, %v10036_v26 }
 0x67f   :  { %12693 = vst [vmem:[#allocation86_spill] sm:$0xff] %v10479_v22  ;;  %v3017_v40 = vmax.f32 %v2810_v7, 0.0  ;;  %v3677_v23 = vmin.f32 %v3037_v14, 6.0  ;;  %v3007_v27 = vmax.f32 %v2807_v17, 0.0  ;;  %6290 = vmatmul.msk.f32.gmra.mxu2 %vm122_vm0, %v12675_v20  ;;  %v5097_v17 = vld [vmem:[%s11590_s6 + $0x78] sm:$0xff]  ;;  %v5096_v20 = vld [vmem:[%s11590_s6 + $0x70] sm:$0xff] }
 0x680   :  { %4750 = vmatpush.msra.mxu3 %v4193_v63  ;;  %5011 = vmatpush.msra.mxu0 %v3707_v57  ;;  %v12692_v63 = vld [vmem:[#allocation153_spill] sm:$0xff]  ;;  %v10481_v36 = vpop.f32.mrf.mxu1  ;;  %v12696_v57 = vld [vmem:[#allocation174_spill] sm:$0xff]  ;;  %v3667_v53 = vmin.f32 %v3027_v32, 6.0  ;;  %v3634_v14 = vmax.f32 %v2369_v0, 0.0  ;;  %v12702_v0 = vld [vmem:[#allocation16_spill] sm:$0xff] }
 0x681   :  { %v2115_v30 = vadd.f32 %v12692_v63, %v12653_v25  ;;  %v4153_v25 = vmin.f32 %v3513_v16, 6.0  ;;  %6228 = vmatmul.msk.f32.gmra.mxu1 %vm122_vm0, %v12696_v57  ;;  %v4133_v16 = vmin.f32 %v3493_v35, 6.0  ;;  %v3657_v45 = vmin.f32 %v3017_v40, 6.0  ;;  %v12701_v32 = vld [vmem:[#allocation325_spill] sm:$0xff] }
 0x682   :  { %4751 = vmatpush.msra.mxu3 %v4183_v8  ;;  %v3687_v8 = vmin.f32 %v3047_v34, 6.0  ;;  %5012 = vmatpush.msra.mxu0 %v3697_v42  ;;  %v4143_v34 = vmin.f32 %v3503_v38, 6.0  ;;  %v2273_v35 = vadd.f32 %v12701_v32, %v10036_v26  ;;  %v2357_v40 = vadd.f32 %v12702_v0, %v10036_v26  ;;  %v12709_v32 = vld [vmem:[#allocation252_spill] sm:$0xff] }
 0x683   :  { %v3483_v18 = vmax.f32 %v2115_v30, 0.0  ;;  %v12700_v30 = vld [vmem:[#allocation115_spill] sm:$0xff]  ;;  %v2267_v0 = vadd.f32 %v12709_v32, %v10036_v26  ;;  %v5094_v32 = vld [vmem:[%s11590_s6 + $0x60] sm:$0xff] }
 0x684   :  { %4752 = vmatpush.msra.mxu3 %v4173_v60  ;;  %5013 = vmatpush.msra.mxu0 %v3687_v8  ;;  %v12697_v60 = vld [vmem:[#allocation62_spill] sm:$0xff]  ;;  %v10495_v63 = vpop.f32.mrf.mxu2  ;;  %v2360_v38 = vadd.f32 %v12700_v30, %v10036_v26  ;;  %v12708_v30 = vld [vmem:[#allocation283_spill] sm:$0xff] }
 0x685   :  { %v2366_v42 = vadd.f32 %v12697_v60, %v10036_v26  ;;  %12698 = vst [vmem:[#allocation111_spill] sm:$0xff] %v10495_v63  ;;  %v4123_v8 = vmin.f32 %v3483_v18, 6.0  ;;  %v4274_v18 = vmin.f32 %v3634_v14, 6.0  ;;  %v3294_v56 = vmax.f32 %v2267_v0, 0.0 }
 0x686   :  { %4753 = vmatpush.msra.mxu3 %v4163_v59  ;;  %5014 = vmatpush.msra.mxu0 %v3677_v23  ;;  %v12699_v59 = vld [vmem:[#allocation59_spill] sm:$0xff]  ;;  %v3604_v14 = vmax.f32 %v2360_v38, 0.0  ;;  %v3314_v38 = vmax.f32 %v2273_v35, 0.0 }
 0x687   :  { %v2363_v7 = vadd.f32 %v12699_v59, %v10036_v26  ;;  %v3624_v9 = vmax.f32 %v2366_v42, 0.0  ;;  %v10514_v42 = vpop.f32.mrf.mxu0  ;;  %v12706_v59 = vld [vmem:[#allocation36_spill] sm:$0xff]  ;;  %6291 = vmatmul.msk.f32.gmra.mxu2 %vm122_vm0, %v12686_v51  ;;  %v10565_v51 = vld [vmem:[%s11589_s5 + $0x8] sm:$0xff] }
 0x688   :  { %4754 = vmatpush.msra.mxu3 %v4153_v25  ;;  %5015 = vmatpush.msra.mxu0 %v3667_v53  ;;  %v10501_v60 = vpop.f32.mrf.mxu1  ;;  %v3647_v25 = vmin.f32 %v3007_v27, 6.0  ;;  %v12704_v27 = vld [vmem:[#allocation6_spill] sm:$0xff]  ;;  %v12705_v53 = vld [vmem:[#allocation324_spill] sm:$0xff]  ;;  %v4244_v35 = vmin.f32 %v3604_v14, 6.0 }
 0x689   :  { %v3614_v23 = vmax.f32 %v2363_v7, 0.0  ;;  %6229 = vmatmul.msk.f32.gmra.mxu1 %vm122_vm0, %v12704_v27  ;;  %v2354_v7 = vadd.f32 %v12706_v59, %v10036_v26  ;;  %v12711_v59 = vld [vmem:[#allocation7_spill] sm:$0xff] }
 0x68a   :  { %4755 = vmatpush.msra.mxu3 %v4143_v34  ;;  %5016 = vmatpush.msra.mxu0 %v3657_v45  ;;  %v10512_v34 = vpop.f32.mrf.mxu3  ;;  %v4264_v45 = vmin.f32 %v3624_v9, 6.0  ;;  %v12710_v9 = vld [vmem:[#allocation48_spill] sm:$0xff] }
 0x68b   :  { %12703 = vst [vmem:[#allocation83_spill] sm:$0xff] %v10512_v34  ;;  %v5095_v34 = vld [vmem:[%s11590_s6 + $0x68] sm:$0xff]  ;;  %v3584_v43 = vmax.f32 %v2354_v7, 0.0 }
 0x68c   :  { %4756 = vmatpush.msra.mxu3 %v4133_v16  ;;  %5017 = vmatpush.msra.mxu0 %v3647_v25  ;;  %v2270_v16 = vadd.f32 %v12705_v53, %v10036_v26  ;;  %v2228_v25 = vadd.f32 %v12708_v30, %v10036_v26  ;;  %v4254_v53 = vmin.f32 %v3614_v23, 6.0  ;;  %v2264_v30 = vadd.f32 %v12711_v59, %v10036_v26  ;;  %v12714_v23 = vld [vmem:[#allocation286_spill] sm:$0xff]  ;;  %v12716_v7 = vld [vmem:[#allocation67_spill] sm:$0xff] }
 0x68d   :  { %5018 = vmatmul.f32.vlgmr.msra.gmra.mxu0 %v10194_v47  ;;  %v12712_v47 = vld [vmem:[#allocation57_spill] sm:$0xff]  ;;  %v2345_v14 = vadd.f32 %v12716_v7, %v10036_v26 }
 0x68e   :  { %4757 = vmatpush.msra.mxu3 %v4123_v8  ;;  %5246 = vmatpush.msrb.mxu0 %v5097_v17  ;;  %v10525_v8 = vpop.f32.mrf.mxu2  ;;  %v2351_v17 = vadd.f32 %v12710_v9, %v10036_v26  ;;  %v3304_v22 = vmax.f32 %v2270_v16, 0.0  ;;  %v2348_v24 = vadd.f32 %v12712_v47, %v10036_v26  ;;  %v3954_v16 = vmin.f32 %v3314_v38, 6.0  ;;  %v12717_v47 = vld [vmem:[#allocation319_spill] sm:$0xff]  ;;  %v12718_v38 = vld [vmem:[#allocation182_spill] sm:$0xff] }
 0x68f   :  { %12707 = vst [vmem:[#allocation80_spill] sm:$0xff] %v10525_v8  ;;  %4758 = vmatmul.f32.vlgmr.msra.gmra.mxu3 %v10415_v61  ;;  %6292 = vmatmul.msk.f32.gmra.mxu2 %vm122_vm0, %v12696_v57 }
 0x690   :  { %4822 = vmatpush.msrb.mxu3 %v4274_v18  ;;  %v3594_v18 = vmax.f32 %v2357_v40, 0.0  ;;  %5247 = vmatpush.msrb.mxu0 %v5096_v20  ;;  %v10545_v9 = vpop.f32.mrf.mxu1  ;;  %v3164_v40 = vmax.f32 %v2228_v25, 0.0  ;;  %v10549_v20 = vadd.f32 %v12714_v23, %v10036_v26  ;;  %v5093_v25 = vld [vmem:[%s11590_s6 + $0x58] sm:$0xff]  ;;  %v2258_v23 = vadd.f32 %v12717_v47, %v10036_v26 }
 0x691   :  { %12713 = vst [vmem:[#allocation77_spill] sm:$0xff] %v10545_v9  ;;  %4638 = vmatmul.f32.vlgmr.msrb.gmra.mxu1 %v10565_v51  ;;  %v3944_v0 = vmin.f32 %v3304_v22, 6.0  ;;  %v12721_v22 = vld [vmem:[#allocation314_spill] sm:$0xff] }
 0x692   :  { %4823 = vmatpush.msrb.mxu3 %v4264_v45  ;;  %5248 = vmatpush.msrb.mxu0 %v5095_v34  ;;  %v12715_v45 = vld [vmem:[#allocation321_spill] sm:$0xff]  ;;  %v4234_v34 = vmin.f32 %v3594_v18, 6.0  ;;  %v3564_v18 = vmax.f32 %v2348_v24, 0.0  ;;  %v10577_v47 = vmin.f32 %v3164_v40, 6.0  ;;  %v3174_v9 = vmax.f32 %v10549_v20, 0.0  ;;  %v10582_v24 = vpop.f32.mrf.mxu0  ;;  %v5091_v40 = vld [vmem:[%s11590_s6 + $0x48] sm:$0xff] }
 0x693   :  { %v2261_v59 = vadd.f32 %v12715_v45, %v10036_v26  ;;  %v3284_v45 = vmax.f32 %v2264_v30, 0.0  ;;  %4782 = vmatpush.msrb.mxu1 %v3954_v16  ;;  %v5092_v30 = vld [vmem:[%s11590_s6 + $0x50] sm:$0xff]  ;;  %v2255_v63 = vadd.f32 %v12721_v22, %v10036_v26  ;;  %v12722_v16 = vld [vmem:[#allocation194_spill] sm:$0xff]  ;;  %v3264_v33 = vmax.f32 %v2258_v23, 0.0 }
 0x694   :  { %4824 = vmatpush.msrb.mxu3 %v4254_v53  ;;  %v3574_v53 = vmax.f32 %v2351_v17, 0.0  ;;  %5249 = vmatpush.msrb.mxu0 %v5094_v32  ;;  %v2342_v17 = vadd.f32 %v12718_v38, %v10036_v26  ;;  %v4224_v32 = vmin.f32 %v3584_v43, 6.0  ;;  %v3934_v43 = vmin.f32 %v3294_v56, 6.0  ;;  %v12723_v20 = vld [vmem:[#allocation291_spill] sm:$0xff]  ;;  %v12729_v23 = vld [vmem:[#allocation300_spill] sm:$0xff] }
 0x695   :  { %v3274_v38 = vmax.f32 %v2261_v59, 0.0  ;;  %4783 = vmatpush.msrb.mxu1 %v3944_v0  ;;  %v12724_v59 = vld [vmem:[#allocation294_spill] sm:$0xff]  ;;  %v3904_v57 = vmin.f32 %v3264_v33, 6.0 }
 0x696   :  { %4825 = vmatpush.msrb.mxu3 %v4244_v35  ;;  %v10570_v35 = vpop.f32.mrf.mxu3  ;;  %v10572_v7 = vpop.f32.mrf.mxu2  ;;  %5250 = vmatpush.msrb.mxu0 %v5093_v25  ;;  %v4214_v8 = vmin.f32 %v3574_v53, 6.0  ;;  %v2237_v22 = vadd.f32 %v12724_v59, %v10036_v26  ;;  %v12725_v25 = vld [vmem:[#allocation311_spill] sm:$0xff]  ;;  %v3544_v0 = vmax.f32 %v2342_v17, 0.0  ;;  %v12728_v59 = vld [vmem:[#allocation297_spill] sm:$0xff]  ;;  %v12731_v17 = vld [vmem:[#allocation218_spill] sm:$0xff] }
 0x697   :  { %12719 = vst [vmem:[#allocation74_spill] sm:$0xff] %v10570_v35  ;;  %v3554_v35 = vmax.f32 %v2345_v14, 0.0  ;;  %v2252_v56 = vadd.f32 %v12725_v25, %v10036_v26  ;;  %v12726_v14 = vld [vmem:[#allocation206_spill] sm:$0xff]  ;;  %4784 = vmatpush.msrb.mxu1 %v3934_v43  ;;  %v2240_v48 = vadd.f32 %v12728_v59, %v10036_v26  ;;  %v5089_v59 = vld [vmem:[%s11590_s6 + $0x38] sm:$0xff]  ;;  %6293 = vmatmul.msk.f32.gmra.mxu2 %vm122_vm0, %v12704_v27 }
 0x698   :  { %4826 = vmatpush.msrb.mxu3 %v4234_v34  ;;  %12720 = vst [vmem:[#allocation114_spill] sm:$0xff] %v10572_v7  ;;  %v2339_v34 = vadd.f32 %v12722_v16, %v10036_v26  ;;  %v2234_v7 = vadd.f32 %v12723_v20, %v10036_v26  ;;  %5251 = vmatpush.msrb.mxu0 %v5092_v30  ;;  %v3924_v16 = vmin.f32 %v3284_v45, 6.0  ;;  %v10597_v29 = vpop.f32.mrf.mxu1  ;;  %v5090_v20 = vld [vmem:[%s11590_s6 + $0x40] sm:$0xff]  ;;  %v12730_v45 = vld [vmem:[#allocation308_spill] sm:$0xff]  ;;  %v3194_v6 = vmax.f32 %v2237_v22, 0.0 }
 0x699   :  { %v2336_v53 = vadd.f32 %v12726_v14, %v10036_v26  ;;  %12727 = vst [vmem:[#allocation71_spill] sm:$0xff] %v10597_v29  ;;  %v2243_v30 = vadd.f32 %v12729_v23, %v10036_v26  ;;  %v2249_v25 = vadd.f32 %v12730_v45, %v10036_v26  ;;  %v3254_v14 = vmax.f32 %v2255_v63, 0.0  ;;  %v12732_v63 = vld [vmem:[#allocation305_spill] sm:$0xff]  ;;  %4718 = vmatmul.f32.vlgmr.msra.gmra.mxu1 %v10565_v51  ;;  %v12744_v27 = vld [vmem:[#allocation288_spill] sm:$0xff] }
 0x69a   :  { %4827 = vmatpush.msrb.mxu3 %v4224_v32  ;;  %v4204_v32 = vmin.f32 %v3564_v18, 6.0  ;;  %5252 = vmatpush.msrb.mxu0 %v5091_v40  ;;  %v2333_v18 = vadd.f32 %v12731_v17, %v10036_v26  ;;  %v3534_v43 = vmax.f32 %v2339_v34, 0.0  ;;  %v4194_v29 = vmin.f32 %v3554_v35, 6.0 }
 0x69b   :  { %4785 = vmatpush.msrb.mxu1 %v3924_v16  ;;  %v3184_v23 = vmax.f32 %v2234_v7, 0.0  ;;  %v2246_v40 = vadd.f32 %v12732_v63, %v10036_v26  ;;  %v3244_v45 = vmax.f32 %v2252_v56, 0.0  ;;  %v3524_v35 = vmax.f32 %v2336_v53, 0.0  ;;  %v5088_v7 = vld [vmem:[%s11590_s6 + $0x30] sm:$0xff]  ;;  %v12735_v63 = vld [vmem:[#allocation230_spill] sm:$0xff] }
 0x69c   :  { %4828 = vmatpush.msrb.mxu3 %v4214_v8  ;;  %v3914_v8 = vmin.f32 %v3274_v38, 6.0  ;;  %5253 = vmatpush.msrb.mxu0 %v5090_v20  ;;  %v12733_v38 = vld [vmem:[#allocation226_spill] sm:$0xff]  ;;  %v4184_v16 = vmin.f32 %v3544_v0, 6.0  ;;  %v10625_v22 = vmin.f32 %v3174_v9, 6.0  ;;  %v3204_v56 = vmax.f32 %v2240_v48, 0.0 }
 0x69d   :  { %v2330_v34 = vadd.f32 %v12733_v38, %v10036_v26  ;;  %v3214_v20 = vmax.f32 %v2243_v30, 0.0  ;;  %v3234_v17 = vmax.f32 %v2249_v25, 0.0  ;;  %v3894_v33 = vmin.f32 %v3254_v14, 6.0  ;;  %v12737_v25 = vld [vmem:[#allocation329_spill] sm:$0xff] }
 0x69e   :  { %4829 = vmatpush.msrb.mxu3 %v4204_v32  ;;  %4786 = vmatpush.msrb.mxu1 %v3914_v8  ;;  %v10620_v32 = vpop.f32.mrf.mxu2  ;;  %v2327_v38 = vadd.f32 %v12735_v63, %v10036_v26  ;;  %v3514_v53 = vmax.f32 %v2333_v18, 0.0  ;;  %v4174_v0 = vmin.f32 %v3534_v43, 6.0  ;;  %v10629_v8 = vpop.f32.mrf.mxu3  ;;  %v10634_v9 = vmin.f32 %v3184_v23, 6.0  ;;  %v12738_v43 = vld [vmem:[#allocation125_spill] sm:$0xff] }
 0x69f   :  { %12734 = vst [vmem:[#allocation181_spill] sm:$0xff] %v10620_v32  ;;  %5254 = vmatpush.msrb.mxu0 %v5089_v59  ;;  %v10636_v48 = vmin.f32 %v3194_v6, 6.0  ;;  %v3224_v30 = vmax.f32 %v2246_v40, 0.0  ;;  %v10640_v14 = vadd.f32 %v12737_v25, %v10036_v26  ;;  %v2577_v59 = vpop.f32.mrf.mxu0  ;;  %v3884_v18 = vmin.f32 %v3244_v45, 6.0  ;;  %v5086_v6 = vld [vmem:[%s11590_s6 + $0x20] sm:$0xff]  ;;  %v12740_v25 = vld [vmem:[#allocation24_spill] sm:$0xff] }
 0x6a0   :  { %4830 = vmatpush.msrb.mxu3 %v4194_v29  ;;  %12736 = vst [vmem:[#allocation177_spill] sm:$0xff] %v10629_v8  ;;  %4787 = vmatpush.msrb.mxu1 %v3904_v57  ;;  %v5087_v29 = vld [vmem:[%s11590_s6 + $0x28] sm:$0xff]  ;;  %v2321_v57 = vadd.f32 %v12738_v43, %v10036_v26  ;;  %v4164_v63 = vmin.f32 %v3524_v35, 6.0  ;;  %v10644_v8 = vpop.f32.mrf.mxu1  ;;  %v3844_v23 = vmin.f32 %v3204_v56, 6.0  ;;  %v3854_v40 = vmin.f32 %v3214_v20, 6.0  ;;  %v12742_v45 = vld [vmem:[#allocation76_spill] sm:$0xff] }
 0x6a1   :  { %5255 = vmatpush.msrb.mxu0 %v5088_v7  ;;  %12739 = vst [vmem:[#allocation172_spill] sm:$0xff] %v10644_v8  ;;  %v2324_v32 = vadd.f32 %v12740_v25, %v10036_v26  ;;  %v12741_v7 = vld [vmem:[#allocation66_spill] sm:$0xff]  ;;  %v3494_v35 = vmax.f32 %v2327_v38, 0.0  ;;  %v5085_v56 = vld [vmem:[%s11590_s6 + $0x18] sm:$0xff]  ;;  %v3864_v20 = vmin.f32 %v3224_v30, 6.0  ;;  %v12743_v43 = vld [vmem:[#allocation327_spill] sm:$0xff] }
 0x6a2   :  { %4831 = vmatpush.msrb.mxu3 %v4184_v16  ;;  %v3504_v16 = vmax.f32 %v2330_v34, 0.0  ;;  %4788 = vmatpush.msrb.mxu1 %v3894_v33  ;;  %v4320_v58 = vadd.f32 %v12742_v45, %v12741_v7  ;;  %v3874_v34 = vmin.f32 %v3234_v17, 6.0  ;;  %v4154_v33 = vmin.f32 %v3514_v53, 6.0  ;;  %v12745_v38 = vld [vmem:[#allocation332_spill] sm:$0xff]  ;;  %v12747_v45 = vld [vmem:[#allocation334_spill] sm:$0xff] }
 0x6a3   :  { %5256 = vmatpush.msrb.mxu0 %v5087_v29  ;;  %v10661_v25 = vadd.f32 %v12743_v43, %v10036_v26  ;;  %v2318_v17 = vadd.f32 %v12744_v27, %v10036_v26  ;;  %v10668_v53 = vadd.f32 %v12745_v38, %v10036_v26  ;;  %v5084_v7 = vld [vmem:[%s11590_s6 + $0x10] sm:$0xff]  ;;  %v2572_v29 = vadd.f32 %v10514_v42, %v10144_v13 }
 0x6a4   :  { %4832 = vmatpush.msrb.mxu3 %v4174_v0  ;;  %v2578_v0 = vadd.f32 %v2577_v59, %v10144_v13  ;;  %4789 = vmatpush.msrb.mxu1 %v3884_v18  ;;  %v3474_v59 = vmax.f32 %v2321_v57, 0.0  ;;  %v4144_v18 = vmin.f32 %v3504_v16, 6.0  ;;  %v12748_v43 = vld [vmem:[#allocation296_spill] sm:$0xff]  ;;  %v3484_v57 = vmax.f32 %v2324_v32, 0.0  ;;  %v12749_v16 = vld [vmem:[#allocation179_spill] sm:$0xff] }
 0x6a5   :  { %5257 = vmatpush.msrb.mxu0 %v5086_v6  ;;  %v10679_v6 = vadd.f32 %v12747_v45, %v10036_v26  ;;  %v2315_v27 = vadd.f32 %v12748_v43, %v10036_v26  ;;  %v4340_v38 = vadd.f32 %v12749_v16, %v4320_v58  ;;  %v5083_v45 = vld [vmem:[%s11590_s6 + $0x8] sm:$0xff] }
 0x6a6   :  { %4833 = vmatpush.msrb.mxu3 %v4164_v63  ;;  %v2575_v63 = vadd.f32 %v10582_v24, %v10144_v13  ;;  %4790 = vmatpush.msrb.mxu1 %v3874_v34  ;;  %v10672_v30 = vpop.f32.mrf.mxu2  ;;  %v12750_v24 = vld [vmem:[#allocation336_spill] sm:$0xff]  ;;  %v3635_v8 = vmax.f32 %v2578_v0, 0.0  ;;  %v10693_v43 = vpop.f32.mrf.mxu3  ;;  %v12751_v58 = vld [vmem:[#allocation338_spill] sm:$0xff]  ;;  %v3464_v0 = vmax.f32 %v2318_v17, 0.0  ;;  %v12756_v17 = vld [vmem:[#allocation157_spill] sm:$0xff]  ;;  %v4124_v1 = vmin.f32 %v3484_v57, 6.0 }
 0x6a7   :  { %12746 = vst [vmem:[#allocation168_spill] sm:$0xff] %v10672_v30  ;;  %5258 = vmatpush.msrb.mxu0 %v5085_v56  ;;  %v10686_v34 = vadd.f32 %v12750_v24, %v10036_v26  ;;  %v10697_v32 = vadd.f32 %v12751_v58, %v10036_v26  ;;  %v12752_v56 = vld [vmem:[#allocation341_spill] sm:$0xff]  ;;  %v4114_v24 = vmin.f32 %v3474_v59, 6.0  ;;  %v2569_v30 = vadd.f32 %v10485_v49, %v10144_v13  ;;  %v10722_v49 = vld [vmem:[%s11589_s5 + $0x10] sm:$0xff] }
 0x6a8   :  { %4834 = vmatpush.msrb.mxu3 %v4154_v33  ;;  %v4134_v33 = vmin.f32 %v3494_v35, 6.0  ;;  %4791 = vmatpush.msrb.mxu1 %v3864_v20  ;;  %v10701_v16 = vadd.f32 %v12752_v56, %v10036_v26  ;;  %v12753_v35 = vld [vmem:[#allocation304_spill] sm:$0xff]  ;;  %v3625_v37 = vmax.f32 %v2575_v63, 0.0  ;;  %v10711_v58 = vpop.f32.mrf.mxu1  ;;  %v5082_v56 = vld [vmem:[%s11590_s6] sm:$0xff]  ;;  %v2566_v63 = vadd.f32 %v10449_v2, %v10144_v13 }
 0x6a9   :  { %v2312_v42 = vadd.f32 %v12753_v35, %v10036_v26  ;;  %5259 = vmatpush.msrb.mxu0 %v5084_v7  ;;  %v12754_v20 = vld [vmem:[#allocation64_spill] sm:$0xff]  ;;  %12755 = vst [vmem:[#allocation118_spill] sm:$0xff] %v10711_v58  ;;  %v2309_v7 = vadd.f32 %v12756_v17, %v10036_v26  ;;  %v3454_v35 = vmax.f32 %v2315_v27, 0.0  ;;  %4658 = vmatmul.f32.vlgmr.msra.gmra.mxu2 %v10722_v49  ;;  %v4275_v17 = vmin.f32 %v3635_v8, 6.0  ;;  %v12759_v27 = vld [vmem:[#allocation173_spill] sm:$0xff] }
 0x6aa   :  { %4835 = vmatpush.msrb.mxu3 %v4144_v18  ;;  %v10707_v18 = vadd.f32 %v12754_v20, %v10036_v26  ;;  %4792 = vmatpush.msrb.mxu1 %v3854_v40  ;;  %v12757_v20 = vld [vmem:[#allocation163_spill] sm:$0xff]  ;;  %v12758_v40 = vld [vmem:[#allocation88_spill] sm:$0xff]  ;;  %v10731_v57 = vadd.f32 %v12759_v27, %v10036_v26  ;;  %v4104_v58 = vmin.f32 %v3464_v0, 6.0  ;;  %v2563_v2 = vadd.f32 %v10410_v28, %v10144_v13 }
 0x6ab   :  { %v4360_v11 = vadd.f32 %v12757_v20, %v4340_v38  ;;  %5260 = vmatpush.msrb.mxu0 %v5083_v45  ;;  %v2482_v59 = vadd.f32 %v12758_v40, %v10144_v13  ;;  %4802 = vmatpush.msra.mxu2 %v4114_v24  ;;  %v12760_v38 = vld [vmem:[#allocation169_spill] sm:$0xff]  ;;  %v3444_v20 = vmax.f32 %v2312_v42, 0.0  ;;  %v12761_v40 = vld [vmem:[#allocation94_spill] sm:$0xff]  ;;  %v3605_v8 = vmax.f32 %v2569_v30, 0.0 }
 0x6ac   :  { %4836 = vmatpush.msrb.mxu3 %v4134_v33  ;;  %v3615_v33 = vmax.f32 %v2572_v29, 0.0  ;;  %4793 = vmatpush.msrb.mxu1 %v3844_v23  ;;  %v2306_v45 = vadd.f32 %v12760_v38, %v10036_v26  ;;  %v2479_v10 = vadd.f32 %v12761_v40, %v10144_v13  ;;  %v4265_v23 = vmin.f32 %v3625_v37, 6.0  ;;  %v12762_v24 = vld [vmem:[#allocation145_spill] sm:$0xff] }
 0x6ad   :  { %5261 = vmatpush.msrb.mxu0 %v5082_v56  ;;  %v2300_v27 = vadd.f32 %v12762_v24, %v10036_v26  ;;  %v3434_v38 = vmax.f32 %v2309_v7, 0.0  ;;  %v4094_v42 = vmin.f32 %v3454_v35, 6.0  ;;  %4803 = vmatpush.msra.mxu2 %v4104_v58  ;;  %v3315_v56 = vmax.f32 %v2482_v59, 0.0  ;;  %v12764_v26 = vld [vmem:[#allocation106_spill] sm:$0xff] }
 0x6ae   :  { %4837 = vmatpush.msrb.mxu3 %v4124_v1  ;;  %5262 = vmatmul.f32.vlgmr.msrb.gmra.mxu0 %v4360_v11  ;;  %v10739_v29 = vpop.f32.mrf.mxu2  ;;  %v12763_v1 = vld [vmem:[#allocation100_spill] sm:$0xff]  ;;  %v2560_v28 = vadd.f32 %v10376_v19, %v10144_v13  ;;  %v3595_v37 = vmax.f32 %v2566_v63, 0.0  ;;  %v4255_v30 = vmin.f32 %v3615_v33, 6.0  ;;  %v3414_v11 = vmax.f32 %v10731_v57, 0.0  ;;  %v4559_v63 = vpop.f32.mrf.mxu3  ;;  %v12765_v57 = vld [vmem:[#allocation17_spill] sm:$0xff] }
 0x6af   :  { %v2476_v0 = vadd.f32 %v12763_v1, %v10144_v13  ;;  %4794 = vmatpush.msrb.mxu1 %v10636_v48  ;;  %v4084_v40 = vmin.f32 %v3444_v20, 6.0  ;;  %v2473_v7 = vadd.f32 %v12764_v26, %v10144_v13  ;;  %4804 = vmatpush.msra.mxu2 %v4094_v42  ;;  %v3305_v35 = vmax.f32 %v2479_v10, 0.0 }
 0x6b0   :  { %4902 = vmatpush.msra.mxu3 %v4275_v17  ;;  %v3424_v17 = vmax.f32 %v2306_v45, 0.0  ;;  %v2557_v48 = vadd.f32 %v10339_v39, %v10144_v13  ;;  %v3585_v58 = vmax.f32 %v2563_v2, 0.0  ;;  %v4245_v59 = vmin.f32 %v3605_v8, 6.0  ;;  %v10754_v19 = vpop.f32.mrf.mxu1 }
 0x6b1   :  { %4795 = vmatpush.msrb.mxu1 %v10634_v9  ;;  %v4074_v33 = vmin.f32 %v3434_v38, 6.0  ;;  %v2470_v45 = vadd.f32 %v12765_v57, %v10144_v13  ;;  %v3295_v20 = vmax.f32 %v2476_v0, 0.0  ;;  %4805 = vmatpush.msra.mxu2 %v4084_v40  ;;  %v10760_v9 = vadd.f32 %v4559_v63, %v10693_v43  ;;  %v12766_v38 = vld [vmem:[#allocation123_spill] sm:$0xff] }
 0x6b2   :  { %4903 = vmatpush.msra.mxu3 %v4265_v23  ;;  %v3955_v10 = vmin.f32 %v3315_v56, 6.0  ;;  %v2554_v39 = vadd.f32 %v10306_v55, %v10144_v13  ;;  %v3575_v2 = vmax.f32 %v2560_v28, 0.0  ;;  %v4235_v8 = vmin.f32 %v3595_v37, 6.0  ;;  %4738 = vmatmul.f32.vlgmr.msrb.gmra.mxu2 %v10722_v49  ;;  %v12767_v37 = vld [vmem:[#allocation33_spill] sm:$0xff] }
 0x6b3   :  { %4796 = vmatpush.msrb.mxu1 %v10625_v22  ;;  %v3404_v23 = vmax.f32 %v2300_v27, 0.0  ;;  %v4064_v24 = vmin.f32 %v3424_v17, 6.0  ;;  %v2467_v42 = vadd.f32 %v12766_v38, %v10144_v13  ;;  %v3285_v1 = vmax.f32 %v2473_v7, 0.0  ;;  %4806 = vmatpush.msra.mxu2 %v4074_v33 }
 0x6b4   :  { %4904 = vmatpush.msra.mxu3 %v4255_v30  ;;  %v3945_v22 = vmin.f32 %v3305_v35, 6.0  ;;  %v2551_v43 = vadd.f32 %v10275_v62, %v10144_v13  ;;  %v3565_v0 = vmax.f32 %v2557_v48, 0.0  ;;  %v4225_v55 = vmin.f32 %v3585_v58, 6.0 }
 0x6b5   :  { %4797 = vmatpush.msrb.mxu1 %v10577_v47  ;;  %v3394_v27 = vmax.f32 %v10707_v18, 0.0  ;;  %v4054_v28 = vmin.f32 %v3414_v11, 6.0  ;;  %v2464_v30 = vadd.f32 %v12767_v37, %v10144_v13  ;;  %v3275_v17 = vmax.f32 %v2470_v45, 0.0  ;;  %4807 = vmatpush.msra.mxu2 %v4064_v24  ;;  %v12768_v18 = vld [vmem:[#allocation15_spill] sm:$0xff]  ;;  %v12769_v45 = vld [vmem:[#allocation50_spill] sm:$0xff] }
 0x6b6   :  { %4905 = vmatpush.msra.mxu3 %v4245_v59  ;;  %v10770_v56 = vpop.f32.mrf.mxu2  ;;  %4798 = vmatmul.f32.vlgmr.msrb.gmra.mxu1 %v10565_v51  ;;  %v3935_v47 = vmin.f32 %v3295_v20, 6.0  ;;  %v2548_v62 = vadd.f32 %v10231_v54, %v10144_v13  ;;  %v3555_v40 = vmax.f32 %v2554_v39, 0.0  ;;  %v4215_v26 = vmin.f32 %v3575_v2, 6.0  ;;  %v12770_v24 = vld [vmem:[#allocation54_spill] sm:$0xff] }
 0x6b7   :  { %4862 = vmatpush.msra.mxu1 %v3955_v10  ;;  %v3384_v7 = vmax.f32 %v10701_v16, 0.0  ;;  %v4044_v35 = vmin.f32 %v3404_v23, 6.0  ;;  %v2461_v11 = vadd.f32 %v12768_v18, %v10144_v13  ;;  %v3265_v48 = vmax.f32 %v2467_v42, 0.0  ;;  %4808 = vmatpush.msra.mxu2 %v4054_v28 }
 0x6b8   :  { %4906 = vmatpush.msra.mxu3 %v4235_v8  ;;  %v3925_v58 = vmin.f32 %v3285_v1, 6.0  ;;  %v2545_v59 = vadd.f32 %v10199_v15, %v10144_v13  ;;  %v3545_v63 = vmax.f32 %v2551_v43, 0.0  ;;  %v4205_v54 = vmin.f32 %v3565_v0, 6.0  ;;  %v10784_v33 = vpop.f32.mrf.mxu1 }
 0x6b9   :  { %4863 = vmatpush.msra.mxu1 %v3945_v22  ;;  %4838 = vmatmul.f32.vlgmr.msrb.gmra.mxu3 %v10415_v61  ;;  %v3374_v16 = vmax.f32 %v10697_v32, 0.0  ;;  %v4034_v57 = vmin.f32 %v3394_v27, 6.0  ;;  %v2458_v20 = vadd.f32 %v12769_v45, %v10144_v13  ;;  %v3255_v10 = vmax.f32 %v2464_v30, 0.0 }
 0x6ba   :  { %4907 = vmatpush.msra.mxu3 %v4225_v55  ;;  %4809 = vmatpush.msra.mxu2 %v4044_v35  ;;  %v3915_v39 = vmin.f32 %v3275_v17, 6.0  ;;  %v2542_v61 = vadd.f32 %v10160_v31, %v10144_v13  ;;  %v3535_v2 = vmax.f32 %v2548_v62, 0.0  ;;  %v4195_v15 = vmin.f32 %v3555_v40, 6.0  ;;  %v12772_v40 = vld [vmem:[#allocation44_spill] sm:$0xff]  ;;  %v12773_v35 = vld [vmem:[#allocation93_spill] sm:$0xff] }
 0x6bb   :  { %4864 = vmatpush.msra.mxu1 %v3935_v47  ;;  %v3364_v8 = vmax.f32 %v10686_v34, 0.0  ;;  %v4024_v23 = vmin.f32 %v3384_v7, 6.0  ;;  %v2455_v32 = vadd.f32 %v12770_v24, %v10144_v13  ;;  %v3245_v38 = vmax.f32 %v2461_v11, 0.0  ;;  %v12771_v34 = vld [vmem:[#allocation63_spill] sm:$0xff] }
 0x6bc   :  { %4908 = vmatpush.msra.mxu3 %v4215_v26  ;;  %4810 = vmatpush.msra.mxu2 %v4034_v57  ;;  %v3905_v42 = vmin.f32 %v3265_v48, 6.0  ;;  %v2539_v1 = vadd.f32 %v10125_v46, %v10144_v13  ;;  %v3525_v22 = vmax.f32 %v2545_v59, 0.0  ;;  %v4185_v43 = vmin.f32 %v3545_v63, 6.0  ;;  %v12774_v59 = vld [vmem:[#allocation186_spill] sm:$0xff]  ;;  %v12775_v57 = vld [vmem:[#allocation68_spill] sm:$0xff] }
 0x6bd   :  { %4865 = vmatpush.msra.mxu1 %v3925_v58  ;;  %v3354_v0 = vmax.f32 %v10679_v6, 0.0  ;;  %v4014_v55 = vmin.f32 %v3374_v16, 6.0  ;;  %v2452_v27 = vadd.f32 %v12771_v34, %v10144_v13  ;;  %v3235_v28 = vmax.f32 %v2458_v20, 0.0 }
 0x6be   :  { %4909 = vmatpush.msra.mxu3 %v4205_v54  ;;  %v10796_v31 = vpop.f32.mrf.mxu2  ;;  %4811 = vmatpush.msra.mxu2 %v4024_v23  ;;  %v3895_v37 = vmin.f32 %v3255_v10, 6.0  ;;  %v2536_v30 = vadd.f32 %v10094_v4, %v10144_v13  ;;  %v3515_v17 = vmax.f32 %v2542_v61, 0.0  ;;  %v4175_v46 = vmin.f32 %v3535_v2, 6.0  ;;  %v12776_v2 = vld [vmem:[#allocation41_spill] sm:$0xff] }
 0x6bf   :  { %4866 = vmatpush.msra.mxu1 %v3915_v39  ;;  %v3344_v47 = vmax.f32 %v10668_v53, 0.0  ;;  %v4004_v62 = vmin.f32 %v3364_v8, 6.0  ;;  %v2449_v6 = vadd.f32 %v12772_v40, %v10144_v13  ;;  %v3225_v26 = vmax.f32 %v2455_v32, 0.0  ;;  %v12782_v40 = vld [vmem:[#allocation215_spill] sm:$0xff] }
 0x6c0   :  { %4910 = vmatpush.msra.mxu3 %v4195_v15  ;;  %4812 = vmatpush.msra.mxu2 %v4014_v55  ;;  %v3885_v7 = vmin.f32 %v3245_v38, 6.0  ;;  %v2530_v18 = vadd.f32 %v12773_v35, %v10144_v13  ;;  %v3505_v11 = vmax.f32 %v2539_v1, 0.0  ;;  %v4165_v48 = vmin.f32 %v3525_v22, 6.0  ;;  %v10808_v4 = vpop.f32.mrf.mxu1 }
 0x6c1   :  { %4867 = vmatpush.msra.mxu1 %v3905_v42  ;;  %v3994_v58 = vmin.f32 %v3354_v0, 6.0  ;;  %v2446_v53 = vadd.f32 %v12774_v59, %v10144_v13  ;;  %v3215_v63 = vmax.f32 %v2452_v27, 0.0  ;;  %v2533_v54 = vadd.f32 %v10066_v50, %v10144_v13  ;;  %v12777_v50 = vld [vmem:[#allocation90_spill] sm:$0xff]  ;;  %v12780_v27 = vld [vmem:[#allocation207_spill] sm:$0xff] }
 0x6c2   :  { %4911 = vmatpush.msra.mxu3 %v4185_v43  ;;  %4813 = vmatpush.msra.mxu2 %v4004_v62  ;;  %v3875_v16 = vmin.f32 %v3235_v28, 6.0  ;;  %v2527_v45 = vadd.f32 %v12775_v57, %v10144_v13  ;;  %v3495_v20 = vmax.f32 %v2536_v30, 0.0  ;;  %v4155_v10 = vmin.f32 %v3515_v17, 6.0 }
 0x6c3   :  { %4868 = vmatpush.msra.mxu1 %v3895_v37  ;;  %v3324_v39 = vmax.f32 %v10661_v25, 0.0  ;;  %v3984_v61 = vmin.f32 %v3344_v47, 6.0  ;;  %v2443_v15 = vadd.f32 %v12776_v2, %v10144_v13  ;;  %v3205_v8 = vmax.f32 %v2449_v6, 0.0  ;;  %v12779_v25 = vld [vmem:[#allocation202_spill] sm:$0xff] }
 0x6c4   :  { %4912 = vmatpush.msra.mxu3 %v4175_v46  ;;  %4814 = vmatpush.msra.mxu2 %v3994_v58  ;;  %v3865_v23 = vmin.f32 %v3225_v26, 6.0  ;;  %v2524_v24 = vadd.f32 %v12777_v50, %v10144_v13  ;;  %v3475_v32 = vmax.f32 %v2530_v18, 0.0  ;;  %v4145_v38 = vmin.f32 %v3505_v11, 6.0  ;;  %v12781_v46 = vld [vmem:[#allocation210_spill] sm:$0xff]  ;;  %v12783_v11 = vld [vmem:[#allocation55_spill] sm:$0xff] }
 0x6c5   :  { %4869 = vmatpush.msra.mxu1 %v3885_v7  ;;  %v12778_v1 = vmax.f32 %v10640_v14, 0.0  ;;  %v2440_v43 = vadd.f32 %v12779_v25, %v10144_v13  ;;  %v3195_v0 = vmax.f32 %v2446_v53, 0.0  ;;  %v3485_v55 = vmax.f32 %v2533_v54, 0.0  ;;  %v12784_v53 = vld [vmem:[#allocation227_spill] sm:$0xff] }
 0x6c6   :  { %4913 = vmatpush.msra.mxu3 %v4165_v48  ;;  %v10821_v42 = vpop.f32.mrf.mxu2  ;;  %4815 = vmatpush.msra.mxu2 %v3984_v61  ;;  %v3855_v34 = vmin.f32 %v3215_v63, 6.0  ;;  %v2521_v28 = vadd.f32 %v12780_v27, %v10144_v13  ;;  %v3465_v37 = vmax.f32 %v2527_v45, 0.0  ;;  %v4135_v30 = vmin.f32 %v3495_v20, 6.0  ;;  %v12785_v45 = vld [vmem:[#allocation61_spill] sm:$0xff] }
 0x6c7   :  { %4870 = vmatpush.msra.mxu1 %v3875_v16  ;;  %v3974_v22 = vmin.f32 %v12778_v1, 6.0  ;;  %v3964_v17 = vmin.f32 %v3324_v39, 6.0  ;;  %v2437_v47 = vadd.f32 %v12781_v46, %v10144_v13  ;;  %v3185_v14 = vmax.f32 %v2443_v15, 0.0  ;;  %v12786_v39 = vld [vmem:[#allocation235_spill] sm:$0xff]  ;;  %v12788_v1 = vld [vmem:[#allocation81_spill] sm:$0xff] }
 0x6c8   :  { %4914 = vmatpush.msra.mxu3 %v4155_v10  ;;  %v3845_v62 = vmin.f32 %v3205_v8, 6.0  ;;  %v2518_v6 = vadd.f32 %v12782_v40, %v10144_v13  ;;  %v3455_v26 = vmax.f32 %v2524_v24, 0.0  ;;  %v4115_v7 = vmin.f32 %v3475_v32, 6.0  ;;  %v10833_v35 = vpop.f32.mrf.mxu1  ;;  %v10851_v32 = vld [vmem:[%s11589_s5 + $0x18] sm:$0xff] }
 0x6c9   :  { %4871 = vmatpush.msra.mxu1 %v3865_v23  ;;  %4816 = vmatpush.msra.mxu2 %v3974_v22  ;;  %v3175_v18 = vmax.f32 %v2440_v43, 0.0  ;;  %v2691_v48 = vadd.f32 %v12783_v11, %v10261_v41  ;;  %v4125_v58 = vmin.f32 %v3485_v55, 6.0  ;;  %v3835_v59 = vmin.f32 %v3195_v0, 6.0  ;;  %v12787_v23 = vld [vmem:[#allocation191_spill] sm:$0xff] }
 0x6ca   :  { %4915 = vmatpush.msra.mxu3 %v4145_v38  ;;  %v2515_v63 = vadd.f32 %v12784_v53, %v10144_v13  ;;  %v3445_v54 = vmax.f32 %v2521_v28, 0.0  ;;  %v4105_v16 = vmin.f32 %v3465_v37, 6.0  ;;  %v3165_v57 = vmax.f32 %v2437_v47, 0.0  ;;  %v12789_v0 = vld [vmem:[#allocation199_spill] sm:$0xff] }
 0x6cb   :  { %4872 = vmatpush.msra.mxu1 %v3855_v34  ;;  %4817 = vmatpush.msra.mxu2 %v3964_v17  ;;  %v2688_v20 = vadd.f32 %v12785_v45, %v10261_v41  ;;  %v3825_v10 = vmin.f32 %v3185_v14, 6.0  ;;  %v2512_v61 = vadd.f32 %v12786_v39, %v10144_v13  ;;  %v3435_v2 = vmax.f32 %v2518_v6, 0.0  ;;  %v12790_v28 = vld [vmem:[#allocation127_spill] sm:$0xff]  ;;  %v12795_v45 = vld [vmem:[#allocation84_spill] sm:$0xff] }
 0x6cc   :  { %4916 = vmatpush.msra.mxu3 %v4135_v30  ;;  %4818 = vmatmul.f32.vlgmr.msra.gmra.mxu2 %v10722_v49  ;;  %v4095_v15 = vmin.f32 %v3455_v26, 6.0  ;;  %v2685_v50 = vadd.f32 %v12787_v23, %v10261_v41  ;;  %v3316_v24 = vmax.f32 %v2691_v48, 0.0  ;;  %v3815_v38 = vmin.f32 %v3175_v18, 6.0  ;;  %v12791_v47 = vld [vmem:[#allocation211_spill] sm:$0xff] }
 0x6cd   :  { %4873 = vmatpush.msra.mxu1 %v3845_v62  ;;  %4882 = vmatpush.msrb.mxu2 %v4115_v7  ;;  %v2509_v22 = vadd.f32 %v12788_v1, %v10144_v13  ;;  %v3425_v25 = vmax.f32 %v2515_v63, 0.0  ;;  %v4085_v43 = vmin.f32 %v3445_v54, 6.0  ;;  %v2682_v55 = vadd.f32 %v12789_v0, %v10261_v41  ;;  %v12792_v6 = vld [vmem:[#allocation135_spill] sm:$0xff] }
 0x6ce   :  { %4917 = vmatpush.msra.mxu3 %v4125_v58  ;;  %v10844_v8 = vpop.f32.mrf.mxu2  ;;  %v3306_v34 = vmax.f32 %v2688_v20, 0.0  ;;  %v3805_v27 = vmin.f32 %v3165_v57, 6.0  ;;  %v2506_v37 = vadd.f32 %v12790_v28, %v10144_v13  ;;  %v3415_v30 = vmax.f32 %v2512_v61, 0.0  ;;  %v12793_v11 = vld [vmem:[#allocation219_spill] sm:$0xff] }
 0x6cf   :  { %4874 = vmatpush.msra.mxu1 %v3835_v59  ;;  %4883 = vmatpush.msrb.mxu2 %v4105_v16  ;;  %v4075_v17 = vmin.f32 %v3435_v2, 6.0  ;;  %v2679_v14 = vadd.f32 %v12791_v47, %v10261_v41  ;;  %v3296_v62 = vmax.f32 %v2685_v50, 0.0  ;;  %v3956_v40 = vmin.f32 %v3316_v24, 6.0  ;;  %v12794_v53 = vld [vmem:[#allocation75_spill] sm:$0xff] }
 0x6d0   :  { %4918 = vmatmul.f32.vlgmr.msra.gmra.mxu3 %v10851_v32  ;;  %v10860_v46 = vpop.f32.mrf.mxu1  ;;  %v2503_v26 = vadd.f32 %v12792_v6, %v10144_v13  ;;  %v3405_v7 = vmax.f32 %v2509_v22, 0.0  ;;  %v4065_v18 = vmin.f32 %v3425_v25, 6.0  ;;  %v2676_v48 = vadd.f32 %v12793_v11, %v10261_v41  ;;  %v12796_v61 = vld [vmem:[#allocation23_spill] sm:$0xff] }
 0x6d1   :  { %4875 = vmatpush.msra.mxu1 %v3825_v10  ;;  %4884 = vmatpush.msrb.mxu2 %v4095_v15  ;;  %v3286_v58 = vmax.f32 %v2682_v55, 0.0  ;;  %v3946_v59 = vmin.f32 %v3306_v34, 6.0  ;;  %v2500_v63 = vadd.f32 %v12794_v53, %v10144_v13  ;;  %v3395_v54 = vmax.f32 %v2506_v37, 0.0  ;;  %v12797_v50 = vld [vmem:[#allocation239_spill] sm:$0xff]  ;;  %v12799_v55 = vld [vmem:[#allocation245_spill] sm:$0xff] }
 0x6d2   :  { %v4055_v16 = vmin.f32 %v3415_v30, 6.0  ;;  %v2673_v20 = vadd.f32 %v12795_v45, %v10261_v41  ;;  %v3276_v10 = vmax.f32 %v2679_v14, 0.0  ;;  %v3936_v39 = vmin.f32 %v3296_v62, 6.0  ;;  %v12800_v37 = vld [vmem:[#allocation175_spill] sm:$0xff] }
 0x6d3   :  { %4876 = vmatpush.msra.mxu1 %v3815_v38  ;;  %4885 = vmatpush.msrb.mxu2 %v4085_v43  ;;  %v2497_v2 = vadd.f32 %v12796_v61, %v10144_v13  ;;  %v3385_v15 = vmax.f32 %v2503_v26, 0.0  ;;  %v4045_v23 = vmin.f32 %v3405_v7, 6.0  ;;  %v2670_v24 = vadd.f32 %v12797_v50, %v10261_v41  ;;  %v12801_v14 = vld [vmem:[#allocation131_spill] sm:$0xff] }
 0x6d4   :  { %v3266_v38 = vmax.f32 %v2676_v48, 0.0  ;;  %v3926_v1 = vmin.f32 %v3286_v58, 6.0  ;;  %v3375_v25 = vmax.f32 %v2500_v63, 0.0  ;;  %v4035_v43 = vmin.f32 %v3395_v54, 6.0  ;;  %v12802_v26 = vld [vmem:[#allocation187_spill] sm:$0xff]  ;;  %v12804_v54 = vld [vmem:[#allocation82_spill] sm:$0xff] }
 0x6d5   :  { %4877 = vmatpush.msra.mxu1 %v3805_v27  ;;  %4886 = vmatpush.msrb.mxu2 %v4075_v17  ;;  %v2667_v34 = vadd.f32 %v12799_v55, %v10261_v41  ;;  %v3256_v27 = vmax.f32 %v2673_v20, 0.0  ;;  %v3916_v28 = vmin.f32 %v3276_v10, 6.0  ;;  %v2491_v30 = vadd.f32 %v12800_v37, %v10144_v13  ;;  %v12803_v58 = vld [vmem:[#allocation143_spill] sm:$0xff] }
 0x6d6   :  { %v10870_v57 = vpop.f32.mrf.mxu2  ;;  %4878 = vmatmul.f32.vlgmr.msra.gmra.mxu1 %v10565_v51  ;;  %v12798_v51 = vld [vmem:[#allocation167_spill] sm:$0xff]  ;;  %v3365_v17 = vmax.f32 %v2497_v2, 0.0  ;;  %v4025_v47 = vmin.f32 %v3385_v15, 6.0  ;;  %v2664_v62 = vadd.f32 %v12801_v14, %v10261_v41  ;;  %v3906_v6 = vmin.f32 %v3266_v38, 6.0 }
 0x6d7   :  { %4942 = vmatpush.msrb.mxu1 %v3956_v40  ;;  %4887 = vmatpush.msrb.mxu2 %v4065_v18  ;;  %v2494_v22 = vadd.f32 %v12798_v51, %v10144_v13  ;;  %v3246_v40 = vmax.f32 %v2670_v24, 0.0  ;;  %v2488_v7 = vadd.f32 %v12802_v26, %v10144_v13  ;;  %v4015_v11 = vmin.f32 %v3375_v25, 6.0  ;;  %v12805_v10 = vld [vmem:[#allocation151_spill] sm:$0xff] }
 0x6d8   :  { %v10881_v0 = vpop.f32.mrf.mxu1  ;;  %v3236_v53 = vmax.f32 %v2667_v34, 0.0  ;;  %v3896_v63 = vmin.f32 %v3256_v27, 6.0  ;;  %v3345_v45 = vmax.f32 %v2491_v30, 0.0  ;;  %v4005_v20 = vmin.f32 %v3365_v17, 6.0  ;;  %v12806_v38 = vld [vmem:[#allocation159_spill] sm:$0xff]  ;;  %v12808_v17 = vld [vmem:[#allocation69_spill] sm:$0xff] }
 0x6d9   :  { %4943 = vmatpush.msrb.mxu1 %v3946_v59  ;;  %4888 = vmatpush.msrb.mxu2 %v4055_v16  ;;  %v3355_v18 = vmax.f32 %v2494_v22, 0.0  ;;  %v2661_v59 = vadd.f32 %v12803_v58, %v10261_v41  ;;  %v2485_v16 = vadd.f32 %v12804_v54, %v10144_v13  ;;  %v3226_v61 = vmax.f32 %v2664_v62, 0.0  ;;  %v12807_v55 = vld [vmem:[#allocation171_spill] sm:$0xff] }
 0x6da   :  { %v3886_v2 = vmin.f32 %v3246_v40, 6.0  ;;  %v2739_v15 = vadd.f32 %v10501_v60, %v10261_v41  ;;  %v2655_v13 = vadd.f32 %v12806_v38, %v10261_v41  ;;  %v3876_v51 = vmin.f32 %v3236_v53, 6.0 }
 0x6db   :  { %4944 = vmatpush.msrb.mxu1 %v3936_v39  ;;  %4889 = vmatpush.msrb.mxu2 %v4045_v23  ;;  %v2658_v39 = vadd.f32 %v12805_v10, %v10261_v41  ;;  %v3335_v23 = vmax.f32 %v2488_v7, 0.0  ;;  %v3995_v50 = vmin.f32 %v3355_v18, 6.0  ;;  %v2736_v22 = vadd.f32 %v10481_v36, %v10261_v41  ;;  %v12809_v7 = vld [vmem:[#allocation20_spill] sm:$0xff] }
 0x6dc   :  { %v3325_v25 = vmax.f32 %v2485_v16, 0.0  ;;  %v2652_v60 = vadd.f32 %v12807_v55, %v10261_v41  ;;  %v3866_v27 = vmin.f32 %v3226_v61, 6.0  ;;  %v3476_v37 = vmax.f32 %v2739_v15, 0.0 }
 0x6dd   :  { %4945 = vmatpush.msrb.mxu1 %v3926_v1  ;;  %4890 = vmatpush.msrb.mxu2 %v4035_v43  ;;  %v3216_v1 = vmax.f32 %v2661_v59, 0.0  ;;  %v3985_v43 = vmin.f32 %v3345_v45, 6.0  ;;  %v3206_v34 = vmax.f32 %v2658_v39, 0.0  ;;  %v3975_v30 = vmin.f32 %v3335_v23, 6.0 }
 0x6de   :  { %v10891_v48 = vpop.f32.mrf.mxu2  ;;  %v3196_v14 = vmax.f32 %v2655_v13, 0.0  ;;  %v2730_v40 = vadd.f32 %v10427_v3, %v10261_v41  ;;  %v3965_v26 = vmin.f32 %v3325_v25, 6.0  ;;  %v3186_v18 = vmax.f32 %v2652_v60, 0.0  ;;  %v12814_v60 = vld [vmem:[#allocation52_spill] sm:$0xff] }
 0x6df   :  { %4946 = vmatpush.msrb.mxu1 %v3916_v28  ;;  %4891 = vmatpush.msrb.mxu2 %v4025_v47  ;;  %v2733_v28 = vadd.f32 %v10455_v21, %v10261_v41  ;;  %v2649_v47 = vadd.f32 %v12808_v17, %v10261_v41  ;;  %v3856_v62 = vmin.f32 %v3216_v1, 6.0  ;;  %v2646_v21 = vadd.f32 %v12809_v7, %v10261_v41  ;;  %v12817_v7 = vld [vmem:[#allocation102_spill] sm:$0xff] }
 0x6e0   :  { %v10901_v24 = vpop.f32.mrf.mxu1  ;;  %v2727_v58 = vadd.f32 %v10392_v44, %v10261_v41  ;;  %v4116_v53 = vmin.f32 %v3476_v37, 6.0  ;;  %v2900_v54 = vadd.f32 %v10152_v5, %v10366_v12  ;;  %v3836_v16 = vmin.f32 %v3196_v14, 6.0  ;;  %v12810_v44 = vld [vmem:[#allocation43_spill] sm:$0xff]  ;;  %v12815_v37 = vld [vmem:[#allocation116_spill] sm:$0xff]  ;;  %v12816_v14 = vld [vmem:[#allocation58_spill] sm:$0xff] }
 0x6e1   :  { %4947 = vmatpush.msrb.mxu1 %v3906_v6  ;;  %4892 = vmatpush.msrb.mxu2 %v4015_v11  ;;  %v3466_v6 = vmax.f32 %v2736_v22, 0.0  ;;  %v3846_v11 = vmin.f32 %v3206_v34, 6.0  ;;  %v3456_v59 = vmax.f32 %v2733_v28, 0.0  ;;  %v2724_v45 = vadd.f32 %v10361_v52, %v10261_v41  ;;  %v12811_v5 = vld [vmem:[#allocation107_spill] sm:$0xff]  ;;  %v12812_v52 = vld [vmem:[#allocation96_spill] sm:$0xff]  ;;  %v12813_v22 = vld [vmem:[#allocation110_spill] sm:$0xff] }
 0x6e2   :  { %v3166_v39 = vmax.f32 %v2646_v21, 0.0  ;;  %v2897_v61 = vadd.f32 %v12810_v44, %v10366_v12  ;;  %v2721_v15 = vadd.f32 %v12811_v5, %v10261_v41  ;;  %v3436_v23 = vmax.f32 %v2727_v58, 0.0  ;;  %v12818_v58 = vld [vmem:[#allocation65_spill] sm:$0xff] }
 0x6e3   :  { %4948 = vmatpush.msrb.mxu1 %v3896_v63  ;;  %4893 = vmatpush.msrb.mxu2 %v4005_v20  ;;  %v3176_v63 = vmax.f32 %v2649_v47, 0.0  ;;  %v3446_v20 = vmax.f32 %v2730_v40, 0.0  ;;  %v4106_v10 = vmin.f32 %v3466_v6, 6.0  ;;  %v2894_v38 = vadd.f32 %v12812_v52, %v10366_v12 }
 0x6e4   :  { %v3317_v13 = vmax.f32 %v2900_v54, 0.0  ;;  %v2718_v25 = vadd.f32 %v12813_v22, %v10261_v41  ;;  %v2891_v34 = vadd.f32 %v12814_v60, %v10366_v12  ;;  %v3806_v28 = vmin.f32 %v3166_v39, 6.0  ;;  %v12819_v54 = vld [vmem:[#allocation28_spill] sm:$0xff]  ;;  %v12820_v39 = vld [vmem:[#allocation195_spill] sm:$0xff] }
 0x6e5   :  { %4949 = vmatpush.msrb.mxu1 %v3886_v2  ;;  %4894 = vmatpush.msrb.mxu2 %v3995_v50  ;;  %v3826_v2 = vmin.f32 %v3186_v18, 6.0  ;;  %v4096_v50 = vmin.f32 %v3456_v59, 6.0  ;;  %v4086_v55 = vmin.f32 %v3446_v20, 6.0  ;;  %v3416_v17 = vmax.f32 %v2721_v15, 0.0  ;;  %v12821_v15 = vld [vmem:[#allocation34_spill] sm:$0xff] }
 0x6e6   :  { %v10913_v36 = vpop.f32.mrf.mxu2  ;;  %v4076_v47 = vmin.f32 %v3436_v23, 6.0  ;;  %v3297_v40 = vmax.f32 %v2894_v38, 0.0  ;;  %v3957_v6 = vmin.f32 %v3317_v13, 6.0  ;;  %v2712_v21 = vadd.f32 %v12817_v7, %v10261_v41  ;;  %v12822_v38 = vld [vmem:[#allocation203_spill] sm:$0xff] }
 0x6e7   :  { %4950 = vmatpush.msrb.mxu1 %v3876_v51  ;;  %4895 = vmatpush.msrb.mxu2 %v3985_v43  ;;  %v3816_v51 = vmin.f32 %v3176_v63, 6.0  ;;  %v3426_v43 = vmax.f32 %v2724_v45, 0.0  ;;  %v3406_v18 = vmax.f32 %v2718_v25, 0.0  ;;  %v2885_v59 = vadd.f32 %v12818_v58, %v10366_v12  ;;  %v12823_v25 = vld [vmem:[#allocation37_spill] sm:$0xff] }
 0x6e8   :  { %v10923_v3 = vpop.f32.mrf.mxu1  ;;  %v4056_v20 = vmin.f32 %v3416_v17, 6.0  ;;  %v2882_v44 = vadd.f32 %v12820_v39, %v10366_v12  ;;  %v2706_v23 = vadd.f32 %v12821_v15, %v10261_v41  ;;  %v2879_v13 = vadd.f32 %v12822_v38, %v10366_v12  ;;  %v12825_v17 = vld [vmem:[#allocation40_spill] sm:$0xff] }
 0x6e9   :  { %4951 = vmatpush.msrb.mxu1 %v3866_v27  ;;  %4896 = vmatpush.msrb.mxu2 %v3975_v30  ;;  %v3307_v27 = vmax.f32 %v2897_v61, 0.0  ;;  %v2715_v30 = vadd.f32 %v12815_v37, %v10261_v41  ;;  %v4046_v52 = vmin.f32 %v3406_v18, 6.0  ;;  %v12827_v18 = vld [vmem:[#allocation46_spill] sm:$0xff] }
 0x6ea   :  { %v3247_v7 = vmax.f32 %v2879_v13, 0.0 }
 0x6eb   :  { %4952 = vmatpush.msrb.mxu1 %v3856_v62  ;;  %4897 = vmatpush.msrb.mxu2 %v3965_v26  ;;  %v2888_v62 = vadd.f32 %v12816_v14, %v10366_v12  ;;  %v3947_v63 = vmin.f32 %v3307_v27, 6.0  ;;  %v3396_v45 = vmax.f32 %v2715_v30, 0.0  ;;  %v3366_v14 = vmax.f32 %v2706_v23, 0.0 }
 0x6ec   :  { %4898 = vmatmul.f32.vlgmr.msrb.gmra.mxu2 %v10722_v49 }
 0x6ed   :  { %4953 = vmatpush.msrb.mxu1 %v3846_v11  ;;  %4962 = vmatpush.msra.mxu2 %v4116_v53  ;;  %v4066_v11 = vmin.f32 %v3426_v43, 6.0  ;;  %v3287_v53 = vmax.f32 %v2891_v34, 0.0  ;;  %v3277_v61 = vmax.f32 %v2888_v62, 0.0  ;;  %v2703_v43 = vadd.f32 %v12823_v25, %v10261_v41  ;;  %v12824_v34 = vld [vmem:[#allocation87_spill] sm:$0xff] }
 0x6ee   :  { %v10934_v1 = vpop.f32.mrf.mxu2  ;;  %v4036_v60 = vmin.f32 %v3396_v45, 6.0  ;;  %v2876_v27 = vadd.f32 %v12824_v34, %v10366_v12 }
 0x6ef   :  { %4954 = vmatpush.msrb.mxu1 %v3836_v16  ;;  %4963 = vmatpush.msra.mxu2 %v4106_v10  ;;  %v2709_v16 = vadd.f32 %v12819_v54, %v10261_v41  ;;  %v10955_v10 = vld [vmem:[%s11589_s5 + $0x8] sm:$0xff]  ;;  %v3927_v22 = vmin.f32 %v3287_v53, 6.0  ;;  %v3917_v37 = vmin.f32 %v3277_v61, 6.0  ;;  %v3356_v58 = vmax.f32 %v2703_v43, 0.0 }
 0x6f0   :  { %v10944_v26 = vpop.f32.mrf.mxu1  ;;  %v12828_v53 = vld [vmem:[#allocation231_spill] sm:$0xff]  ;;  %v3237_v54 = vmax.f32 %v2876_v27, 0.0  ;;  %v4006_v61 = vmin.f32 %v3366_v14, 6.0 }
 0x6f1   :  { %4955 = vmatpush.msrb.mxu1 %v3826_v2  ;;  %4964 = vmatpush.msra.mxu2 %v4096_v50  ;;  %v3937_v2 = vmin.f32 %v3297_v40, 6.0  ;;  %v3386_v50 = vmax.f32 %v2712_v21, 0.0  ;;  %v12826_v40 = vld [vmem:[#allocation223_spill] sm:$0xff] }
 0x6f3   :  { %4956 = vmatpush.msrb.mxu1 %v3816_v51  ;;  %4965 = vmatpush.msra.mxu2 %v4086_v55  ;;  %v3267_v51 = vmax.f32 %v2885_v59, 0.0  ;;  %v3376_v55 = vmax.f32 %v2709_v16, 0.0  ;;  %v4026_v62 = vmin.f32 %v3386_v50, 6.0  ;;  %v3887_v50 = vmin.f32 %v3247_v7, 6.0 }
 0x6f5   :  { %4957 = vmatpush.msrb.mxu1 %v3806_v28  ;;  %4966 = vmatpush.msra.mxu2 %v4076_v47  ;;  %v3257_v28 = vmax.f32 %v2882_v44, 0.0  ;;  %v2700_v47 = vadd.f32 %v12825_v17, %v10261_v41  ;;  %v3907_v21 = vmin.f32 %v3267_v51, 6.0  ;;  %v4016_v59 = vmin.f32 %v3376_v55, 6.0 }
 0x6f6   :  { %4958 = vmatmul.f32.vlgmr.msrb.gmra.mxu1 %v10955_v10  ;;  %v10960_v5 = vpop.f32.mrf.mxu2  ;;  %v3996_v51 = vmin.f32 %v3356_v58, 6.0  ;;  %v3877_v55 = vmin.f32 %v3237_v54, 6.0 }
 0x6f7   :  { %5022 = vmatpush.msra.mxu1 %v3957_v6  ;;  %4967 = vmatpush.msra.mxu2 %v4066_v11  ;;  %v2873_v6 = vadd.f32 %v12826_v40, %v10366_v12  ;;  %v2697_v11 = vadd.f32 %v12827_v18, %v10261_v41  ;;  %v3897_v16 = vmin.f32 %v3257_v28, 6.0  ;;  %v3346_v44 = vmax.f32 %v2700_v47, 0.0  ;;  %v12834_v28 = vld [vmem:[#allocation78_spill] sm:$0xff] }
 0x6f8   :  { %v10970_v30 = vpop.f32.mrf.mxu1  ;;  %v12835_v40 = vld [vmem:[#allocation114_spill] sm:$0xff] }
 0x6f9   :  { %5023 = vmatpush.msra.mxu1 %v3947_v63  ;;  %4968 = vmatpush.msra.mxu2 %v4056_v20  ;;  %v2870_v63 = vadd.f32 %v12828_v53, %v10366_v12  ;;  %v12829_v20 = vld [vmem:[#allocation49_spill] sm:$0xff]  ;;  %v3227_v23 = vmax.f32 %v2873_v6, 0.0  ;;  %v3336_v13 = vmax.f32 %v2697_v11, 0.0  ;;  %v3986_v47 = vmin.f32 %v3346_v44, 6.0  ;;  %v12837_v53 = vld [vmem:[#allocation80_spill] sm:$0xff] }
 0x6fa   :  { %v2694_v39 = vadd.f32 %v12829_v20, %v10261_v41  ;;  %v2942_v6 = vadd.f32 %v12835_v40, %v10366_v12  ;;  %v12838_v20 = vld [vmem:[#allocation155_spill] sm:$0xff]  ;;  %v2778_v40 = vadd.f32 %v10944_v26, %v10261_v41  ;;  %v12843_v26 = vld [vmem:[#allocation101_spill] sm:$0xff] }
 0x6fb   :  { %5024 = vmatpush.msra.mxu1 %v3937_v2  ;;  %4969 = vmatpush.msra.mxu2 %v4046_v52  ;;  %v12830_v2 = vld [vmem:[#allocation242_spill] sm:$0xff]  ;;  %v12831_v52 = vld [vmem:[#allocation168_spill] sm:$0xff]  ;;  %v3217_v43 = vmax.f32 %v2870_v63, 0.0  ;;  %v3976_v11 = vmin.f32 %v3336_v13, 6.0  ;;  %v2939_v63 = vadd.f32 %v12837_v53, %v10366_v12 }
 0x6fc   :  { %v2867_v15 = vadd.f32 %v12830_v2, %v10366_v12  ;;  %v2948_v38 = vadd.f32 %v12831_v52, %v10366_v12  ;;  %v3326_v17 = vmax.f32 %v2694_v39, 0.0  ;;  %v2855_v39 = vadd.f32 %v12838_v20, %v10366_v12 }
 0x6fd   :  { %5025 = vmatpush.msra.mxu1 %v3927_v22  ;;  %4970 = vmatpush.msra.mxu2 %v4036_v60  ;;  %v12832_v22 = vld [vmem:[#allocation248_spill] sm:$0xff]  ;;  %v12833_v60 = vld [vmem:[#allocation181_spill] sm:$0xff]  ;;  %v2924_v20 = vadd.f32 %v12843_v26, %v10366_v12 }
 0x6fe   :  { %v10980_v45 = vpop.f32.mrf.mxu2  ;;  %v2864_v25 = vadd.f32 %v12832_v22, %v10366_v12  ;;  %v2945_v34 = vadd.f32 %v12833_v60, %v10366_v12  ;;  %v3207_v14 = vmax.f32 %v2867_v15, 0.0  ;;  %v3477_v7 = vmax.f32 %v2948_v38, 0.0  ;;  %v12839_v15 = vld [vmem:[#allocation111_spill] sm:$0xff]  ;;  %v12840_v22 = vld [vmem:[#allocation89_spill] sm:$0xff] }
 0x6ff   :  { %5026 = vmatpush.msra.mxu1 %v3917_v37  ;;  %4971 = vmatpush.msra.mxu2 %v4026_v62  ;;  %v2861_v37 = vadd.f32 %v12834_v28, %v10366_v12  ;;  %v3867_v62 = vmin.f32 %v3227_v23, 6.0  ;;  %v2936_v23 = vadd.f32 %v12839_v15, %v10366_v12  ;;  %v2781_v28 = vadd.f32 %v10970_v30, %v10261_v41  ;;  %v12842_v30 = vld [vmem:[#allocation98_spill] sm:$0xff] }
 0x700   :  { %v2783_v27 = vpop.f32.mrf.mxu1  ;;  %v3197_v58 = vmax.f32 %v2864_v25, 0.0  ;;  %v3467_v54 = vmax.f32 %v2945_v34, 0.0  ;;  %v3847_v2 = vmin.f32 %v3207_v14, 6.0  ;;  %v4117_v52 = vmin.f32 %v3477_v7, 6.0 }
 0x701   :  { %5027 = vmatpush.msra.mxu1 %v3907_v21  ;;  %4972 = vmatpush.msra.mxu2 %v4016_v59  ;;  %v12836_v21 = vld [vmem:[#allocation147_spill] sm:$0xff]  ;;  %v3857_v59 = vmin.f32 %v3217_v43, 6.0  ;;  %v3187_v44 = vmax.f32 %v2861_v37, 0.0  ;;  %v2784_v13 = vadd.f32 %v2783_v27, %v10261_v41  ;;  %v2933_v25 = vadd.f32 %v12840_v22, %v10366_v12 }
 0x702   :  { %v2858_v18 = vadd.f32 %v12836_v21, %v10366_v12  ;;  %v3447_v43 = vmax.f32 %v2939_v63, 0.0  ;;  %v3167_v34 = vmax.f32 %v2855_v39, 0.0  ;;  %v12841_v27 = vld [vmem:[#allocation95_spill] sm:$0xff]  ;;  %v3437_v14 = vmax.f32 %v2936_v23, 0.0 }
 0x703   :  { %5028 = vmatpush.msra.mxu1 %v3897_v16  ;;  %4973 = vmatpush.msra.mxu2 %v4006_v61  ;;  %v3966_v61 = vmin.f32 %v3326_v17, 6.0  ;;  %v3827_v17 = vmin.f32 %v3187_v44, 6.0  ;;  %v3616_v53 = vmax.f32 %v2781_v28, 0.0  ;;  %v3606_v15 = vmax.f32 %v2778_v40, 0.0  ;;  %v5110_v40 = vld [vmem:[%s11590_s6 + $0xe0] sm:$0xff] }
 0x704   :  { %v3177_v38 = vmax.f32 %v2858_v18, 0.0  ;;  %v2927_v18 = vadd.f32 %v12842_v30, %v10366_v12  ;;  %v4077_v44 = vmin.f32 %v3437_v14, 6.0  ;;  %v2766_v28 = vadd.f32 %v10860_v46, %v10261_v41 }
 0x705   :  { %5029 = vmatpush.msra.mxu1 %v3887_v50  ;;  %4974 = vmatpush.msra.mxu2 %v3996_v51  ;;  %v3457_v50 = vmax.f32 %v2942_v6, 0.0  ;;  %v3837_v51 = vmin.f32 %v3197_v58, 6.0  ;;  %v3626_v6 = vmax.f32 %v2784_v13, 0.0  ;;  %v4087_v58 = vmin.f32 %v3447_v43, 6.0  ;;  %v5112_v13 = vld [vmem:[%s11590_s6 + $0xf0] sm:$0xff] }
 0x706   :  { %v11000_v16 = vpop.f32.mrf.mxu2  ;;  %v3817_v21 = vmin.f32 %v3177_v38, 6.0 }
 0x707   :  { %5030 = vmatpush.msra.mxu1 %v3877_v55  ;;  %4975 = vmatpush.msra.mxu2 %v3986_v47  ;;  %v4107_v55 = vmin.f32 %v3467_v54, 6.0  ;;  %v2930_v47 = vadd.f32 %v12841_v27, %v10366_v12  ;;  %v3807_v54 = vmin.f32 %v3167_v34, 6.0  ;;  %v4266_v23 = vmin.f32 %v3626_v6, 6.0  ;;  %v5111_v34 = vld [vmem:[%s11590_s6 + $0xe8] sm:$0xff] }
 0x708   :  { %v2786_v60 = vpop.f32.mrf.mxu1 }
 0x709   :  { %5031 = vmatpush.msra.mxu1 %v3867_v62  ;;  %4976 = vmatpush.msra.mxu2 %v3976_v11  ;;  %v2787_v37 = vadd.f32 %v2786_v60, %v10261_v41  ;;  %v4097_v62 = vmin.f32 %v3457_v50, 6.0  ;;  %v3427_v11 = vmax.f32 %v2933_v25, 0.0  ;;  %v3417_v39 = vmax.f32 %v2930_v47, 0.0 }
 0x70a   :  { %v4256_v25 = vmin.f32 %v3616_v53, 6.0 }
 0x70b   :  { %5032 = vmatpush.msra.mxu1 %v3857_v59  ;;  %4977 = vmatpush.msra.mxu2 %v3966_v61  ;;  %v3636_v7 = vmax.f32 %v2787_v37, 0.0  ;;  %v2775_v59 = vadd.f32 %v10923_v3, %v10261_v41  ;;  %v5113_v61 = vld [vmem:[%s11590_s6 + $0xf8] sm:$0xff]  ;;  %v4067_v38 = vmin.f32 %v3427_v11, 6.0  ;;  %v4057_v60 = vmin.f32 %v3417_v39, 6.0 }
 0x70c   :  { %4978 = vmatmul.f32.vlgmr.msra.gmra.mxu2 %v10722_v49  ;;  %v12844_v3 = vld [vmem:[#allocation104_spill] sm:$0xff]  ;;  %v4246_v37 = vmin.f32 %v3606_v15, 6.0  ;;  %v2757_v39 = vadd.f32 %v10784_v33, %v10261_v41  ;;  %v2754_v33 = vadd.f32 %v10754_v19, %v10261_v41 }
 0x70d   :  { %5033 = vmatpush.msra.mxu1 %v3847_v2  ;;  %5042 = vmatpush.msrb.mxu2 %v4117_v52  ;;  %v4276_v63 = vmin.f32 %v3636_v7, 6.0  ;;  %v2772_v2 = vadd.f32 %v10901_v24, %v10261_v41  ;;  %v2921_v50 = vadd.f32 %v12844_v3, %v10366_v12  ;;  %v3407_v52 = vmax.f32 %v2927_v18, 0.0  ;;  %v12845_v24 = vld [vmem:[#allocation105_spill] sm:$0xff]  ;;  %v12847_v7 = vld [vmem:[#allocation22_spill] sm:$0xff]  ;;  %v5160_v19 = vld [vmem:[%s11590_s6 + $0x270] sm:$0xff] }
 0x70e   :  { %v11019_v49 = vpop.f32.mrf.mxu2  ;;  %v3596_v22 = vmax.f32 %v2775_v59, 0.0  ;;  %v2918_v43 = vadd.f32 %v12845_v24, %v10366_v12  ;;  %v5109_v11 = vld [vmem:[%s11590_s6 + $0xd8] sm:$0xff]  ;;  %v3566_v59 = vmax.f32 %v2766_v28, 0.0  ;;  %v5107_v3 = vld [vmem:[%s11590_s6 + $0xc8] sm:$0xff] }
 0x70f   :  { %5034 = vmatpush.msra.mxu1 %v3837_v51  ;;  %5043 = vmatpush.msrb.mxu2 %v4107_v55  ;;  %v2769_v51 = vadd.f32 %v10881_v0, %v10261_v41  ;;  %v3397_v55 = vmax.f32 %v2924_v20, 0.0  ;;  %v3586_v0 = vmax.f32 %v2772_v2, 0.0  ;;  %v3387_v47 = vmax.f32 %v2921_v50, 0.0  ;;  %v5108_v20 = vld [vmem:[%s11590_s6 + $0xd0] sm:$0xff]  ;;  %v5161_v50 = vld [vmem:[%s11590_s6 + $0x278] sm:$0xff] }
 0x710   :  { %4982 = vmatpush.msrb.mxu3 %v4276_v63  ;;  %v4047_v14 = vmin.f32 %v3407_v52, 6.0  ;;  %v4236_v6 = vmin.f32 %v3596_v22, 6.0  ;;  %v3377_v30 = vmax.f32 %v2918_v43, 0.0  ;;  %v5106_v43 = vld [vmem:[%s11590_s6 + $0xc0] sm:$0xff]  ;;  %5326 = vmatpush.msra.mxu0 %v5161_v50  ;;  %v11129_v50 = vpop.f32.mrf.mxu3 }
 0x711   :  { %5035 = vmatpush.msra.mxu1 %v3827_v17  ;;  %5044 = vmatpush.msrb.mxu2 %v4097_v62  ;;  %v12846_v17 = vld [vmem:[#allocation113_spill] sm:$0xff]  ;;  %v3576_v46 = vmax.f32 %v2769_v51, 0.0  ;;  %v4037_v18 = vmin.f32 %v3397_v55, 6.0  ;;  %v4226_v53 = vmin.f32 %v3586_v0, 6.0  ;;  %v4027_v26 = vmin.f32 %v3387_v47, 6.0  ;;  %v12851_v0 = vld [vmem:[#allocation118_spill] sm:$0xff] }
 0x712   :  { %4983 = vmatpush.msrb.mxu3 %v4266_v23  ;;  %v2915_v27 = vadd.f32 %v12846_v17, %v10366_v12  ;;  %v4017_v23 = vmin.f32 %v3377_v30, 6.0  ;;  %v3536_v55 = vmax.f32 %v2757_v39, 0.0  ;;  %v5105_v17 = vld [vmem:[%s11590_s6 + $0xb8] sm:$0xff]  ;;  %5327 = vmatpush.msra.mxu0 %v5160_v19  ;;  %v3526_v47 = vmax.f32 %v2754_v33, 0.0  ;;  %v5154_v19 = vld [vmem:[%s11590_s6 + $0x240] sm:$0xff] }
 0x713   :  { %5036 = vmatpush.msra.mxu1 %v3817_v21  ;;  %5045 = vmatpush.msrb.mxu2 %v4087_v58  ;;  %v2912_v21 = vadd.f32 %v12847_v7, %v10366_v12  ;;  %v2760_v58 = vadd.f32 %v10808_v4, %v10261_v41  ;;  %v12849_v4 = vld [vmem:[#allocation31_spill] sm:$0xff] }
 0x714   :  { %4984 = vmatpush.msrb.mxu3 %v4256_v25  ;;  %v2906_v2 = vadd.f32 %v12849_v4, %v10366_v12  ;;  %v5104_v7 = vld [vmem:[%s11590_s6 + $0xb0] sm:$0xff]  ;;  %v4176_v30 = vmin.f32 %v3536_v55, 6.0  ;;  %v5129_v4 = vld [vmem:[%s11590_s6 + $0x178] sm:$0xff] }
 0x715   :  { %5037 = vmatpush.msra.mxu1 %v3807_v54  ;;  %5046 = vmatpush.msrb.mxu2 %v4077_v44  ;;  %v3367_v54 = vmax.f32 %v2915_v27, 0.0  ;;  %v3357_v15 = vmax.f32 %v2912_v21, 0.0  ;;  %v3546_v52 = vmax.f32 %v2760_v58, 0.0  ;;  %v5159_v27 = vld [vmem:[%s11590_s6 + $0x268] sm:$0xff]  ;;  %v5158_v21 = vld [vmem:[%s11590_s6 + $0x260] sm:$0xff] }
 0x716   :  { %5038 = vmatmul.f32.vlgmr.msra.gmra.mxu1 %v10955_v10  ;;  %v11047_v62 = vpop.f32.mrf.mxu2  ;;  %v2763_v10 = vadd.f32 %v10833_v35, %v10261_v41  ;;  %4985 = vmatpush.msrb.mxu3 %v4246_v37  ;;  %v12848_v35 = vld [vmem:[#allocation25_spill] sm:$0xff]  ;;  %v2751_v37 = vadd.f32 %v12851_v0, %v10261_v41  ;;  %v12855_v55 = vld [vmem:[#allocation139_spill] sm:$0xff] }
 0x717   :  { %5266 = vmatpush.msrb.mxu1 %v5113_v61  ;;  %5047 = vmatpush.msrb.mxu2 %v4067_v38  ;;  %v2909_v63 = vadd.f32 %v12848_v35, %v10366_v12  ;;  %v4216_v61 = vmin.f32 %v3576_v46, 6.0  ;;  %v4206_v38 = vmin.f32 %v3566_v59, 6.0  ;;  %v4007_v25 = vmin.f32 %v3367_v54, 6.0  ;;  %v12852_v46 = vld [vmem:[#allocation172_spill] sm:$0xff]  ;;  %v5099_v0 = vld [vmem:[%s11590_s6 + $0x88] sm:$0xff] }
 0x718   :  { %4986 = vmatpush.msrb.mxu3 %v4236_v6  ;;  %v3556_v44 = vmax.f32 %v2763_v10, 0.0  ;;  %v3997_v28 = vmin.f32 %v3357_v15, 6.0  ;;  %v2748_v6 = vadd.f32 %v12852_v46, %v10261_v41  ;;  %5328 = vmatpush.msra.mxu0 %v5159_v27  ;;  %v3516_v59 = vmax.f32 %v2751_v37, 0.0  ;;  %v5157_v35 = vld [vmem:[%s11590_s6 + $0x258] sm:$0xff]  ;;  %v5126_v37 = vld [vmem:[%s11590_s6 + $0x160] sm:$0xff] }
 0x719   :  { %5267 = vmatpush.msrb.mxu1 %v5112_v13  ;;  %5048 = vmatpush.msrb.mxu2 %v4057_v60  ;;  %v12850_v13 = vld [vmem:[#allocation99_spill] sm:$0xff]  ;;  %v3347_v22 = vmax.f32 %v2909_v63, 0.0  ;;  %v4166_v63 = vmin.f32 %v3526_v47, 6.0  ;;  %v5153_v27 = vld [vmem:[%s11590_s6 + $0x238] sm:$0xff] }
 0x71a   :  { %4987 = vmatpush.msrb.mxu3 %v4226_v53  ;;  %v2903_v51 = vadd.f32 %v12850_v13, %v10366_v12  ;;  %v4196_v60 = vmin.f32 %v3556_v44, 6.0  ;;  %v5103_v53 = vld [vmem:[%s11590_s6 + $0xa8] sm:$0xff]  ;;  %5329 = vmatpush.msra.mxu0 %v5158_v21  ;;  %v3506_v39 = vmax.f32 %v2748_v6, 0.0  ;;  %v12857_v46 = vld [vmem:[#allocation92_spill] sm:$0xff]  ;;  %v2984_v21 = vadd.f32 %v11000_v16, %v10366_v12 }
 0x71b   :  { %5268 = vmatpush.msrb.mxu1 %v5111_v34  ;;  %5049 = vmatpush.msrb.mxu2 %v4047_v14  ;;  %v3337_v34 = vmax.f32 %v2906_v2, 0.0  ;;  %v4186_v14 = vmin.f32 %v3546_v52, 6.0  ;;  %v3987_v10 = vmin.f32 %v3347_v22, 6.0  ;;  %v5156_v2 = vld [vmem:[%s11590_s6 + $0x250] sm:$0xff]  ;;  %v5155_v52 = vld [vmem:[%s11590_s6 + $0x248] sm:$0xff]  ;;  %v2981_v16 = vadd.f32 %v10980_v45, %v10366_v12  ;;  %v5150_v45 = vld [vmem:[%s11590_s6 + $0x220] sm:$0xff] }
 0x71c   :  { %4988 = vmatpush.msrb.mxu3 %v4216_v61  ;;  %v5102_v61 = vld [vmem:[%s11590_s6 + $0xa0] sm:$0xff]  ;;  %5330 = vmatpush.msra.mxu0 %v5157_v35  ;;  %v4146_v13 = vmin.f32 %v3506_v39, 6.0  ;;  %v5127_v22 = vld [vmem:[%s11590_s6 + $0x168] sm:$0xff]  ;;  %v4639_v39 = vpop.f32.mrf.mxu1 }
 0x71d   :  { %5269 = vmatpush.msrb.mxu1 %v5110_v40  ;;  %5050 = vmatpush.msrb.mxu2 %v4037_v18  ;;  %v3327_v40 = vmax.f32 %v2903_v51, 0.0  ;;  %v3977_v18 = vmin.f32 %v3337_v34, 6.0  ;;  %v5100_v51 = vld [vmem:[%s11590_s6 + $0x90] sm:$0xff]  ;;  %v5151_v35 = vld [vmem:[%s11590_s6 + $0x228] sm:$0xff] }
 0x71e   :  { %v11080_v24 = vpop.f32.mrf.mxu2  ;;  %4989 = vmatpush.msrb.mxu3 %v4206_v38  ;;  %5331 = vmatpush.msra.mxu0 %v5156_v2 }
 0x71f   :  { %5270 = vmatpush.msrb.mxu1 %v5109_v11  ;;  %5051 = vmatpush.msrb.mxu2 %v4027_v26  ;;  %v12853_v11 = vld [vmem:[#allocation71_spill] sm:$0xff]  ;;  %v3967_v54 = vmin.f32 %v3327_v40, 6.0  ;;  %v12854_v26 = vld [vmem:[#allocation77_spill] sm:$0xff] }
 0x720   :  { %4990 = vmatpush.msrb.mxu3 %v4196_v60  ;;  %v2745_v58 = vadd.f32 %v12853_v11, %v10261_v41  ;;  %v12856_v60 = vld [vmem:[#allocation108_spill] sm:$0xff]  ;;  %5332 = vmatpush.msra.mxu0 %v5155_v52  ;;  %v5123_v11 = vld [vmem:[%s11590_s6 + $0x148] sm:$0xff] }
 0x721   :  { %5271 = vmatpush.msrb.mxu1 %v5108_v20  ;;  %5052 = vmatpush.msrb.mxu2 %v4017_v23  ;;  %v2742_v20 = vadd.f32 %v12854_v26, %v10261_v41  ;;  %v4156_v41 = vmin.f32 %v3516_v59, 6.0  ;;  %v5101_v23 = vld [vmem:[%s11590_s6 + $0x98] sm:$0xff]  ;;  %v4420_v34 = vadd.f32 %v12856_v60, %v12855_v55  ;;  %v3597_v26 = vmax.f32 %v2984_v21, 0.0 }
 0x722   :  { %4991 = vmatpush.msrb.mxu3 %v4186_v14  ;;  %v3496_v15 = vmax.f32 %v2745_v58, 0.0  ;;  %v5098_v14 = vld [vmem:[%s11590_s6 + $0x80] sm:$0xff]  ;;  %v5125_v40 = vld [vmem:[%s11590_s6 + $0x158] sm:$0xff]  ;;  %5333 = vmatpush.msra.mxu0 %v5154_v19  ;;  %v11183_v58 = vpop.f32.mrf.mxu3 }
 0x723   :  { %5272 = vmatpush.msrb.mxu1 %v5107_v3  ;;  %5053 = vmatpush.msrb.mxu2 %v4007_v25  ;;  %v5128_v3 = vld [vmem:[%s11590_s6 + $0x170] sm:$0xff]  ;;  %v3486_v38 = vmax.f32 %v2742_v20, 0.0  ;;  %v4440_v6 = vadd.f32 %v12857_v46, %v4420_v34  ;;  %v4237_v52 = vmin.f32 %v3597_v26, 6.0  ;;  %v5118_v19 = vld [vmem:[%s11590_s6 + $0x120] sm:$0xff]  ;;  %v5177_v55 = vld [vmem:[%s11590_s6 + $0x2f8] sm:$0xff]  ;;  %v2960_v46 = vadd.f32 %v10821_v42, %v10366_v12 }
 0x724   :  { %4992 = vmatpush.msrb.mxu3 %v4176_v30  ;;  %v6331_v25 = vld [vmem:[%s11589_s5 + $0x10] sm:$0xff]  ;;  %5334 = vmatpush.msra.mxu0 %v5153_v27 }
 0x725   :  { %5273 = vmatpush.msrb.mxu1 %v5106_v43  ;;  %5054 = vmatpush.msrb.mxu2 %v3997_v28  ;;  %v2993_v43 = vadd.f32 %v11080_v24, %v10366_v12  ;;  %v4136_v28 = vmin.f32 %v3496_v15, 6.0  ;;  %v2990_v24 = vadd.f32 %v11047_v62, %v10366_v12  ;;  %v4126_v47 = vmin.f32 %v3486_v38, 6.0  ;;  %v5149_v15 = vld [vmem:[%s11590_s6 + $0x218] sm:$0xff]  ;;  %v5119_v38 = vld [vmem:[%s11590_s6 + $0x128] sm:$0xff]  ;;  %v5172_v26 = vld [vmem:[%s11590_s6 + $0x2d0] sm:$0xff] }
 0x726   :  { %v2995_v44 = vpop.f32.mrf.mxu2  ;;  %4993 = vmatpush.msrb.mxu3 %v4166_v63  ;;  %v2987_v62 = vadd.f32 %v11019_v49, %v10366_v12  ;;  %v5152_v49 = vld [vmem:[%s11590_s6 + $0x230] sm:$0xff]  ;;  %v2978_v63 = vadd.f32 %v10960_v5, %v10366_v12  ;;  %v3587_v5 = vmax.f32 %v2981_v16, 0.0  ;;  %v5114_v16 = vld [vmem:[%s11590_s6 + $0x100] sm:$0xff] }
 0x727   :  { %5274 = vmatpush.msrb.mxu1 %v5105_v17  ;;  %5055 = vmatpush.msrb.mxu2 %v3987_v10  ;;  %v2996_v33 = vadd.f32 %v2995_v44, %v10366_v12  ;;  %v3627_v10 = vmax.f32 %v2993_v43, 0.0  ;;  %v3617_v30 = vmax.f32 %v2990_v24, 0.0  ;;  %v5121_v44 = vld [vmem:[%s11590_s6 + $0x138] sm:$0xff]  ;;  %v5147_v43 = vld [vmem:[%s11590_s6 + $0x208] sm:$0xff] }
 0x728   :  { %4994 = vmatpush.msrb.mxu3 %v4156_v41  ;;  %v3607_v59 = vmax.f32 %v2987_v62, 0.0  ;;  %5335 = vmatpush.msra.mxu0 %v5152_v49  ;;  %v5116_v62 = vld [vmem:[%s11590_s6 + $0x110] sm:$0xff]  ;;  %v2957_v49 = vadd.f32 %v10796_v31, %v10366_v12  ;;  %v12861_v31 = vld [vmem:[#allocation177_spill] sm:$0xff] }
 0x729   :  { %5275 = vmatpush.msrb.mxu1 %v5104_v7  ;;  %5056 = vmatpush.msrb.mxu2 %v3977_v18  ;;  %v3637_v17 = vmax.f32 %v2996_v33, 0.0  ;;  %v5124_v7 = vld [vmem:[%s11590_s6 + $0x150] sm:$0xff]  ;;  %v4257_v20 = vmin.f32 %v3617_v30, 6.0  ;;  %v3577_v33 = vmax.f32 %v2978_v63, 0.0  ;;  %v5115_v30 = vld [vmem:[%s11590_s6 + $0x108] sm:$0xff] }
 0x72a   :  { %4995 = vmatpush.msrb.mxu3 %v4146_v13  ;;  %5336 = vmatpush.msra.mxu0 %v5151_v35  ;;  %v4247_v2 = vmin.f32 %v3607_v59, 6.0  ;;  %v5173_v59 = vld [vmem:[%s11590_s6 + $0x2d8] sm:$0xff]  ;;  %v3517_v35 = vmax.f32 %v2960_v46, 0.0  ;;  %v5183_v46 = vld [vmem:[%s11590_s6 + $0x328] sm:$0xff] }
 0x72b   :  { %5276 = vmatpush.msrb.mxu1 %v5103_v53  ;;  %5057 = vmatpush.msrb.mxu2 %v3967_v54  ;;  %v4277_v18 = vmin.f32 %v3637_v17, 6.0  ;;  %v4267_v53 = vmin.f32 %v3627_v10, 6.0  ;;  %v4619_v54 = vpop.f32.mrf.mxu0  ;;  %v4217_v34 = vmin.f32 %v3577_v33, 6.0  ;;  %v5117_v17 = vld [vmem:[%s11590_s6 + $0x118] sm:$0xff]  ;;  %v5175_v10 = vld [vmem:[%s11590_s6 + $0x2e8] sm:$0xff]  ;;  %v5168_v33 = vld [vmem:[%s11590_s6 + $0x2b0] sm:$0xff] }
 0x72c   :  { %5058 = vmatmul.f32.vlgmr.msrb.gmra.mxu2 %v6331_v25  ;;  %4996 = vmatpush.msrb.mxu3 %v4136_v28  ;;  %v4227_v25 = vmin.f32 %v3587_v5, 6.0  ;;  %v5146_v28 = vld [vmem:[%s11590_s6 + $0x200] sm:$0xff] }
 0x72d   :  { %5277 = vmatpush.msrb.mxu1 %v5102_v61  ;;  %5286 = vmatpush.msra.mxu2 %v5129_v4  ;;  %v4640_v61 = vadd.f32 %v4639_v39, %v4619_v54  ;;  %v2975_v4 = vadd.f32 %v10934_v1, %v10366_v12  ;;  %v5148_v1 = vld [vmem:[%s11590_s6 + $0x210] sm:$0xff]  ;;  %v5193_v54 = vld [vmem:[%s11590_s6 + $0x378] sm:$0xff] }
 0x72e   :  { %4997 = vmatpush.msrb.mxu3 %v4126_v47  ;;  %v4659_v41 = vpop.f32.mrf.mxu2  ;;  %5337 = vmatpush.msra.mxu0 %v5150_v45  ;;  %v2963_v47 = vadd.f32 %v10844_v8, %v10366_v12  ;;  %v12860_v8 = vld [vmem:[#allocation74_spill] sm:$0xff]  ;;  %v3507_v45 = vmax.f32 %v2957_v49, 0.0  ;;  %v5192_v39 = vld [vmem:[%s11590_s6 + $0x370] sm:$0xff] }
 0x72f   :  { %5278 = vmatpush.msrb.mxu1 %v5101_v23  ;;  %5287 = vmatpush.msra.mxu2 %v5128_v3  ;;  %v5120_v23 = vld [vmem:[%s11590_s6 + $0x130] sm:$0xff]  ;;  %v2972_v3 = vadd.f32 %v10913_v36, %v10366_v12  ;;  %v4660_v13 = vadd.f32 %v4659_v41, %v4640_v61  ;;  %v4679_v36 = vpop.f32.mrf.mxu3  ;;  %v5169_v41 = vld [vmem:[%s11590_s6 + $0x2b8] sm:$0xff]  ;;  %v5138_v49 = vld [vmem:[%s11590_s6 + $0x1c0] sm:$0xff] }
 0x730   :  { %4998 = vmatmul.f32.vlgmr.msrb.gmra.mxu3 %v10851_v32  ;;  %v5122_v32 = vld [vmem:[%s11590_s6 + $0x140] sm:$0xff]  ;;  %5338 = vmatpush.msra.mxu0 %v5149_v15  ;;  %v3527_v42 = vmax.f32 %v2963_v47, 0.0  ;;  %v5184_v47 = vld [vmem:[%s11590_s6 + $0x330] sm:$0xff] }
 0x731   :  { %5279 = vmatpush.msrb.mxu1 %v5100_v51  ;;  %5288 = vmatpush.msra.mxu2 %v5127_v22  ;;  %v2969_v51 = vadd.f32 %v10891_v48, %v10366_v12  ;;  %v3567_v22 = vmax.f32 %v2975_v4, 0.0  ;;  %v2966_v48 = vadd.f32 %v10870_v57, %v10366_v12  ;;  %v3557_v60 = vmax.f32 %v2972_v3, 0.0  ;;  %v5176_v57 = vld [vmem:[%s11590_s6 + $0x2f0] sm:$0xff]  ;;  %v5190_v15 = vld [vmem:[%s11590_s6 + $0x360] sm:$0xff]  ;;  %v5189_v3 = vld [vmem:[%s11590_s6 + $0x358] sm:$0xff] }
 0x732   :  { %5062 = vmatpush.msra.mxu3 %v4277_v18  ;;  %5339 = vmatpush.msra.mxu0 %v5148_v1  ;;  %v4680_v27 = vadd.f32 %v4679_v36, %v4660_v13  ;;  %v5174_v18 = vld [vmem:[%s11590_s6 + $0x2e0] sm:$0xff]  ;;  %v4157_v4 = vmin.f32 %v3517_v35, 6.0  ;;  %v4719_v1 = vpop.f32.mrf.mxu1  ;;  %v5188_v13 = vld [vmem:[%s11590_s6 + $0x350] sm:$0xff] }
 0x733   :  { %5280 = vmatpush.msrb.mxu1 %v5099_v0  ;;  %5289 = vmatpush.msra.mxu2 %v5126_v37  ;;  %v12858_v0 = vld [vmem:[#allocation86_spill] sm:$0xff]  ;;  %v12859_v37 = vld [vmem:[#allocation83_spill] sm:$0xff] }
 0x734   :  { %5063 = vmatpush.msra.mxu3 %v4267_v53  ;;  %v4480_v24 = vadd.f32 %v12859_v37, %v12858_v0  ;;  %5340 = vmatpush.msra.mxu0 %v5147_v43  ;;  %v2954_v53 = vadd.f32 %v10770_v56, %v10366_v12  ;;  %v4167_v56 = vmin.f32 %v3527_v42, 6.0  ;;  %v5144_v36 = vld [vmem:[%s11590_s6 + $0x1f0] sm:$0xff]  ;;  %v5187_v43 = vld [vmem:[%s11590_s6 + $0x348] sm:$0xff]  ;;  %v5142_v0 = vld [vmem:[%s11590_s6 + $0x1e0] sm:$0xff] }
 0x735   :  { %5281 = vmatpush.msrb.mxu1 %v5098_v14  ;;  %5290 = vmatpush.msra.mxu2 %v5125_v40  ;;  %v3547_v14 = vmax.f32 %v2969_v51, 0.0  ;;  %v4207_v40 = vmin.f32 %v3567_v22, 6.0  ;;  %v5167_v51 = vld [vmem:[%s11590_s6 + $0x2a8] sm:$0xff]  ;;  %v4699_v22 = vpop.f32.mrf.mxu0  ;;  %v5185_v37 = vld [vmem:[%s11590_s6 + $0x338] sm:$0xff]  ;;  %v5136_v35 = vld [vmem:[%s11590_s6 + $0x1b0] sm:$0xff] }
 0x736   :  { %5282 = vmatmul.f32.vlgmr.msrb.gmra.mxu1 %v4440_v6  ;;  %5064 = vmatpush.msra.mxu3 %v4257_v20  ;;  %v3537_v6 = vmax.f32 %v2966_v48, 0.0  ;;  %v4500_v21 = vadd.f32 %v12860_v8, %v4480_v24  ;;  %v2951_v20 = vadd.f32 %v10739_v29, %v10366_v12  ;;  %v3497_v61 = vmax.f32 %v2954_v53, 0.0  ;;  %v5191_v12 = vld [vmem:[%s11590_s6 + $0x368] sm:$0xff]  ;;  %v5170_v29 = vld [vmem:[%s11590_s6 + $0x2c0] sm:$0xff]  ;;  %v5181_v42 = vld [vmem:[%s11590_s6 + $0x318] sm:$0xff] }
 0x737   :  { %5291 = vmatpush.msra.mxu2 %v5124_v7  ;;  %5346 = vmatpush.msra.mxu1 %v5177_v55  ;;  %v4197_v7 = vmin.f32 %v3557_v60, 6.0  ;;  %v4739_v55 = vpop.f32.mrf.mxu2  ;;  %v5166_v48 = vld [vmem:[%s11590_s6 + $0x2a0] sm:$0xff]  ;;  %v5143_v60 = vld [vmem:[%s11590_s6 + $0x1e8] sm:$0xff] }
 0x738   :  { %5065 = vmatpush.msra.mxu3 %v4247_v2  ;;  %5341 = vmatpush.msra.mxu0 %v5146_v28  ;;  %v4520_v63 = vadd.f32 %v12861_v31, %v4500_v21  ;;  %v3487_v5 = vmax.f32 %v2951_v20, 0.0  ;;  %v4147_v2 = vmin.f32 %v3507_v45, 6.0  ;;  %v5165_v28 = vld [vmem:[%s11590_s6 + $0x298] sm:$0xff]  ;;  %v5139_v8 = vld [vmem:[%s11590_s6 + $0x1c8] sm:$0xff]  ;;  %v5182_v21 = vld [vmem:[%s11590_s6 + $0x320] sm:$0xff] }
 0x739   :  { %5292 = vmatpush.msra.mxu2 %v5123_v11  ;;  %5347 = vmatpush.msra.mxu1 %v5176_v57  ;;  %v4187_v11 = vmin.f32 %v3547_v14, 6.0  ;;  %v5141_v57 = vld [vmem:[%s11590_s6 + $0x1d8] sm:$0xff]  ;;  %v5135_v31 = vld [vmem:[%s11590_s6 + $0x1a8] sm:$0xff]  ;;  %v5132_v45 = vld [vmem:[%s11590_s6 + $0x190] sm:$0xff] }
 0x73a   :  { %5066 = vmatpush.msra.mxu3 %v4237_v52  ;;  %5342 = vmatmul.f32.vlgmr.msra.gmra.mxu0 %v4680_v27  ;;  %v4127_v52 = vmin.f32 %v3487_v5, 6.0  ;;  %v5164_v27 = vld [vmem:[%s11590_s6 + $0x290] sm:$0xff]  ;;  %v4799_v14 = vpop.f32.mrf.mxu1  ;;  %v5133_v20 = vld [vmem:[%s11590_s6 + $0x198] sm:$0xff]  ;;  %v5206_v5 = vld [vmem:[%s11590_s6 + $0x3e0] sm:$0xff] }
 0x73b   :  { %5293 = vmatpush.msra.mxu2 %v5122_v32  ;;  %5348 = vmatpush.msra.mxu1 %v5175_v10  ;;  %v4177_v32 = vmin.f32 %v3537_v6, 6.0 }
 0x73c   :  { %5067 = vmatpush.msra.mxu3 %v4227_v25  ;;  %v6332_v25 = vld [vmem:[%s11589_s5 + $0x18] sm:$0xff] }
 0x73d   :  { %5294 = vmatpush.msra.mxu2 %v5121_v44  ;;  %5349 = vmatpush.msra.mxu1 %v5174_v18  ;;  %v5171_v44 = vld [vmem:[%s11590_s6 + $0x2c8] sm:$0xff]  ;;  %v4779_v6 = vpop.f32.mrf.mxu0 }
 0x73e   :  { %5068 = vmatpush.msra.mxu3 %v4217_v34  ;;  %v5186_v34 = vld [vmem:[%s11590_s6 + $0x340] sm:$0xff] }
 0x73f   :  { %5295 = vmatpush.msra.mxu2 %v5120_v23  ;;  %5350 = vmatpush.msra.mxu1 %v5173_v59  ;;  %v4137_v23 = vmin.f32 %v3497_v61, 6.0  ;;  %v5180_v59 = vld [vmem:[%s11590_s6 + $0x310] sm:$0xff] }
 0x740   :  { %5069 = vmatpush.msra.mxu3 %v4207_v40  ;;  %v5163_v40 = vld [vmem:[%s11590_s6 + $0x288] sm:$0xff] }
 0x741   :  { %5296 = vmatpush.msra.mxu2 %v5119_v38  ;;  %5351 = vmatpush.msra.mxu1 %v5172_v26  ;;  %v5145_v38 = vld [vmem:[%s11590_s6 + $0x1f8] sm:$0xff]  ;;  %v5134_v26 = vld [vmem:[%s11590_s6 + $0x1a0] sm:$0xff] }
 0x742   :  { %5070 = vmatpush.msra.mxu3 %v4197_v7  ;;  %v5162_v7 = vld [vmem:[%s11590_s6 + $0x280] sm:$0xff] }
 0x743   :  { %5297 = vmatpush.msra.mxu2 %v5118_v19  ;;  %5352 = vmatpush.msra.mxu1 %v5171_v44  ;;  %v4720_v19 = vadd.f32 %v4719_v1, %v4699_v22  ;;  %v5130_v44 = vld [vmem:[%s11590_s6 + $0x180] sm:$0xff]  ;;  %v5200_v22 = vld [vmem:[%s11590_s6 + $0x3b0] sm:$0xff] }
 0x744   :  { %5071 = vmatpush.msra.mxu3 %v4187_v11  ;;  %v5137_v11 = vld [vmem:[%s11590_s6 + $0x1b8] sm:$0xff]  ;;  %v5202_v1 = vld [vmem:[%s11590_s6 + $0x3c0] sm:$0xff] }
 0x745   :  { %5298 = vmatpush.msra.mxu2 %v5117_v17  ;;  %5353 = vmatpush.msra.mxu1 %v5170_v29  ;;  %v4740_v24 = vadd.f32 %v4739_v55, %v4720_v19  ;;  %v4759_v17 = vpop.f32.mrf.mxu3  ;;  %v5223_v29 = vld [vmem:[%s11590_s6 + $0x468] sm:$0xff]  ;;  %v4859_v55 = vpop.f32.mrf.mxu0 }
 0x746   :  { %5072 = vmatpush.msra.mxu3 %v4177_v32  ;;  %v5179_v32 = vld [vmem:[%s11590_s6 + $0x308] sm:$0xff] }
 0x747   :  { %5299 = vmatpush.msra.mxu2 %v5116_v62  ;;  %5354 = vmatpush.msra.mxu1 %v5169_v41  ;;  %v5140_v62 = vld [vmem:[%s11590_s6 + $0x1d0] sm:$0xff]  ;;  %v4760_v10 = vadd.f32 %v4759_v17, %v4740_v24  ;;  %v5221_v41 = vld [vmem:[%s11590_s6 + $0x458] sm:$0xff]  ;;  %v5215_v19 = vld [vmem:[%s11590_s6 + $0x428] sm:$0xff] }
 0x748   :  { %5073 = vmatpush.msra.mxu3 %v4167_v56  ;;  %v4580_v56 = vadd.f32 %v11129_v50, %v10760_v9  ;;  %v5208_v9 = vld [vmem:[%s11590_s6 + $0x3f0] sm:$0xff]  ;;  %v5225_v50 = vld [vmem:[%s11590_s6 + $0x478] sm:$0xff]  ;;  %v5195_v17 = vld [vmem:[%s11590_s6 + $0x388] sm:$0xff] }
 0x749   :  { %5300 = vmatpush.msra.mxu2 %v5115_v30  ;;  %5355 = vmatpush.msra.mxu1 %v5168_v33  ;;  %v4800_v30 = vadd.f32 %v4799_v14, %v4779_v6  ;;  %v5203_v33 = vld [vmem:[%s11590_s6 + $0x3c8] sm:$0xff]  ;;  %v5213_v14 = vld [vmem:[%s11590_s6 + $0x418] sm:$0xff]  ;;  %v5240_v6 = vld [vmem:[%s11590_s6 + $0x4f0] sm:$0xff] }
 0x74a   :  { %5074 = vmatpush.msra.mxu3 %v4157_v4  ;;  %v4600_v61 = vadd.f32 %v11183_v58, %v4580_v56  ;;  %v5209_v4 = vld [vmem:[%s11590_s6 + $0x3f8] sm:$0xff]  ;;  %5406 = vmatpush.msrb.mxu0 %v5225_v50  ;;  %v5207_v58 = vld [vmem:[%s11590_s6 + $0x3e8] sm:$0xff] }
 0x74b   :  { %5301 = vmatpush.msra.mxu2 %v5114_v16  ;;  %5356 = vmatpush.msra.mxu1 %v5167_v51  ;;  %v5217_v51 = vld [vmem:[%s11590_s6 + $0x438] sm:$0xff]  ;;  %v5227_v56 = vld [vmem:[%s11590_s6 + $0x488] sm:$0xff] }
 0x74c   :  { %5302 = vmatmul.f32.vlgmr.msra.gmra.mxu2 %v4520_v63  ;;  %5075 = vmatpush.msra.mxu3 %v4147_v2  ;;  %v5222_v2 = vld [vmem:[%s11590_s6 + $0x460] sm:$0xff] }
 0x74d   :  { %5366 = vmatpush.msrb.mxu2 %v5193_v54  ;;  %5357 = vmatpush.msra.mxu1 %v5166_v48  ;;  %v4839_v53 = vpop.f32.mrf.mxu3  ;;  %v5178_v54 = vld [vmem:[%s11590_s6 + $0x300] sm:$0xff] }
 0x74e   :  { %5076 = vmatpush.msra.mxu3 %v4137_v23  ;;  %v5204_v23 = vld [vmem:[%s11590_s6 + $0x3d0] sm:$0xff]  ;;  %v5198_v48 = vld [vmem:[%s11590_s6 + $0x3a0] sm:$0xff] }
 0x74f   :  { %5367 = vmatpush.msrb.mxu2 %v5192_v39  ;;  %5358 = vmatpush.msra.mxu1 %v5165_v28  ;;  %v4819_v18 = vpop.f32.mrf.mxu2  ;;  %v5131_v39 = vld [vmem:[%s11590_s6 + $0x188] sm:$0xff]  ;;  %v5197_v28 = vld [vmem:[%s11590_s6 + $0x398] sm:$0xff] }
 0x750   :  { %5077 = vmatpush.msra.mxu3 %v4127_v52  ;;  %v4820_v16 = vadd.f32 %v4819_v18, %v4800_v30  ;;  %v5219_v52 = vld [vmem:[%s11590_s6 + $0x448] sm:$0xff]  ;;  %v5236_v30 = vld [vmem:[%s11590_s6 + $0x4d0] sm:$0xff] }
 0x751   :  { %5368 = vmatpush.msrb.mxu2 %v5191_v12  ;;  %5078 = vmatmul.f32.vlgmr.msra.gmra.mxu3 %v6332_v25  ;;  %v5224_v12 = vld [vmem:[%s11590_s6 + $0x470] sm:$0xff]  ;;  %v5235_v18 = vld [vmem:[%s11590_s6 + $0x4c8] sm:$0xff] }
 0x752   :  { %5306 = vmatpush.msrb.mxu3 %v5145_v38  ;;  %5359 = vmatpush.msra.mxu1 %v5164_v27  ;;  %v4840_v63 = vadd.f32 %v4839_v53, %v4820_v16  ;;  %v5218_v38 = vld [vmem:[%s11590_s6 + $0x440] sm:$0xff]  ;;  %v5216_v25 = vld [vmem:[%s11590_s6 + $0x430] sm:$0xff]  ;;  %v5231_v16 = vld [vmem:[%s11590_s6 + $0x4a8] sm:$0xff]  ;;  %v4939_v53 = vpop.f32.mrf.mxu0 }
 0x753   :  { %5369 = vmatpush.msrb.mxu2 %v5190_v15  ;;  %5407 = vmatpush.msrb.mxu0 %v5224_v12  ;;  %v5205_v15 = vld [vmem:[%s11590_s6 + $0x3d8] sm:$0xff] }
 0x754   :  { %5307 = vmatpush.msrb.mxu3 %v5144_v36  ;;  %5360 = vmatpush.msra.mxu1 %v5163_v40  ;;  %v4879_v36 = vpop.f32.mrf.mxu1  ;;  %v5212_v40 = vld [vmem:[%s11590_s6 + $0x410] sm:$0xff] }
 0x755   :  { %5370 = vmatpush.msrb.mxu2 %v5189_v3  ;;  %5408 = vmatpush.msrb.mxu0 %v5223_v29  ;;  %v5220_v3 = vld [vmem:[%s11590_s6 + $0x450] sm:$0xff]  ;;  %v4919_v24 = vpop.f32.mrf.mxu3  ;;  %v6309_v29 = vld [vmem:[%s11591_s7] ss:$0 sm:$0xff] }
 0x756   :  { %5308 = vmatpush.msrb.mxu3 %v5143_v60  ;;  %5361 = vmatpush.msra.mxu1 %v5162_v7  ;;  %v4880_v60 = vadd.f32 %v4879_v36, %v4859_v55  ;;  %v5239_v7 = vld [vmem:[%s11590_s6 + $0x4e8] sm:$0xff] }
 0x757   :  { %5371 = vmatpush.msrb.mxu2 %v5188_v13  ;;  %5362 = vmatmul.f32.vlgmr.msra.gmra.mxu1 %v4760_v10  ;;  %v5201_v13 = vld [vmem:[%s11590_s6 + $0x3b8] sm:$0xff]  ;;  %v5210_v10 = vld [vmem:[%s11590_s6 + $0x400] sm:$0xff] }
 0x758   :  { %5309 = vmatpush.msrb.mxu3 %v5142_v0  ;;  %5409 = vmatpush.msrb.mxu0 %v5222_v2 }
 0x759   :  { %5372 = vmatpush.msrb.mxu2 %v5187_v43  ;;  %v5199_v43 = vld [vmem:[%s11590_s6 + $0x3a8] sm:$0xff] }
 0x75a   :  { %5310 = vmatpush.msrb.mxu3 %v5141_v57  ;;  %5410 = vmatpush.msrb.mxu0 %v5221_v41  ;;  %v5194_v57 = vld [vmem:[%s11590_s6 + $0x380] sm:$0xff] }
 0x75b   :  { %5373 = vmatpush.msrb.mxu2 %v5186_v34 }
 0x75c   :  { %5311 = vmatpush.msrb.mxu3 %v5140_v62  ;;  %5411 = vmatpush.msrb.mxu0 %v5220_v3  ;;  %v5211_v62 = vld [vmem:[%s11590_s6 + $0x408] sm:$0xff] }
 0x75d   :  { %5374 = vmatpush.msrb.mxu2 %v5185_v37  ;;  %v5196_v37 = vld [vmem:[%s11590_s6 + $0x390] sm:$0xff] }
 0x75e   :  { %5312 = vmatpush.msrb.mxu3 %v5139_v8  ;;  %5412 = vmatpush.msrb.mxu0 %v5219_v52  ;;  %v5238_v8 = vld [vmem:[%s11590_s6 + $0x4e0] sm:$0xff] }
 0x75f   :  { %5375 = vmatpush.msrb.mxu2 %v5184_v47  ;;  %v5214_v47 = vld [vmem:[%s11590_s6 + $0x420] sm:$0xff] }
 0x760   :  { %5313 = vmatpush.msrb.mxu3 %v5138_v49  ;;  %5413 = vmatpush.msrb.mxu0 %v5218_v38  ;;  %v5234_v49 = vld [vmem:[%s11590_s6 + $0x4c0] sm:$0xff] }
 0x761   :  { %5376 = vmatpush.msrb.mxu2 %v5183_v46  ;;  %v5241_v46 = vld [vmem:[%s11590_s6 + $0x4f8] sm:$0xff] }
 0x762   :  { %5314 = vmatpush.msrb.mxu3 %v5137_v11  ;;  %5414 = vmatpush.msrb.mxu0 %v5217_v51  ;;  %v5232_v11 = vld [vmem:[%s11590_s6 + $0x4b0] sm:$0xff] }
 0x763   :  { %5377 = vmatpush.msrb.mxu2 %v5182_v21  ;;  %5426 = vmatpush.msrb.mxu1 %v5241_v46  ;;  %v5237_v21 = vld [vmem:[%s11590_s6 + $0x4d8] sm:$0xff] }
 0x764   :  { %5315 = vmatpush.msrb.mxu3 %v5136_v35  ;;  %5415 = vmatpush.msrb.mxu0 %v5216_v25 }
 0x765   :  { %5378 = vmatpush.msrb.mxu2 %v5181_v42  ;;  %5427 = vmatpush.msrb.mxu1 %v5240_v6  ;;  %v5233_v42 = vld [vmem:[%s11590_s6 + $0x4b8] sm:$0xff] }
 0x766   :  { %5316 = vmatpush.msrb.mxu3 %v5135_v31  ;;  %5416 = vmatpush.msrb.mxu0 %v5215_v19  ;;  %v5229_v31 = vld [vmem:[%s11590_s6 + $0x498] sm:$0xff] }
 0x767   :  { %5379 = vmatpush.msrb.mxu2 %v5180_v59  ;;  %5428 = vmatpush.msrb.mxu1 %v5239_v7  ;;  %v5230_v59 = vld [vmem:[%s11590_s6 + $0x4a0] sm:$0xff] }
 0x768   :  { %5317 = vmatpush.msrb.mxu3 %v5134_v26  ;;  %5417 = vmatpush.msrb.mxu0 %v5214_v47 }
 0x769   :  { %5380 = vmatpush.msrb.mxu2 %v5179_v32  ;;  %5429 = vmatpush.msrb.mxu1 %v5238_v8  ;;  %v5471_v8 = vld [vmem:[%s11594_s10] sm:$0xff] }
 0x76a   :  { %5318 = vmatpush.msrb.mxu3 %v5133_v20  ;;  %5418 = vmatpush.msrb.mxu0 %v5213_v14 }
 0x76b   :  { %5381 = vmatpush.msrb.mxu2 %v5178_v54  ;;  %5430 = vmatpush.msrb.mxu1 %v5237_v21  ;;  %v5228_v54 = vld [vmem:[%s11590_s6 + $0x490] sm:$0xff] }
 0x76c   :  { %5382 = vmatmul.f32.vlgmr.msrb.gmra.mxu2 %v4840_v63  ;;  %5319 = vmatpush.msrb.mxu3 %v5132_v45 }
 0x76d   :  { %5419 = vmatpush.msrb.mxu0 %v5212_v40  ;;  %5431 = vmatpush.msrb.mxu1 %v5236_v30  ;;  %v6359_v30 = vmov 0  }
 0x76e   :  { %5320 = vmatpush.msrb.mxu3 %v5131_v39  ;;  %v5226_v39 = vld [vmem:[%s11590_s6 + $0x480] sm:$0xff]  ;;  %6307 = vset.pattern.permute.xlu0 %v6359_v30 }
 0x76f   :  { %v4899_v34 = vpop.f32.mrf.mxu2  ;;  %5420 = vmatpush.msrb.mxu0 %v5211_v62  ;;  %5432 = vmatpush.msrb.mxu1 %v5235_v18 }
 0x770   :  { %5321 = vmatpush.msrb.mxu3 %v5130_v44  ;;  %v4900_v0 = vadd.f32 %v4899_v34, %v4880_v60  ;;  %v5019_v44 = vpop.f32.mrf.mxu0  ;;  %v6310_v34 = vld [vmem:[%s11592_s8] ss:$0 sm:$0xff] }
 0x771   :  { %5322 = vmatmul.f32.vlgmr.msrb.gmra.mxu3 %v4600_v61  ;;  %5421 = vmatpush.msrb.mxu0 %v5210_v10 }
 0x772   :  { %5386 = vmatpush.msra.mxu3 %v5209_v4  ;;  %v4920_v27 = vadd.f32 %v4919_v24, %v4900_v0  ;;  %5433 = vmatpush.msrb.mxu1 %v5234_v49  ;;  %v6311_v24 = vld [vmem:[#allocation2] ss:$0 sm:$0xff] }
 0x773   :  { %v4959_v35 = vpop.f32.mrf.mxu1 }
 0x774   :  { %5387 = vmatpush.msra.mxu3 %v5208_v9  ;;  %5434 = vmatpush.msrb.mxu1 %v5233_v42  ;;  %v4960_v32 = vadd.f32 %v4959_v35, %v4939_v53 }
 0x776   :  { %5388 = vmatpush.msra.mxu3 %v5207_v58  ;;  %5435 = vmatpush.msrb.mxu1 %v5232_v11 }
 0x778   :  { %5389 = vmatpush.msra.mxu3 %v5206_v5  ;;  %5436 = vmatpush.msrb.mxu1 %v5231_v16  ;;  %v5263_v5 = vpop.f32.mrf.mxu0 }
 0x77a   :  { %5390 = vmatpush.msra.mxu3 %v5205_v15  ;;  %5437 = vmatpush.msrb.mxu1 %v5230_v59  ;;  %v5264_v15 = vadd.f32 %v6309_v29, %v5263_v5 }
 0x77c   :  { %5391 = vmatpush.msra.mxu3 %v5204_v23  ;;  %5438 = vmatpush.msrb.mxu1 %v5229_v31 }
 0x77e   :  { %5392 = vmatpush.msra.mxu3 %v5203_v33  ;;  %5439 = vmatpush.msrb.mxu1 %v5228_v54 }
 0x780   :  { %5393 = vmatpush.msra.mxu3 %v5202_v1  ;;  %5440 = vmatpush.msrb.mxu1 %v5227_v56  ;;  %v5541_v56 = vld [vmem:[%s11596_s12] sm:$0xff] }
 0x782   :  { %5394 = vmatpush.msra.mxu3 %v5201_v13  ;;  %5441 = vmatpush.msrb.mxu1 %v5226_v39 }
 0x784   :  { %5395 = vmatpush.msra.mxu3 %v5200_v22 }
 0x786   :  { %5396 = vmatpush.msra.mxu3 %v5199_v43 }
 0x788   :  { %5397 = vmatpush.msra.mxu3 %v5198_v48 }
 0x78a   :  { %5398 = vmatpush.msra.mxu3 %v5197_v28 }
 0x78c   :  { %5399 = vmatpush.msra.mxu3 %v5196_v37 }
 0x78e   :  { %5400 = vmatpush.msra.mxu3 %v5195_v17 }
 0x78f   :  { %v4979_v63 = vpop.f32.mrf.mxu2 }
 0x790   :  { %5401 = vmatpush.msra.mxu3 %v5194_v57  ;;  %v4980_v26 = vadd.f32 %v4979_v63, %v4960_v32 }
 0x791   :  { %5402 = vmatmul.f32.vlgmr.msra.gmra.mxu3 %v4920_v27 }
 0x793   :  { %v5039_v61 = vpop.f32.mrf.mxu1 }
 0x794   :  { %v5040_v4 = vadd.f32 %v5039_v61, %v5019_v44  ;;  %v5511_v61 = vld [vmem:[%s11595_s11] sm:$0x3] }
 0x7af   :  { %v5059_v9 = vpop.f32.mrf.mxu2 }
 0x7b0   :  { %v5060_v50 = vadd.f32 %v5059_v9, %v5040_v4  ;;  %v6312_v9 = vld [vmem:[%s11597_s13] ss:$0 sm:$0xff] }
 0x7b3   :  { %v4999_v20 = vpop.f32.mrf.mxu3  ;;  %v5283_v2 = vpop.f32.mrf.mxu1 }
 0x7b4   :  { %v5000_v45 = vadd.f32 %v4999_v20, %v4980_v26  ;;  %v5284_v23 = vadd.f32 %v5283_v2, %v5264_v15  ;;  %v5544_v26 = vld [vmem:[%s11596_s12 + $0x18] sm:$0xff]  ;;  %v5543_v20 = vld [vmem:[%s11596_s12 + $0x10] sm:$0xff] }
 0x7b6   :  { %5422 = vmatmul.f32.vlgmr.msrb.gmra.mxu0 %v5000_v45  ;;  %v5542_v45 = vld [vmem:[%s11596_s12 + $0x8] sm:$0xff]  ;;  %s5579_s12 = sshll.u32 %s6360_s1, 4  ;;  %s5580_s12 = int_to_ptr.vmem [resolvable:$true] %s5579_s12 }
 0x7b7   :  { %v5343_v1 = vpop.f32.mrf.mxu0 }
 0x7cf   :  { %v5303_v41 = vpop.f32.mrf.mxu2 }
 0x7d0   :  { %v5304_v33 = vadd.f32 %v5303_v41, %v5284_v23 }
 0x7d4   :  { %v5079_v12 = vpop.f32.mrf.mxu3  ;;  %v5363_v13 = vpop.f32.mrf.mxu1 }
 0x7d5   :  { %v5080_v58 = vadd.f32 %v5079_v12, %v5060_v50 }
 0x7d7   :  { %5442 = vmatmul.f32.vlgmr.msrb.gmra.mxu1 %v5080_v58 }
 0x7ef   :  { %v5383_v22 = vpop.f32.mrf.mxu2 }
 0x7f4   :  { %v5323_v3 = vpop.f32.mrf.mxu3 }
 0x7f5   :  { %v5324_v52 = vadd.f32 %v5323_v3, %v5304_v33 }
 0x7f7   :  { %v5344_v38 = vadd.f32 %v5343_v1, %v5324_v52 }
 0x7f9   :  { %v5364_v51 = vadd.f32 %v5363_v13, %v5344_v38 }
 0x7fb   :  { %v5384_v36 = vadd.f32 %v5383_v22, %v5364_v51 }
 0x814   :  { %v5403_v25 = vpop.f32.mrf.mxu3 }
 0x815   :  { %v5404_v19 = vadd.f32 %v5403_v25, %v5384_v36 }
 0x833   :  { %v5423_v43 = vpop.f32.mrf.mxu0 }
 0x834   :  { %v5424_v55 = vadd.f32 %v5423_v43, %v5404_v19 }
 0x854   :  { %v5443_v48 = vpop.f32.mrf.mxu1 }
 0x855   :  { %v5444_v60 = vadd.f32 %v5443_v48, %v5424_v55 }
 0x857   :  { %v5446_v28 = vmax.f32 %v5444_v60, 0.0 }
 0x859   :  { %v5451_v0 = vmul.f32 %v6310_v34, %v5446_v28 }
 0x85b   :  { %v5452_v37 = vsel %vm122_vm0, %v5451_v0, 0.0 }
 0x85c   :  { %5453 = vadd.xlane.f32.xlu0 %v5452_v37 }
 0x8cf   :  { %v5454_v17 = vpop.xlane.xlu0 %5453 }
 0x8d0   :  { %v5459_v27 = vadd.f32 %v6311_v24, %v5454_v17 }
 0x8d2   :  { %v5461_v57 = vsel %vm5460_vm1, %v5459_v27, -inf }
 0x8d3   :  { %v5462_v47 = vrot.slane %v5461_v57, 4 }
 0x8d5   :  { %v5463_v14 = vmax.f32 %v5461_v57, %v5462_v47 }
 0x8d7   :  { %v5464_v40 = vrot.slane %v5463_v14, 2 }
 0x8d9   :  { %v5465_v62 = vmax.f32 %v5463_v14, %v5464_v40 }
 0x8db   :  { %v5466_v10 = vrot.slane %v5465_v62, 1 }
 0x8dd   :  { %v5467_v46 = vmax.f32 %v5465_v62, %v5466_v10 }
 0x8df   :  { %v5468_v6 = vsub.f32 %v5459_v27, %v5467_v46 }
 0x8e1   :  { %v5469_v7 = vmul.f32 1.442695, %v5468_v6 }
 0x8e3   :  { %6313 = vpow2.f32 %v5469_v7 }
 0x8e9   :  { %v6314_v21 = vpop.eup %6313 }
 0x8ea   :  { %5491 = vmatpush.msra.mxu2 %v6314_v21 }
 0x8eb   :  { %6294 = vmatmul.msk.f32.vlgmr.msra.gmra.mxu2 %vm5472_vm2, %v5471_v8 }
 0x8ec   :  { %5564 = vmatpush.msrb.mxu2 %v5544_v26 }
 0x8ee   :  { %5565 = vmatpush.msrb.mxu2 %v5543_v20 }
 0x8f0   :  { %5566 = vmatpush.msrb.mxu2 %v5542_v45 }
 0x8f2   :  { %5567 = vmatpush.msrb.mxu2 %v5541_v56 }
 0x96e   :  { %v5493_v18 = vpop.f32.mrf.mxu2 }
 0x96f   :  { %6315 = vrcp.f32 %v5493_v18  ;;  %v5507_v16 = vand.u32 2147483648, %v5493_v18  ;;  %v5505_v53 = vand.u32 2147483647, %v5493_v18  ;;  %vm5501_vm4 = vweird.f32 %v5493_v18 }
 0x971   :  { %v5508_v32 = vor.u32 1.1754944e-38, %v5507_v16  ;;  %vm5506_vm6 = vcmp.eq.f32.partialorder %v5505_v53, 8.507059e+37 }
 0x975   :  { %v6316_v49 = vpop.eup %6315 }
 0x976   :  { %v5497_v42 = vmul.f32 %v6316_v49, %v5493_v18  ;;  %vm5502_vm3 = vweird.f32 %v6316_v49 }
 0x977   :  { %vm5503_vm5 = vmor %vm5501_vm4, %vm5502_vm3 }
 0x978   :  { %v5498_v11 = vsub.f32 1.0, %v5497_v42 }
 0x97a   :  { %v5499_v59 = vmul.f32 %v6316_v49, %v5498_v11 }
 0x97c   :  { %v5500_v35 = vadd.f32 %v6316_v49, %v5499_v59 }
 0x97e   :  { %v5504_v31 = vsel %vm5503_vm5, %v6316_v49, %v5500_v35 }
 0x97f   :  { %v5509_v63 = vsel %vm5506_vm6, %v5508_v32, %v5504_v31 }
 0x980   :  { %v5510_v54 = vmul.f32 %v6314_v21, %v5509_v63 }
 0x982   :  { %5514 = vperm.xlu0 %6307, %v5510_v54  }
 0x9f4   :  { %v5515_v39 = vpop.permute.xlu0 %5514 }
 0x9f5   :  { %v5517_v44 = vmul.f32 %v5515_v39, %v5446_v28 }
 0x9f7   :  { %5536 = vmatpush.msrb.mxu3 %v5517_v44 }
 0x9f8   :  { %6295 = vmatmul.msk.f32.vlgmr.msrb.gmra.mxu3 %vm5472_vm2, %v5511_v61 }
 0xa7b   :  { %v5538_v4 = vpop.f32.mrf.mxu3 }
 0xa7c   :  { %6296 = vmatmul.msk.f32.vlgmr.msrb.gmra.mxu2 %vm122_vm0, %v5538_v4 }
 0xaff   :  { %v5569_v50 = vpop.f32.mrf.mxu2 }
 0xb00   :  { %v5570_v12 = vadd.f32 %v6312_v9, %v5569_v50 }
 0xb02   :  { %5573 = vst.msk [vmem:[#allocation3] sm:$0x3] %vm5572_vm7, %v5570_v12 }
 0xb03   :  { %5584 = dma.vmem_to_hbm [thread:$0]  %s5580_s12, 32, %s5582_s2, [#allocation4]  }
 0xb04   :  { %6357 = dma.done.wait [#allocation4], 32  }
 0xb05   :  { %6358 = vsyncadd [#allocation4], 4294967264 }
 0xb06   :  { %5589 = vsyncpa [#allocation4], 1 }

</bundles_post_ra>
